<compile_context>
chip_gen: v6e
topology: v6e:2x2x1
jax: 0.10.0
libtpu: 0.0.40
codegen_flags: <defaults>
</compile_context>

<pallas_src>
import functools

import jax
import jax.numpy as jnp
from jax.experimental import pallas as pl
from jax.experimental.pallas import tpu as pltpu

_MIN_PALLAS_DIM = 64          # tiny-GEMM fallback threshold
_TILE_CAP_M = 1024            # M tile cap (rows of the activation matrix)
_TILE_CAP_N = 512             # N tile cap (output channels, lane dim)
_TILE_CAP_K = 512             # K tile cap (reduction dim)
_VMEM_LIMIT = 32 * 1024 * 1024  # explicit budget; worst-case tiles use ~7 MiB


# ----------------------------------------------------------------------------
# Pallas kernel: tiled bf16 matmul, f32 accum, fused per-channel affine + act
# ----------------------------------------------------------------------------
def _mm_kernel(x_ref, w_ref, sb_ref, o_ref, acc_ref, *, act):
    k = pl.program_id(2)

    d = jnp.dot(x_ref[...], w_ref[...], preferred_element_type=jnp.float32)

    @pl.when(k == 0)
    def _():
        acc_ref[...] = d          # direct write: no zero-init pass

    @pl.when(k > 0)
    def _():
        acc_ref[...] += d

    @pl.when(k == pl.num_programs(2) - 1)
    def _():
        # sb_ref: row 0 = per-channel scale, row 1 = per-channel bias (f32)
        y = acc_ref[...] * sb_ref[0:1, :] + sb_ref[1:2, :]
        if act == "relu":
            y = jnp.maximum(y, 0.0)
        elif act == "tanh01":
            y = (jnp.tanh(y) + 1.0) * 0.5
        o_ref[...] = y.astype(o_ref.dtype)   # bf16 store -> half the writeback


def _round_up(x, m):
    return (x + m - 1) // m * m


def _pick_block(dim, cap, granule):
    """Return (padded_dim, block).

    Small dims (<= cap): one full-extent block, padded only to `granule`.
    Large dims: choose the tile FIRST -- the 128-multiple in [256, cap] that
    wastes the least padding (ties -> larger tile, feeds the 256x256 MXU on
    v6e/v7x) -- then pad the dim up to a multiple of it.  Falls back to 128
    only if every >=256 tile would waste more than ~12.5%.
    """
    if dim <= cap:
        p = _round_up(dim, granule)
        return p, p
    best_t, best_waste = None, None
    t = 256
    while t <= cap:
        waste = _round_up(dim, t) - dim
        if best_waste is None or waste <= best_waste:   # ties -> larger tile
            best_t, best_waste = t, waste
        t += 128
    if best_t is None or best_waste > dim // 8:
        best_t = 128
    return _round_up(dim, best_t), best_t


def _pad2d(x, rows, cols):
    pr, pc = rows - x.shape[0], cols - x.shape[1]
    if pr == 0 and pc == 0:
        return x
    return jnp.pad(x, ((0, pr), (0, pc)))


def _pad1d(x, n):
    p = n - x.shape[0]
    return x if p == 0 else jnp.pad(x, ((0, p),))


def _affine_act(y, scale, bias, act):
    y = y * scale + bias
    if act == "relu":
        y = jnp.maximum(y, 0.0)
    elif act == "tanh01":
        y = (jnp.tanh(y) + 1.0) * 0.5
    return y


def matmul_affine_act(x, w, scale=None, bias=None, act="none"):
    """y = act((x @ w) * scale + bias).  Big GEMMs run in the Pallas kernel
    (bf16 MXU operands, f32 accumulator, bf16 output); tiny ones use XLA."""
    M, K = x.shape
    _, N = w.shape
    if scale is None:
        scale = jnp.ones((N,), jnp.float32)
    if bias is None:
        bias = jnp.zeros((N,), jnp.float32)
    scale = scale.astype(jnp.float32)
    bias = bias.astype(jnp.float32)

    # Tiny GEMMs (APA heads, FiLM with K=prior_dim, the 3-channel output conv)
    # stay on plain XLA -- padding them to MXU tiles wastes >95% of the work.
    # Big-N/K GEMMs keep the Pallas path even when M is small (middle
    # ResBlocks at low spatial resolution are weight-/HBM-bound).
    use_pallas = (N >= _MIN_PALLAS_DIM and K >= _MIN_PALLAS_DIM and
                  (M >= _MIN_PALLAS_DIM or (N >= 128 and K >= 128)))
    if not use_pallas:
        y = jnp.dot(x.astype(jnp.float32), w.astype(jnp.float32),
                    preferred_element_type=jnp.float32)
        return _affine_act(y, scale, bias, act)

    xb = x.astype(jnp.bfloat16)   # no-op: activations are bf16-resident
    wb = w.astype(jnp.bfloat16)   # no-op: conv weights pre-cast at init

    Mp, tm = _pick_block(M, _TILE_CAP_M, 16)    # bf16 sublane granule
    Kp, tk = _pick_block(K, _TILE_CAP_K, 128)   # lane granule
    Np, tn = _pick_block(N, _TILE_CAP_N, 128)   # lane granule

    # v7x shards the "parallel" grid axes across its 2 TensorCores: make sure
    # the parallel portion of the grid has >= 2 steps whenever possible.
    if (Mp // tm) * (Np // tn) < 2:
        if tm >= 32:                               # Mp == tm here; halve it
            tm //= 2
        elif tn >= 256 and (tn // 2) % 128 == 0:   # otherwise split N
            tn //= 2

    xp = _pad2d(xb, Mp, Kp)
    wp = _pad2d(wb, Kp, Np)
    sb = jnp.stack([_pad1d(scale, Np), _pad1d(bias, Np)], axis=0)  # (2, Np)

    grid = (Mp // tm, Np // tn, Kp // tk)

    out = pl.pallas_call(
        functools.partial(_mm_kernel, act=act),
        out_shape=jax.ShapeDtypeStruct((Mp, Np), jnp.bfloat16),
        grid_spec=pltpu.PrefetchScalarGridSpec(
            num_scalar_prefetch=0,
            grid=grid,
            in_specs=[
                pl.BlockSpec((tm, tk), lambda i, j, k: (i, k)),
                pl.BlockSpec((tk, tn), lambda i, j, k: (k, j)),
                pl.BlockSpec((2, tn), lambda i, j, k: (0, j)),
            ],
            out_specs=pl.BlockSpec((tm, tn), lambda i, j, k: (i, j)),
            scratch_shapes=[pltpu.VMEM((tm, tn), jnp.float32)],
        ),
        compiler_params=pltpu.CompilerParams(
            dimension_semantics=("parallel", "parallel", "arbitrary"),
            vmem_limit_bytes=_VMEM_LIMIT),
    )(xp, wp, sb)
    # TODO(synk): keep padded (Mp, Np) activations alive across back-to-back
    # GEMMs to avoid this slice + the next layer's re-pad (pure HBM passes).
    return out[:M, :N]


# ----------------------------------------------------------------------------
# Conv (NHWC) via im2col + Pallas GEMM
# ----------------------------------------------------------------------------
def conv2d(x, w, scale=None, bias=None, act="none", stride=1, padding=0,
           pad_mode="zero"):
    # x: (N, H, W, C) NHWC; w: (Cout, Cin, kh, kw) (PyTorch weight layout)
    N, H, W, C = x.shape
    Cout, Cin, kh, kw = w.shape
    if padding > 0:
        mode = "reflect" if pad_mode == "reflect" else "constant"
        x = jnp.pad(x, ((0, 0), (padding, padding), (padding, padding), (0, 0)),
                    mode=mode)
    Hp, Wp = x.shape[1], x.shape[2]
    Ho = (Hp - kh) // stride + 1
    Wo = (Wp - kw) // stride + 1

    if kh == 1 and kw == 1 and stride == 1:
        patches = x.reshape(N * Ho * Wo, C)
        wmat = w.reshape(Cout, Cin).T                     # (Cin, Cout)
    else:
        # im2col stays in bf16 (x is bf16-resident) -> half the old HBM blowup.
        # TODO(synk): stream this im2col through the K-axis index_map instead
        # of materializing it (kh*kw x HBM traffic for 7x7/4x4/3x3 kernels).
        cols = []
        for dy in range(kh):
            for dx in range(kw):
                cols.append(x[:, dy:dy + stride * Ho:stride,
                              dx:dx + stride * Wo:stride, :])
        patches = jnp.stack(cols, axis=3)                 # (N, Ho, Wo, kh*kw, C)
        patches = patches.reshape(N * Ho * Wo, kh * kw * C)
        wmat = w.transpose(2, 3, 1, 0).reshape(kh * kw * Cin, Cout)

    y = matmul_affine_act(patches, wmat, scale, bias, act)
    return y.reshape(N, Ho, Wo, Cout)


def conv_bn_act(x, p, stride=1, pad=0, pad_mode="zero", act="relu"):
    # BatchNorm folded as eval-mode per-channel affine (synthetic running stats).
    eps = 1e-5
    s = p["gamma"] / jnp.sqrt(p["var"] + eps)
    b = p["beta"] - p["mean"] * s + p["b"] * s
    return conv2d(x, p["w"], scale=s, bias=b, act=act, stride=stride,
                  padding=pad, pad_mode=pad_mode)


# ----------------------------------------------------------------------------
# Sub-modules (definitions absent from the snippet; shape-consistent versions)
# ----------------------------------------------------------------------------
def resblock(x, p):
    # TODO(synk): exact ResBlock definition not in snippet; conv-bn-relu,
    # conv-bn, residual add (no final ReLU) used.
    y = conv_bn_act(x, p["c1"], stride=1, pad=1, act="relu")
    y = conv_bn_act(y, p["c2"], stride=1, pad=1, act="none")
    return x + y


def apa(x, rep_list, p):
    # TODO(synk): exact APA definition not in snippet; global-pooled feature and
    # concatenated reps are projected and fused into a (B, prior_dim) prior.
    fea = jnp.mean(x.astype(jnp.float32), axis=(1, 2))   # (B, C) NHWC pooling
    rep = jnp.concatenate(rep_list, axis=1)              # (B, 76+76+152)
    h = (matmul_affine_act(fea, p["fea"]["w"], bias=p["fea"]["b"], act="relu")
         + matmul_affine_act(rep, p["rep"]["w"], bias=p["rep"]["b"], act="relu"))
    return matmul_affine_act(h, p["out"]["w"], bias=p["out"]["b"], act="none")


def bam(x, prior, p):
    # TODO(synk): exact BAM definition not in snippet; FiLM modulation from the
    # prior + concat + 1x1 conv fuse (use_concat=True) used.
    C = x.shape[-1]
    gb = matmul_affine_act(prior, p["film"]["w"], bias=p["film"]["b"],
                           act="none")                    # (B, 2C) f32
    gamma = gb[:, :C][:, None, None, :]
    beta = gb[:, C:][:, None, None, :]
    mod = (x.astype(jnp.float32) * (1.0 + gamma) + beta).astype(x.dtype)
    cat = jnp.concatenate([x, mod], axis=-1)              # (B, H, W, 2C) bf16
    return conv2d(cat, p["fuse"]["w"], bias=p["fuse"]["b"], act="relu")


def upsample(x, p):
    # TODO(synk): exact Upsample definition not in snippet; nearest 2x +
    # conv3x3 (dim -> dim//2) + BN + ReLU used.
    x = jnp.repeat(jnp.repeat(x, 2, axis=1), 2, axis=2)
    return conv_bn_act(x, p, stride=1, pad=1, act="relu")


# ----------------------------------------------------------------------------
# Full MAPs_IN forward (NCHW f32 boundary, NHWC bf16 internal)
# ----------------------------------------------------------------------------
def maps_in_forward(params, inputs, rep_c_list):
    F_list, P_list, skips = [], [], []

    # NCHW -> NHWC and f32 -> bf16 exactly once at the module boundary.
    x = jnp.transpose(inputs, (0, 2, 3, 1)).astype(jnp.bfloat16)

    x = conv_bn_act(x, params["enc1"], stride=1, pad=3, pad_mode="reflect")
    skips.append(x)
    x = conv_bn_act(x, params["enc2"], stride=2, pad=1)
    skips.append(x)
    x = conv_bn_act(x, params["enc3"], stride=2, pad=1)
    skips.append(x)

    for i in range(4):
        x = resblock(x, params["middle"][i])

    p1 = apa(x, rep_c_list, params["apa1"])
    F_list.append(jnp.transpose(x, (0, 3, 1, 2)).astype(jnp.float32))
    P_list.append(p1)
    x = x + skips[-1]
    x = bam(x, p1, params["dec1"])
    x = upsample(x, params["up1"])

    p2 = apa(x, rep_c_list, params["apa2"])
    F_list.append(jnp.transpose(x, (0, 3, 1, 2)).astype(jnp.float32))
    P_list.append(p2)
    x = x + skips[-2]
    x = bam(x, p2, params["dec2"])
    x = upsample(x, params["up2"])

    p3 = apa(x, rep_c_list, params["apa3"])
    F_list.append(jnp.transpose(x, (0, 3, 1, 2)).astype(jnp.float32))
    P_list.append(p3)
    x = x + skips[-3]
    x = bam(x, p3, params["dec3"])

    x = conv2d(x, params["out"]["w"], bias=params["out"]["b"], act="tanh01",
               padding=3, pad_mode="reflect")             # (tanh(x)+1)/2 fused
    x = jnp.transpose(x, (0, 3, 1, 2)).astype(jnp.float32)
    return x, F_list, P_list


# ----------------------------------------------------------------------------
# Deterministic parameter construction (conv weights pre-cast to bf16)
# ----------------------------------------------------------------------------
class KeyGen:
    def __init__(self, key):
        self.key = key
        self.i = 0

    def __call__(self):
        self.i += 1
        return jax.random.fold_in(self.key, self.i)


def _init(key, shape, scale=0.05):
    return jax.random.normal(key, shape, jnp.float32) * scale


def conv_p(kg, cin, cout, k):
    return dict(w=_init(kg(), (cout, cin, k, k)).astype(jnp.bfloat16),
                b=_init(kg(), (cout,)))


def conv_bn_p(kg, cin, cout, k):
    p = conv_p(kg, cin, cout, k)
    p.update(gamma=1.0 + _init(kg(), (cout,)),
             beta=_init(kg(), (cout,)),
             mean=_init(kg(), (cout,)),
             var=jnp.ones((cout,), jnp.float32))
    return p


def linear_p(kg, din, dout):
    # Linear weights stay f32: they only feed the tiny XLA-fallback GEMMs.
    return dict(w=_init(kg(), (din, dout)), b=_init(kg(), (dout,)))


def apa_p(kg, cin, rep_dim=76 + 76 + 152, hidden=64, out_dim=10):
    return dict(fea=linear_p(kg, cin, hidden),
                rep=linear_p(kg, rep_dim, hidden),
                out=linear_p(kg, hidden, out_dim))


def bam_p(kg, x_dim, out_dim, prior_dim=10):
    return dict(film=linear_p(kg, prior_dim, 2 * x_dim),
                fuse=conv_p(kg, 2 * x_dim, out_dim, 1))


def init_params(key, input_nc=4, output_nc=3, ngf=64, prior_dim=10):
    kg = KeyGen(key)
    return dict(
        enc1=conv_bn_p(kg, input_nc, ngf, 7),
        enc2=conv_bn_p(kg, ngf, ngf * 2, 4),
        enc3=conv_bn_p(kg, ngf * 2, ngf * 4, 4),
        middle=[dict(c1=conv_bn_p(kg, ngf * 4, ngf * 4, 3),
                     c2=conv_bn_p(kg, ngf * 4, ngf * 4, 3)) for _ in range(4)],
        apa1=apa_p(kg, ngf * 4, out_dim=prior_dim),
        apa2=apa_p(kg, ngf * 2, out_dim=prior_dim),
        apa3=apa_p(kg, ngf, out_dim=prior_dim),
        dec1=bam_p(kg, ngf * 4, ngf * 4, prior_dim),
        dec2=bam_p(kg, ngf * 2, ngf * 2, prior_dim),
        dec3=bam_p(kg, ngf, ngf, prior_dim),
        up1=conv_bn_p(kg, ngf * 4, ngf * 2, 3),
        up2=conv_bn_p(kg, ngf * 2, ngf, 3),
        out=conv_p(kg, ngf, output_nc, 7),
    )


# ----------------------------------------------------------------------------
if __name__ == "__main__":
    root = jax.random.PRNGKey(0)
    k_param, k_x, k_r1, k_r2, k_r3 = jax.random.split(root, 5)

    params = init_params(k_param)

    B, H, W = 2, 16, 16
    x = jax.random.normal(k_x, (B, 4, H, W), jnp.float32)
    rep_c_list = [jax.random.normal(k_r1, (B, 76), jnp.float32),
                  jax.random.normal(k_r2, (B, 76), jnp.float32),
                  jax.random.normal(k_r3, (B, 152), jnp.float32)]

    fwd = jax.jit(maps_in_forward)
    out, F_list, P_list = fwd(params, x, rep_c_list)
    jax.block_until_ready((out, F_list, P_list))

    assert out.shape == (B, 3, H, W)
    assert F_list[0].shape == (B, 256, H // 4, W // 4)
    assert F_list[1].shape == (B, 128, H // 2, W // 2)
    assert F_list[2].shape == (B, 64, H, W)
    assert all(p.shape == (B, 10) for p in P_list)
    assert bool(jnp.all(jnp.isfinite(out)))
    print("KERNEL_OK")
</pallas_src>

<mosaic_0001>
module attributes {stable_mosaic.version = 11 : i64} {
  func.func @_mm_kernel(%arg0: i32, %arg1: i32, %arg2: i32, %arg3: memref<256x256xbf16, #tpu.memory_space<vmem>>, %arg4: memref<256x128xbf16, #tpu.memory_space<vmem>>, %arg5: memref<2x128xf32, #tpu.memory_space<vmem>>, %arg6: memref<256x128xbf16, #tpu.memory_space<vmem>>, %arg7: memref<256x128xf32, #tpu.memory_space<vmem>>) attributes {dimension_semantics = [#tpu.dimension_semantics<parallel>, #tpu.dimension_semantics<parallel>, #tpu.dimension_semantics<arbitrary>], iteration_bounds = array<i64: 2, 1, 1>, scalar_prefetch = 0 : i64, scratch_operands = 1 : i64, tpu.core_type = #tpu.core_type<tc>, window_params = [{transform_indices = @transform_0, window_bounds = array<i64: 256, 256>}, {transform_indices = @transform_1, window_bounds = array<i64: 256, 128>}, {transform_indices = @transform_2, window_bounds = array<i64: 2, 128>}, {transform_indices = @transform_3, window_bounds = array<i64: 256, 128>}]} {
    %c0 = arith.constant 0 : index
    %c0_0 = arith.constant 0 : index
    %0 = vector.load %arg3[%c0, %c0_0] : memref<256x256xbf16, #tpu.memory_space<vmem>>, vector<256x256xbf16>
    %c0_1 = arith.constant 0 : index
    %c0_2 = arith.constant 0 : index
    %1 = vector.load %arg4[%c0_1, %c0_2] : memref<256x128xbf16, #tpu.memory_space<vmem>>, vector<256x128xbf16>
    %cst = arith.constant dense<0.000000e+00> : vector<256x128xf32>
    %2 = tpu.matmul %0, %1, %cst {dimension_numbers = #tpu.dot_dimension_numbers<[1], [0], [0], [1], [0, 0, 1, 1], [], []>} : vector<256x256xbf16>, vector<256x128xbf16>, vector<256x128xf32> -> vector<256x128xf32>
    %c0_i32 = arith.constant 0 : i32
    %3 = arith.cmpi eq, %arg2, %c0_i32 : i32
    %4 = arith.extui %3 : i1 to i32
    %c0_i32_3 = arith.constant 0 : i32
    %5 = arith.cmpi ne, %4, %c0_i32_3 : i32
    scf.if %5 {
      %c0_8 = arith.constant 0 : index
      %c0_9 = arith.constant 0 : index
      %12 = vector.load %arg7[%c0_8, %c0_9] : memref<256x128xf32, #tpu.memory_space<vmem>>, vector<256x128xf32>
      tpu.vector_store %arg7[%c0_8, %c0_9], %2 {strides = array<i32>} : memref<256x128xf32, #tpu.memory_space<vmem>>, vector<256x128xf32>,
    } else {
    }
    %c0_i32_4 = arith.constant 0 : i32
    %6 = arith.cmpi sgt, %arg2, %c0_i32_4 : i32
    %7 = arith.extui %6 : i1 to i32
    %c0_i32_5 = arith.constant 0 : i32
    %8 = arith.cmpi ne, %7, %c0_i32_5 : i32
    scf.if %8 {
      %c0_8 = arith.constant 0 : index
      %c0_9 = arith.constant 0 : index
      %12 = vector.load %arg7[%c0_8, %c0_9] : memref<256x128xf32, #tpu.memory_space<vmem>>, vector<256x128xf32>
      %13 = arith.addf %12, %2 : vector<256x128xf32>
      %c0_10 = arith.constant 0 : index
      %c0_11 = arith.constant 0 : index
      %14 = vector.load %arg7[%c0_10, %c0_11] : memref<256x128xf32, #tpu.memory_space<vmem>>, vector<256x128xf32>
      tpu.vector_store %arg7[%c0_10, %c0_11], %13 {strides = array<i32>} : memref<256x128xf32, #tpu.memory_space<vmem>>, vector<256x128xf32>,
    } else {
    }
    %c0_i32_6 = arith.constant 0 : i32
    %9 = arith.cmpi eq, %arg2, %c0_i32_6 : i32
    %10 = arith.extui %9 : i1 to i32
    %c0_i32_7 = arith.constant 0 : i32
    %11 = arith.cmpi ne, %10, %c0_i32_7 : i32
    scf.if %11 {
      %c0_8 = arith.constant 0 : index
      %c0_9 = arith.constant 0 : index
      %12 = vector.load %arg7[%c0_8, %c0_9] : memref<256x128xf32, #tpu.memory_space<vmem>>, vector<256x128xf32>
      %c0_10 = arith.constant 0 : index
      %c0_11 = arith.constant 0 : index
      %13 = vector.load %arg5[%c0_10, %c0_11] : memref<2x128xf32, #tpu.memory_space<vmem>>, vector<1x128xf32>
      %14 = vector.broadcast %13 : vector<1x128xf32> to vector<256x128xf32>
      %15 = arith.mulf %12, %14 : vector<256x128xf32>
      %c1 = arith.constant 1 : index
      %c0_12 = arith.constant 0 : index
      %16 = vector.load %arg5[%c1, %c0_12] : memref<2x128xf32, #tpu.memory_space<vmem>>, vector<1x128xf32>
      %17 = vector.broadcast %16 : vector<1x128xf32> to vector<256x128xf32>
      %18 = arith.addf %15, %17 : vector<256x128xf32>
      %cst_13 = arith.constant 0.000000e+00 : f32
      %19 = vector.broadcast %cst_13 : f32 to vector<256x128xf32>
      %20 = arith.maximumf %18, %19 : vector<256x128xf32>
      %21 = arith.truncf %20 : vector<256x128xf32> to vector<256x128xbf16>
      %c0_14 = arith.constant 0 : index
      %c0_15 = arith.constant 0 : index
      %22 = vector.load %arg6[%c0_14, %c0_15] : memref<256x128xbf16, #tpu.memory_space<vmem>>, vector<256x128xbf16>
      tpu.vector_store %arg6[%c0_14, %c0_15], %21 {strides = array<i32>} : memref<256x128xbf16, #tpu.memory_space<vmem>>, vector<256x128xbf16>,
    } else {
    }
    return
  }
  func.func @transform_0(%arg0: i32, %arg1: i32, %arg2: i32) -> (i32, i32) {
    %c0_i32 = arith.constant 0 : i32
    return %arg0, %arg2 : i32, i32
  }
  func.func @transform_1(%arg0: i32, %arg1: i32, %arg2: i32) -> (i32, i32) {
    %c0_i32 = arith.constant 0 : i32
    return %arg2, %arg1 : i32, i32
  }
  func.func @transform_2(%arg0: i32, %arg1: i32, %arg2: i32) -> (i32, i32) {
    %c0_i32 = arith.constant 0 : i32
    %c0_i32_0 = arith.constant 0 : i32
    return %c0_i32, %arg1 : i32, i32
  }
  func.func @transform_3(%arg0: i32, %arg1: i32, %arg2: i32) -> (i32, i32) {
    %c0_i32 = arith.constant 0 : i32
    return %arg0, %arg1 : i32, i32
  }
}

module attributes {stable_mosaic.version = 11 : i64} {
  func.func @_mm_kernel(%arg0: i32, %arg1: i32, %arg2: i32, %arg3: memref<64x512xbf16, #tpu.memory_space<vmem>>, %arg4: memref<512x128xbf16, #tpu.memory_space<vmem>>, %arg5: memref<2x128xf32, #tpu.memory_space<vmem>>, %arg6: memref<64x128xbf16, #tpu.memory_space<vmem>>, %arg7: memref<64x128xf32, #tpu.memory_space<vmem>>) attributes {dimension_semantics = [#tpu.dimension_semantics<parallel>, #tpu.dimension_semantics<parallel>, #tpu.dimension_semantics<arbitrary>], iteration_bounds = array<i64: 2, 1, 2>, scalar_prefetch = 0 : i64, scratch_operands = 1 : i64, tpu.core_type = #tpu.core_type<tc>, window_params = [{transform_indices = @transform_0, window_bounds = array<i64: 64, 512>}, {transform_indices = @transform_1, window_bounds = array<i64: 512, 128>}, {transform_indices = @transform_2, window_bounds = array<i64: 2, 128>}, {transform_indices = @transform_3, window_bounds = array<i64: 64, 128>}]} {
    %c0 = arith.constant 0 : index
    %c0_0 = arith.constant 0 : index
    %0 = vector.load %arg3[%c0, %c0_0] : memref<64x512xbf16, #tpu.memory_space<vmem>>, vector<64x512xbf16>
    %c0_1 = arith.constant 0 : index
    %c0_2 = arith.constant 0 : index
    %1 = vector.load %arg4[%c0_1, %c0_2] : memref<512x128xbf16, #tpu.memory_space<vmem>>, vector<512x128xbf16>
    %cst = arith.constant dense<0.000000e+00> : vector<64x128xf32>
    %2 = tpu.matmul %0, %1, %cst {dimension_numbers = #tpu.dot_dimension_numbers<[1], [0], [0], [1], [0, 0, 1, 1], [], []>} : vector<64x512xbf16>, vector<512x128xbf16>, vector<64x128xf32> -> vector<64x128xf32>
    %c0_i32 = arith.constant 0 : i32
    %3 = arith.cmpi eq, %arg2, %c0_i32 : i32
    %4 = arith.extui %3 : i1 to i32
    %c0_i32_3 = arith.constant 0 : i32
    %5 = arith.cmpi ne, %4, %c0_i32_3 : i32
    scf.if %5 {
      %c0_7 = arith.constant 0 : index
      %c0_8 = arith.constant 0 : index
      %12 = vector.load %arg7[%c0_7, %c0_8] : memref<64x128xf32, #tpu.memory_space<vmem>>, vector<64x128xf32>
      tpu.vector_store %arg7[%c0_7, %c0_8], %2 {strides = array<i32>} : memref<64x128xf32, #tpu.memory_space<vmem>>, vector<64x128xf32>,
    } else {
    }
    %c0_i32_4 = arith.constant 0 : i32
    %6 = arith.cmpi sgt, %arg2, %c0_i32_4 : i32
    %7 = arith.extui %6 : i1 to i32
    %c0_i32_5 = arith.constant 0 : i32
    %8 = arith.cmpi ne, %7, %c0_i32_5 : i32
    scf.if %8 {
      %c0_7 = arith.constant 0 : index
      %c0_8 = arith.constant 0 : index
      %12 = vector.load %arg7[%c0_7, %c0_8] : memref<64x128xf32, #tpu.memory_space<vmem>>, vector<64x128xf32>
      %13 = arith.addf %12, %2 : vector<64x128xf32>
      %c0_9 = arith.constant 0 : index
      %c0_10 = arith.constant 0 : index
      %14 = vector.load %arg7[%c0_9, %c0_10] : memref<64x128xf32, #tpu.memory_space<vmem>>, vector<64x128xf32>
      tpu.vector_store %arg7[%c0_9, %c0_10], %13 {strides = array<i32>} : memref<64x128xf32, #tpu.memory_space<vmem>>, vector<64x128xf32>,
    } else {
    }
    %c1_i32 = arith.constant 1 : i32
    %9 = arith.cmpi eq, %arg2, %c1_i32 : i32
    %10 = arith.extui %9 : i1 to i32
    %c0_i32_6 = arith.constant 0 : i32
    %11 = arith.cmpi ne, %10, %c0_i32_6 : i32
    scf.if %11 {
      %c0_7 = arith.constant 0 : index
      %c0_8 = arith.constant 0 : index
      %12 = vector.load %arg7[%c0_7, %c0_8] : memref<64x128xf32, #tpu.memory_space<vmem>>, vector<64x128xf32>
      %c0_9 = arith.constant 0 : index
      %c0_10 = arith.constant 0 : index
      %13 = vector.load %arg5[%c0_9, %c0_10] : memref<2x128xf32, #tpu.memory_space<vmem>>, vector<1x128xf32>
      %14 = vector.broadcast %13 : vector<1x128xf32> to vector<64x128xf32>
      %15 = arith.mulf %12, %14 : vector<64x128xf32>
      %c1 = arith.constant 1 : index
      %c0_11 = arith.constant 0 : index
      %16 = vector.load %arg5[%c1, %c0_11] : memref<2x128xf32, #tpu.memory_space<vmem>>, vector<1x128xf32>
      %17 = vector.broadcast %16 : vector<1x128xf32> to vector<64x128xf32>
      %18 = arith.addf %15, %17 : vector<64x128xf32>
      %cst_12 = arith.constant 0.000000e+00 : f32
      %19 = vector.broadcast %cst_12 : f32 to vector<64x128xf32>
      %20 = arith.maximumf %18, %19 : vector<64x128xf32>
      %21 = arith.truncf %20 : vector<64x128xf32> to vector<64x128xbf16>
      %c0_13 = arith.constant 0 : index
      %c0_14 = arith.constant 0 : index
      %22 = vector.load %arg6[%c0_13, %c0_14] : memref<64x128xbf16, #tpu.memory_space<vmem>>, vector<64x128xbf16>
      tpu.vector_store %arg6[%c0_13, %c0_14], %21 {strides = array<i32>} : memref<64x128xbf16, #tpu.memory_space<vmem>>, vector<64x128xbf16>,
    } else {
    }
    return
  }
  func.func @transform_0(%arg0: i32, %arg1: i32, %arg2: i32) -> (i32, i32) {
    %c0_i32 = arith.constant 0 : i32
    return %arg0, %arg2 : i32, i32
  }
  func.func @transform_1(%arg0: i32, %arg1: i32, %arg2: i32) -> (i32, i32) {
    %c0_i32 = arith.constant 0 : i32
    return %arg2, %arg1 : i32, i32
  }
  func.func @transform_2(%arg0: i32, %arg1: i32, %arg2: i32) -> (i32, i32) {
    %c0_i32 = arith.constant 0 : i32
    %c0_i32_0 = arith.constant 0 : i32
    return %c0_i32, %arg1 : i32, i32
  }
  func.func @transform_3(%arg0: i32, %arg1: i32, %arg2: i32) -> (i32, i32) {
    %c0_i32 = arith.constant 0 : i32
    return %arg0, %arg1 : i32, i32
  }
}

module attributes {stable_mosaic.version = 11 : i64} {
  func.func @_mm_kernel(%arg0: i32, %arg1: i32, %arg2: i32, %arg3: memref<16x512xbf16, #tpu.memory_space<vmem>>, %arg4: memref<512x256xbf16, #tpu.memory_space<vmem>>, %arg5: memref<2x256xf32, #tpu.memory_space<vmem>>, %arg6: memref<16x256xbf16, #tpu.memory_space<vmem>>, %arg7: memref<16x256xf32, #tpu.memory_space<vmem>>) attributes {dimension_semantics = [#tpu.dimension_semantics<parallel>, #tpu.dimension_semantics<parallel>, #tpu.dimension_semantics<arbitrary>], iteration_bounds = array<i64: 2, 1, 4>, scalar_prefetch = 0 : i64, scratch_operands = 1 : i64, tpu.core_type = #tpu.core_type<tc>, window_params = [{transform_indices = @transform_0, window_bounds = array<i64: 16, 512>}, {transform_indices = @transform_1, window_bounds = array<i64: 512, 256>}, {transform_indices = @transform_2, window_bounds = array<i64: 2, 256>}, {transform_indices = @transform_3, window_bounds = array<i64: 16, 256>}]} {
    %c0 = arith.constant 0 : index
    %c0_0 = arith.constant 0 : index
    %0 = vector.load %arg3[%c0, %c0_0] : memref<16x512xbf16, #tpu.memory_space<vmem>>, vector<16x512xbf16>
    %c0_1 = arith.constant 0 : index
    %c0_2 = arith.constant 0 : index
    %1 = vector.load %arg4[%c0_1, %c0_2] : memref<512x256xbf16, #tpu.memory_space<vmem>>, vector<512x256xbf16>
    %cst = arith.constant dense<0.000000e+00> : vector<16x256xf32>
    %2 = tpu.matmul %0, %1, %cst {dimension_numbers = #tpu.dot_dimension_numbers<[1], [0], [0], [1], [0, 0, 1, 1], [], []>} : vector<16x512xbf16>, vector<512x256xbf16>, vector<16x256xf32> -> vector<16x256xf32>
    %c0_i32 = arith.constant 0 : i32
    %3 = arith.cmpi eq, %arg2, %c0_i32 : i32
    %4 = arith.extui %3 : i1 to i32
    %c0_i32_3 = arith.constant 0 : i32
    %5 = arith.cmpi ne, %4, %c0_i32_3 : i32
    scf.if %5 {
      %c0_7 = arith.constant 0 : index
      %c0_8 = arith.constant 0 : index
      %12 = vector.load %arg7[%c0_7, %c0_8] : memref<16x256xf32, #tpu.memory_space<vmem>>, vector<16x256xf32>
      tpu.vector_store %arg7[%c0_7, %c0_8], %2 {strides = array<i32>} : memref<16x256xf32, #tpu.memory_space<vmem>>, vector<16x256xf32>,
    } else {
    }
    %c0_i32_4 = arith.constant 0 : i32
    %6 = arith.cmpi sgt, %arg2, %c0_i32_4 : i32
    %7 = arith.extui %6 : i1 to i32
    %c0_i32_5 = arith.constant 0 : i32
    %8 = arith.cmpi ne, %7, %c0_i32_5 : i32
    scf.if %8 {
      %c0_7 = arith.constant 0 : index
      %c0_8 = arith.constant 0 : index
      %12 = vector.load %arg7[%c0_7, %c0_8] : memref<16x256xf32, #tpu.memory_space<vmem>>, vector<16x256xf32>
      %13 = arith.addf %12, %2 : vector<16x256xf32>
      %c0_9 = arith.constant 0 : index
      %c0_10 = arith.constant 0 : index
      %14 = vector.load %arg7[%c0_9, %c0_10] : memref<16x256xf32, #tpu.memory_space<vmem>>, vector<16x256xf32>
      tpu.vector_store %arg7[%c0_9, %c0_10], %13 {strides = array<i32>} : memref<16x256xf32, #tpu.memory_space<vmem>>, vector<16x256xf32>,
    } else {
    }
    %c3_i32 = arith.constant 3 : i32
    %9 = arith.cmpi eq, %arg2, %c3_i32 : i32
    %10 = arith.extui %9 : i1 to i32
    %c0_i32_6 = arith.constant 0 : i32
    %11 = arith.cmpi ne, %10, %c0_i32_6 : i32
    scf.if %11 {
      %c0_7 = arith.constant 0 : index
      %c0_8 = arith.constant 0 : index
      %12 = vector.load %arg7[%c0_7, %c0_8] : memref<16x256xf32, #tpu.memory_space<vmem>>, vector<16x256xf32>
      %c0_9 = arith.constant 0 : index
      %c0_10 = arith.constant 0 : index
      %13 = vector.load %arg5[%c0_9, %c0_10] : memref<2x256xf32, #tpu.memory_space<vmem>>, vector<1x256xf32>
      %14 = vector.broadcast %13 : vector<1x256xf32> to vector<16x256xf32>
      %15 = arith.mulf %12, %14 : vector<16x256xf32>
      %c1 = arith.constant 1 : index
      %c0_11 = arith.constant 0 : index
      %16 = vector.load %arg5[%c1, %c0_11] : memref<2x256xf32, #tpu.memory_space<vmem>>, vector<1x256xf32>
      %17 = vector.broadcast %16 : vector<1x256xf32> to vector<16x256xf32>
      %18 = arith.addf %15, %17 : vector<16x256xf32>
      %cst_12 = arith.constant 0.000000e+00 : f32
      %19 = vector.broadcast %cst_12 : f32 to vector<16x256xf32>
      %20 = arith.maximumf %18, %19 : vector<16x256xf32>
      %21 = arith.truncf %20 : vector<16x256xf32> to vector<16x256xbf16>
      %c0_13 = arith.constant 0 : index
      %c0_14 = arith.constant 0 : index
      %22 = vector.load %arg6[%c0_13, %c0_14] : memref<16x256xbf16, #tpu.memory_space<vmem>>, vector<16x256xbf16>
      tpu.vector_store %arg6[%c0_13, %c0_14], %21 {strides = array<i32>} : memref<16x256xbf16, #tpu.memory_space<vmem>>, vector<16x256xbf16>,
    } else {
    }
    return
  }
  func.func @transform_0(%arg0: i32, %arg1: i32, %arg2: i32) -> (i32, i32) {
    %c0_i32 = arith.constant 0 : i32
    return %arg0, %arg2 : i32, i32
  }
  func.func @transform_1(%arg0: i32, %arg1: i32, %arg2: i32) -> (i32, i32) {
    %c0_i32 = arith.constant 0 : i32
    return %arg2, %arg1 : i32, i32
  }
  func.func @transform_2(%arg0: i32, %arg1: i32, %arg2: i32) -> (i32, i32) {
    %c0_i32 = arith.constant 0 : i32
    %c0_i32_0 = arith.constant 0 : i32
    return %c0_i32, %arg1 : i32, i32
  }
  func.func @transform_3(%arg0: i32, %arg1: i32, %arg2: i32) -> (i32, i32) {
    %c0_i32 = arith.constant 0 : i32
    return %arg0, %arg1 : i32, i32
  }
}

module attributes {stable_mosaic.version = 11 : i64} {
  func.func @_mm_kernel(%arg0: i32, %arg1: i32, %arg2: i32, %arg3: memref<16x384xbf16, #tpu.memory_space<vmem>>, %arg4: memref<384x256xbf16, #tpu.memory_space<vmem>>, %arg5: memref<2x256xf32, #tpu.memory_space<vmem>>, %arg6: memref<16x256xbf16, #tpu.memory_space<vmem>>, %arg7: memref<16x256xf32, #tpu.memory_space<vmem>>) attributes {dimension_semantics = [#tpu.dimension_semantics<parallel>, #tpu.dimension_semantics<parallel>, #tpu.dimension_semantics<arbitrary>], iteration_bounds = array<i64: 2, 1, 6>, scalar_prefetch = 0 : i64, scratch_operands = 1 : i64, tpu.core_type = #tpu.core_type<tc>, window_params = [{transform_indices = @transform_0, window_bounds = array<i64: 16, 384>}, {transform_indices = @transform_1, window_bounds = array<i64: 384, 256>}, {transform_indices = @transform_2, window_bounds = array<i64: 2, 256>}, {transform_indices = @transform_3, window_bounds = array<i64: 16, 256>}]} {
    %c0 = arith.constant 0 : index
    %c0_0 = arith.constant 0 : index
    %0 = vector.load %arg3[%c0, %c0_0] : memref<16x384xbf16, #tpu.memory_space<vmem>>, vector<16x384xbf16>
    %c0_1 = arith.constant 0 : index
    %c0_2 = arith.constant 0 : index
    %1 = vector.load %arg4[%c0_1, %c0_2] : memref<384x256xbf16, #tpu.memory_space<vmem>>, vector<384x256xbf16>
    %cst = arith.constant dense<0.000000e+00> : vector<16x256xf32>
    %2 = tpu.matmul %0, %1, %cst {dimension_numbers = #tpu.dot_dimension_numbers<[1], [0], [0], [1], [0, 0, 1, 1], [], []>} : vector<16x384xbf16>, vector<384x256xbf16>, vector<16x256xf32> -> vector<16x256xf32>
    %c0_i32 = arith.constant 0 : i32
    %3 = arith.cmpi eq, %arg2, %c0_i32 : i32
    %4 = arith.extui %3 : i1 to i32
    %c0_i32_3 = arith.constant 0 : i32
    %5 = arith.cmpi ne, %4, %c0_i32_3 : i32
    scf.if %5 {
      %c0_7 = arith.constant 0 : index
      %c0_8 = arith.constant 0 : index
      %12 = vector.load %arg7[%c0_7, %c0_8] : memref<16x256xf32, #tpu.memory_space<vmem>>, vector<16x256xf32>
      tpu.vector_store %arg7[%c0_7, %c0_8], %2 {strides = array<i32>} : memref<16x256xf32, #tpu.memory_space<vmem>>, vector<16x256xf32>,
    } else {
    }
    %c0_i32_4 = arith.constant 0 : i32
    %6 = arith.cmpi sgt, %arg2, %c0_i32_4 : i32
    %7 = arith.extui %6 : i1 to i32
    %c0_i32_5 = arith.constant 0 : i32
    %8 = arith.cmpi ne, %7, %c0_i32_5 : i32
    scf.if %8 {
      %c0_7 = arith.constant 0 : index
      %c0_8 = arith.constant 0 : index
      %12 = vector.load %arg7[%c0_7, %c0_8] : memref<16x256xf32, #tpu.memory_space<vmem>>, vector<16x256xf32>
      %13 = arith.addf %12, %2 : vector<16x256xf32>
      %c0_9 = arith.constant 0 : index
      %c0_10 = arith.constant 0 : index
      %14 = vector.load %arg7[%c0_9, %c0_10] : memref<16x256xf32, #tpu.memory_space<vmem>>, vector<16x256xf32>
      tpu.vector_store %arg7[%c0_9, %c0_10], %13 {strides = array<i32>} : memref<16x256xf32, #tpu.memory_space<vmem>>, vector<16x256xf32>,
    } else {
    }
    %c5_i32 = arith.constant 5 : i32
    %9 = arith.cmpi eq, %arg2, %c5_i32 : i32
    %10 = arith.extui %9 : i1 to i32
    %c0_i32_6 = arith.constant 0 : i32
    %11 = arith.cmpi ne, %10, %c0_i32_6 : i32
    scf.if %11 {
      %c0_7 = arith.constant 0 : index
      %c0_8 = arith.constant 0 : index
      %12 = vector.load %arg7[%c0_7, %c0_8] : memref<16x256xf32, #tpu.memory_space<vmem>>, vector<16x256xf32>
      %c0_9 = arith.constant 0 : index
      %c0_10 = arith.constant 0 : index
      %13 = vector.load %arg5[%c0_9, %c0_10] : memref<2x256xf32, #tpu.memory_space<vmem>>, vector<1x256xf32>
      %14 = vector.broadcast %13 : vector<1x256xf32> to vector<16x256xf32>
      %15 = arith.mulf %12, %14 : vector<16x256xf32>
      %c1 = arith.constant 1 : index
      %c0_11 = arith.constant 0 : index
      %16 = vector.load %arg5[%c1, %c0_11] : memref<2x256xf32, #tpu.memory_space<vmem>>, vector<1x256xf32>
      %17 = vector.broadcast %16 : vector<1x256xf32> to vector<16x256xf32>
      %18 = arith.addf %15, %17 : vector<16x256xf32>
      %cst_12 = arith.constant 0.000000e+00 : f32
      %19 = vector.broadcast %cst_12 : f32 to vector<16x256xf32>
      %20 = arith.maximumf %18, %19 : vector<16x256xf32>
      %21 = arith.truncf %20 : vector<16x256xf32> to vector<16x256xbf16>
      %c0_13 = arith.constant 0 : index
      %c0_14 = arith.constant 0 : index
      %22 = vector.load %arg6[%c0_13, %c0_14] : memref<16x256xbf16, #tpu.memory_space<vmem>>, vector<16x256xbf16>
      tpu.vector_store %arg6[%c0_13, %c0_14], %21 {strides = array<i32>} : memref<16x256xbf16, #tpu.memory_space<vmem>>, vector<16x256xbf16>,
    } else {
    }
    return
  }
  func.func @transform_0(%arg0: i32, %arg1: i32, %arg2: i32) -> (i32, i32) {
    %c0_i32 = arith.constant 0 : i32
    return %arg0, %arg2 : i32, i32
  }
  func.func @transform_1(%arg0: i32, %arg1: i32, %arg2: i32) -> (i32, i32) {
    %c0_i32 = arith.constant 0 : i32
    return %arg2, %arg1 : i32, i32
  }
  func.func @transform_2(%arg0: i32, %arg1: i32, %arg2: i32) -> (i32, i32) {
    %c0_i32 = arith.constant 0 : i32
    %c0_i32_0 = arith.constant 0 : i32
    return %c0_i32, %arg1 : i32, i32
  }
  func.func @transform_3(%arg0: i32, %arg1: i32, %arg2: i32) -> (i32, i32) {
    %c0_i32 = arith.constant 0 : i32
    return %arg0, %arg1 : i32, i32
  }
}

module attributes {stable_mosaic.version = 11 : i64} {
  func.func @_mm_kernel(%arg0: i32, %arg1: i32, %arg2: i32, %arg3: memref<16x384xbf16, #tpu.memory_space<vmem>>, %arg4: memref<384x256xbf16, #tpu.memory_space<vmem>>, %arg5: memref<2x256xf32, #tpu.memory_space<vmem>>, %arg6: memref<16x256xbf16, #tpu.memory_space<vmem>>, %arg7: memref<16x256xf32, #tpu.memory_space<vmem>>) attributes {dimension_semantics = [#tpu.dimension_semantics<parallel>, #tpu.dimension_semantics<parallel>, #tpu.dimension_semantics<arbitrary>], iteration_bounds = array<i64: 2, 1, 6>, scalar_prefetch = 0 : i64, scratch_operands = 1 : i64, tpu.core_type = #tpu.core_type<tc>, window_params = [{transform_indices = @transform_0, window_bounds = array<i64: 16, 384>}, {transform_indices = @transform_1, window_bounds = array<i64: 384, 256>}, {transform_indices = @transform_2, window_bounds = array<i64: 2, 256>}, {transform_indices = @transform_3, window_bounds = array<i64: 16, 256>}]} {
    %c0 = arith.constant 0 : index
    %c0_0 = arith.constant 0 : index
    %0 = vector.load %arg3[%c0, %c0_0] : memref<16x384xbf16, #tpu.memory_space<vmem>>, vector<16x384xbf16>
    %c0_1 = arith.constant 0 : index
    %c0_2 = arith.constant 0 : index
    %1 = vector.load %arg4[%c0_1, %c0_2] : memref<384x256xbf16, #tpu.memory_space<vmem>>, vector<384x256xbf16>
    %cst = arith.constant dense<0.000000e+00> : vector<16x256xf32>
    %2 = tpu.matmul %0, %1, %cst {dimension_numbers = #tpu.dot_dimension_numbers<[1], [0], [0], [1], [0, 0, 1, 1], [], []>} : vector<16x384xbf16>, vector<384x256xbf16>, vector<16x256xf32> -> vector<16x256xf32>
    %c0_i32 = arith.constant 0 : i32
    %3 = arith.cmpi eq, %arg2, %c0_i32 : i32
    %4 = arith.extui %3 : i1 to i32
    %c0_i32_3 = arith.constant 0 : i32
    %5 = arith.cmpi ne, %4, %c0_i32_3 : i32
    scf.if %5 {
      %c0_7 = arith.constant 0 : index
      %c0_8 = arith.constant 0 : index
      %12 = vector.load %arg7[%c0_7, %c0_8] : memref<16x256xf32, #tpu.memory_space<vmem>>, vector<16x256xf32>
      tpu.vector_store %arg7[%c0_7, %c0_8], %2 {strides = array<i32>} : memref<16x256xf32, #tpu.memory_space<vmem>>, vector<16x256xf32>,
    } else {
    }
    %c0_i32_4 = arith.constant 0 : i32
    %6 = arith.cmpi sgt, %arg2, %c0_i32_4 : i32
    %7 = arith.extui %6 : i1 to i32
    %c0_i32_5 = arith.constant 0 : i32
    %8 = arith.cmpi ne, %7, %c0_i32_5 : i32
    scf.if %8 {
      %c0_7 = arith.constant 0 : index
      %c0_8 = arith.constant 0 : index
      %12 = vector.load %arg7[%c0_7, %c0_8] : memref<16x256xf32, #tpu.memory_space<vmem>>, vector<16x256xf32>
      %13 = arith.addf %12, %2 : vector<16x256xf32>
      %c0_9 = arith.constant 0 : index
      %c0_10 = arith.constant 0 : index
      %14 = vector.load %arg7[%c0_9, %c0_10] : memref<16x256xf32, #tpu.memory_space<vmem>>, vector<16x256xf32>
      tpu.vector_store %arg7[%c0_9, %c0_10], %13 {strides = array<i32>} : memref<16x256xf32, #tpu.memory_space<vmem>>, vector<16x256xf32>,
    } else {
    }
    %c5_i32 = arith.constant 5 : i32
    %9 = arith.cmpi eq, %arg2, %c5_i32 : i32
    %10 = arith.extui %9 : i1 to i32
    %c0_i32_6 = arith.constant 0 : i32
    %11 = arith.cmpi ne, %10, %c0_i32_6 : i32
    scf.if %11 {
      %c0_7 = arith.constant 0 : index
      %c0_8 = arith.constant 0 : index
      %12 = vector.load %arg7[%c0_7, %c0_8] : memref<16x256xf32, #tpu.memory_space<vmem>>, vector<16x256xf32>
      %c0_9 = arith.constant 0 : index
      %c0_10 = arith.constant 0 : index
      %13 = vector.load %arg5[%c0_9, %c0_10] : memref<2x256xf32, #tpu.memory_space<vmem>>, vector<1x256xf32>
      %14 = vector.broadcast %13 : vector<1x256xf32> to vector<16x256xf32>
      %15 = arith.mulf %12, %14 : vector<16x256xf32>
      %c1 = arith.constant 1 : index
      %c0_11 = arith.constant 0 : index
      %16 = vector.load %arg5[%c1, %c0_11] : memref<2x256xf32, #tpu.memory_space<vmem>>, vector<1x256xf32>
      %17 = vector.broadcast %16 : vector<1x256xf32> to vector<16x256xf32>
      %18 = arith.addf %15, %17 : vector<16x256xf32>
      %19 = arith.truncf %18 : vector<16x256xf32> to vector<16x256xbf16>
      %c0_12 = arith.constant 0 : index
      %c0_13 = arith.constant 0 : index
      %20 = vector.load %arg6[%c0_12, %c0_13] : memref<16x256xbf16, #tpu.memory_space<vmem>>, vector<16x256xbf16>
      tpu.vector_store %arg6[%c0_12, %c0_13], %19 {strides = array<i32>} : memref<16x256xbf16, #tpu.memory_space<vmem>>, vector<16x256xbf16>,
    } else {
    }
    return
  }
  func.func @transform_0(%arg0: i32, %arg1: i32, %arg2: i32) -> (i32, i32) {
    %c0_i32 = arith.constant 0 : i32
    return %arg0, %arg2 : i32, i32
  }
  func.func @transform_1(%arg0: i32, %arg1: i32, %arg2: i32) -> (i32, i32) {
    %c0_i32 = arith.constant 0 : i32
    return %arg2, %arg1 : i32, i32
  }
  func.func @transform_2(%arg0: i32, %arg1: i32, %arg2: i32) -> (i32, i32) {
    %c0_i32 = arith.constant 0 : i32
    %c0_i32_0 = arith.constant 0 : i32
    return %c0_i32, %arg1 : i32, i32
  }
  func.func @transform_3(%arg0: i32, %arg1: i32, %arg2: i32) -> (i32, i32) {
    %c0_i32 = arith.constant 0 : i32
    return %arg0, %arg1 : i32, i32
  }
}

module attributes {stable_mosaic.version = 11 : i64} {
  func.func @_mm_kernel(%arg0: i32, %arg1: i32, %arg2: i32, %arg3: memref<16x512xbf16, #tpu.memory_space<vmem>>, %arg4: memref<512x256xbf16, #tpu.memory_space<vmem>>, %arg5: memref<2x256xf32, #tpu.memory_space<vmem>>, %arg6: memref<16x256xbf16, #tpu.memory_space<vmem>>, %arg7: memref<16x256xf32, #tpu.memory_space<vmem>>) attributes {dimension_semantics = [#tpu.dimension_semantics<parallel>, #tpu.dimension_semantics<parallel>, #tpu.dimension_semantics<arbitrary>], iteration_bounds = array<i64: 2, 1, 1>, scalar_prefetch = 0 : i64, scratch_operands = 1 : i64, tpu.core_type = #tpu.core_type<tc>, window_params = [{transform_indices = @transform_0, window_bounds = array<i64: 16, 512>}, {transform_indices = @transform_1, window_bounds = array<i64: 512, 256>}, {transform_indices = @transform_2, window_bounds = array<i64: 2, 256>}, {transform_indices = @transform_3, window_bounds = array<i64: 16, 256>}]} {
    %c0 = arith.constant 0 : index
    %c0_0 = arith.constant 0 : index
    %0 = vector.load %arg3[%c0, %c0_0] : memref<16x512xbf16, #tpu.memory_space<vmem>>, vector<16x512xbf16>
    %c0_1 = arith.constant 0 : index
    %c0_2 = arith.constant 0 : index
    %1 = vector.load %arg4[%c0_1, %c0_2] : memref<512x256xbf16, #tpu.memory_space<vmem>>, vector<512x256xbf16>
    %cst = arith.constant dense<0.000000e+00> : vector<16x256xf32>
    %2 = tpu.matmul %0, %1, %cst {dimension_numbers = #tpu.dot_dimension_numbers<[1], [0], [0], [1], [0, 0, 1, 1], [], []>} : vector<16x512xbf16>, vector<512x256xbf16>, vector<16x256xf32> -> vector<16x256xf32>
    %c0_i32 = arith.constant 0 : i32
    %3 = arith.cmpi eq, %arg2, %c0_i32 : i32
    %4 = arith.extui %3 : i1 to i32
    %c0_i32_3 = arith.constant 0 : i32
    %5 = arith.cmpi ne, %4, %c0_i32_3 : i32
    scf.if %5 {
      %c0_8 = arith.constant 0 : index
      %c0_9 = arith.constant 0 : index
      %12 = vector.load %arg7[%c0_8, %c0_9] : memref<16x256xf32, #tpu.memory_space<vmem>>, vector<16x256xf32>
      tpu.vector_store %arg7[%c0_8, %c0_9], %2 {strides = array<i32>} : memref<16x256xf32, #tpu.memory_space<vmem>>, vector<16x256xf32>,
    } else {
    }
    %c0_i32_4 = arith.constant 0 : i32
    %6 = arith.cmpi sgt, %arg2, %c0_i32_4 : i32
    %7 = arith.extui %6 : i1 to i32
    %c0_i32_5 = arith.constant 0 : i32
    %8 = arith.cmpi ne, %7, %c0_i32_5 : i32
    scf.if %8 {
      %c0_8 = arith.constant 0 : index
      %c0_9 = arith.constant 0 : index
      %12 = vector.load %arg7[%c0_8, %c0_9] : memref<16x256xf32, #tpu.memory_space<vmem>>, vector<16x256xf32>
      %13 = arith.addf %12, %2 : vector<16x256xf32>
      %c0_10 = arith.constant 0 : index
      %c0_11 = arith.constant 0 : index
      %14 = vector.load %arg7[%c0_10, %c0_11] : memref<16x256xf32, #tpu.memory_space<vmem>>, vector<16x256xf32>
      tpu.vector_store %arg7[%c0_10, %c0_11], %13 {strides = array<i32>} : memref<16x256xf32, #tpu.memory_space<vmem>>, vector<16x256xf32>,
    } else {
    }
    %c0_i32_6 = arith.constant 0 : i32
    %9 = arith.cmpi eq, %arg2, %c0_i32_6 : i32
    %10 = arith.extui %9 : i1 to i32
    %c0_i32_7 = arith.constant 0 : i32
    %11 = arith.cmpi ne, %10, %c0_i32_7 : i32
    scf.if %11 {
      %c0_8 = arith.constant 0 : index
      %c0_9 = arith.constant 0 : index
      %12 = vector.load %arg7[%c0_8, %c0_9] : memref<16x256xf32, #tpu.memory_space<vmem>>, vector<16x256xf32>
      %c0_10 = arith.constant 0 : index
      %c0_11 = arith.constant 0 : index
      %13 = vector.load %arg5[%c0_10, %c0_11] : memref<2x256xf32, #tpu.memory_space<vmem>>, vector<1x256xf32>
      %14 = vector.broadcast %13 : vector<1x256xf32> to vector<16x256xf32>
      %15 = arith.mulf %12, %14 : vector<16x256xf32>
      %c1 = arith.constant 1 : index
      %c0_12 = arith.constant 0 : index
      %16 = vector.load %arg5[%c1, %c0_12] : memref<2x256xf32, #tpu.memory_space<vmem>>, vector<1x256xf32>
      %17 = vector.broadcast %16 : vector<1x256xf32> to vector<16x256xf32>
      %18 = arith.addf %15, %17 : vector<16x256xf32>
      %cst_13 = arith.constant 0.000000e+00 : f32
      %19 = vector.broadcast %cst_13 : f32 to vector<16x256xf32>
      %20 = arith.maximumf %18, %19 : vector<16x256xf32>
      %21 = arith.truncf %20 : vector<16x256xf32> to vector<16x256xbf16>
      %c0_14 = arith.constant 0 : index
      %c0_15 = arith.constant 0 : index
      %22 = vector.load %arg6[%c0_14, %c0_15] : memref<16x256xbf16, #tpu.memory_space<vmem>>, vector<16x256xbf16>
      tpu.vector_store %arg6[%c0_14, %c0_15], %21 {strides = array<i32>} : memref<16x256xbf16, #tpu.memory_space<vmem>>, vector<16x256xbf16>,
    } else {
    }
    return
  }
  func.func @transform_0(%arg0: i32, %arg1: i32, %arg2: i32) -> (i32, i32) {
    %c0_i32 = arith.constant 0 : i32
    return %arg0, %arg2 : i32, i32
  }
  func.func @transform_1(%arg0: i32, %arg1: i32, %arg2: i32) -> (i32, i32) {
    %c0_i32 = arith.constant 0 : i32
    return %arg2, %arg1 : i32, i32
  }
  func.func @transform_2(%arg0: i32, %arg1: i32, %arg2: i32) -> (i32, i32) {
    %c0_i32 = arith.constant 0 : i32
    %c0_i32_0 = arith.constant 0 : i32
    return %c0_i32, %arg1 : i32, i32
  }
  func.func @transform_3(%arg0: i32, %arg1: i32, %arg2: i32) -> (i32, i32) {
    %c0_i32 = arith.constant 0 : i32
    return %arg0, %arg1 : i32, i32
  }
}

module attributes {stable_mosaic.version = 11 : i64} {
  func.func @_mm_kernel(%arg0: i32, %arg1: i32, %arg2: i32, %arg3: memref<64x384xbf16, #tpu.memory_space<vmem>>, %arg4: memref<384x128xbf16, #tpu.memory_space<vmem>>, %arg5: memref<2x128xf32, #tpu.memory_space<vmem>>, %arg6: memref<64x128xbf16, #tpu.memory_space<vmem>>, %arg7: memref<64x128xf32, #tpu.memory_space<vmem>>) attributes {dimension_semantics = [#tpu.dimension_semantics<parallel>, #tpu.dimension_semantics<parallel>, #tpu.dimension_semantics<arbitrary>], iteration_bounds = array<i64: 2, 1, 6>, scalar_prefetch = 0 : i64, scratch_operands = 1 : i64, tpu.core_type = #tpu.core_type<tc>, window_params = [{transform_indices = @transform_0, window_bounds = array<i64: 64, 384>}, {transform_indices = @transform_1, window_bounds = array<i64: 384, 128>}, {transform_indices = @transform_2, window_bounds = array<i64: 2, 128>}, {transform_indices = @transform_3, window_bounds = array<i64: 64, 128>}]} {
    %c0 = arith.constant 0 : index
    %c0_0 = arith.constant 0 : index
    %0 = vector.load %arg3[%c0, %c0_0] : memref<64x384xbf16, #tpu.memory_space<vmem>>, vector<64x384xbf16>
    %c0_1 = arith.constant 0 : index
    %c0_2 = arith.constant 0 : index
    %1 = vector.load %arg4[%c0_1, %c0_2] : memref<384x128xbf16, #tpu.memory_space<vmem>>, vector<384x128xbf16>
    %cst = arith.constant dense<0.000000e+00> : vector<64x128xf32>
    %2 = tpu.matmul %0, %1, %cst {dimension_numbers = #tpu.dot_dimension_numbers<[1], [0], [0], [1], [0, 0, 1, 1], [], []>} : vector<64x384xbf16>, vector<384x128xbf16>, vector<64x128xf32> -> vector<64x128xf32>
    %c0_i32 = arith.constant 0 : i32
    %3 = arith.cmpi eq, %arg2, %c0_i32 : i32
    %4 = arith.extui %3 : i1 to i32
    %c0_i32_3 = arith.constant 0 : i32
    %5 = arith.cmpi ne, %4, %c0_i32_3 : i32
    scf.if %5 {
      %c0_7 = arith.constant 0 : index
      %c0_8 = arith.constant 0 : index
      %12 = vector.load %arg7[%c0_7, %c0_8] : memref<64x128xf32, #tpu.memory_space<vmem>>, vector<64x128xf32>
      tpu.vector_store %arg7[%c0_7, %c0_8], %2 {strides = array<i32>} : memref<64x128xf32, #tpu.memory_space<vmem>>, vector<64x128xf32>,
    } else {
    }
    %c0_i32_4 = arith.constant 0 : i32
    %6 = arith.cmpi sgt, %arg2, %c0_i32_4 : i32
    %7 = arith.extui %6 : i1 to i32
    %c0_i32_5 = arith.constant 0 : i32
    %8 = arith.cmpi ne, %7, %c0_i32_5 : i32
    scf.if %8 {
      %c0_7 = arith.constant 0 : index
      %c0_8 = arith.constant 0 : index
      %12 = vector.load %arg7[%c0_7, %c0_8] : memref<64x128xf32, #tpu.memory_space<vmem>>, vector<64x128xf32>
      %13 = arith.addf %12, %2 : vector<64x128xf32>
      %c0_9 = arith.constant 0 : index
      %c0_10 = arith.constant 0 : index
      %14 = vector.load %arg7[%c0_9, %c0_10] : memref<64x128xf32, #tpu.memory_space<vmem>>, vector<64x128xf32>
      tpu.vector_store %arg7[%c0_9, %c0_10], %13 {strides = array<i32>} : memref<64x128xf32, #tpu.memory_space<vmem>>, vector<64x128xf32>,
    } else {
    }
    %c5_i32 = arith.constant 5 : i32
    %9 = arith.cmpi eq, %arg2, %c5_i32 : i32
    %10 = arith.extui %9 : i1 to i32
    %c0_i32_6 = arith.constant 0 : i32
    %11 = arith.cmpi ne, %10, %c0_i32_6 : i32
    scf.if %11 {
      %c0_7 = arith.constant 0 : index
      %c0_8 = arith.constant 0 : index
      %12 = vector.load %arg7[%c0_7, %c0_8] : memref<64x128xf32, #tpu.memory_space<vmem>>, vector<64x128xf32>
      %c0_9 = arith.constant 0 : index
      %c0_10 = arith.constant 0 : index
      %13 = vector.load %arg5[%c0_9, %c0_10] : memref<2x128xf32, #tpu.memory_space<vmem>>, vector<1x128xf32>
      %14 = vector.broadcast %13 : vector<1x128xf32> to vector<64x128xf32>
      %15 = arith.mulf %12, %14 : vector<64x128xf32>
      %c1 = arith.constant 1 : index
      %c0_11 = arith.constant 0 : index
      %16 = vector.load %arg5[%c1, %c0_11] : memref<2x128xf32, #tpu.memory_space<vmem>>, vector<1x128xf32>
      %17 = vector.broadcast %16 : vector<1x128xf32> to vector<64x128xf32>
      %18 = arith.addf %15, %17 : vector<64x128xf32>
      %cst_12 = arith.constant 0.000000e+00 : f32
      %19 = vector.broadcast %cst_12 : f32 to vector<64x128xf32>
      %20 = arith.maximumf %18, %19 : vector<64x128xf32>
      %21 = arith.truncf %20 : vector<64x128xf32> to vector<64x128xbf16>
      %c0_13 = arith.constant 0 : index
      %c0_14 = arith.constant 0 : index
      %22 = vector.load %arg6[%c0_13, %c0_14] : memref<64x128xbf16, #tpu.memory_space<vmem>>, vector<64x128xbf16>
      tpu.vector_store %arg6[%c0_13, %c0_14], %21 {strides = array<i32>} : memref<64x128xbf16, #tpu.memory_space<vmem>>, vector<64x128xbf16>,
    } else {
    }
    return
  }
  func.func @transform_0(%arg0: i32, %arg1: i32, %arg2: i32) -> (i32, i32) {
    %c0_i32 = arith.constant 0 : i32
    return %arg0, %arg2 : i32, i32
  }
  func.func @transform_1(%arg0: i32, %arg1: i32, %arg2: i32) -> (i32, i32) {
    %c0_i32 = arith.constant 0 : i32
    return %arg2, %arg1 : i32, i32
  }
  func.func @transform_2(%arg0: i32, %arg1: i32, %arg2: i32) -> (i32, i32) {
    %c0_i32 = arith.constant 0 : i32
    %c0_i32_0 = arith.constant 0 : i32
    return %c0_i32, %arg1 : i32, i32
  }
  func.func @transform_3(%arg0: i32, %arg1: i32, %arg2: i32) -> (i32, i32) {
    %c0_i32 = arith.constant 0 : i32
    return %arg0, %arg1 : i32, i32
  }
}

module attributes {stable_mosaic.version = 11 : i64} {
  func.func @_mm_kernel(%arg0: i32, %arg1: i32, %arg2: i32, %arg3: memref<64x256xbf16, #tpu.memory_space<vmem>>, %arg4: memref<256x128xbf16, #tpu.memory_space<vmem>>, %arg5: memref<2x128xf32, #tpu.memory_space<vmem>>, %arg6: memref<64x128xbf16, #tpu.memory_space<vmem>>, %arg7: memref<64x128xf32, #tpu.memory_space<vmem>>) attributes {dimension_semantics = [#tpu.dimension_semantics<parallel>, #tpu.dimension_semantics<parallel>, #tpu.dimension_semantics<arbitrary>], iteration_bounds = array<i64: 2, 1, 1>, scalar_prefetch = 0 : i64, scratch_operands = 1 : i64, tpu.core_type = #tpu.core_type<tc>, window_params = [{transform_indices = @transform_0, window_bounds = array<i64: 64, 256>}, {transform_indices = @transform_1, window_bounds = array<i64: 256, 128>}, {transform_indices = @transform_2, window_bounds = array<i64: 2, 128>}, {transform_indices = @transform_3, window_bounds = array<i64: 64, 128>}]} {
    %c0 = arith.constant 0 : index
    %c0_0 = arith.constant 0 : index
    %0 = vector.load %arg3[%c0, %c0_0] : memref<64x256xbf16, #tpu.memory_space<vmem>>, vector<64x256xbf16>
    %c0_1 = arith.constant 0 : index
    %c0_2 = arith.constant 0 : index
    %1 = vector.load %arg4[%c0_1, %c0_2] : memref<256x128xbf16, #tpu.memory_space<vmem>>, vector<256x128xbf16>
    %cst = arith.constant dense<0.000000e+00> : vector<64x128xf32>
    %2 = tpu.matmul %0, %1, %cst {dimension_numbers = #tpu.dot_dimension_numbers<[1], [0], [0], [1], [0, 0, 1, 1], [], []>} : vector<64x256xbf16>, vector<256x128xbf16>, vector<64x128xf32> -> vector<64x128xf32>
    %c0_i32 = arith.constant 0 : i32
    %3 = arith.cmpi eq, %arg2, %c0_i32 : i32
    %4 = arith.extui %3 : i1 to i32
    %c0_i32_3 = arith.constant 0 : i32
    %5 = arith.cmpi ne, %4, %c0_i32_3 : i32
    scf.if %5 {
      %c0_8 = arith.constant 0 : index
      %c0_9 = arith.constant 0 : index
      %12 = vector.load %arg7[%c0_8, %c0_9] : memref<64x128xf32, #tpu.memory_space<vmem>>, vector<64x128xf32>
      tpu.vector_store %arg7[%c0_8, %c0_9], %2 {strides = array<i32>} : memref<64x128xf32, #tpu.memory_space<vmem>>, vector<64x128xf32>,
    } else {
    }
    %c0_i32_4 = arith.constant 0 : i32
    %6 = arith.cmpi sgt, %arg2, %c0_i32_4 : i32
    %7 = arith.extui %6 : i1 to i32
    %c0_i32_5 = arith.constant 0 : i32
    %8 = arith.cmpi ne, %7, %c0_i32_5 : i32
    scf.if %8 {
      %c0_8 = arith.constant 0 : index
      %c0_9 = arith.constant 0 : index
      %12 = vector.load %arg7[%c0_8, %c0_9] : memref<64x128xf32, #tpu.memory_space<vmem>>, vector<64x128xf32>
      %13 = arith.addf %12, %2 : vector<64x128xf32>
      %c0_10 = arith.constant 0 : index
      %c0_11 = arith.constant 0 : index
      %14 = vector.load %arg7[%c0_10, %c0_11] : memref<64x128xf32, #tpu.memory_space<vmem>>, vector<64x128xf32>
      tpu.vector_store %arg7[%c0_10, %c0_11], %13 {strides = array<i32>} : memref<64x128xf32, #tpu.memory_space<vmem>>, vector<64x128xf32>,
    } else {
    }
    %c0_i32_6 = arith.constant 0 : i32
    %9 = arith.cmpi eq, %arg2, %c0_i32_6 : i32
    %10 = arith.extui %9 : i1 to i32
    %c0_i32_7 = arith.constant 0 : i32
    %11 = arith.cmpi ne, %10, %c0_i32_7 : i32
    scf.if %11 {
      %c0_8 = arith.constant 0 : index
      %c0_9 = arith.constant 0 : index
      %12 = vector.load %arg7[%c0_8, %c0_9] : memref<64x128xf32, #tpu.memory_space<vmem>>, vector<64x128xf32>
      %c0_10 = arith.constant 0 : index
      %c0_11 = arith.constant 0 : index
      %13 = vector.load %arg5[%c0_10, %c0_11] : memref<2x128xf32, #tpu.memory_space<vmem>>, vector<1x128xf32>
      %14 = vector.broadcast %13 : vector<1x128xf32> to vector<64x128xf32>
      %15 = arith.mulf %12, %14 : vector<64x128xf32>
      %c1 = arith.constant 1 : index
      %c0_12 = arith.constant 0 : index
      %16 = vector.load %arg5[%c1, %c0_12] : memref<2x128xf32, #tpu.memory_space<vmem>>, vector<1x128xf32>
      %17 = vector.broadcast %16 : vector<1x128xf32> to vector<64x128xf32>
      %18 = arith.addf %15, %17 : vector<64x128xf32>
      %cst_13 = arith.constant 0.000000e+00 : f32
      %19 = vector.broadcast %cst_13 : f32 to vector<64x128xf32>
      %20 = arith.maximumf %18, %19 : vector<64x128xf32>
      %21 = arith.truncf %20 : vector<64x128xf32> to vector<64x128xbf16>
      %c0_14 = arith.constant 0 : index
      %c0_15 = arith.constant 0 : index
      %22 = vector.load %arg6[%c0_14, %c0_15] : memref<64x128xbf16, #tpu.memory_space<vmem>>, vector<64x128xbf16>
      tpu.vector_store %arg6[%c0_14, %c0_15], %21 {strides = array<i32>} : memref<64x128xbf16, #tpu.memory_space<vmem>>, vector<64x128xbf16>,
    } else {
    }
    return
  }
  func.func @transform_0(%arg0: i32, %arg1: i32, %arg2: i32) -> (i32, i32) {
    %c0_i32 = arith.constant 0 : i32
    return %arg0, %arg2 : i32, i32
  }
  func.func @transform_1(%arg0: i32, %arg1: i32, %arg2: i32) -> (i32, i32) {
    %c0_i32 = arith.constant 0 : i32
    return %arg2, %arg1 : i32, i32
  }
  func.func @transform_2(%arg0: i32, %arg1: i32, %arg2: i32) -> (i32, i32) {
    %c0_i32 = arith.constant 0 : i32
    %c0_i32_0 = arith.constant 0 : i32
    return %c0_i32, %arg1 : i32, i32
  }
  func.func @transform_3(%arg0: i32, %arg1: i32, %arg2: i32) -> (i32, i32) {
    %c0_i32 = arith.constant 0 : i32
    return %arg0, %arg1 : i32, i32
  }
}

module attributes {stable_mosaic.version = 11 : i64} {
  func.func @_mm_kernel(%arg0: i32, %arg1: i32, %arg2: i32, %arg3: memref<256x384xbf16, #tpu.memory_space<vmem>>, %arg4: memref<384x128xbf16, #tpu.memory_space<vmem>>, %arg5: memref<2x128xf32, #tpu.memory_space<vmem>>, %arg6: memref<256x128xbf16, #tpu.memory_space<vmem>>, %arg7: memref<256x128xf32, #tpu.memory_space<vmem>>) attributes {dimension_semantics = [#tpu.dimension_semantics<parallel>, #tpu.dimension_semantics<parallel>, #tpu.dimension_semantics<arbitrary>], iteration_bounds = array<i64: 2, 1, 3>, scalar_prefetch = 0 : i64, scratch_operands = 1 : i64, tpu.core_type = #tpu.core_type<tc>, window_params = [{transform_indices = @transform_0, window_bounds = array<i64: 256, 384>}, {transform_indices = @transform_1, window_bounds = array<i64: 384, 128>}, {transform_indices = @transform_2, window_bounds = array<i64: 2, 128>}, {transform_indices = @transform_3, window_bounds = array<i64: 256, 128>}]} {
    %c0 = arith.constant 0 : index
    %c0_0 = arith.constant 0 : index
    %0 = vector.load %arg3[%c0, %c0_0] : memref<256x384xbf16, #tpu.memory_space<vmem>>, vector<256x384xbf16>
    %c0_1 = arith.constant 0 : index
    %c0_2 = arith.constant 0 : index
    %1 = vector.load %arg4[%c0_1, %c0_2] : memref<384x128xbf16, #tpu.memory_space<vmem>>, vector<384x128xbf16>
    %cst = arith.constant dense<0.000000e+00> : vector<256x128xf32>
    %2 = tpu.matmul %0, %1, %cst {dimension_numbers = #tpu.dot_dimension_numbers<[1], [0], [0], [1], [0, 0, 1, 1], [], []>} : vector<256x384xbf16>, vector<384x128xbf16>, vector<256x128xf32> -> vector<256x128xf32>
    %c0_i32 = arith.constant 0 : i32
    %3 = arith.cmpi eq, %arg2, %c0_i32 : i32
    %4 = arith.extui %3 : i1 to i32
    %c0_i32_3 = arith.constant 0 : i32
    %5 = arith.cmpi ne, %4, %c0_i32_3 : i32
    scf.if %5 {
      %c0_7 = arith.constant 0 : index
      %c0_8 = arith.constant 0 : index
      %12 = vector.load %arg7[%c0_7, %c0_8] : memref<256x128xf32, #tpu.memory_space<vmem>>, vector<256x128xf32>
      tpu.vector_store %arg7[%c0_7, %c0_8], %2 {strides = array<i32>} : memref<256x128xf32, #tpu.memory_space<vmem>>, vector<256x128xf32>,
    } else {
    }
    %c0_i32_4 = arith.constant 0 : i32
    %6 = arith.cmpi sgt, %arg2, %c0_i32_4 : i32
    %7 = arith.extui %6 : i1 to i32
    %c0_i32_5 = arith.constant 0 : i32
    %8 = arith.cmpi ne, %7, %c0_i32_5 : i32
    scf.if %8 {
      %c0_7 = arith.constant 0 : index
      %c0_8 = arith.constant 0 : index
      %12 = vector.load %arg7[%c0_7, %c0_8] : memref<256x128xf32, #tpu.memory_space<vmem>>, vector<256x128xf32>
      %13 = arith.addf %12, %2 : vector<256x128xf32>
      %c0_9 = arith.constant 0 : index
      %c0_10 = arith.constant 0 : index
      %14 = vector.load %arg7[%c0_9, %c0_10] : memref<256x128xf32, #tpu.memory_space<vmem>>, vector<256x128xf32>
      tpu.vector_store %arg7[%c0_9, %c0_10], %13 {strides = array<i32>} : memref<256x128xf32, #tpu.memory_space<vmem>>, vector<256x128xf32>,
    } else {
    }
    %c2_i32 = arith.constant 2 : i32
    %9 = arith.cmpi eq, %arg2, %c2_i32 : i32
    %10 = arith.extui %9 : i1 to i32
    %c0_i32_6 = arith.constant 0 : i32
    %11 = arith.cmpi ne, %10, %c0_i32_6 : i32
    scf.if %11 {
      %c0_7 = arith.constant 0 : index
      %c0_8 = arith.constant 0 : index
      %12 = vector.load %arg7[%c0_7, %c0_8] : memref<256x128xf32, #tpu.memory_space<vmem>>, vector<256x128xf32>
      %c0_9 = arith.constant 0 : index
      %c0_10 = arith.constant 0 : index
      %13 = vector.load %arg5[%c0_9, %c0_10] : memref<2x128xf32, #tpu.memory_space<vmem>>, vector<1x128xf32>
      %14 = vector.broadcast %13 : vector<1x128xf32> to vector<256x128xf32>
      %15 = arith.mulf %12, %14 : vector<256x128xf32>
      %c1 = arith.constant 1 : index
      %c0_11 = arith.constant 0 : index
      %16 = vector.load %arg5[%c1, %c0_11] : memref<2x128xf32, #tpu.memory_space<vmem>>, vector<1x128xf32>
      %17 = vector.broadcast %16 : vector<1x128xf32> to vector<256x128xf32>
      %18 = arith.addf %15, %17 : vector<256x128xf32>
      %cst_12 = arith.constant 0.000000e+00 : f32
      %19 = vector.broadcast %cst_12 : f32 to vector<256x128xf32>
      %20 = arith.maximumf %18, %19 : vector<256x128xf32>
      %21 = arith.truncf %20 : vector<256x128xf32> to vector<256x128xbf16>
      %c0_13 = arith.constant 0 : index
      %c0_14 = arith.constant 0 : index
      %22 = vector.load %arg6[%c0_13, %c0_14] : memref<256x128xbf16, #tpu.memory_space<vmem>>, vector<256x128xbf16>
      tpu.vector_store %arg6[%c0_13, %c0_14], %21 {strides = array<i32>} : memref<256x128xbf16, #tpu.memory_space<vmem>>, vector<256x128xbf16>,
    } else {
    }
    return
  }
  func.func @transform_0(%arg0: i32, %arg1: i32, %arg2: i32) -> (i32, i32) {
    %c0_i32 = arith.constant 0 : i32
    return %arg0, %arg2 : i32, i32
  }
  func.func @transform_1(%arg0: i32, %arg1: i32, %arg2: i32) -> (i32, i32) {
    %c0_i32 = arith.constant 0 : i32
    return %arg2, %arg1 : i32, i32
  }
  func.func @transform_2(%arg0: i32, %arg1: i32, %arg2: i32) -> (i32, i32) {
    %c0_i32 = arith.constant 0 : i32
    %c0_i32_0 = arith.constant 0 : i32
    return %c0_i32, %arg1 : i32, i32
  }
  func.func @transform_3(%arg0: i32, %arg1: i32, %arg2: i32) -> (i32, i32) {
    %c0_i32 = arith.constant 0 : i32
    return %arg0, %arg1 : i32, i32
  }
}

module attributes {stable_mosaic.version = 11 : i64} {
  func.func @_mm_kernel(%arg0: i32, %arg1: i32, %arg2: i32, %arg3: memref<256x128xbf16, #tpu.memory_space<vmem>>, %arg4: memref<128x128xbf16, #tpu.memory_space<vmem>>, %arg5: memref<2x128xf32, #tpu.memory_space<vmem>>, %arg6: memref<256x128xbf16, #tpu.memory_space<vmem>>, %arg7: memref<256x128xf32, #tpu.memory_space<vmem>>) attributes {dimension_semantics = [#tpu.dimension_semantics<parallel>, #tpu.dimension_semantics<parallel>, #tpu.dimension_semantics<arbitrary>], iteration_bounds = array<i64: 2, 1, 1>, scalar_prefetch = 0 : i64, scratch_operands = 1 : i64, tpu.core_type = #tpu.core_type<tc>, window_params = [{transform_indices = @transform_0, window_bounds = array<i64: 256, 128>}, {transform_indices = @transform_1, window_bounds = array<i64: 128, 128>}, {transform_indices = @transform_2, window_bounds = array<i64: 2, 128>}, {transform_indices = @transform_3, window_bounds = array<i64: 256, 128>}]} {
    %c0 = arith.constant 0 : index
    %c0_0 = arith.constant 0 : index
    %0 = vector.load %arg3[%c0, %c0_0] : memref<256x128xbf16, #tpu.memory_space<vmem>>, vector<256x128xbf16>
    %c0_1 = arith.constant 0 : index
    %c0_2 = arith.constant 0 : index
    %1 = vector.load %arg4[%c0_1, %c0_2] : memref<128x128xbf16, #tpu.memory_space<vmem>>, vector<128x128xbf16>
    %cst = arith.constant dense<0.000000e+00> : vector<256x128xf32>
    %2 = tpu.matmul %0, %1, %cst {dimension_numbers = #tpu.dot_dimension_numbers<[1], [0], [0], [1], [0, 0, 1, 1], [], []>} : vector<256x128xbf16>, vector<128x128xbf16>, vector<256x128xf32> -> vector<256x128xf32>
    %c0_i32 = arith.constant 0 : i32
    %3 = arith.cmpi eq, %arg2, %c0_i32 : i32
    %4 = arith.extui %3 : i1 to i32
    %c0_i32_3 = arith.constant 0 : i32
    %5 = arith.cmpi ne, %4, %c0_i32_3 : i32
    scf.if %5 {
      %c0_8 = arith.constant 0 : index
      %c0_9 = arith.constant 0 : index
      %12 = vector.load %arg7[%c0_8, %c0_9] : memref<256x128xf32, #tpu.memory_space<vmem>>, vector<256x128xf32>
      tpu.vector_store %arg7[%c0_8, %c0_9], %2 {strides = array<i32>} : memref<256x128xf32, #tpu.memory_space<vmem>>, vector<256x128xf32>,
    } else {
    }
    %c0_i32_4 = arith.constant 0 : i32
    %6 = arith.cmpi sgt, %arg2, %c0_i32_4 : i32
    %7 = arith.extui %6 : i1 to i32
    %c0_i32_5 = arith.constant 0 : i32
    %8 = arith.cmpi ne, %7, %c0_i32_5 : i32
    scf.if %8 {
      %c0_8 = arith.constant 0 : index
      %c0_9 = arith.constant 0 : index
      %12 = vector.load %arg7[%c0_8, %c0_9] : memref<256x128xf32, #tpu.memory_space<vmem>>, vector<256x128xf32>
      %13 = arith.addf %12, %2 : vector<256x128xf32>
      %c0_10 = arith.constant 0 : index
      %c0_11 = arith.constant 0 : index
      %14 = vector.load %arg7[%c0_10, %c0_11] : memref<256x128xf32, #tpu.memory_space<vmem>>, vector<256x128xf32>
      tpu.vector_store %arg7[%c0_10, %c0_11], %13 {strides = array<i32>} : memref<256x128xf32, #tpu.memory_space<vmem>>, vector<256x128xf32>,
    } else {
    }
    %c0_i32_6 = arith.constant 0 : i32
    %9 = arith.cmpi eq, %arg2, %c0_i32_6 : i32
    %10 = arith.extui %9 : i1 to i32
    %c0_i32_7 = arith.constant 0 : i32
    %11 = arith.cmpi ne, %10, %c0_i32_7 : i32
    scf.if %11 {
      %c0_8 = arith.constant 0 : index
      %c0_9 = arith.constant 0 : index
      %12 = vector.load %arg7[%c0_8, %c0_9] : memref<256x128xf32, #tpu.memory_space<vmem>>, vector<256x128xf32>
      %c0_10 = arith.constant 0 : index
      %c0_11 = arith.constant 0 : index
      %13 = vector.load %arg5[%c0_10, %c0_11] : memref<2x128xf32, #tpu.memory_space<vmem>>, vector<1x128xf32>
      %14 = vector.broadcast %13 : vector<1x128xf32> to vector<256x128xf32>
      %15 = arith.mulf %12, %14 : vector<256x128xf32>
      %c1 = arith.constant 1 : index
      %c0_12 = arith.constant 0 : index
      %16 = vector.load %arg5[%c1, %c0_12] : memref<2x128xf32, #tpu.memory_space<vmem>>, vector<1x128xf32>
      %17 = vector.broadcast %16 : vector<1x128xf32> to vector<256x128xf32>
      %18 = arith.addf %15, %17 : vector<256x128xf32>
      %cst_13 = arith.constant 0.000000e+00 : f32
      %19 = vector.broadcast %cst_13 : f32 to vector<256x128xf32>
      %20 = arith.maximumf %18, %19 : vector<256x128xf32>
      %21 = arith.truncf %20 : vector<256x128xf32> to vector<256x128xbf16>
      %c0_14 = arith.constant 0 : index
      %c0_15 = arith.constant 0 : index
      %22 = vector.load %arg6[%c0_14, %c0_15] : memref<256x128xbf16, #tpu.memory_space<vmem>>, vector<256x128xbf16>
      tpu.vector_store %arg6[%c0_14, %c0_15], %21 {strides = array<i32>} : memref<256x128xbf16, #tpu.memory_space<vmem>>, vector<256x128xbf16>,
    } else {
    }
    return
  }
  func.func @transform_0(%arg0: i32, %arg1: i32, %arg2: i32) -> (i32, i32) {
    %c0_i32 = arith.constant 0 : i32
    return %arg0, %arg2 : i32, i32
  }
  func.func @transform_1(%arg0: i32, %arg1: i32, %arg2: i32) -> (i32, i32) {
    %c0_i32 = arith.constant 0 : i32
    return %arg2, %arg1 : i32, i32
  }
  func.func @transform_2(%arg0: i32, %arg1: i32, %arg2: i32) -> (i32, i32) {
    %c0_i32 = arith.constant 0 : i32
    %c0_i32_0 = arith.constant 0 : i32
    return %c0_i32, %arg1 : i32, i32
  }
  func.func @transform_3(%arg0: i32, %arg1: i32, %arg2: i32) -> (i32, i32) {
    %c0_i32 = arith.constant 0 : i32
    return %arg0, %arg1 : i32, i32
  }
}

</mosaic_0001>

<bundles_post_ra>
// kernel: maps_in_forward.16
= control target key start
LH: loop header
LB: loop body
LE: loop exit
PB: predicated region body
PF: predicated region fallthrough
CT: control target
= control target key end

     0   :  { %s1790_s12 = smov 0   ;;  %s1792_s13 = smov 0   ;;  %s2001_s0 = inlined_call_operand.vmem [shape: bf16[512,256], index: 0, kind: input, shape index: {}]   ;;  %s2002_s1 = inlined_call_operand.vmem [shape: bf16[256,128], index: 1, kind: input, shape index: {}]   ;;  %s2003_s2 = inlined_call_operand.vmem [shape: f32[2,128], index: 2, kind: input, shape index: {}]   ;;  %s2004_s3 = inlined_call_operand.vmem [shape: bf16[512,128], index: 3, kind: output, shape index: {}]  }
   0x1   :  { %s1794_s14 = smov 0  }
   0x2 LB: > { %s32_s15 = sadd.s32 1, %s1764_s13  ;;  %p1312_p0 = scmp.ge.s32.totalorder %s1768_s14, 1  ;;  %s1768_s14 = sphi %s1794_s14, %s13_s14   ;;  %s1764_s13 = sphi %s1792_s13, %s2006_s13   ;;  %s1760_s12 = sphi %s1790_s12, %s2005_s12  }
   0x3   : > { %p34_p1 = scmp.ge.s32.totalorder %s32_s15, 2  ;;  %p192_p2 = scmp.lt.s32.totalorder %s1768_s14, 3 }
   0x5   : > { %s2008_s15 = smov (%p34_p1, %s32_s15), 0  ;;  %p193_p3 = pnand %p1312_p0, %p192_p2 }
   0x6   : > { %s1313_s18 = sshll.u32 (!%p193_p3), %s1760_s12, 5 }
   0x7   : > { %196 = sbr.rel (%p193_p3) target bundleno = 311 (0x137), region = 32  ;;  %p238_p4 = scmp.lt.s32.totalorder (!%p193_p3), %s1313_s18, 63 }
   0xc   : > { %v1682_v0 = vld [vmem:[%s2002_s1 + $0x78] sm:$0xff]   ;;  %v1684_v2 = vld [vmem:[%s2002_s1 + $0x70] sm:$0xff]   ;;  %v1686_v4 = vld [vmem:[%s2002_s1 + $0x68] sm:$0xff]   ;;  %s2010_s18 = smov (!%p238_p4, %s1313_s18), 63 }
   0xd   : > { %v1683_v1 = vld [vmem:[%s2002_s1 + $0x38] sm:$0xff]   ;;  %1530 = vmatprep.subr.bf16.mxu0 %v1682_v0  ;;  %1642 = vmatprep.subr.bf16.mxu1 %v1682_v0  ;;  %v1685_v3 = vld [vmem:[%s2002_s1 + $0x30] sm:$0xff]   ;;  %v1687_v5 = vld [vmem:[%s2002_s1 + $0x28] sm:$0xff]   ;;  %s1402_s6 = sshll.u32 %s2010_s18, 3  ;;  %s1317_s7 = sshll.u32 %s2010_s18, 2 }
   0xe   : > { %1531 = vmatpush3.bf16.msra.mxu0 %v1683_v1  ;;  %1650 = vmatpush3.bf16.msra.mxu1 %v1683_v1  ;;  %v1688_v6 = vld [vmem:[%s2002_s1 + $0x60] sm:$0xff]   ;;  %v1690_v8 = vld [vmem:[%s2002_s1 + $0x58] sm:$0xff]   ;;  %s1841_s11 = scalar_lea.vmem %s2001_s0, %s1402_s6  ;;  %v1692_v10 = vld [vmem:[%s2002_s1 + $0x50] sm:$0xff]   ;;  %s1918_s10 = scalar_lea.vmem %s2004_s3, %s1317_s7 }
   0xf   : > { %1532 = vmatprep.subr.bf16.mxu0 %v1684_v2  ;;  %1643 = vmatprep.subr.bf16.mxu1 %v1684_v2  ;;  %v1689_v7 = vld [vmem:[%s2002_s1 + $0x20] sm:$0xff]   ;;  %v1691_v9 = vld [vmem:[%s2002_s1 + $0x18] sm:$0xff]   ;;  %v1693_v13 = vld [vmem:[%s2002_s1 + $0x10] sm:$0xff]  }
  0x10   : > { %v1700_v11 = vld [vmem:[%s1841_s11 + $0x4] ss:$8 sps:$4 sm:$0xff]   ;;  %v1698_v18 = vld [vmem:[%s1841_s11] ss:$8 sps:$4 sm:$0xff]   ;;  %v1704_v20 = vld [vmem:[%s1841_s11 + $0x14] ss:$8 sps:$4 sm:$0xff]  }
  0x11   : > { %v1703_v12 = vld [vmem:[%s1841_s11 + $0x84] ss:$8 sps:$4 sm:$0xff]   ;;  %623 = vmatprep.mubr.bf16.mxu0 %v1700_v11  ;;  %v1701_v19 = vld [vmem:[%s1841_s11 + $0x80] ss:$8 sps:$4 sm:$0xff]   ;;  %v1706_v21 = vld [vmem:[%s1841_s11 + $0x94] ss:$8 sps:$4 sm:$0xff]  }
  0x12   : > { %1533 = vmatpush3.bf16.msra.mxu0 %v1685_v3  ;;  %1651 = vmatpush3.bf16.msra.mxu1 %v1685_v3  ;;  %v1694_v14 = vld [vmem:[%s2002_s1 + $0x48] sm:$0xff]   ;;  %v1696_v16 = vld [vmem:[%s2002_s1 + $0x40] sm:$0xff]   ;;  %v1708_v22 = vld [vmem:[%s1841_s11 + $0x10] ss:$8 sps:$4 sm:$0xff]  }
  0x13   : > { %1534 = vmatprep.subr.bf16.mxu0 %v1686_v4  ;;  %1644 = vmatprep.subr.bf16.mxu1 %v1686_v4  ;;  %v1695_v15 = vld [vmem:[%s2002_s1 + $0x8] sm:$0xff]   ;;  %v1697_v17 = vld [vmem:[%s2002_s1] sm:$0xff]   ;;  %v1709_v23 = vld [vmem:[%s1841_s11 + $0x90] ss:$8 sps:$4 sm:$0xff]  }
  0x14   : > { %687 = vmatprep.mubr.bf16.mxu1 %v1703_v12  ;;  %v1710_v24 = vld [vmem:[%s1841_s11 + $0x24] ss:$8 sps:$4 sm:$0xff]   ;;  %v1714_v26 = vld [vmem:[%s1841_s11 + $0x20] ss:$8 sps:$4 sm:$0xff]   ;;  %v1716_v28 = vld [vmem:[%s1841_s11 + $0x34] ss:$8 sps:$4 sm:$0xff]  }
  0x15   : > { %v1712_v25 = vld [vmem:[%s1841_s11 + $0xa4] ss:$8 sps:$4 sm:$0xff]   ;;  %v1715_v27 = vld [vmem:[%s1841_s11 + $0xa0] ss:$8 sps:$4 sm:$0xff]   ;;  %v1718_v29 = vld [vmem:[%s1841_s11 + $0xb4] ss:$8 sps:$4 sm:$0xff]  }
  0x16   : > { %1535 = vmatpush3.bf16.msra.mxu0 %v1687_v5  ;;  %1652 = vmatpush3.bf16.msra.mxu1 %v1687_v5  ;;  %v1720_v30 = vld [vmem:[%s1841_s11 + $0x30] ss:$8 sps:$4 sm:$0xff]   ;;  %v1722_v32 = vld [vmem:[%s1841_s11 + $0x44] ss:$8 sps:$4 sm:$0xff]   ;;  %v1726_v34 = vld [vmem:[%s1841_s11 + $0x40] ss:$8 sps:$4 sm:$0xff]  }
  0x17   : > { %1536 = vmatprep.subr.bf16.mxu0 %v1688_v6  ;;  %1645 = vmatprep.subr.bf16.mxu1 %v1688_v6  ;;  %v1721_v31 = vld [vmem:[%s1841_s11 + $0xb0] ss:$8 sps:$4 sm:$0xff]   ;;  %v1724_v33 = vld [vmem:[%s1841_s11 + $0xc4] ss:$8 sps:$4 sm:$0xff]   ;;  %v1727_v35 = vld [vmem:[%s1841_s11 + $0xc0] ss:$8 sps:$4 sm:$0xff]  }
  0x18   : > { %v1728_v36 = vld [vmem:[%s1841_s11 + $0x54] ss:$8 sps:$4 sm:$0xff]   ;;  %v1732_v38 = vld [vmem:[%s1841_s11 + $0x50] ss:$8 sps:$4 sm:$0xff]   ;;  %v1734_v40 = vld [vmem:[%s1841_s11 + $0x64] ss:$8 sps:$4 sm:$0xff]  }
  0x19   : > { %v1730_v37 = vld [vmem:[%s1841_s11 + $0xd4] ss:$8 sps:$4 sm:$0xff]   ;;  %v1733_v39 = vld [vmem:[%s1841_s11 + $0xd0] ss:$8 sps:$4 sm:$0xff]   ;;  %v1736_v41 = vld [vmem:[%s1841_s11 + $0xe4] ss:$8 sps:$4 sm:$0xff]  }
  0x1a   : > { %1537 = vmatpush3.bf16.msra.mxu0 %v1689_v7  ;;  %1653 = vmatpush3.bf16.msra.mxu1 %v1689_v7  ;;  %v1738_v42 = vld [vmem:[%s1841_s11 + $0x60] ss:$8 sps:$4 sm:$0xff]   ;;  %v1740_v44 = vld [vmem:[%s1841_s11 + $0x74] ss:$8 sps:$4 sm:$0xff]   ;;  %v1744_v46 = vld [vmem:[%s1841_s11 + $0x70] ss:$8 sps:$4 sm:$0xff]  }
  0x1b   : > { %1538 = vmatprep.subr.bf16.mxu0 %v1690_v8  ;;  %1646 = vmatprep.subr.bf16.mxu1 %v1690_v8  ;;  %v1739_v43 = vld [vmem:[%s1841_s11 + $0xe0] ss:$8 sps:$4 sm:$0xff]   ;;  %v1742_v45 = vld [vmem:[%s1841_s11 + $0xf4] ss:$8 sps:$4 sm:$0xff]   ;;  %v1745_v47 = vld [vmem:[%s1841_s11 + $0xf0] ss:$8 sps:$4 sm:$0xff]  }
  0x1c   : > { %v1899_v51 = vld [vmem:[%s2003_s2] ss:$0 sm:$0xff]  ;;  %v1906_v59 = vld [vmem:[%s2003_s2 + $0x1] ss:$0 sm:$0xff] }
  0x1e   : > { %1539 = vmatpush3.bf16.msra.mxu0 %v1691_v9  ;;  %1654 = vmatpush3.bf16.msra.mxu1 %v1691_v9 }
  0x1f   : > { %1540 = vmatprep.subr.bf16.mxu0 %v1692_v10  ;;  %1647 = vmatprep.subr.bf16.mxu1 %v1692_v10 }
  0x22   : > { %1541 = vmatpush3.bf16.msra.mxu0 %v1693_v13  ;;  %1655 = vmatpush3.bf16.msra.mxu1 %v1693_v13 }
  0x23   : > { %1542 = vmatprep.subr.bf16.mxu0 %v1694_v14  ;;  %1648 = vmatprep.subr.bf16.mxu1 %v1694_v14 }
  0x26   : > { %1543 = vmatpush3.bf16.msra.mxu0 %v1695_v15  ;;  %1656 = vmatpush3.bf16.msra.mxu1 %v1695_v15 }
  0x27   : > { %1544 = vmatprep.subr.bf16.mxu0 %v1696_v16  ;;  %1649 = vmatprep.subr.bf16.mxu1 %v1696_v16 }
  0x2a   : > { %1545 = vmatpush3.bf16.msra.mxu0 %v1697_v17  ;;  %1657 = vmatpush3.bf16.msra.mxu1 %v1697_v17 }
  0x2d   : > { %624 = vmatmul.mubr.bf16.vlgmr.msra.gmra.mxu0 %v1698_v18  ;;  %688 = vmatmul.mubr.bf16.vlgmr.msra.gmra.mxu1 %v1701_v19 }
  0x2e   : > { %631 = vmatprep.mubr.bf16.mxu0 %v1704_v20  ;;  %695 = vmatprep.mubr.bf16.mxu1 %v1706_v21 }
  0x35   : > { %632 = vmatmul.mubr.bf16.gmra.mxu0 %v1708_v22  ;;  %696 = vmatmul.mubr.bf16.gmra.mxu1 %v1709_v23 }
  0x36   : > { %639 = vmatprep.mubr.bf16.mxu0 %v1710_v24  ;;  %703 = vmatprep.mubr.bf16.mxu1 %v1712_v25 }
  0x3d   : > { %640 = vmatmul.mubr.bf16.gmra.mxu0 %v1714_v26  ;;  %704 = vmatmul.mubr.bf16.gmra.mxu1 %v1715_v27 }
  0x3e   : > { %647 = vmatprep.mubr.bf16.mxu0 %v1716_v28  ;;  %711 = vmatprep.mubr.bf16.mxu1 %v1718_v29 }
  0x45   : > { %648 = vmatmul.mubr.bf16.gmra.mxu0 %v1720_v30  ;;  %712 = vmatmul.mubr.bf16.gmra.mxu1 %v1721_v31 }
  0x46   : > { %655 = vmatprep.mubr.bf16.mxu0 %v1722_v32  ;;  %719 = vmatprep.mubr.bf16.mxu1 %v1724_v33 }
  0x4d   : > { %656 = vmatmul.mubr.bf16.gmra.mxu0 %v1726_v34  ;;  %720 = vmatmul.mubr.bf16.gmra.mxu1 %v1727_v35 }
  0x4e   : > { %663 = vmatprep.mubr.bf16.mxu0 %v1728_v36  ;;  %727 = vmatprep.mubr.bf16.mxu1 %v1730_v37 }
  0x55   : > { %664 = vmatmul.mubr.bf16.gmra.mxu0 %v1732_v38  ;;  %728 = vmatmul.mubr.bf16.gmra.mxu1 %v1733_v39 }
  0x56   : > { %671 = vmatprep.mubr.bf16.mxu0 %v1734_v40  ;;  %735 = vmatprep.mubr.bf16.mxu1 %v1736_v41 }
  0x5d   : > { %672 = vmatmul.mubr.bf16.gmra.mxu0 %v1738_v42  ;;  %736 = vmatmul.mubr.bf16.gmra.mxu1 %v1739_v43 }
  0x5e   : > { %679 = vmatprep.mubr.bf16.mxu0 %v1740_v44  ;;  %743 = vmatprep.mubr.bf16.mxu1 %v1742_v45 }
  0x65   : > { %680 = vmatmul.mubr.bf16.gmra.mxu0 %v1744_v46  ;;  %744 = vmatmul.mubr.bf16.gmra.mxu1 %v1745_v47 }
  0xed   : > { %v1546_v48 = vpop.f32.mrf.mxu0  ;;  %v1594_v49 = vpop.f32.mrf.mxu1 }
  0xef   : > { %v1547_v50 = vpop.f32.mrf.mxu0  ;;  %v1595_v52 = vpop.f32.mrf.mxu1 }
  0xf0   : > { %v1548_v53 = vadd.f32 %v1547_v50, %v1546_v48  ;;  %v1596_v54 = vadd.f32 %v1595_v52, %v1594_v49 }
  0xf1   : > { %v1549_v55 = vpop.f32.mrf.mxu0  ;;  %v1597_v56 = vpop.f32.mrf.mxu1 }
  0xf2   : > { %v928_v57 = vmul.f32 %v1548_v53, %v1899_v51  ;;  %v944_v58 = vmul.f32 %v1596_v54, %v1899_v51 }
  0xf3   : > { %v1550_v60 = vpop.f32.mrf.mxu0  ;;  %v1598_v61 = vpop.f32.mrf.mxu1 }
  0xf4   : > { %v1551_v62 = vadd.f32 %v1550_v60, %v1549_v55  ;;  %v1599_v63 = vadd.f32 %v1598_v61, %v1597_v56  ;;  %v965_v2 = vadd.f32 %v1906_v59, %v928_v57  ;;  %v981_v3 = vadd.f32 %v1906_v59, %v944_v58 }
  0xf5   : > { %v1552_v0 = vpop.f32.mrf.mxu0  ;;  %v1600_v1 = vpop.f32.mrf.mxu1 }
  0xf6   : > { %v929_v4 = vmul.f32 %v1551_v62, %v1899_v51  ;;  %v945_v5 = vmul.f32 %v1599_v63, %v1899_v51  ;;  %v997_v14 = vmax.f32 %v965_v2, 0.0  ;;  %v1013_v15 = vmax.f32 %v981_v3, 0.0 }
  0xf7   : > { %v1553_v6 = vpop.f32.mrf.mxu0  ;;  %v1601_v7 = vpop.f32.mrf.mxu1 }
  0xf8   : > { %v966_v8 = vadd.f32 %v1906_v59, %v929_v4  ;;  %v982_v9 = vadd.f32 %v1906_v59, %v945_v5  ;;  %v1554_v10 = vadd.f32 %v1553_v6, %v1552_v0  ;;  %v1602_v11 = vadd.f32 %v1601_v7, %v1600_v1 }
  0xf9   : > { %v1555_v12 = vpop.f32.mrf.mxu0  ;;  %v1603_v13 = vpop.f32.mrf.mxu1 }
  0xfa   : > { %v998_v16 = vmax.f32 %v966_v8, 0.0  ;;  %v1014_v17 = vmax.f32 %v982_v9, 0.0  ;;  %v930_v18 = vmul.f32 %v1554_v10, %v1899_v51  ;;  %v946_v19 = vmul.f32 %v1602_v11, %v1899_v51 }
  0xfb   : > { %v1556_v20 = vpop.f32.mrf.mxu0  ;;  %v1604_v21 = vpop.f32.mrf.mxu1 }
  0xfc   : > { %v1438_v22 = vpack.c.bf16 %v998_v16, %v997_v14  ;;  %v1478_v23 = vpack.c.bf16 %v1014_v17, %v1013_v15  ;;  %v1557_v24 = vadd.f32 %v1556_v20, %v1555_v12  ;;  %v1605_v25 = vadd.f32 %v1604_v21, %v1603_v13 }
  0xfd   : > { %v1558_v26 = vpop.f32.mrf.mxu0  ;;  %v1606_v27 = vpop.f32.mrf.mxu1  ;;  %v967_v28 = vadd.f32 %v1906_v59, %v930_v18  ;;  %v983_v29 = vadd.f32 %v1906_v59, %v946_v19 }
  0xfe   : > { %1439 = vst [vmem:[%s1918_s10] sm:$0xff] %v1438_v22   ;;  %1522 = vst [vmem:[%s1918_s10 + $0x40] sm:$0xff] %v1478_v23   ;;  %v931_v30 = vmul.f32 %v1557_v24, %v1899_v51  ;;  %v947_v31 = vmul.f32 %v1605_v25, %v1899_v51 }
  0xff   : > { %v1559_v32 = vpop.f32.mrf.mxu0  ;;  %v1607_v33 = vpop.f32.mrf.mxu1  ;;  %v999_v42 = vmax.f32 %v967_v28, 0.0  ;;  %v1015_v43 = vmax.f32 %v983_v29, 0.0 }
 0x100   : > { %v1560_v34 = vadd.f32 %v1559_v32, %v1558_v26  ;;  %v1608_v35 = vadd.f32 %v1607_v33, %v1606_v27  ;;  %v968_v36 = vadd.f32 %v1906_v59, %v931_v30  ;;  %v984_v37 = vadd.f32 %v1906_v59, %v947_v31 }
 0x101   : > { %v1561_v38 = vpop.f32.mrf.mxu0  ;;  %v1609_v39 = vpop.f32.mrf.mxu1 }
 0x102   : > { %v932_v40 = vmul.f32 %v1560_v34, %v1899_v51  ;;  %v948_v41 = vmul.f32 %v1608_v35, %v1899_v51  ;;  %v1000_v44 = vmax.f32 %v968_v36, 0.0  ;;  %v1016_v45 = vmax.f32 %v984_v37, 0.0 }
 0x103   : > { %v1562_v46 = vpop.f32.mrf.mxu0  ;;  %v1610_v47 = vpop.f32.mrf.mxu1 }
 0x104   : > { %v1563_v48 = vadd.f32 %v1562_v46, %v1561_v38  ;;  %v1611_v49 = vadd.f32 %v1610_v47, %v1609_v39  ;;  %v1443_v50 = vpack.c.bf16 %v1000_v44, %v999_v42  ;;  %v1483_v52 = vpack.c.bf16 %v1016_v45, %v1015_v43 }
 0x105   : > { %v1564_v53 = vpop.f32.mrf.mxu0  ;;  %v1612_v54 = vpop.f32.mrf.mxu1  ;;  %v969_v55 = vadd.f32 %v1906_v59, %v932_v40  ;;  %v985_v56 = vadd.f32 %v1906_v59, %v948_v41 }
 0x106   : > { %v933_v57 = vmul.f32 %v1563_v48, %v1899_v51  ;;  %v949_v58 = vmul.f32 %v1611_v49, %v1899_v51  ;;  %1515 = vst [vmem:[%s1918_s10 + $0x8] sm:$0xff] %v1443_v50   ;;  %1523 = vst [vmem:[%s1918_s10 + $0x48] sm:$0xff] %v1483_v52  }
 0x107   : > { %v1565_v60 = vpop.f32.mrf.mxu0  ;;  %v1613_v61 = vpop.f32.mrf.mxu1  ;;  %v1001_v4 = vmax.f32 %v969_v55, 0.0  ;;  %v1017_v5 = vmax.f32 %v985_v56, 0.0 }
 0x108   : > { %v970_v62 = vadd.f32 %v1906_v59, %v933_v57  ;;  %v986_v63 = vadd.f32 %v1906_v59, %v949_v58  ;;  %v1566_v0 = vadd.f32 %v1565_v60, %v1564_v53  ;;  %v1614_v1 = vadd.f32 %v1613_v61, %v1612_v54 }
 0x109   : > { %v1567_v2 = vpop.f32.mrf.mxu0  ;;  %v1615_v3 = vpop.f32.mrf.mxu1 }
 0x10a   : > { %v1002_v6 = vmax.f32 %v970_v62, 0.0  ;;  %v1018_v7 = vmax.f32 %v986_v63, 0.0  ;;  %v934_v8 = vmul.f32 %v1566_v0, %v1899_v51  ;;  %v950_v9 = vmul.f32 %v1614_v1, %v1899_v51 }
 0x10b   : > { %v1568_v10 = vpop.f32.mrf.mxu0  ;;  %v1616_v11 = vpop.f32.mrf.mxu1 }
 0x10c   : > { %v1448_v12 = vpack.c.bf16 %v1002_v6, %v1001_v4  ;;  %v1488_v13 = vpack.c.bf16 %v1018_v7, %v1017_v5  ;;  %v1569_v14 = vadd.f32 %v1568_v10, %v1567_v2  ;;  %v1617_v15 = vadd.f32 %v1616_v11, %v1615_v3 }
 0x10d   : > { %v1570_v16 = vpop.f32.mrf.mxu0  ;;  %v1618_v17 = vpop.f32.mrf.mxu1  ;;  %v971_v18 = vadd.f32 %v1906_v59, %v934_v8  ;;  %v987_v19 = vadd.f32 %v1906_v59, %v950_v9 }
 0x10e   : > { %1516 = vst [vmem:[%s1918_s10 + $0x10] sm:$0xff] %v1448_v12   ;;  %1524 = vst [vmem:[%s1918_s10 + $0x50] sm:$0xff] %v1488_v13   ;;  %v935_v20 = vmul.f32 %v1569_v14, %v1899_v51  ;;  %v951_v21 = vmul.f32 %v1617_v15, %v1899_v51 }
 0x10f   : > { %v1571_v22 = vpop.f32.mrf.mxu0  ;;  %v1619_v23 = vpop.f32.mrf.mxu1  ;;  %v1003_v32 = vmax.f32 %v971_v18, 0.0  ;;  %v1019_v33 = vmax.f32 %v987_v19, 0.0 }
 0x110   : > { %v1572_v24 = vadd.f32 %v1571_v22, %v1570_v16  ;;  %v1620_v25 = vadd.f32 %v1619_v23, %v1618_v17  ;;  %v972_v26 = vadd.f32 %v1906_v59, %v935_v20  ;;  %v988_v27 = vadd.f32 %v1906_v59, %v951_v21 }
 0x111   : > { %v1573_v28 = vpop.f32.mrf.mxu0  ;;  %v1621_v29 = vpop.f32.mrf.mxu1 }
 0x112   : > { %v936_v30 = vmul.f32 %v1572_v24, %v1899_v51  ;;  %v952_v31 = vmul.f32 %v1620_v25, %v1899_v51  ;;  %v1004_v34 = vmax.f32 %v972_v26, 0.0  ;;  %v1020_v35 = vmax.f32 %v988_v27, 0.0 }
 0x113   : > { %v1574_v36 = vpop.f32.mrf.mxu0  ;;  %v1622_v37 = vpop.f32.mrf.mxu1 }
 0x114   : > { %v1575_v38 = vadd.f32 %v1574_v36, %v1573_v28  ;;  %v1623_v39 = vadd.f32 %v1622_v37, %v1621_v29  ;;  %v1453_v40 = vpack.c.bf16 %v1004_v34, %v1003_v32  ;;  %v1493_v41 = vpack.c.bf16 %v1020_v35, %v1019_v33 }
 0x115   : > { %v1576_v42 = vpop.f32.mrf.mxu0  ;;  %v1624_v43 = vpop.f32.mrf.mxu1  ;;  %v973_v44 = vadd.f32 %v1906_v59, %v936_v30  ;;  %v989_v45 = vadd.f32 %v1906_v59, %v952_v31 }
 0x116   : > { %v937_v46 = vmul.f32 %v1575_v38, %v1899_v51  ;;  %v953_v47 = vmul.f32 %v1623_v39, %v1899_v51  ;;  %1517 = vst [vmem:[%s1918_s10 + $0x18] sm:$0xff] %v1453_v40   ;;  %1525 = vst [vmem:[%s1918_s10 + $0x58] sm:$0xff] %v1493_v41  }
 0x117   : > { %v1577_v48 = vpop.f32.mrf.mxu0  ;;  %v1625_v49 = vpop.f32.mrf.mxu1  ;;  %v1005_v57 = vmax.f32 %v973_v44, 0.0  ;;  %v1021_v58 = vmax.f32 %v989_v45, 0.0 }
 0x118   : > { %v974_v50 = vadd.f32 %v1906_v59, %v937_v46  ;;  %v990_v52 = vadd.f32 %v1906_v59, %v953_v47  ;;  %v1578_v53 = vadd.f32 %v1577_v48, %v1576_v42  ;;  %v1626_v54 = vadd.f32 %v1625_v49, %v1624_v43 }
 0x119   : > { %v1579_v55 = vpop.f32.mrf.mxu0  ;;  %v1627_v56 = vpop.f32.mrf.mxu1 }
 0x11a   : > { %v1006_v60 = vmax.f32 %v974_v50, 0.0  ;;  %v1022_v61 = vmax.f32 %v990_v52, 0.0  ;;  %v938_v62 = vmul.f32 %v1578_v53, %v1899_v51  ;;  %v954_v63 = vmul.f32 %v1626_v54, %v1899_v51 }
 0x11b   : > { %v1580_v0 = vpop.f32.mrf.mxu0  ;;  %v1628_v1 = vpop.f32.mrf.mxu1 }
 0x11c   : > { %v1458_v2 = vpack.c.bf16 %v1006_v60, %v1005_v57  ;;  %v1498_v3 = vpack.c.bf16 %v1022_v61, %v1021_v58  ;;  %v1581_v4 = vadd.f32 %v1580_v0, %v1579_v55  ;;  %v1629_v5 = vadd.f32 %v1628_v1, %v1627_v56 }
 0x11d   : > { %v1582_v6 = vpop.f32.mrf.mxu0  ;;  %v1630_v7 = vpop.f32.mrf.mxu1  ;;  %v975_v8 = vadd.f32 %v1906_v59, %v938_v62  ;;  %v991_v9 = vadd.f32 %v1906_v59, %v954_v63 }
 0x11e   : > { %1518 = vst [vmem:[%s1918_s10 + $0x20] sm:$0xff] %v1458_v2   ;;  %1526 = vst [vmem:[%s1918_s10 + $0x60] sm:$0xff] %v1498_v3   ;;  %v939_v10 = vmul.f32 %v1581_v4, %v1899_v51  ;;  %v955_v11 = vmul.f32 %v1629_v5, %v1899_v51 }
 0x11f   : > { %v1583_v12 = vpop.f32.mrf.mxu0  ;;  %v1631_v13 = vpop.f32.mrf.mxu1  ;;  %v1007_v22 = vmax.f32 %v975_v8, 0.0  ;;  %v1023_v23 = vmax.f32 %v991_v9, 0.0 }
 0x120   : > { %v1584_v14 = vadd.f32 %v1583_v12, %v1582_v6  ;;  %v1632_v15 = vadd.f32 %v1631_v13, %v1630_v7  ;;  %v976_v16 = vadd.f32 %v1906_v59, %v939_v10  ;;  %v992_v17 = vadd.f32 %v1906_v59, %v955_v11 }
 0x121   : > { %v1585_v18 = vpop.f32.mrf.mxu0  ;;  %v1633_v19 = vpop.f32.mrf.mxu1 }
 0x122   : > { %v940_v20 = vmul.f32 %v1584_v14, %v1899_v51  ;;  %v956_v21 = vmul.f32 %v1632_v15, %v1899_v51  ;;  %v1008_v24 = vmax.f32 %v976_v16, 0.0  ;;  %v1024_v25 = vmax.f32 %v992_v17, 0.0 }
 0x123   : > { %v1586_v26 = vpop.f32.mrf.mxu0  ;;  %v1634_v27 = vpop.f32.mrf.mxu1 }
 0x124   : > { %v1587_v28 = vadd.f32 %v1586_v26, %v1585_v18  ;;  %v1635_v29 = vadd.f32 %v1634_v27, %v1633_v19  ;;  %v1463_v30 = vpack.c.bf16 %v1008_v24, %v1007_v22  ;;  %v1503_v31 = vpack.c.bf16 %v1024_v25, %v1023_v23 }
 0x125   : > { %v1588_v32 = vpop.f32.mrf.mxu0  ;;  %v1636_v33 = vpop.f32.mrf.mxu1  ;;  %v977_v34 = vadd.f32 %v1906_v59, %v940_v20  ;;  %v993_v35 = vadd.f32 %v1906_v59, %v956_v21 }
 0x126   : > { %v941_v36 = vmul.f32 %v1587_v28, %v1899_v51  ;;  %v957_v37 = vmul.f32 %v1635_v29, %v1899_v51  ;;  %1519 = vst [vmem:[%s1918_s10 + $0x28] sm:$0xff] %v1463_v30   ;;  %1527 = vst [vmem:[%s1918_s10 + $0x68] sm:$0xff] %v1503_v31  }
 0x127   : > { %v1589_v38 = vpop.f32.mrf.mxu0  ;;  %v1637_v39 = vpop.f32.mrf.mxu1  ;;  %v1009_v46 = vmax.f32 %v977_v34, 0.0  ;;  %v1025_v47 = vmax.f32 %v993_v35, 0.0 }
 0x128   : > { %v978_v40 = vadd.f32 %v1906_v59, %v941_v36  ;;  %v994_v41 = vadd.f32 %v1906_v59, %v957_v37  ;;  %v1590_v42 = vadd.f32 %v1589_v38, %v1588_v32  ;;  %v1638_v43 = vadd.f32 %v1637_v39, %v1636_v33 }
 0x129   : > { %v1591_v44 = vpop.f32.mrf.mxu0  ;;  %v1639_v45 = vpop.f32.mrf.mxu1 }
 0x12a   : > { %v1010_v48 = vmax.f32 %v978_v40, 0.0  ;;  %v1026_v49 = vmax.f32 %v994_v41, 0.0  ;;  %v942_v50 = vmul.f32 %v1590_v42, %v1899_v51  ;;  %v958_v52 = vmul.f32 %v1638_v43, %v1899_v51 }
 0x12b   : > { %v1592_v53 = vpop.f32.mrf.mxu0  ;;  %v1640_v54 = vpop.f32.mrf.mxu1 }
 0x12c   : > { %v1468_v55 = vpack.c.bf16 %v1010_v48, %v1009_v46  ;;  %v1508_v56 = vpack.c.bf16 %v1026_v49, %v1025_v47  ;;  %v1593_v57 = vadd.f32 %v1592_v53, %v1591_v44  ;;  %v1641_v58 = vadd.f32 %v1640_v54, %v1639_v45 }
 0x12d   : > { %v979_v60 = vadd.f32 %v1906_v59, %v942_v50  ;;  %v995_v61 = vadd.f32 %v1906_v59, %v958_v52 }
 0x12e   : > { %1520 = vst [vmem:[%s1918_s10 + $0x30] sm:$0xff] %v1468_v55   ;;  %1528 = vst [vmem:[%s1918_s10 + $0x70] sm:$0xff] %v1508_v56   ;;  %v943_v62 = vmul.f32 %v1593_v57, %v1899_v51  ;;  %v959_v63 = vmul.f32 %v1641_v58, %v1899_v51 }
 0x12f   : > { %v1011_v2 = vmax.f32 %v979_v60, 0.0  ;;  %v1027_v3 = vmax.f32 %v995_v61, 0.0 }
 0x130   : > { %v980_v0 = vadd.f32 %v1906_v59, %v943_v62  ;;  %v996_v1 = vadd.f32 %v1906_v59, %v959_v63 }
 0x132   : > { %v1012_v4 = vmax.f32 %v980_v0, 0.0  ;;  %v1028_v5 = vmax.f32 %v996_v1, 0.0 }
 0x134   : > { %v1473_v6 = vpack.c.bf16 %v1012_v4, %v1011_v2  ;;  %v1513_v7 = vpack.c.bf16 %v1028_v5, %v1027_v3 }
 0x136   : > { %1521 = vst [vmem:[%s1918_s10 + $0x38] sm:$0xff] %v1473_v6   ;;  %1529 = vst [vmem:[%s1918_s10 + $0x78] sm:$0xff] %v1513_v7  }
 0x137 PF: > { %s13_s14 = sadd.s32 1, %s1768_s14   ;;  %s2005_s12 = smov %s1764_s13 }
 0x138   : > { %p10_p5 = scmp.ge.s32.totalorder %s13_s14, 4   ;;  %s2006_s13 = smov %s2008_s15 }
 0x13a   :  { %12 = sbr.rel (!%p10_p5) target bundleno = 2 (0x2), region = 80 }

// kernel: maps_in_forward.17
= control target key start
LH: loop header
LB: loop body
LE: loop exit
PB: predicated region body
PF: predicated region fallthrough
CT: control target
= control target key end

     0   :  { %s1414_s12 = smov 0   ;;  %s1416_s13 = smov 0   ;;  %s1595_s0 = inlined_call_operand.vmem [shape: bf16[128,1024], index: 0, kind: input, shape index: {}]   ;;  %s1596_s1 = inlined_call_operand.vmem [shape: bf16[1024,128], index: 1, kind: input, shape index: {}]   ;;  %s1597_s2 = inlined_call_operand.vmem [shape: f32[2,128], index: 2, kind: input, shape index: {}]   ;;  %s1598_s3 = inlined_call_operand.vmem [shape: bf16[128,128], index: 3, kind: output, shape index: {}]  }
   0x1   :  { %s1418_s14 = smov 0   ;;  %s1420_s15 = smov 0  }
   0x2   :  { %s1422_s16 = smov 0   ;;  %s1424_s17 = smov 0  }
   0x3   :  { %s1426_s18 = smov 0  }
   0x4 LB: > { %s25_s19 = sadd.s32 1, %s1384_s16  ;;  %s32_s20 = sadd.s32 1, %s1388_s17  ;;  %s1392_s18 = sphi %s1426_s18, %s13_s18   ;;  %s1388_s17 = sphi %s1424_s17, %s1604_s17   ;;  %s1384_s16 = sphi %s1422_s16, %s1603_s16   ;;  %s1380_s15 = sphi %s1420_s15, %s1602_s15   ;;  %s1376_s14 = sphi %s1418_s14, %s1601_s14   ;;  %s1372_s13 = sphi %s1416_s13, %s1600_s13   ;;  %s1368_s12 = sphi %s1414_s12, %s1599_s12  }
   0x5   : > { %p26_p0 = scmp.ge.s32.totalorder %s25_s19, 2  ;;  %p48_p1 = scmp.ne.s32.totalorder %s1372_s13, %s1368_s12 }
   0x6   : > { %p49_p2 = scmp.eq.s32.totalorder %s1392_s18, 0  ;;  %s41_s24 = sadd.s32 1, %s1372_s13 }
   0x7   : > { %s1606_s19 = smov (%p26_p0, %s25_s19), 0  ;;  %s1608_s20 = smov (!%p26_p0, %s32_s20), %s1388_s17 }
   0x8   : > { %p50_p3 = por %p49_p2, %p48_p1  ;;  %p34_p4 = scmp.ge.s32.totalorder %s1608_s20, 2 }
   0x9   : > { %s37_s21 = ssub.s32 %s1384_s16, %s1606_s19  ;;  %p1039_p6 = scmp.ge.s32.totalorder %s1392_s18, 4 }
   0xa   : > { %s1610_s20 = smov (%p34_p4, %s1608_s20), 0 }
   0xb   : > { %s36_s22 = ssub.s32 %s1388_s17, %s1610_s20  ;;  %163 = sbr.rel (%p1039_p6) target bundleno = 31 (0x1f), region = 20 }
   0xc   : > { %s38_s23 = sor.u32 %s37_s21, %s36_s22 }
   0xd   : > { %p39_p5 = scmp.eq.s32.totalorder %s38_s23, 0 }
   0xf   : > { %s1465_s25 = scalar_select %p39_p5, %s1372_s13, %s41_s24  }
  0x10   : > { %166 = sbr.rel (!%p50_p3) target bundleno = 31 (0x1f), region = 24  ;;  %s168_s26 = sand.u32 (%p50_p3), 1, %s1372_s13  }
  0x11   : > { %s1042_s27 = sshll.u32 (%p50_p3), %s1384_s16, 2  ;;  %s1040_s28 = sshll.u32 (%p50_p3), %s168_s26, 7 }
  0x12   : > { %s1114_s29 = sshll.u32 (%p50_p3), %s1388_s17, 6  ;;  %s170_s8 = scalar_lea.vmem (%p50_p3), [#allocation3], %s1040_s28 }
  0x13   : > { %s174_s30 = sadd.s32 (%p50_p3), %s1114_s29, %s1042_s27 }
  0x14   : > { %s1044_s4 = sshll.u32 (%p50_p3), %s174_s30, 2 }
  0x15   : > { %s1474_s7 = scalar_lea.vmem %s1595_s0, %s1044_s4 }
  0x16   : > { %v189_v0 = vld [vmem:[%s1474_s7] sm:$0xff]  ;;  %v191_v1 = vld [vmem:[%s1474_s7 + $0x8] sm:$0xff] }
  0x17   : > { %v193_v2 = vld [vmem:[%s1474_s7 + $0x20] sm:$0xff]  ;;  %190 = vst [vmem:[%s170_s8] sm:$0xff] %v189_v0  ;;  %192 = vst [vmem:[%s170_s8 + $0x8] sm:$0xff] %v191_v1  ;;  %v195_v3 = vld [vmem:[%s1474_s7 + $0x28] sm:$0xff] }
  0x18   : > { %194 = vst [vmem:[%s170_s8 + $0x10] sm:$0xff] %v193_v2  ;;  %v197_v4 = vld [vmem:[%s1474_s7 + $0x40] sm:$0xff]  ;;  %v199_v5 = vld [vmem:[%s1474_s7 + $0x48] sm:$0xff]  ;;  %196 = vst [vmem:[%s170_s8 + $0x18] sm:$0xff] %v195_v3 }
  0x19   : > { %198 = vst [vmem:[%s170_s8 + $0x20] sm:$0xff] %v197_v4  ;;  %200 = vst [vmem:[%s170_s8 + $0x28] sm:$0xff] %v199_v5  ;;  %v201_v6 = vld [vmem:[%s1474_s7 + $0x60] sm:$0xff]  ;;  %v203_v7 = vld [vmem:[%s1474_s7 + $0x68] sm:$0xff] }
  0x1a   : > { %v205_v8 = vld [vmem:[%s1474_s7 + $0x80] sm:$0xff]  ;;  %202 = vst [vmem:[%s170_s8 + $0x30] sm:$0xff] %v201_v6  ;;  %204 = vst [vmem:[%s170_s8 + $0x38] sm:$0xff] %v203_v7  ;;  %v207_v9 = vld [vmem:[%s1474_s7 + $0x88] sm:$0xff] }
  0x1b   : > { %206 = vst [vmem:[%s170_s8 + $0x40] sm:$0xff] %v205_v8  ;;  %v209_v10 = vld [vmem:[%s1474_s7 + $0xa0] sm:$0xff]  ;;  %v211_v11 = vld [vmem:[%s1474_s7 + $0xa8] sm:$0xff]  ;;  %208 = vst [vmem:[%s170_s8 + $0x48] sm:$0xff] %v207_v9 }
  0x1c   : > { %210 = vst [vmem:[%s170_s8 + $0x50] sm:$0xff] %v209_v10  ;;  %212 = vst [vmem:[%s170_s8 + $0x58] sm:$0xff] %v211_v11  ;;  %v213_v12 = vld [vmem:[%s1474_s7 + $0xc0] sm:$0xff]  ;;  %v215_v13 = vld [vmem:[%s1474_s7 + $0xc8] sm:$0xff] }
  0x1d   : > { %v217_v14 = vld [vmem:[%s1474_s7 + $0xe0] sm:$0xff]  ;;  %214 = vst [vmem:[%s170_s8 + $0x60] sm:$0xff] %v213_v12  ;;  %216 = vst [vmem:[%s170_s8 + $0x68] sm:$0xff] %v215_v13  ;;  %v219_v15 = vld [vmem:[%s1474_s7 + $0xe8] sm:$0xff] }
  0x1e   : > { %218 = vst [vmem:[%s170_s8 + $0x70] sm:$0xff] %v217_v14  ;;  %220 = vst [vmem:[%s170_s8 + $0x78] sm:$0xff] %v219_v15 }
  0x1f PF: > { %p1045_p7 = scmp.ge.s32.totalorder %s1392_s18, 1  ;;  %p237_p8 = scmp.lt.s32.totalorder %s1392_s18, 5 }
  0x21   : > { %p238_p9 = pnand %p1045_p7, %p237_p8 }
  0x22   : > { %s1047_s9 = sshll.u32 (!%p238_p9), %s1376_s14, 6  ;;  %s1049_s10 = sshll.u32 (!%p238_p9), %s1380_s15, 3 }
  0x23   : > { %241 = sbr.rel (%p238_p9) target bundleno = 343 (0x157), region = 51  ;;  %p285_p10 = scmp.lt.s32.totalorder (!%p238_p9), %s1047_s9, 127 }
  0x24   : > { %p298_p11 = scmp.lt.s32.totalorder (!%p238_p9), %s1049_s10, 15  ;;  %s244_s28 = sand.u32 (!%p238_p9), 1, %s1368_s12  }
  0x25   : > { %s1046_s29 = sshll.u32 (!%p238_p9), %s244_s28, 7  ;;  %p1099_p12 = scmp.ne.s32.totalorder (!%p238_p9), %s1376_s14, 0 }
  0x26   : > { %s1539_s12 = scalar_lea.vmem (!%p238_p9), [#allocation3], %s1046_s29 }
  0x28   : > { %s1612_s9 = smov (!%p285_p10, %s1047_s9), 127  ;;  %s1614_s10 = smov (!%p298_p11, %s1049_s10), 15  ;;  %v1314_v48 = vld [vmem:[%s1539_s12] ss:$16 sps:$4 sm:$0xff]   ;;  %v1316_v49 = vld [vmem:[%s1539_s12 + $0x4] ss:$16 sps:$4 sm:$0xff]  }
  0x29   : > { %s1048_s11 = sshll.u32 %s1612_s9, 2  ;;  %s1050_s24 = sshll.u32 %s1614_s10, 2  ;;  %v1317_v50 = vld [vmem:[%s1539_s12 + $0x8] ss:$16 sps:$4 sm:$0xff]   ;;  %v1319_v51 = vld [vmem:[%s1539_s12 + $0xc] ss:$16 sps:$4 sm:$0xff]   ;;  %691 = vmatprep.mubr.bf16.mxu0 %v1316_v49 }
  0x2a   : > { %s1499_s23 = scalar_lea.vmem %s1596_s1, %s1048_s11  ;;  %s1504_s27 = scalar_lea.vmem %s1598_s3, %s1050_s24  ;;  %v1320_v52 = vld [vmem:[%s1539_s12 + $0x24] ss:$16 sps:$4 sm:$0xff]   ;;  %756 = vmatprep.mubr.bf16.mxu1 %v1319_v51  ;;  %v1322_v53 = vld [vmem:[%s1539_s12 + $0x2c] ss:$16 sps:$4 sm:$0xff]   ;;  %v1324_v54 = vld [vmem:[%s1539_s12 + $0x20] ss:$16 sps:$4 sm:$0xff]  }
  0x2b   : > { %v1282_v16 = vld [vmem:[%s1499_s23 + $0x78] sm:$0xff]   ;;  %v1286_v20 = vld [vmem:[%s1499_s23 + $0x70] sm:$0xff]   ;;  %v1290_v24 = vld [vmem:[%s1499_s23 + $0x68] sm:$0xff]  }
  0x2c   : > { %v1283_v17 = vld [vmem:[%s1499_s23 + $0xf8] sm:$0xff]   ;;  %1146 = vmatprep.subr.bf16.mxu0 %v1282_v16  ;;  %v1287_v21 = vld [vmem:[%s1499_s23 + $0xf0] sm:$0xff]   ;;  %v1291_v25 = vld [vmem:[%s1499_s23 + $0xe8] sm:$0xff]  }
  0x2d   : > { %v1284_v18 = vld [vmem:[%s1499_s23 + $0x38] sm:$0xff]   ;;  %1186 = vmatprep.subr.bf16.mxu1 %v1283_v17  ;;  %v1288_v22 = vld [vmem:[%s1499_s23 + $0x30] sm:$0xff]   ;;  %v1292_v26 = vld [vmem:[%s1499_s23 + $0x28] sm:$0xff]  }
  0x2e   : > { %v1285_v19 = vld [vmem:[%s1499_s23 + $0xb8] sm:$0xff]   ;;  %1147 = vmatpush3.bf16.msra.mxu0 %v1284_v18  ;;  %v1289_v23 = vld [vmem:[%s1499_s23 + $0xb0] sm:$0xff]   ;;  %v1293_v27 = vld [vmem:[%s1499_s23 + $0xa8] sm:$0xff]  }
  0x2f   : > { %1187 = vmatpush3.bf16.msra.mxu1 %v1285_v19  ;;  %1148 = vmatprep.subr.bf16.mxu0 %v1286_v20  ;;  %v1294_v28 = vld [vmem:[%s1499_s23 + $0x60] sm:$0xff]   ;;  %v1298_v32 = vld [vmem:[%s1499_s23 + $0x58] sm:$0xff]   ;;  %v1302_v36 = vld [vmem:[%s1499_s23 + $0x50] sm:$0xff]  }
  0x30   : > { %1188 = vmatprep.subr.bf16.mxu1 %v1287_v21  ;;  %v1295_v29 = vld [vmem:[%s1499_s23 + $0xe0] sm:$0xff]   ;;  %v1299_v33 = vld [vmem:[%s1499_s23 + $0xd8] sm:$0xff]   ;;  %v1303_v37 = vld [vmem:[%s1499_s23 + $0xd0] sm:$0xff]  }
  0x31   : > { %v1296_v30 = vld [vmem:[%s1499_s23 + $0x20] sm:$0xff]   ;;  %v1300_v34 = vld [vmem:[%s1499_s23 + $0x18] sm:$0xff]   ;;  %v1304_v38 = vld [vmem:[%s1499_s23 + $0x10] sm:$0xff]  }
  0x32   : > { %1149 = vmatpush3.bf16.msra.mxu0 %v1288_v22  ;;  %v1297_v31 = vld [vmem:[%s1499_s23 + $0xa0] sm:$0xff]   ;;  %v1301_v35 = vld [vmem:[%s1499_s23 + $0x98] sm:$0xff]   ;;  %v1305_v39 = vld [vmem:[%s1499_s23 + $0x90] sm:$0xff]  }
  0x33   : > { %1189 = vmatpush3.bf16.msra.mxu1 %v1289_v23  ;;  %1150 = vmatprep.subr.bf16.mxu0 %v1290_v24  ;;  %v1306_v40 = vld [vmem:[%s1499_s23 + $0x48] sm:$0xff]   ;;  %v1310_v44 = vld [vmem:[%s1499_s23 + $0x40] sm:$0xff]  }
  0x34   : > { %1190 = vmatprep.subr.bf16.mxu1 %v1291_v25  ;;  %v1307_v41 = vld [vmem:[%s1499_s23 + $0xc8] sm:$0xff]   ;;  %v1311_v45 = vld [vmem:[%s1499_s23 + $0xc0] sm:$0xff]  }
  0x35   : > { %v1308_v42 = vld [vmem:[%s1499_s23 + $0x8] sm:$0xff]   ;;  %v1312_v46 = vld [vmem:[%s1499_s23] sm:$0xff]  }
  0x36   : > { %1151 = vmatpush3.bf16.msra.mxu0 %v1292_v26  ;;  %v1309_v43 = vld [vmem:[%s1499_s23 + $0x88] sm:$0xff]   ;;  %v1313_v47 = vld [vmem:[%s1499_s23 + $0x80] sm:$0xff]  }
  0x37   : > { %1191 = vmatpush3.bf16.msra.mxu1 %v1293_v27  ;;  %1152 = vmatprep.subr.bf16.mxu0 %v1294_v28  ;;  %v1325_v55 = vld [vmem:[%s1539_s12 + $0x28] ss:$16 sps:$4 sm:$0xff]   ;;  %v1326_v56 = vld [vmem:[%s1539_s12 + $0x44] ss:$16 sps:$4 sm:$0xff]   ;;  %v1328_v57 = vld [vmem:[%s1539_s12 + $0x4c] ss:$16 sps:$4 sm:$0xff]  }
  0x38   : > { %1192 = vmatprep.subr.bf16.mxu1 %v1295_v29  ;;  %v1330_v58 = vld [vmem:[%s1539_s12 + $0x40] ss:$16 sps:$4 sm:$0xff]   ;;  %v1331_v59 = vld [vmem:[%s1539_s12 + $0x48] ss:$16 sps:$4 sm:$0xff]   ;;  %v1332_v60 = vld [vmem:[%s1539_s12 + $0x64] ss:$16 sps:$4 sm:$0xff]  }
  0x39   : > { %v1334_v61 = vld [vmem:[%s1539_s12 + $0x6c] ss:$16 sps:$4 sm:$0xff]   ;;  %v1336_v62 = vld [vmem:[%s1539_s12 + $0x60] ss:$16 sps:$4 sm:$0xff]   ;;  %v1337_v63 = vld [vmem:[%s1539_s12 + $0x68] ss:$16 sps:$4 sm:$0xff]  }
  0x3a   : > { %1153 = vmatpush3.bf16.msra.mxu0 %v1296_v30 }
  0x3b   : > { %1193 = vmatpush3.bf16.msra.mxu1 %v1297_v31  ;;  %1154 = vmatprep.subr.bf16.mxu0 %v1298_v32 }
  0x3c   : > { %1194 = vmatprep.subr.bf16.mxu1 %v1299_v33 }
  0x3e   : > { %1155 = vmatpush3.bf16.msra.mxu0 %v1300_v34 }
  0x3f   : > { %1195 = vmatpush3.bf16.msra.mxu1 %v1301_v35  ;;  %1156 = vmatprep.subr.bf16.mxu0 %v1302_v36 }
  0x40   : > { %1196 = vmatprep.subr.bf16.mxu1 %v1303_v37 }
  0x42   : > { %1157 = vmatpush3.bf16.msra.mxu0 %v1304_v38 }
  0x43   : > { %1197 = vmatpush3.bf16.msra.mxu1 %v1305_v39  ;;  %1158 = vmatprep.subr.bf16.mxu0 %v1306_v40 }
  0x44   : > { %1198 = vmatprep.subr.bf16.mxu1 %v1307_v41 }
  0x46   : > { %1159 = vmatpush3.bf16.msra.mxu0 %v1308_v42 }
  0x47   : > { %1199 = vmatpush3.bf16.msra.mxu1 %v1309_v43  ;;  %1160 = vmatprep.subr.bf16.mxu0 %v1310_v44 }
  0x48   : > { %1200 = vmatprep.subr.bf16.mxu1 %v1311_v45 }
  0x4a   : > { %1161 = vmatpush3.bf16.msra.mxu0 %v1312_v46 }
  0x4b   : > { %1201 = vmatpush3.bf16.msra.mxu1 %v1313_v47 }
  0x4d   : > { %692 = vmatmul.mubr.bf16.vlgmr.msra.gmra.mxu0 %v1314_v48 }
  0x4e   : > { %757 = vmatmul.mubr.bf16.vlgmr.msra.gmra.mxu1 %v1317_v50  ;;  %699 = vmatprep.mubr.bf16.mxu0 %v1320_v52 }
  0x4f   : > { %764 = vmatprep.mubr.bf16.mxu1 %v1322_v53 }
  0x55   : > { %700 = vmatmul.mubr.bf16.gmra.mxu0 %v1324_v54 }
  0x56   : > { %765 = vmatmul.mubr.bf16.gmra.mxu1 %v1325_v55  ;;  %707 = vmatprep.mubr.bf16.mxu0 %v1326_v56 }
  0x57   : > { %772 = vmatprep.mubr.bf16.mxu1 %v1328_v57 }
  0x5d   : > { %708 = vmatmul.mubr.bf16.gmra.mxu0 %v1330_v58 }
  0x5e   : > { %773 = vmatmul.mubr.bf16.gmra.mxu1 %v1331_v59  ;;  %715 = vmatprep.mubr.bf16.mxu0 %v1332_v60 }
  0x5f   : > { %780 = vmatprep.mubr.bf16.mxu1 %v1334_v61 }
  0x65   : > { %716 = vmatmul.mubr.bf16.gmra.mxu0 %v1336_v62 }
  0x66   : > { %781 = vmatmul.mubr.bf16.gmra.mxu1 %v1337_v63 }
 0x10d   : > { %v1162_v0 = vpop.f32.mrf.mxu0 }
 0x10e   : > { %v1202_v1 = vpop.f32.mrf.mxu1 }
 0x10f   : > { %v1163_v2 = vpop.f32.mrf.mxu0 }
 0x110   : > { %v1164_v3 = vadd.f32 %v1163_v2, %v1162_v0  ;;  %v1203_v4 = vpop.f32.mrf.mxu1 }
 0x111   : > { %v1204_v5 = vadd.f32 %v1203_v4, %v1202_v1  ;;  %v1165_v6 = vpop.f32.mrf.mxu0 }
 0x112   : > { %v1205_v7 = vpop.f32.mrf.mxu1 }
 0x113   : > { %v1557_v8 = vadd.f32 %v1204_v5, %v1164_v3  ;;  %v1166_v9 = vpop.f32.mrf.mxu0 }
 0x114   : > { %v1167_v10 = vadd.f32 %v1166_v9, %v1165_v6  ;;  %v1206_v11 = vpop.f32.mrf.mxu1 }
 0x115   : > { %v1207_v12 = vadd.f32 %v1206_v11, %v1205_v7  ;;  %v1168_v13 = vpop.f32.mrf.mxu0 }
 0x116   : > { %v1208_v14 = vpop.f32.mrf.mxu1 }
 0x117   : > { %v762_v15 = vadd.f32 %v1207_v12, %v1167_v10  ;;  %v1169_v16 = vpop.f32.mrf.mxu0 }
 0x118   : > { %v1170_v17 = vadd.f32 %v1169_v16, %v1168_v13  ;;  %v1209_v18 = vpop.f32.mrf.mxu1 }
 0x119   : > { %v1210_v19 = vadd.f32 %v1209_v18, %v1208_v14  ;;  %v1171_v20 = vpop.f32.mrf.mxu0 }
 0x11a   : > { %v1211_v21 = vpop.f32.mrf.mxu1 }
 0x11b   : > { %v767_v22 = vadd.f32 %v1210_v19, %v1170_v17  ;;  %v1172_v23 = vpop.f32.mrf.mxu0 }
 0x11c   : > { %v1173_v24 = vadd.f32 %v1172_v23, %v1171_v20  ;;  %v1212_v25 = vpop.f32.mrf.mxu1 }
 0x11d   : > { %v1213_v26 = vadd.f32 %v1212_v25, %v1211_v21  ;;  %v1174_v27 = vpop.f32.mrf.mxu0 }
 0x11e   : > { %v1214_v28 = vpop.f32.mrf.mxu1 }
 0x11f   : > { %v770_v29 = vadd.f32 %v1213_v26, %v1173_v24  ;;  %v1175_v30 = vpop.f32.mrf.mxu0 }
 0x120   : > { %v1176_v31 = vadd.f32 %v1175_v30, %v1174_v27  ;;  %v1215_v32 = vpop.f32.mrf.mxu1 }
 0x121   : > { %v1216_v33 = vadd.f32 %v1215_v32, %v1214_v28  ;;  %v1177_v34 = vpop.f32.mrf.mxu0 }
 0x122   : > { %v1217_v35 = vpop.f32.mrf.mxu1 }
 0x123   : > { %v775_v36 = vadd.f32 %v1216_v33, %v1176_v31  ;;  %v1178_v37 = vpop.f32.mrf.mxu0 }
 0x124   : > { %v1179_v38 = vadd.f32 %v1178_v37, %v1177_v34  ;;  %v1218_v39 = vpop.f32.mrf.mxu1 }
 0x125   : > { %v1219_v40 = vadd.f32 %v1218_v39, %v1217_v35  ;;  %v1180_v41 = vpop.f32.mrf.mxu0 }
 0x126   : > { %v1220_v42 = vpop.f32.mrf.mxu1 }
 0x127   : > { %v778_v43 = vadd.f32 %v1219_v40, %v1179_v38  ;;  %v1181_v44 = vpop.f32.mrf.mxu0 }
 0x128   : > { %v1182_v45 = vadd.f32 %v1181_v44, %v1180_v41  ;;  %v1221_v46 = vpop.f32.mrf.mxu1 }
 0x129   : > { %v1222_v47 = vadd.f32 %v1221_v46, %v1220_v42  ;;  %v1183_v48 = vpop.f32.mrf.mxu0 }
 0x12a   : > { %v1223_v49 = vpop.f32.mrf.mxu1 }
 0x12b   : > { %v783_v50 = vadd.f32 %v1222_v47, %v1182_v45  ;;  %v1184_v51 = vpop.f32.mrf.mxu0  ;;  %792 = sbr.rel (%p1099_p12) target bundleno = 308 (0x134), region = 59 }
 0x12c   : > { %v1185_v52 = vadd.f32 %v1184_v51, %v1183_v48  ;;  %v1224_v53 = vpop.f32.mrf.mxu1 }
 0x12d   : > { %v1225_v54 = vadd.f32 %v1224_v53, %v1223_v49 }
 0x12f   : > { %v786_v55 = vadd.f32 %v1225_v54, %v1185_v52 }
 0x130   : > { %793 = vst [vmem:[#allocation2 + $0x30] sm:$0xff] %v1557_v8  ;;  %794 = vst [vmem:[#allocation2] sm:$0xff] %v762_v15 }
 0x131   : > { %795 = vst [vmem:[#allocation2 + $0x18] sm:$0xff] %v767_v22  ;;  %796 = vst [vmem:[#allocation2 + $0x10] sm:$0xff] %v770_v29 }
 0x132   : > { %797 = vst [vmem:[#allocation2 + $0x8] sm:$0xff] %v775_v36  ;;  %798 = vst [vmem:[#allocation2 + $0x20] sm:$0xff] %v778_v43 }
 0x133   : > { %799 = vst [vmem:[#allocation2 + $0x28] sm:$0xff] %v783_v50  ;;  %800 = vst [vmem:[#allocation2 + $0x38] sm:$0xff] %v786_v55 }
 0x134 PF: > { %p1100_p13 = scmp.le.s32.totalorder %s1376_s14, 0 }
 0x136   : > { %804 = sbr.rel (%p1100_p13) target bundleno = 322 (0x142), region = 63 }
 0x13b   : > { %v805_v56 = vld [vmem:[#allocation2 + $0x30] sm:$0xff]  ;;  %v806_v57 = vld [vmem:[#allocation2] sm:$0xff]  ;;  %v807_v58 = vld [vmem:[#allocation2 + $0x18] sm:$0xff] }
 0x13c   : > { %v813_v59 = vadd.f32 %v805_v56, %v1557_v8  ;;  %v814_v60 = vadd.f32 %v806_v57, %v762_v15  ;;  %v815_v61 = vadd.f32 %v807_v58, %v767_v22  ;;  %v808_v62 = vld [vmem:[#allocation2 + $0x10] sm:$0xff]  ;;  %v809_v63 = vld [vmem:[#allocation2 + $0x8] sm:$0xff]  ;;  %v810_v0 = vld [vmem:[#allocation2 + $0x20] sm:$0xff] }
 0x13d   : > { %v816_v1 = vadd.f32 %v808_v62, %v770_v29  ;;  %v817_v2 = vadd.f32 %v809_v63, %v775_v36  ;;  %v818_v3 = vadd.f32 %v810_v0, %v778_v43  ;;  %v811_v4 = vld [vmem:[#allocation2 + $0x28] sm:$0xff]  ;;  %v812_v5 = vld [vmem:[#allocation2 + $0x38] sm:$0xff] }
 0x13e   : > { %821 = vst [vmem:[#allocation2 + $0x30] sm:$0xff] %v813_v59  ;;  %822 = vst [vmem:[#allocation2] sm:$0xff] %v814_v60  ;;  %v819_v6 = vadd.f32 %v811_v4, %v783_v50  ;;  %v820_v7 = vadd.f32 %v812_v5, %v786_v55 }
 0x13f   : > { %823 = vst [vmem:[#allocation2 + $0x18] sm:$0xff] %v815_v61  ;;  %824 = vst [vmem:[#allocation2 + $0x10] sm:$0xff] %v816_v1 }
 0x140   : > { %825 = vst [vmem:[#allocation2 + $0x8] sm:$0xff] %v817_v2  ;;  %826 = vst [vmem:[#allocation2 + $0x20] sm:$0xff] %v818_v3 }
 0x141   : > { %827 = vst [vmem:[#allocation2 + $0x28] sm:$0xff] %v819_v6  ;;  %828 = vst [vmem:[#allocation2 + $0x38] sm:$0xff] %v820_v7 }
 0x142 PF: > { %p1101_p0 = scmp.ne.s32.totalorder %s1376_s14, 1 }
 0x144   : > { %832 = sbr.rel (%p1101_p0) target bundleno = 343 (0x157), region = 67 }
 0x149   : > { %v833_v8 = vld [vmem:[#allocation2 + $0x30] sm:$0xff]  ;;  %v834_v9 = vld [vmem:[#allocation2] sm:$0xff]  ;;  %v835_v14 = vld [vmem:[#allocation2 + $0x18] sm:$0xff] }
 0x14a   : > { %v1102_v10 = vld [vmem:[%s1597_s2] ss:$0 sm:$0xff]  ;;  %v1103_v13 = vld [vmem:[%s1597_s2 + $0x1] ss:$0 sm:$0xff]  ;;  %v836_v15 = vld [vmem:[#allocation2 + $0x10] sm:$0xff] }
 0x14b   : > { %v846_v11 = vmul.f32 %v1102_v10, %v833_v8  ;;  %v847_v12 = vmul.f32 %v1102_v10, %v834_v9  ;;  %v848_v16 = vmul.f32 %v1102_v10, %v835_v14  ;;  %v849_v17 = vmul.f32 %v1102_v10, %v836_v15  ;;  %v837_v18 = vld [vmem:[#allocation2 + $0x8] sm:$0xff]  ;;  %v838_v19 = vld [vmem:[#allocation2 + $0x20] sm:$0xff]  ;;  %v840_v25 = vld [vmem:[#allocation2 + $0x38] sm:$0xff] }
 0x14c   : > { %v839_v20 = vld [vmem:[#allocation2 + $0x28] sm:$0xff]  ;;  %v850_v23 = vmul.f32 %v1102_v10, %v837_v18  ;;  %v851_v24 = vmul.f32 %v1102_v10, %v838_v19  ;;  %v853_v29 = vmul.f32 %v1102_v10, %v840_v25 }
 0x14d   : > { %v859_v21 = vadd.f32 %v1103_v13, %v846_v11  ;;  %v860_v22 = vadd.f32 %v1103_v13, %v847_v12  ;;  %v861_v26 = vadd.f32 %v1103_v13, %v848_v16  ;;  %v862_v27 = vadd.f32 %v1103_v13, %v849_v17 }
 0x14e   : > { %v852_v28 = vmul.f32 %v1102_v10, %v839_v20  ;;  %v863_v32 = vadd.f32 %v1103_v13, %v850_v23  ;;  %v864_v33 = vadd.f32 %v1103_v13, %v851_v24  ;;  %v866_v37 = vadd.f32 %v1103_v13, %v853_v29 }
 0x14f   : > { %v867_v30 = vmax.f32 %v859_v21, 0.0  ;;  %v868_v31 = vmax.f32 %v860_v22, 0.0  ;;  %v869_v34 = vmax.f32 %v861_v26, 0.0  ;;  %v870_v35 = vmax.f32 %v862_v27, 0.0 }
 0x150   : > { %v865_v36 = vadd.f32 %v1103_v13, %v852_v28  ;;  %v871_v39 = vmax.f32 %v863_v32, 0.0  ;;  %v872_v40 = vmax.f32 %v864_v33, 0.0  ;;  %v874_v43 = vmax.f32 %v866_v37, 0.0 }
 0x151   : > { %v1126_v38 = vpack.c.bf16 %v868_v31, %v867_v30  ;;  %v1131_v41 = vpack.c.bf16 %v870_v35, %v869_v34 }
 0x152   : > { %v873_v42 = vmax.f32 %v865_v36, 0.0  ;;  %v1136_v44 = vpack.c.bf16 %v872_v40, %v871_v39 }
 0x153   : > { %1127 = vst [vmem:[%s1504_s27] sm:$0xff] %v1126_v38   ;;  %1143 = vst [vmem:[%s1504_s27 + $0x8] sm:$0xff] %v1131_v41  }
 0x154   : > { %v1141_v45 = vpack.c.bf16 %v874_v43, %v873_v42  ;;  %1144 = vst [vmem:[%s1504_s27 + $0x10] sm:$0xff] %v1136_v44  }
 0x156   : > { %1145 = vst [vmem:[%s1504_s27 + $0x18] sm:$0xff] %v1141_v45  }
 0x157 PF: > { %s13_s18 = sadd.s32 1, %s1392_s18   ;;  %s1599_s12 = smov %s1372_s13 }
 0x158   : > { %p10_p1 = scmp.ge.s32.totalorder %s13_s18, 6   ;;  %s1600_s13 = smov %s1465_s25 }
 0x159   : > { %s1601_s14 = smov %s1384_s16  ;;  %s1602_s15 = smov %s1388_s17 }
 0x15a   : > { %s1603_s16 = smov %s1606_s19  ;;  %s1604_s17 = smov %s1610_s20 }
 0x15b   :  { %12 = sbr.rel (!%p10_p1) target bundleno = 4 (0x4), region = 108 }

// kernel: maps_in_forward.18
= control target key start
LH: loop header
LB: loop body
LE: loop exit
PB: predicated region body
PF: predicated region fallthrough
CT: control target
= control target key end

     0   :  { %s1342_s12 = smov 0   ;;  %s1344_s13 = smov 0   ;;  %s1519_s0 = inlined_call_operand.vmem [shape: bf16[32,2048], index: 0, kind: input, shape index: {}]   ;;  %s1520_s1 = inlined_call_operand.vmem [shape: bf16[2048,256], index: 1, kind: input, shape index: {}]   ;;  %s1521_s2 = inlined_call_operand.vmem [shape: f32[2,256], index: 2, kind: input, shape index: {}]   ;;  %s1522_s3 = inlined_call_operand.vmem [shape: bf16[32,256], index: 3, kind: output, shape index: {}]  }
   0x1   :  { %s1346_s14 = smov 0   ;;  %s1348_s15 = smov 0  }
   0x2   :  { %s1350_s16 = smov 0   ;;  %s1352_s17 = smov 0  }
   0x3   :  { %s1354_s18 = smov 0  }
   0x4 LB: > { %s25_s19 = sadd.s32 1, %s1312_s16  ;;  %s32_s20 = sadd.s32 1, %s1316_s17  ;;  %s1320_s18 = sphi %s1354_s18, %s13_s18   ;;  %s1316_s17 = sphi %s1352_s17, %s1528_s17   ;;  %s1312_s16 = sphi %s1350_s16, %s1527_s16   ;;  %s1308_s15 = sphi %s1348_s15, %s1526_s15   ;;  %s1304_s14 = sphi %s1346_s14, %s1525_s14   ;;  %s1300_s13 = sphi %s1344_s13, %s1524_s13   ;;  %s1296_s12 = sphi %s1342_s12, %s1523_s12  }
   0x5   : > { %p26_p0 = scmp.ge.s32.totalorder %s25_s19, 4  ;;  %p48_p1 = scmp.ne.s32.totalorder %s1300_s13, %s1296_s12 }
   0x6   : > { %p49_p2 = scmp.eq.s32.totalorder %s1320_s18, 0  ;;  %s41_s24 = sadd.s32 1, %s1300_s13 }
   0x7   : > { %s1530_s19 = smov (%p26_p0, %s25_s19), 0  ;;  %s1532_s20 = smov (!%p26_p0, %s32_s20), %s1316_s17 }
   0x8   : > { %p50_p3 = por %p49_p2, %p48_p1  ;;  %p34_p4 = scmp.ge.s32.totalorder %s1532_s20, 2 }
   0x9   : > { %s37_s21 = ssub.s32 %s1312_s16, %s1530_s19  ;;  %p1013_p6 = scmp.ge.s32.totalorder %s1320_s18, 8 }
   0xa   : > { %s1534_s20 = smov (%p34_p4, %s1532_s20), 0 }
   0xb   : > { %s36_s22 = ssub.s32 %s1316_s17, %s1534_s20  ;;  %165 = sbr.rel (%p1013_p6) target bundleno = 25 (0x19), region = 20 }
   0xc   : > { %s38_s23 = sor.u32 %s37_s21, %s36_s22 }
   0xd   : > { %p39_p5 = scmp.eq.s32.totalorder %s38_s23, 0 }
   0xf   : > { %s1393_s25 = scalar_select %p39_p5, %s1300_s13, %s41_s24  }
  0x10   : > { %168 = sbr.rel (!%p50_p3) target bundleno = 25 (0x19), region = 24  ;;  %s170_s26 = sand.u32 (%p50_p3), 1, %s1300_s13  }
  0x11   : > { %s1016_s27 = sshll.u32 (%p50_p3), %s1312_s16, 2  ;;  %s1014_s28 = sshll.u32 (%p50_p3), %s170_s26, 5 }
  0x12   : > { %s1103_s29 = sshll.u32 (%p50_p3), %s1316_s17, 5  ;;  %s172_s8 = scalar_lea.vmem (%p50_p3), [#allocation3], %s1014_s28 }
  0x13   : > { %s176_s30 = sadd.s32 (%p50_p3), %s1103_s29, %s1016_s27 }
  0x14   : > { %s1018_s4 = sshll.u32 (%p50_p3), %s176_s30, 2 }
  0x15   : > { %s178_s7 = scalar_lea.vmem %s1519_s0, %s1018_s4 }
  0x16   : > { %v191_v0 = vld [vmem:[%s178_s7] sm:$0xff]  ;;  %v193_v1 = vld [vmem:[%s178_s7 + $0x8] sm:$0xff] }
  0x17   : > { %v195_v2 = vld [vmem:[%s178_s7 + $0x40] sm:$0xff]  ;;  %192 = vst [vmem:[%s172_s8] sm:$0xff] %v191_v0  ;;  %194 = vst [vmem:[%s172_s8 + $0x8] sm:$0xff] %v193_v1  ;;  %v197_v3 = vld [vmem:[%s178_s7 + $0x48] sm:$0xff] }
  0x18   : > { %196 = vst [vmem:[%s172_s8 + $0x10] sm:$0xff] %v195_v2  ;;  %198 = vst [vmem:[%s172_s8 + $0x18] sm:$0xff] %v197_v3 }
  0x19 PF: > { %p1019_p7 = scmp.ge.s32.totalorder %s1320_s18, 1  ;;  %p218_p8 = scmp.lt.s32.totalorder %s1320_s18, 9 }
  0x1b   : > { %p219_p9 = pnand %p1019_p7, %p218_p8 }
  0x1c   : > { %s1021_s9 = sshll.u32 (!%p219_p9), %s1304_s14, 6  ;;  %s1024_s10 = sshll.u32 (!%p219_p9), %s1308_s15, 1 }
  0x1d   : > { %222 = sbr.rel (%p219_p9) target bundleno = 341 (0x155), region = 51  ;;  %p272_p10 = scmp.lt.s32.totalorder (!%p219_p9), %s1021_s9, 255 }
  0x1e   : > { %p290_p11 = scmp.lt.s32.totalorder (!%p219_p9), %s1024_s10, 3  ;;  %s225_s28 = sand.u32 (!%p219_p9), 1, %s1296_s12  }
  0x1f   : > { %s1020_s29 = sshll.u32 (!%p219_p9), %s225_s28, 5  ;;  %p1095_p12 = scmp.ne.s32.totalorder (!%p219_p9), %s1304_s14, 0 }
  0x20   : > { %s1463_s12 = scalar_lea.vmem (!%p219_p9), [#allocation3], %s1020_s29 }
  0x22   : > { %s1536_s9 = smov (!%p272_p10, %s1021_s9), 255  ;;  %s1538_s10 = smov (!%p290_p11, %s1024_s10), 3  ;;  %v1262_v51 = vld [vmem:[%s1463_s12 + $0x4] ss:$16 sps:$4 sm:$0xff]   ;;  %v1265_v55 = vld [vmem:[%s1463_s12 + $0xc] ss:$16 sps:$4 sm:$0xff]  }
  0x23   : > { %s1104_s11 = sshll.u32 %s1536_s9, 3  ;;  %s1105_s24 = sshll.u32 %s1538_s10, 3  ;;  %740 = vmatprep.mubr.bf16.mxu0 %v1262_v51  ;;  %783 = vmatprep.mubr.bf16.mxu1 %v1265_v55 }
  0x24   : > { %s1409_s23 = scalar_lea.vmem %s1520_s1, %s1104_s11  ;;  %s1414_s27 = scalar_lea.vmem %s1522_s3, %s1105_s24 }
  0x25   : > { %v1164_v4 = vld [vmem:[%s1409_s23 + $0x74] ss:$8 sps:$4 sm:$0xff]   ;;  %v1168_v6 = vld [vmem:[%s1409_s23 + $0x70] ss:$8 sps:$4 sm:$0xff]   ;;  %v1170_v8 = vld [vmem:[%s1409_s23 + $0x64] ss:$8 sps:$4 sm:$0xff]  }
  0x26   : > { %v1166_v5 = vld [vmem:[%s1409_s23 + $0x174] ss:$8 sps:$4 sm:$0xff]   ;;  %708 = vmatprep.subr.bf16.mxu0 %v1164_v4  ;;  %v1169_v7 = vld [vmem:[%s1409_s23 + $0x170] ss:$8 sps:$4 sm:$0xff]   ;;  %v1172_v9 = vld [vmem:[%s1409_s23 + $0x164] ss:$8 sps:$4 sm:$0xff]  }
  0x27   : > { %751 = vmatprep.subr.bf16.mxu1 %v1166_v5  ;;  %709 = vmatpush1.bf16.msra.mxu0 %v1168_v6  ;;  %v1174_v10 = vld [vmem:[%s1409_s23 + $0x60] ss:$8 sps:$4 sm:$0xff]   ;;  %v1176_v12 = vld [vmem:[%s1409_s23 + $0x54] ss:$8 sps:$4 sm:$0xff]   ;;  %v1180_v14 = vld [vmem:[%s1409_s23 + $0x50] ss:$8 sps:$4 sm:$0xff]  }
  0x28   : > { %752 = vmatpush1.bf16.msra.mxu1 %v1169_v7  ;;  %710 = vmatprep.subr.bf16.mxu0 %v1170_v8  ;;  %v1175_v11 = vld [vmem:[%s1409_s23 + $0x160] ss:$8 sps:$4 sm:$0xff]   ;;  %v1178_v13 = vld [vmem:[%s1409_s23 + $0x154] ss:$8 sps:$4 sm:$0xff]   ;;  %v1181_v15 = vld [vmem:[%s1409_s23 + $0x150] ss:$8 sps:$4 sm:$0xff]  }
  0x29   : > { %753 = vmatprep.subr.bf16.mxu1 %v1172_v9  ;;  %v1182_v16 = vld [vmem:[%s1409_s23 + $0x44] ss:$8 sps:$4 sm:$0xff]   ;;  %v1186_v18 = vld [vmem:[%s1409_s23 + $0x40] ss:$8 sps:$4 sm:$0xff]   ;;  %v1188_v20 = vld [vmem:[%s1409_s23 + $0x34] ss:$8 sps:$4 sm:$0xff]  }
  0x2a   : > { %v1184_v17 = vld [vmem:[%s1409_s23 + $0x144] ss:$8 sps:$4 sm:$0xff]   ;;  %v1187_v19 = vld [vmem:[%s1409_s23 + $0x140] ss:$8 sps:$4 sm:$0xff]   ;;  %v1190_v21 = vld [vmem:[%s1409_s23 + $0x134] ss:$8 sps:$4 sm:$0xff]  }
  0x2b   : > { %711 = vmatpush1.bf16.msra.mxu0 %v1174_v10  ;;  %v1192_v22 = vld [vmem:[%s1409_s23 + $0x30] ss:$8 sps:$4 sm:$0xff]   ;;  %v1194_v24 = vld [vmem:[%s1409_s23 + $0x24] ss:$8 sps:$4 sm:$0xff]   ;;  %v1198_v26 = vld [vmem:[%s1409_s23 + $0x20] ss:$8 sps:$4 sm:$0xff]  }
  0x2c   : > { %754 = vmatpush1.bf16.msra.mxu1 %v1175_v11  ;;  %712 = vmatprep.subr.bf16.mxu0 %v1176_v12  ;;  %v1193_v23 = vld [vmem:[%s1409_s23 + $0x130] ss:$8 sps:$4 sm:$0xff]   ;;  %v1196_v25 = vld [vmem:[%s1409_s23 + $0x124] ss:$8 sps:$4 sm:$0xff]   ;;  %v1199_v27 = vld [vmem:[%s1409_s23 + $0x120] ss:$8 sps:$4 sm:$0xff]  }
  0x2d   : > { %755 = vmatprep.subr.bf16.mxu1 %v1178_v13  ;;  %v1200_v28 = vld [vmem:[%s1409_s23 + $0x14] ss:$8 sps:$4 sm:$0xff]   ;;  %v1204_v30 = vld [vmem:[%s1409_s23 + $0x10] ss:$8 sps:$4 sm:$0xff]   ;;  %v1206_v32 = vld [vmem:[%s1409_s23 + $0x4] ss:$8 sps:$4 sm:$0xff]  }
  0x2e   : > { %v1202_v29 = vld [vmem:[%s1409_s23 + $0x114] ss:$8 sps:$4 sm:$0xff]   ;;  %v1205_v31 = vld [vmem:[%s1409_s23 + $0x110] ss:$8 sps:$4 sm:$0xff]   ;;  %v1208_v33 = vld [vmem:[%s1409_s23 + $0x104] ss:$8 sps:$4 sm:$0xff]  }
  0x2f   : > { %713 = vmatpush1.bf16.msra.mxu0 %v1180_v14  ;;  %v1210_v34 = vld [vmem:[%s1409_s23] ss:$8 sps:$4 sm:$0xff]   ;;  %v1212_v36 = vld [vmem:[%s1409_s23 + $0xf4] ss:$8 sps:$4 sm:$0xff]   ;;  %v1216_v38 = vld [vmem:[%s1409_s23 + $0xf0] ss:$8 sps:$4 sm:$0xff]  }
  0x30   : > { %756 = vmatpush1.bf16.msra.mxu1 %v1181_v15  ;;  %714 = vmatprep.subr.bf16.mxu0 %v1182_v16  ;;  %v1211_v35 = vld [vmem:[%s1409_s23 + $0x100] ss:$8 sps:$4 sm:$0xff]   ;;  %v1214_v37 = vld [vmem:[%s1409_s23 + $0x1f4] ss:$8 sps:$4 sm:$0xff]   ;;  %v1217_v39 = vld [vmem:[%s1409_s23 + $0x1f0] ss:$8 sps:$4 sm:$0xff]  }
  0x31   : > { %757 = vmatprep.subr.bf16.mxu1 %v1184_v17  ;;  %v1218_v40 = vld [vmem:[%s1409_s23 + $0xe4] ss:$8 sps:$4 sm:$0xff]   ;;  %v1222_v42 = vld [vmem:[%s1409_s23 + $0xe0] ss:$8 sps:$4 sm:$0xff]   ;;  %v1224_v44 = vld [vmem:[%s1409_s23 + $0xd4] ss:$8 sps:$4 sm:$0xff]  }
  0x32   : > { %v1220_v41 = vld [vmem:[%s1409_s23 + $0x1e4] ss:$8 sps:$4 sm:$0xff]   ;;  %v1223_v43 = vld [vmem:[%s1409_s23 + $0x1e0] ss:$8 sps:$4 sm:$0xff]   ;;  %v1226_v45 = vld [vmem:[%s1409_s23 + $0x1d4] ss:$8 sps:$4 sm:$0xff]  }
  0x33   : > { %715 = vmatpush1.bf16.msra.mxu0 %v1186_v18  ;;  %v1228_v46 = vld [vmem:[%s1409_s23 + $0xd0] ss:$8 sps:$4 sm:$0xff]   ;;  %v1230_v48 = vld [vmem:[%s1409_s23 + $0xc4] ss:$8 sps:$4 sm:$0xff]   ;;  %v1234_v50 = vld [vmem:[%s1409_s23 + $0xc0] ss:$8 sps:$4 sm:$0xff]  }
  0x34   : > { %758 = vmatpush1.bf16.msra.mxu1 %v1187_v19  ;;  %716 = vmatprep.subr.bf16.mxu0 %v1188_v20  ;;  %v1229_v47 = vld [vmem:[%s1409_s23 + $0x1d0] ss:$8 sps:$4 sm:$0xff]   ;;  %v1232_v49 = vld [vmem:[%s1409_s23 + $0x1c4] ss:$8 sps:$4 sm:$0xff]   ;;  %v1235_v52 = vld [vmem:[%s1409_s23 + $0x1c0] ss:$8 sps:$4 sm:$0xff]  }
  0x35   : > { %759 = vmatprep.subr.bf16.mxu1 %v1190_v21  ;;  %v1236_v53 = vld [vmem:[%s1409_s23 + $0xb4] ss:$8 sps:$4 sm:$0xff]   ;;  %v1240_v56 = vld [vmem:[%s1409_s23 + $0xb0] ss:$8 sps:$4 sm:$0xff]   ;;  %v1242_v58 = vld [vmem:[%s1409_s23 + $0xa4] ss:$8 sps:$4 sm:$0xff]  }
  0x36   : > { %v1238_v54 = vld [vmem:[%s1409_s23 + $0x1b4] ss:$8 sps:$4 sm:$0xff]   ;;  %v1241_v57 = vld [vmem:[%s1409_s23 + $0x1b0] ss:$8 sps:$4 sm:$0xff]   ;;  %v1244_v59 = vld [vmem:[%s1409_s23 + $0x1a4] ss:$8 sps:$4 sm:$0xff]  }
  0x37   : > { %717 = vmatpush1.bf16.msra.mxu0 %v1192_v22  ;;  %v1246_v60 = vld [vmem:[%s1409_s23 + $0xa0] ss:$8 sps:$4 sm:$0xff]   ;;  %v1248_v62 = vld [vmem:[%s1409_s23 + $0x94] ss:$8 sps:$4 sm:$0xff]   ;;  %v1252_v0 = vld [vmem:[%s1409_s23 + $0x90] ss:$8 sps:$4 sm:$0xff]  }
  0x38   : > { %760 = vmatpush1.bf16.msra.mxu1 %v1193_v23  ;;  %718 = vmatprep.subr.bf16.mxu0 %v1194_v24  ;;  %v1247_v61 = vld [vmem:[%s1409_s23 + $0x1a0] ss:$8 sps:$4 sm:$0xff]   ;;  %v1250_v63 = vld [vmem:[%s1409_s23 + $0x194] ss:$8 sps:$4 sm:$0xff]   ;;  %v1253_v1 = vld [vmem:[%s1409_s23 + $0x190] ss:$8 sps:$4 sm:$0xff]  }
  0x39   : > { %761 = vmatprep.subr.bf16.mxu1 %v1196_v25  ;;  %v1254_v2 = vld [vmem:[%s1409_s23 + $0x84] ss:$8 sps:$4 sm:$0xff]   ;;  %v1258_v4 = vld [vmem:[%s1409_s23 + $0x80] ss:$8 sps:$4 sm:$0xff]  }
  0x3a   : > { %v1256_v3 = vld [vmem:[%s1409_s23 + $0x184] ss:$8 sps:$4 sm:$0xff]   ;;  %v1259_v5 = vld [vmem:[%s1409_s23 + $0x180] ss:$8 sps:$4 sm:$0xff]  }
  0x3b   : > { %719 = vmatpush1.bf16.msra.mxu0 %v1198_v26  ;;  %v1260_v6 = vld [vmem:[%s1463_s12] ss:$16 sps:$4 sm:$0xff]   ;;  %v1263_v7 = vld [vmem:[%s1463_s12 + $0x8] ss:$16 sps:$4 sm:$0xff]  }
  0x3c   : > { %762 = vmatpush1.bf16.msra.mxu1 %v1199_v27  ;;  %720 = vmatprep.subr.bf16.mxu0 %v1200_v28 }
  0x3d   : > { %763 = vmatprep.subr.bf16.mxu1 %v1202_v29 }
  0x3f   : > { %721 = vmatpush1.bf16.msra.mxu0 %v1204_v30 }
  0x40   : > { %764 = vmatpush1.bf16.msra.mxu1 %v1205_v31  ;;  %722 = vmatprep.subr.bf16.mxu0 %v1206_v32 }
  0x41   : > { %765 = vmatprep.subr.bf16.mxu1 %v1208_v33 }
  0x43   : > { %723 = vmatpush1.bf16.msra.mxu0 %v1210_v34 }
  0x44   : > { %766 = vmatpush1.bf16.msra.mxu1 %v1211_v35  ;;  %724 = vmatprep.subr.bf16.mxu0 %v1212_v36 }
  0x45   : > { %767 = vmatprep.subr.bf16.mxu1 %v1214_v37 }
  0x47   : > { %725 = vmatpush2.bf16.msra.mxu0 %v1216_v38 }
  0x48   : > { %768 = vmatpush2.bf16.msra.mxu1 %v1217_v39  ;;  %726 = vmatprep.subr.bf16.mxu0 %v1218_v40 }
  0x49   : > { %769 = vmatprep.subr.bf16.mxu1 %v1220_v41 }
  0x4b   : > { %727 = vmatpush2.bf16.msra.mxu0 %v1222_v42 }
  0x4c   : > { %770 = vmatpush2.bf16.msra.mxu1 %v1223_v43  ;;  %728 = vmatprep.subr.bf16.mxu0 %v1224_v44 }
  0x4d   : > { %771 = vmatprep.subr.bf16.mxu1 %v1226_v45 }
  0x4f   : > { %729 = vmatpush2.bf16.msra.mxu0 %v1228_v46 }
  0x50   : > { %772 = vmatpush2.bf16.msra.mxu1 %v1229_v47  ;;  %730 = vmatprep.subr.bf16.mxu0 %v1230_v48 }
  0x51   : > { %773 = vmatprep.subr.bf16.mxu1 %v1232_v49 }
  0x53   : > { %731 = vmatpush2.bf16.msra.mxu0 %v1234_v50 }
  0x54   : > { %774 = vmatpush2.bf16.msra.mxu1 %v1235_v52  ;;  %732 = vmatprep.subr.bf16.mxu0 %v1236_v53 }
  0x55   : > { %775 = vmatprep.subr.bf16.mxu1 %v1238_v54 }
  0x57   : > { %733 = vmatpush2.bf16.msra.mxu0 %v1240_v56 }
  0x58   : > { %776 = vmatpush2.bf16.msra.mxu1 %v1241_v57  ;;  %734 = vmatprep.subr.bf16.mxu0 %v1242_v58 }
  0x59   : > { %777 = vmatprep.subr.bf16.mxu1 %v1244_v59 }
  0x5b   : > { %735 = vmatpush2.bf16.msra.mxu0 %v1246_v60 }
  0x5c   : > { %778 = vmatpush2.bf16.msra.mxu1 %v1247_v61  ;;  %736 = vmatprep.subr.bf16.mxu0 %v1248_v62 }
  0x5d   : > { %779 = vmatprep.subr.bf16.mxu1 %v1250_v63 }
  0x5f   : > { %737 = vmatpush2.bf16.msra.mxu0 %v1252_v0 }
  0x60   : > { %780 = vmatpush2.bf16.msra.mxu1 %v1253_v1  ;;  %738 = vmatprep.subr.bf16.mxu0 %v1254_v2 }
  0x61   : > { %781 = vmatprep.subr.bf16.mxu1 %v1256_v3 }
  0x63   : > { %739 = vmatpush2.bf16.msra.mxu0 %v1258_v4 }
  0x64   : > { %782 = vmatpush2.bf16.msra.mxu1 %v1259_v5 }
  0x66   : > { %741 = vmatmul.mubr.bf16.vlgmr.msra.gmra.mxu0 %v1260_v6 }
  0x67   : > { %784 = vmatmul.mubr.bf16.vlgmr.msra.gmra.mxu1 %v1263_v7 }
 0x126   : > { %v742_v8 = vpop.f32.mrf.mxu0 }
 0x127   : > { %v785_v9 = vpop.f32.mrf.mxu1 }
 0x128   : > { %v786_v10 = vadd.f32 %v785_v9, %v742_v8  ;;  %v744_v11 = vpop.f32.mrf.mxu0 }
 0x129   : > { %v787_v12 = vpop.f32.mrf.mxu1 }
 0x12a   : > { %v788_v13 = vadd.f32 %v787_v12, %v744_v11  ;;  %v746_v14 = vpop.f32.mrf.mxu0  ;;  %797 = sbr.rel (%p1095_p12) target bundleno = 305 (0x131), region = 59 }
 0x12b   : > { %v789_v15 = vpop.f32.mrf.mxu1 }
 0x12c   : > { %v790_v16 = vadd.f32 %v789_v15, %v746_v14  ;;  %v748_v17 = vpop.f32.mrf.mxu0 }
 0x12d   : > { %v791_v18 = vpop.f32.mrf.mxu1 }
 0x12e   : > { %v792_v19 = vadd.f32 %v791_v18, %v748_v17 }
 0x12f   : > { %798 = vst [vmem:[#allocation2 + $0x10] sm:$0xff] %v786_v10  ;;  %799 = vst [vmem:[#allocation2] sm:$0xff] %v788_v13 }
 0x130   : > { %800 = vst [vmem:[#allocation2 + $0x18] sm:$0xff] %v790_v16  ;;  %801 = vst [vmem:[#allocation2 + $0x8] sm:$0xff] %v792_v19 }
 0x131 PF: > { %p1096_p13 = scmp.le.s32.totalorder %s1304_s14, 0 }
 0x133   : > { %805 = sbr.rel (%p1096_p13) target bundleno = 317 (0x13d), region = 63 }
 0x138   : > { %v806_v20 = vld [vmem:[#allocation2 + $0x10] sm:$0xff]  ;;  %v807_v21 = vld [vmem:[#allocation2] sm:$0xff]  ;;  %v808_v22 = vld [vmem:[#allocation2 + $0x18] sm:$0xff] }
 0x139   : > { %v810_v23 = vadd.f32 %v806_v20, %v786_v10  ;;  %v811_v24 = vadd.f32 %v807_v21, %v788_v13  ;;  %v812_v25 = vadd.f32 %v808_v22, %v790_v16  ;;  %v809_v26 = vld [vmem:[#allocation2 + $0x8] sm:$0xff] }
 0x13a   : > { %v813_v27 = vadd.f32 %v809_v26, %v792_v19 }
 0x13b   : > { %814 = vst [vmem:[#allocation2 + $0x10] sm:$0xff] %v810_v23  ;;  %815 = vst [vmem:[#allocation2] sm:$0xff] %v811_v24 }
 0x13c   : > { %816 = vst [vmem:[#allocation2 + $0x18] sm:$0xff] %v812_v25  ;;  %817 = vst [vmem:[#allocation2 + $0x8] sm:$0xff] %v813_v27 }
 0x13d PF: > { %p1097_p0 = scmp.ne.s32.totalorder %s1304_s14, 3 }
 0x13f   : > { %821 = sbr.rel (%p1097_p0) target bundleno = 341 (0x155), region = 67 }
 0x144   : > { %v828_v28 = vlaneseq  ;;  %v826_v30 = vld [vmem:[%s1521_s2] ss:$2 sm:$0x3]  ;;  %v1098_v31 = vld [vmem:[%s1521_s2 + $0x1] ss:$2 sm:$0x3] }
 0x145   : > { %v822_v32 = vld [vmem:[#allocation2 + $0x10] sm:$0xff]  ;;  %v823_v35 = vld [vmem:[#allocation2] sm:$0xff]  ;;  %v824_v36 = vld [vmem:[#allocation2 + $0x18] sm:$0xff] }
 0x146   : > { %v829_v29 = vshrl.u32 %v828_v28, 7  ;;  %v825_v37 = vld [vmem:[#allocation2 + $0x8] sm:$0xff] }
 0x148   : > { %v830_v33 = vsub.s32 0, %v829_v29  ;;  %v834_v34 = vsub.s32 1, %v829_v29 }
 0x14a   : > { %v831_v38 = vrot.slane %v826_v30, %v830_v33  ;;  %v835_v39 = vrot.slane %v826_v30, %v834_v34  ;;  %v848_v40 = vrot.slane %v1098_v31, %v830_v33  ;;  %v852_v41 = vrot.slane %v1098_v31, %v834_v34 }
 0x14c   : > { %v838_v42 = vmul.f32 %v831_v38, %v822_v32  ;;  %v839_v43 = vmul.f32 %v835_v39, %v823_v35  ;;  %v840_v44 = vmul.f32 %v831_v38, %v824_v36  ;;  %v841_v45 = vmul.f32 %v835_v39, %v825_v37 }
 0x14e   : > { %v855_v46 = vadd.f32 %v848_v40, %v838_v42  ;;  %v856_v47 = vadd.f32 %v852_v41, %v839_v43  ;;  %v857_v48 = vadd.f32 %v848_v40, %v840_v44  ;;  %v858_v49 = vadd.f32 %v852_v41, %v841_v45 }
 0x150   : > { %v859_v50 = vmax.f32 %v855_v46, 0.0  ;;  %v860_v51 = vmax.f32 %v856_v47, 0.0  ;;  %v861_v52 = vmax.f32 %v857_v48, 0.0  ;;  %v862_v53 = vmax.f32 %v858_v49, 0.0 }
 0x152   : > { %v1106_v54 = vpack.c.bf16 %v860_v51, %v859_v50  ;;  %v1107_v55 = vpack.c.bf16 %v862_v53, %v861_v52 }
 0x154   : > { %875 = vst [vmem:[%s1414_s27] sm:$0xff] %v1106_v54  ;;  %876 = vst [vmem:[%s1414_s27 + $0x8] sm:$0xff] %v1107_v55 }
 0x155 PF: > { %s13_s18 = sadd.s32 1, %s1320_s18   ;;  %s1523_s12 = smov %s1300_s13 }
 0x156   : > { %p10_p1 = scmp.ge.s32.totalorder %s13_s18, 10   ;;  %s1524_s13 = smov %s1393_s25 }
 0x157   : > { %s1525_s14 = smov %s1312_s16  ;;  %s1526_s15 = smov %s1316_s17 }
 0x158   : > { %s1527_s16 = smov %s1530_s19  ;;  %s1528_s17 = smov %s1534_s20 }
 0x159   :  { %12 = sbr.rel (!%p10_p1) target bundleno = 4 (0x4), region = 109 }

// kernel: maps_in_forward.19
= control target key start
LH: loop header
LB: loop body
LE: loop exit
PB: predicated region body
PF: predicated region fallthrough
CT: control target
= control target key end

     0   :  { %s1218_s12 = smov 0   ;;  %s1220_s13 = smov 0   ;;  %s1378_s0 = inlined_call_operand.vmem [shape: bf16[32,2304], index: 0, kind: input, shape index: {}]   ;;  %s1379_s1 = inlined_call_operand.vmem [shape: bf16[2304,256], index: 1, kind: input, shape index: {}]   ;;  %s1380_s2 = inlined_call_operand.vmem [shape: f32[2,256], index: 2, kind: input, shape index: {}]   ;;  %s1381_s3 = inlined_call_operand.vmem [shape: bf16[32,256], index: 3, kind: output, shape index: {}]  }
   0x1   :  { %s1222_s14 = smov 0   ;;  %s1224_s15 = smov 0  }
   0x2   :  { %s1226_s16 = smov 0   ;;  %s1228_s17 = smov 0  }
   0x3   :  { %s1230_s18 = smov 0  }
   0x4 LB: > { %s25_s19 = sadd.s32 1, %s1187_s16  ;;  %s32_s20 = sadd.s32 1, %s1191_s17  ;;  %s1195_s18 = sphi %s1230_s18, %s13_s18   ;;  %s1191_s17 = sphi %s1228_s17, %s1387_s17   ;;  %s1187_s16 = sphi %s1226_s16, %s1386_s16   ;;  %s1183_s15 = sphi %s1224_s15, %s1385_s15   ;;  %s1179_s14 = sphi %s1222_s14, %s1384_s14   ;;  %s1175_s13 = sphi %s1220_s13, %s1383_s13   ;;  %s1171_s12 = sphi %s1218_s12, %s1382_s12  }
   0x5   : > { %p26_p0 = scmp.ge.s32.totalorder %s25_s19, 6  ;;  %p48_p1 = scmp.ne.s32.totalorder %s1175_s13, %s1171_s12 }
   0x6   : > { %p49_p2 = scmp.eq.s32.totalorder %s1195_s18, 0  ;;  %s41_s24 = sadd.s32 1, %s1175_s13 }
   0x7   : > { %s1389_s19 = smov (%p26_p0, %s25_s19), 0  ;;  %s1391_s20 = smov (!%p26_p0, %s32_s20), %s1191_s17 }
   0x8   : > { %p50_p3 = por %p49_p2, %p48_p1  ;;  %p34_p4 = scmp.ge.s32.totalorder %s1391_s20, 2 }
   0x9   : > { %s37_s21 = ssub.s32 %s1187_s16, %s1389_s19  ;;  %p928_p6 = scmp.ge.s32.totalorder %s1195_s18, 12 }
   0xa   : > { %s1393_s20 = smov (%p34_p4, %s1391_s20), 0 }
   0xb   : > { %s36_s22 = ssub.s32 %s1191_s17, %s1393_s20  ;;  %165 = sbr.rel (%p928_p6) target bundleno = 27 (0x1b), region = 20 }
   0xc   : > { %s38_s23 = sor.u32 %s37_s21, %s36_s22 }
   0xd   : > { %p39_p5 = scmp.eq.s32.totalorder %s38_s23, 0 }
   0xf   : > { %s1269_s25 = scalar_select %p39_p5, %s1175_s13, %s41_s24  }
  0x10   : > { %168 = sbr.rel (!%p50_p3) target bundleno = 27 (0x1b), region = 24  ;;  %s170_s26 = sand.u32 (%p50_p3), 1, %s1175_s13  }
  0x11   : > { %s174_s27 = smul.u32 (%p50_p3), 3, %s1187_s16 }
  0x12   : > { %s1005_s28 = smul.u32 (%p50_p3), 24, %s170_s26 }
  0x13   : > { %s1006_s29 = smul.u32 (%p50_p3), 36, %s1191_s17 }
  0x14   : > { %s172_s8 = scalar_lea.vmem (%p50_p3), [#allocation3], %s1005_s28 }
  0x15   : > { %s176_s30 = sadd.s32 %s1006_s29, %s174_s27 }
  0x16   : > { %s931_s4 = sshll.u32 %s176_s30, 2 }
  0x17   : > { %s178_s7 = scalar_lea.vmem %s1378_s0, %s931_s4 }
  0x18   : > { %v193_v0 = vld [vmem:[%s178_s7] sm:$0xff]  ;;  %v195_v1 = vld [vmem:[%s178_s7 + $0x48] sm:$0xff]  ;;  %v934_v3 = vld [vmem:[%s178_s7 + $0x50] sm:$0xf] }
  0x19   : > { %v932_v2 = vld [vmem:[%s178_s7 + $0x8] sm:$0xf]  ;;  %194 = vst [vmem:[%s172_s8] sm:$0xff] %v193_v0  ;;  %196 = vst [vmem:[%s172_s8 + $0xc] sm:$0xff] %v195_v1 }
  0x1a   : > { %933 = vst [vmem:[%s172_s8 + $0x8] sm:$0xf] %v932_v2  ;;  %935 = vst [vmem:[%s172_s8 + $0x14] sm:$0xf] %v934_v3 }
  0x1b PF: > { %p936_p7 = scmp.ge.s32.totalorder %s1195_s18, 1  ;;  %p228_p8 = scmp.lt.s32.totalorder %s1195_s18, 13 }
  0x1d   : > { %p229_p9 = pnand %p936_p7, %p228_p8 }
  0x1e   : > { %s280_s9 = smul.u32 (!%p229_p9), 48, %s1179_s14  ;;  %s939_s10 = sshll.u32 (!%p229_p9), %s1183_s15, 1 }
  0x1f   : > { %232 = sbr.rel (%p229_p9) target bundleno = 342 (0x156), region = 54  ;;  %p300_p10 = scmp.lt.s32.totalorder (!%p229_p9), %s939_s10, 3 }
  0x20   : > { %s235_s11 = sand.u32 (!%p229_p9), 1, %s1171_s12   ;;  %p282_p11 = scmp.lt.s32.totalorder (!%p229_p9), %s280_s9, 287 }
  0x21   : > { %s1007_s21 = smul.u32 (!%p229_p9), 24, %s235_s11  ;;  %p993_p12 = scmp.ne.s32.totalorder (!%p229_p9), %s1179_s14, 0 }
  0x23   : > { %s1288_s28 = scalar_lea.vmem (!%p229_p9), [#allocation3], %s1007_s21 }
  0x24   : > { %v1197_v4 = vmov 0   ;;  %s1395_s10 = smov (!%p300_p10, %s939_s10), 3  ;;  %s1397_s9 = smov (!%p282_p11, %s280_s9), 287  ;;  %v1140_v37 = vld [vmem:[%s1288_s28 + $0x4] ss:$12 sps:$4 sm:$0xff]  }
  0x25   : > { %694 = vmatprep.mubr.bf16.mxu1 %v1197_v4  ;;  %s1002_s22 = sshll.u32 %s1395_s10, 3  ;;  %s1001_s23 = sshll.u32 %s1397_s9, 3  ;;  %651 = vmatprep.mubr.bf16.mxu0 %v1140_v37  ;;  %v1134_v45 = vld [vmem:[%s1288_s28 + $0x8] ss:$12 sps:$4 sm:$0xff]   ;;  %v1138_v55 = vld [vmem:[%s1288_s28] ss:$12 sps:$4 sm:$0xff]  }
  0x26   : > { %s1286_s27 = scalar_lea.vmem %s1381_s3, %s1002_s22  ;;  %s1293_s15 = scalar_lea.vmem %s1379_s1, %s1001_s23 }
  0x27   : > { %v1065_v5 = vld [vmem:[%s1293_s15 + $0x74] ss:$8 sps:$4 sm:$0xff]   ;;  %v1067_v6 = vld [vmem:[%s1293_s15 + $0x70] ss:$8 sps:$4 sm:$0xff]   ;;  %v1068_v7 = vld [vmem:[%s1293_s15 + $0x64] ss:$8 sps:$4 sm:$0xff]  }
  0x28   : > { %619 = vmatprep.subr.bf16.mxu0 %v1065_v5  ;;  %v1070_v8 = vld [vmem:[%s1293_s15 + $0x60] ss:$8 sps:$4 sm:$0xff]   ;;  %v1071_v9 = vld [vmem:[%s1293_s15 + $0x54] ss:$8 sps:$4 sm:$0xff]   ;;  %v1073_v10 = vld [vmem:[%s1293_s15 + $0x50] ss:$8 sps:$4 sm:$0xff]  }
  0x29   : > { %620 = vmatpush1.bf16.msra.mxu0 %v1067_v6  ;;  %v1074_v11 = vld [vmem:[%s1293_s15 + $0x44] ss:$8 sps:$4 sm:$0xff]   ;;  %v1086_v12 = vld [vmem:[%s1293_s15 + $0x174] ss:$8 sps:$4 sm:$0xff]   ;;  %v1088_v13 = vld [vmem:[%s1293_s15 + $0x170] ss:$8 sps:$4 sm:$0xff]  }
  0x2a   : > { %621 = vmatprep.subr.bf16.mxu0 %v1068_v7  ;;  %v1076_v14 = vld [vmem:[%s1293_s15 + $0x40] ss:$8 sps:$4 sm:$0xff]   ;;  %v1077_v15 = vld [vmem:[%s1293_s15 + $0x34] ss:$8 sps:$4 sm:$0xff]   ;;  %662 = vmatprep.subr.bf16.mxu1 %v1086_v12  ;;  %v1092_v16 = vld [vmem:[%s1293_s15 + $0x164] ss:$8 sps:$4 sm:$0xff]  }
  0x2b   : > { %663 = vmatpush1.bf16.msra.mxu1 %v1088_v13  ;;  %v1094_v17 = vld [vmem:[%s1293_s15 + $0x160] ss:$8 sps:$4 sm:$0xff]   ;;  %v1079_v18 = vld [vmem:[%s1293_s15 + $0x30] ss:$8 sps:$4 sm:$0xff]   ;;  %v1098_v19 = vld [vmem:[%s1293_s15 + $0x154] ss:$8 sps:$4 sm:$0xff]  }
  0x2c   : > { %664 = vmatprep.subr.bf16.mxu1 %v1092_v16  ;;  %v1080_v20 = vld [vmem:[%s1293_s15 + $0x24] ss:$8 sps:$4 sm:$0xff]   ;;  %v1100_v21 = vld [vmem:[%s1293_s15 + $0x150] ss:$8 sps:$4 sm:$0xff]   ;;  %v1082_v23 = vld [vmem:[%s1293_s15 + $0x20] ss:$8 sps:$4 sm:$0xff]  }
  0x2d   : > { %622 = vmatpush1.bf16.msra.mxu0 %v1070_v8  ;;  %v1104_v22 = vld [vmem:[%s1293_s15 + $0x144] ss:$8 sps:$4 sm:$0xff]   ;;  %v1083_v24 = vld [vmem:[%s1293_s15 + $0x14] ss:$8 sps:$4 sm:$0xff]   ;;  %v1106_v25 = vld [vmem:[%s1293_s15 + $0x140] ss:$8 sps:$4 sm:$0xff]  }
  0x2e   : > { %623 = vmatprep.subr.bf16.mxu0 %v1071_v9  ;;  %v1110_v26 = vld [vmem:[%s1293_s15 + $0x134] ss:$8 sps:$4 sm:$0xff]   ;;  %v1085_v27 = vld [vmem:[%s1293_s15 + $0x10] ss:$8 sps:$4 sm:$0xff]   ;;  %v1089_v28 = vld [vmem:[%s1293_s15 + $0x4] ss:$8 sps:$4 sm:$0xff]  }
  0x2f   : > { %665 = vmatpush1.bf16.msra.mxu1 %v1094_v17  ;;  %v1112_v29 = vld [vmem:[%s1293_s15 + $0x130] ss:$8 sps:$4 sm:$0xff]   ;;  %v1116_v30 = vld [vmem:[%s1293_s15 + $0x124] ss:$8 sps:$4 sm:$0xff]   ;;  %v1091_v31 = vld [vmem:[%s1293_s15] ss:$8 sps:$4 sm:$0xff]  }
  0x30   : > { %666 = vmatprep.subr.bf16.mxu1 %v1098_v19  ;;  %v1095_v32 = vld [vmem:[%s1293_s15 + $0xf4] ss:$8 sps:$4 sm:$0xff]   ;;  %v1118_v33 = vld [vmem:[%s1293_s15 + $0x120] ss:$8 sps:$4 sm:$0xff]   ;;  %v1097_v35 = vld [vmem:[%s1293_s15 + $0xf0] ss:$8 sps:$4 sm:$0xff]  }
  0x31   : > { %624 = vmatpush1.bf16.msra.mxu0 %v1073_v10  ;;  %v1122_v34 = vld [vmem:[%s1293_s15 + $0x114] ss:$8 sps:$4 sm:$0xff]   ;;  %v1101_v36 = vld [vmem:[%s1293_s15 + $0xe4] ss:$8 sps:$4 sm:$0xff]   ;;  %v1124_v38 = vld [vmem:[%s1293_s15 + $0x110] ss:$8 sps:$4 sm:$0xff]  }
  0x32   : > { %625 = vmatprep.subr.bf16.mxu0 %v1074_v11  ;;  %v1128_v39 = vld [vmem:[%s1293_s15 + $0x104] ss:$8 sps:$4 sm:$0xff]   ;;  %v1103_v40 = vld [vmem:[%s1293_s15 + $0xe0] ss:$8 sps:$4 sm:$0xff]   ;;  %v1107_v41 = vld [vmem:[%s1293_s15 + $0xd4] ss:$8 sps:$4 sm:$0xff]  }
  0x33   : > { %667 = vmatpush1.bf16.msra.mxu1 %v1100_v21  ;;  %v1130_v42 = vld [vmem:[%s1293_s15 + $0x100] ss:$8 sps:$4 sm:$0xff]   ;;  %v1109_v43 = vld [vmem:[%s1293_s15 + $0xd0] ss:$8 sps:$4 sm:$0xff]   ;;  %v1113_v44 = vld [vmem:[%s1293_s15 + $0xc4] ss:$8 sps:$4 sm:$0xff]  }
  0x34   : > { %668 = vmatprep.subr.bf16.mxu1 %v1104_v22  ;;  %v1115_v46 = vld [vmem:[%s1293_s15 + $0xc0] ss:$8 sps:$4 sm:$0xff]   ;;  %v1119_v47 = vld [vmem:[%s1293_s15 + $0xb4] ss:$8 sps:$4 sm:$0xff]   ;;  %v1121_v48 = vld [vmem:[%s1293_s15 + $0xb0] ss:$8 sps:$4 sm:$0xff]  }
  0x35   : > { %626 = vmatpush1.bf16.msra.mxu0 %v1076_v14  ;;  %v1125_v49 = vld [vmem:[%s1293_s15 + $0xa4] ss:$8 sps:$4 sm:$0xff]   ;;  %v1127_v50 = vld [vmem:[%s1293_s15 + $0xa0] ss:$8 sps:$4 sm:$0xff]   ;;  %v1131_v51 = vld [vmem:[%s1293_s15 + $0x94] ss:$8 sps:$4 sm:$0xff]  }
  0x36   : > { %627 = vmatprep.subr.bf16.mxu0 %v1077_v15  ;;  %v1133_v52 = vld [vmem:[%s1293_s15 + $0x90] ss:$8 sps:$4 sm:$0xff]   ;;  %v1135_v53 = vld [vmem:[%s1293_s15 + $0x84] ss:$8 sps:$4 sm:$0xff]   ;;  %v1137_v54 = vld [vmem:[%s1293_s15 + $0x80] ss:$8 sps:$4 sm:$0xff]  }
  0x37   : > { %669 = vmatpush1.bf16.msra.mxu1 %v1106_v25 }
  0x38   : > { %670 = vmatprep.subr.bf16.mxu1 %v1110_v26 }
  0x39   : > { %628 = vmatpush1.bf16.msra.mxu0 %v1079_v18 }
  0x3a   : > { %629 = vmatprep.subr.bf16.mxu0 %v1080_v20 }
  0x3b   : > { %671 = vmatpush1.bf16.msra.mxu1 %v1112_v29 }
  0x3c   : > { %672 = vmatprep.subr.bf16.mxu1 %v1116_v30 }
  0x3d   : > { %630 = vmatpush1.bf16.msra.mxu0 %v1082_v23 }
  0x3e   : > { %631 = vmatprep.subr.bf16.mxu0 %v1083_v24 }
  0x3f   : > { %673 = vmatpush1.bf16.msra.mxu1 %v1118_v33 }
  0x40   : > { %674 = vmatprep.subr.bf16.mxu1 %v1122_v34 }
  0x41   : > { %632 = vmatpush1.bf16.msra.mxu0 %v1085_v27 }
  0x42   : > { %633 = vmatprep.subr.bf16.mxu0 %v1089_v28 }
  0x43   : > { %675 = vmatpush1.bf16.msra.mxu1 %v1124_v38 }
  0x44   : > { %676 = vmatprep.subr.bf16.mxu1 %v1128_v39 }
  0x45   : > { %634 = vmatpush1.bf16.msra.mxu0 %v1091_v31 }
  0x46   : > { %635 = vmatprep.subr.bf16.mxu0 %v1095_v32 }
  0x47   : > { %677 = vmatpush1.bf16.msra.mxu1 %v1130_v42 }
  0x49   : > { %636 = vmatpush2.bf16.msra.mxu0 %v1097_v35 }
  0x4a   : > { %637 = vmatprep.subr.bf16.mxu0 %v1101_v36  ;;  %695 = vmatmul.mubr.bf16.vlgmr.msra.gmra.mxu1 %v1134_v45 }
  0x4d   : > { %638 = vmatpush2.bf16.msra.mxu0 %v1103_v40 }
  0x4e   : > { %639 = vmatprep.subr.bf16.mxu0 %v1107_v41 }
  0x51   : > { %640 = vmatpush2.bf16.msra.mxu0 %v1109_v43 }
  0x52   : > { %641 = vmatprep.subr.bf16.mxu0 %v1113_v44 }
  0x55   : > { %642 = vmatpush2.bf16.msra.mxu0 %v1115_v46 }
  0x56   : > { %643 = vmatprep.subr.bf16.mxu0 %v1119_v47 }
  0x59   : > { %644 = vmatpush2.bf16.msra.mxu0 %v1121_v48 }
  0x5a   : > { %645 = vmatprep.subr.bf16.mxu0 %v1125_v49 }
  0x5d   : > { %646 = vmatpush2.bf16.msra.mxu0 %v1127_v50 }
  0x5e   : > { %647 = vmatprep.subr.bf16.mxu0 %v1131_v51 }
  0x61   : > { %648 = vmatpush2.bf16.msra.mxu0 %v1133_v52 }
  0x62   : > { %649 = vmatprep.subr.bf16.mxu0 %v1135_v53 }
  0x65   : > { %650 = vmatpush2.bf16.msra.mxu0 %v1137_v54 }
  0x68   : > { %652 = vmatmul.mubr.bf16.vlgmr.msra.gmra.mxu0 %v1138_v55 }
 0x10a   : > { %v696_v56 = vpop.f32.mrf.mxu1 }
 0x10c   : > { %v698_v57 = vpop.f32.mrf.mxu1 }
 0x10e   : > { %v700_v60 = vpop.f32.mrf.mxu1 }
 0x110   : > { %v702_v1 = vpop.f32.mrf.mxu1 }
 0x128   : > { %v653_v58 = vpop.f32.mrf.mxu0 }
 0x129   : > { %v697_v59 = vadd.f32 %v696_v56, %v653_v58 }
 0x12a   : > { %v655_v61 = vpop.f32.mrf.mxu0 }
 0x12b   : > { %v699_v62 = vadd.f32 %v698_v57, %v655_v61  ;;  %708 = sbr.rel (%p993_p12) target bundleno = 306 (0x132), region = 62 }
 0x12c   : > { %v657_v63 = vpop.f32.mrf.mxu0 }
 0x12d   : > { %v701_v0 = vadd.f32 %v700_v60, %v657_v63 }
 0x12e   : > { %v659_v2 = vpop.f32.mrf.mxu0 }
 0x12f   : > { %v703_v3 = vadd.f32 %v702_v1, %v659_v2 }
 0x130   : > { %709 = vst [vmem:[#allocation2 + $0x10] sm:$0xff] %v697_v59  ;;  %710 = vst [vmem:[#allocation2] sm:$0xff] %v699_v62 }
 0x131   : > { %711 = vst [vmem:[#allocation2 + $0x18] sm:$0xff] %v701_v0  ;;  %712 = vst [vmem:[#allocation2 + $0x8] sm:$0xff] %v703_v3 }
 0x132 PF: > { %p994_p13 = scmp.le.s32.totalorder %s1179_s14, 0 }
 0x134   : > { %716 = sbr.rel (%p994_p13) target bundleno = 318 (0x13e), region = 66 }
 0x139   : > { %v717_v4 = vld [vmem:[#allocation2 + $0x10] sm:$0xff]  ;;  %v718_v5 = vld [vmem:[#allocation2] sm:$0xff]  ;;  %v719_v6 = vld [vmem:[#allocation2 + $0x18] sm:$0xff] }
 0x13a   : > { %v721_v7 = vadd.f32 %v717_v4, %v697_v59  ;;  %v722_v8 = vadd.f32 %v718_v5, %v699_v62  ;;  %v723_v9 = vadd.f32 %v719_v6, %v701_v0  ;;  %v720_v10 = vld [vmem:[#allocation2 + $0x8] sm:$0xff] }
 0x13b   : > { %v724_v11 = vadd.f32 %v720_v10, %v703_v3 }
 0x13c   : > { %725 = vst [vmem:[#allocation2 + $0x10] sm:$0xff] %v721_v7  ;;  %726 = vst [vmem:[#allocation2] sm:$0xff] %v722_v8 }
 0x13d   : > { %727 = vst [vmem:[#allocation2 + $0x18] sm:$0xff] %v723_v9  ;;  %728 = vst [vmem:[#allocation2 + $0x8] sm:$0xff] %v724_v11 }
 0x13e PF: > { %p995_p0 = scmp.ne.s32.totalorder %s1179_s14, 5 }
 0x140   : > { %732 = sbr.rel (%p995_p0) target bundleno = 342 (0x156), region = 70 }
 0x145   : > { %v739_v12 = vlaneseq  ;;  %v737_v14 = vld [vmem:[%s1380_s2] ss:$2 sm:$0x3]  ;;  %v996_v15 = vld [vmem:[%s1380_s2 + $0x1] ss:$2 sm:$0x3] }
 0x146   : > { %v733_v16 = vld [vmem:[#allocation2 + $0x10] sm:$0xff]  ;;  %v734_v19 = vld [vmem:[#allocation2] sm:$0xff]  ;;  %v735_v20 = vld [vmem:[#allocation2 + $0x18] sm:$0xff] }
 0x147   : > { %v740_v13 = vshrl.u32 %v739_v12, 7  ;;  %v736_v21 = vld [vmem:[#allocation2 + $0x8] sm:$0xff] }
 0x149   : > { %v741_v17 = vsub.s32 0, %v740_v13  ;;  %v745_v18 = vsub.s32 1, %v740_v13 }
 0x14b   : > { %v742_v22 = vrot.slane %v737_v14, %v741_v17  ;;  %v746_v23 = vrot.slane %v737_v14, %v745_v18  ;;  %v759_v24 = vrot.slane %v996_v15, %v741_v17  ;;  %v763_v25 = vrot.slane %v996_v15, %v745_v18 }
 0x14d   : > { %v749_v26 = vmul.f32 %v742_v22, %v733_v16  ;;  %v750_v27 = vmul.f32 %v746_v23, %v734_v19  ;;  %v751_v28 = vmul.f32 %v742_v22, %v735_v20  ;;  %v752_v29 = vmul.f32 %v746_v23, %v736_v21 }
 0x14f   : > { %v766_v30 = vadd.f32 %v759_v24, %v749_v26  ;;  %v767_v31 = vadd.f32 %v763_v25, %v750_v27  ;;  %v768_v32 = vadd.f32 %v759_v24, %v751_v28  ;;  %v769_v33 = vadd.f32 %v763_v25, %v752_v29 }
 0x151   : > { %v770_v34 = vmax.f32 %v766_v30, 0.0  ;;  %v771_v35 = vmax.f32 %v767_v31, 0.0  ;;  %v772_v36 = vmax.f32 %v768_v32, 0.0  ;;  %v773_v37 = vmax.f32 %v769_v33, 0.0 }
 0x153   : > { %v1003_v38 = vpack.c.bf16 %v771_v35, %v770_v34  ;;  %v1004_v39 = vpack.c.bf16 %v773_v37, %v772_v36 }
 0x155   : > { %786 = vst [vmem:[%s1286_s27] sm:$0xff] %v1003_v38  ;;  %787 = vst [vmem:[%s1286_s27 + $0x8] sm:$0xff] %v1004_v39 }
 0x156 PF: > { %s13_s18 = sadd.s32 1, %s1195_s18   ;;  %s1382_s12 = smov %s1175_s13 }
 0x157   : > { %p10_p1 = scmp.ge.s32.totalorder %s13_s18, 14   ;;  %s1383_s13 = smov %s1269_s25 }
 0x158   : > { %s1384_s14 = smov %s1187_s16  ;;  %s1385_s15 = smov %s1191_s17 }
 0x159   : > { %s1386_s16 = smov %s1389_s19  ;;  %s1387_s17 = smov %s1393_s20 }
 0x15a   :  { %12 = sbr.rel (!%p10_p1) target bundleno = 4 (0x4), region = 118 }

// kernel: maps_in_forward.20
= control target key start
LH: loop header
LB: loop body
LE: loop exit
PB: predicated region body
PF: predicated region fallthrough
CT: control target
= control target key end

     0   :  { %s1214_s12 = smov 0   ;;  %s1216_s13 = smov 0   ;;  %s1374_s0 = inlined_call_operand.vmem [shape: bf16[32,2304], index: 0, kind: input, shape index: {}]   ;;  %s1375_s1 = inlined_call_operand.vmem [shape: bf16[2304,256], index: 1, kind: input, shape index: {}]   ;;  %s1376_s2 = inlined_call_operand.vmem [shape: f32[2,256], index: 2, kind: input, shape index: {}]   ;;  %s1377_s3 = inlined_call_operand.vmem [shape: bf16[32,256], index: 3, kind: output, shape index: {}]  }
   0x1   :  { %s1218_s14 = smov 0   ;;  %s1220_s15 = smov 0  }
   0x2   :  { %s1222_s16 = smov 0   ;;  %s1224_s17 = smov 0  }
   0x3   :  { %s1226_s18 = smov 0  }
   0x4 LB: > { %s25_s19 = sadd.s32 1, %s1183_s16  ;;  %s32_s20 = sadd.s32 1, %s1187_s17  ;;  %s1191_s18 = sphi %s1226_s18, %s13_s18   ;;  %s1187_s17 = sphi %s1224_s17, %s1383_s17   ;;  %s1183_s16 = sphi %s1222_s16, %s1382_s16   ;;  %s1179_s15 = sphi %s1220_s15, %s1381_s15   ;;  %s1175_s14 = sphi %s1218_s14, %s1380_s14   ;;  %s1171_s13 = sphi %s1216_s13, %s1379_s13   ;;  %s1167_s12 = sphi %s1214_s12, %s1378_s12  }
   0x5   : > { %p26_p0 = scmp.ge.s32.totalorder %s25_s19, 6  ;;  %p48_p1 = scmp.ne.s32.totalorder %s1171_s13, %s1167_s12 }
   0x6   : > { %p49_p2 = scmp.eq.s32.totalorder %s1191_s18, 0  ;;  %s41_s24 = sadd.s32 1, %s1171_s13 }
   0x7   : > { %s1385_s19 = smov (%p26_p0, %s25_s19), 0  ;;  %s1387_s20 = smov (!%p26_p0, %s32_s20), %s1187_s17 }
   0x8   : > { %p50_p3 = por %p49_p2, %p48_p1  ;;  %p34_p4 = scmp.ge.s32.totalorder %s1387_s20, 2 }
   0x9   : > { %s37_s21 = ssub.s32 %s1183_s16, %s1385_s19  ;;  %p924_p6 = scmp.ge.s32.totalorder %s1191_s18, 12 }
   0xa   : > { %s1389_s20 = smov (%p34_p4, %s1387_s20), 0 }
   0xb   : > { %s36_s22 = ssub.s32 %s1187_s17, %s1389_s20  ;;  %165 = sbr.rel (%p924_p6) target bundleno = 27 (0x1b), region = 20 }
   0xc   : > { %s38_s23 = sor.u32 %s37_s21, %s36_s22 }
   0xd   : > { %p39_p5 = scmp.eq.s32.totalorder %s38_s23, 0 }
   0xf   : > { %s1265_s25 = scalar_select %p39_p5, %s1171_s13, %s41_s24  }
  0x10   : > { %168 = sbr.rel (!%p50_p3) target bundleno = 27 (0x1b), region = 24  ;;  %s170_s26 = sand.u32 (%p50_p3), 1, %s1171_s13  }
  0x11   : > { %s174_s27 = smul.u32 (%p50_p3), 3, %s1183_s16 }
  0x12   : > { %s1001_s28 = smul.u32 (%p50_p3), 24, %s170_s26 }
  0x13   : > { %s1002_s29 = smul.u32 (%p50_p3), 36, %s1187_s17 }
  0x14   : > { %s172_s8 = scalar_lea.vmem (%p50_p3), [#allocation3], %s1001_s28 }
  0x15   : > { %s176_s30 = sadd.s32 %s1002_s29, %s174_s27 }
  0x16   : > { %s927_s4 = sshll.u32 %s176_s30, 2 }
  0x17   : > { %s178_s7 = scalar_lea.vmem %s1374_s0, %s927_s4 }
  0x18   : > { %v193_v0 = vld [vmem:[%s178_s7] sm:$0xff]  ;;  %v195_v1 = vld [vmem:[%s178_s7 + $0x48] sm:$0xff]  ;;  %v930_v3 = vld [vmem:[%s178_s7 + $0x50] sm:$0xf] }
  0x19   : > { %v928_v2 = vld [vmem:[%s178_s7 + $0x8] sm:$0xf]  ;;  %194 = vst [vmem:[%s172_s8] sm:$0xff] %v193_v0  ;;  %196 = vst [vmem:[%s172_s8 + $0xc] sm:$0xff] %v195_v1 }
  0x1a   : > { %929 = vst [vmem:[%s172_s8 + $0x8] sm:$0xf] %v928_v2  ;;  %931 = vst [vmem:[%s172_s8 + $0x14] sm:$0xf] %v930_v3 }
  0x1b PF: > { %p932_p7 = scmp.ge.s32.totalorder %s1191_s18, 1  ;;  %p228_p8 = scmp.lt.s32.totalorder %s1191_s18, 13 }
  0x1d   : > { %p229_p9 = pnand %p932_p7, %p228_p8 }
  0x1e   : > { %s280_s9 = smul.u32 (!%p229_p9), 48, %s1175_s14  ;;  %s935_s10 = sshll.u32 (!%p229_p9), %s1179_s15, 1 }
  0x1f   : > { %232 = sbr.rel (%p229_p9) target bundleno = 340 (0x154), region = 54  ;;  %p300_p10 = scmp.lt.s32.totalorder (!%p229_p9), %s935_s10, 3 }
  0x20   : > { %s235_s11 = sand.u32 (!%p229_p9), 1, %s1167_s12   ;;  %p282_p11 = scmp.lt.s32.totalorder (!%p229_p9), %s280_s9, 287 }
  0x21   : > { %s1003_s21 = smul.u32 (!%p229_p9), 24, %s235_s11  ;;  %p989_p12 = scmp.ne.s32.totalorder (!%p229_p9), %s1175_s14, 0 }
  0x23   : > { %s1284_s28 = scalar_lea.vmem (!%p229_p9), [#allocation3], %s1003_s21 }
  0x24   : > { %v1193_v4 = vmov 0   ;;  %s1391_s10 = smov (!%p300_p10, %s935_s10), 3  ;;  %s1393_s9 = smov (!%p282_p11, %s280_s9), 287  ;;  %v1136_v37 = vld [vmem:[%s1284_s28 + $0x4] ss:$12 sps:$4 sm:$0xff]  }
  0x25   : > { %694 = vmatprep.mubr.bf16.mxu1 %v1193_v4  ;;  %s998_s22 = sshll.u32 %s1391_s10, 3  ;;  %s997_s23 = sshll.u32 %s1393_s9, 3  ;;  %651 = vmatprep.mubr.bf16.mxu0 %v1136_v37  ;;  %v1130_v45 = vld [vmem:[%s1284_s28 + $0x8] ss:$12 sps:$4 sm:$0xff]   ;;  %v1134_v55 = vld [vmem:[%s1284_s28] ss:$12 sps:$4 sm:$0xff]  }
  0x26   : > { %s1282_s27 = scalar_lea.vmem %s1377_s3, %s998_s22  ;;  %s1289_s15 = scalar_lea.vmem %s1375_s1, %s997_s23 }
  0x27   : > { %v1061_v5 = vld [vmem:[%s1289_s15 + $0x74] ss:$8 sps:$4 sm:$0xff]   ;;  %v1063_v6 = vld [vmem:[%s1289_s15 + $0x70] ss:$8 sps:$4 sm:$0xff]   ;;  %v1064_v7 = vld [vmem:[%s1289_s15 + $0x64] ss:$8 sps:$4 sm:$0xff]  }
  0x28   : > { %619 = vmatprep.subr.bf16.mxu0 %v1061_v5  ;;  %v1066_v8 = vld [vmem:[%s1289_s15 + $0x60] ss:$8 sps:$4 sm:$0xff]   ;;  %v1067_v9 = vld [vmem:[%s1289_s15 + $0x54] ss:$8 sps:$4 sm:$0xff]   ;;  %v1069_v10 = vld [vmem:[%s1289_s15 + $0x50] ss:$8 sps:$4 sm:$0xff]  }
  0x29   : > { %620 = vmatpush1.bf16.msra.mxu0 %v1063_v6  ;;  %v1070_v11 = vld [vmem:[%s1289_s15 + $0x44] ss:$8 sps:$4 sm:$0xff]   ;;  %v1082_v12 = vld [vmem:[%s1289_s15 + $0x174] ss:$8 sps:$4 sm:$0xff]   ;;  %v1084_v13 = vld [vmem:[%s1289_s15 + $0x170] ss:$8 sps:$4 sm:$0xff]  }
  0x2a   : > { %621 = vmatprep.subr.bf16.mxu0 %v1064_v7  ;;  %v1072_v14 = vld [vmem:[%s1289_s15 + $0x40] ss:$8 sps:$4 sm:$0xff]   ;;  %v1073_v15 = vld [vmem:[%s1289_s15 + $0x34] ss:$8 sps:$4 sm:$0xff]   ;;  %662 = vmatprep.subr.bf16.mxu1 %v1082_v12  ;;  %v1088_v16 = vld [vmem:[%s1289_s15 + $0x164] ss:$8 sps:$4 sm:$0xff]  }
  0x2b   : > { %663 = vmatpush1.bf16.msra.mxu1 %v1084_v13  ;;  %v1090_v17 = vld [vmem:[%s1289_s15 + $0x160] ss:$8 sps:$4 sm:$0xff]   ;;  %v1075_v18 = vld [vmem:[%s1289_s15 + $0x30] ss:$8 sps:$4 sm:$0xff]   ;;  %v1094_v19 = vld [vmem:[%s1289_s15 + $0x154] ss:$8 sps:$4 sm:$0xff]  }
  0x2c   : > { %664 = vmatprep.subr.bf16.mxu1 %v1088_v16  ;;  %v1076_v20 = vld [vmem:[%s1289_s15 + $0x24] ss:$8 sps:$4 sm:$0xff]   ;;  %v1096_v21 = vld [vmem:[%s1289_s15 + $0x150] ss:$8 sps:$4 sm:$0xff]   ;;  %v1078_v23 = vld [vmem:[%s1289_s15 + $0x20] ss:$8 sps:$4 sm:$0xff]  }
  0x2d   : > { %622 = vmatpush1.bf16.msra.mxu0 %v1066_v8  ;;  %v1100_v22 = vld [vmem:[%s1289_s15 + $0x144] ss:$8 sps:$4 sm:$0xff]   ;;  %v1079_v24 = vld [vmem:[%s1289_s15 + $0x14] ss:$8 sps:$4 sm:$0xff]   ;;  %v1102_v25 = vld [vmem:[%s1289_s15 + $0x140] ss:$8 sps:$4 sm:$0xff]  }
  0x2e   : > { %623 = vmatprep.subr.bf16.mxu0 %v1067_v9  ;;  %v1106_v26 = vld [vmem:[%s1289_s15 + $0x134] ss:$8 sps:$4 sm:$0xff]   ;;  %v1081_v27 = vld [vmem:[%s1289_s15 + $0x10] ss:$8 sps:$4 sm:$0xff]   ;;  %v1085_v28 = vld [vmem:[%s1289_s15 + $0x4] ss:$8 sps:$4 sm:$0xff]  }
  0x2f   : > { %665 = vmatpush1.bf16.msra.mxu1 %v1090_v17  ;;  %v1108_v29 = vld [vmem:[%s1289_s15 + $0x130] ss:$8 sps:$4 sm:$0xff]   ;;  %v1112_v30 = vld [vmem:[%s1289_s15 + $0x124] ss:$8 sps:$4 sm:$0xff]   ;;  %v1087_v31 = vld [vmem:[%s1289_s15] ss:$8 sps:$4 sm:$0xff]  }
  0x30   : > { %666 = vmatprep.subr.bf16.mxu1 %v1094_v19  ;;  %v1091_v32 = vld [vmem:[%s1289_s15 + $0xf4] ss:$8 sps:$4 sm:$0xff]   ;;  %v1114_v33 = vld [vmem:[%s1289_s15 + $0x120] ss:$8 sps:$4 sm:$0xff]   ;;  %v1093_v35 = vld [vmem:[%s1289_s15 + $0xf0] ss:$8 sps:$4 sm:$0xff]  }
  0x31   : > { %624 = vmatpush1.bf16.msra.mxu0 %v1069_v10  ;;  %v1118_v34 = vld [vmem:[%s1289_s15 + $0x114] ss:$8 sps:$4 sm:$0xff]   ;;  %v1097_v36 = vld [vmem:[%s1289_s15 + $0xe4] ss:$8 sps:$4 sm:$0xff]   ;;  %v1120_v38 = vld [vmem:[%s1289_s15 + $0x110] ss:$8 sps:$4 sm:$0xff]  }
  0x32   : > { %625 = vmatprep.subr.bf16.mxu0 %v1070_v11  ;;  %v1124_v39 = vld [vmem:[%s1289_s15 + $0x104] ss:$8 sps:$4 sm:$0xff]   ;;  %v1099_v40 = vld [vmem:[%s1289_s15 + $0xe0] ss:$8 sps:$4 sm:$0xff]   ;;  %v1103_v41 = vld [vmem:[%s1289_s15 + $0xd4] ss:$8 sps:$4 sm:$0xff]  }
  0x33   : > { %667 = vmatpush1.bf16.msra.mxu1 %v1096_v21  ;;  %v1126_v42 = vld [vmem:[%s1289_s15 + $0x100] ss:$8 sps:$4 sm:$0xff]   ;;  %v1105_v43 = vld [vmem:[%s1289_s15 + $0xd0] ss:$8 sps:$4 sm:$0xff]   ;;  %v1109_v44 = vld [vmem:[%s1289_s15 + $0xc4] ss:$8 sps:$4 sm:$0xff]  }
  0x34   : > { %668 = vmatprep.subr.bf16.mxu1 %v1100_v22  ;;  %v1111_v46 = vld [vmem:[%s1289_s15 + $0xc0] ss:$8 sps:$4 sm:$0xff]   ;;  %v1115_v47 = vld [vmem:[%s1289_s15 + $0xb4] ss:$8 sps:$4 sm:$0xff]   ;;  %v1117_v48 = vld [vmem:[%s1289_s15 + $0xb0] ss:$8 sps:$4 sm:$0xff]  }
  0x35   : > { %626 = vmatpush1.bf16.msra.mxu0 %v1072_v14  ;;  %v1121_v49 = vld [vmem:[%s1289_s15 + $0xa4] ss:$8 sps:$4 sm:$0xff]   ;;  %v1123_v50 = vld [vmem:[%s1289_s15 + $0xa0] ss:$8 sps:$4 sm:$0xff]   ;;  %v1127_v51 = vld [vmem:[%s1289_s15 + $0x94] ss:$8 sps:$4 sm:$0xff]  }
  0x36   : > { %627 = vmatprep.subr.bf16.mxu0 %v1073_v15  ;;  %v1129_v52 = vld [vmem:[%s1289_s15 + $0x90] ss:$8 sps:$4 sm:$0xff]   ;;  %v1131_v53 = vld [vmem:[%s1289_s15 + $0x84] ss:$8 sps:$4 sm:$0xff]   ;;  %v1133_v54 = vld [vmem:[%s1289_s15 + $0x80] ss:$8 sps:$4 sm:$0xff]  }
  0x37   : > { %669 = vmatpush1.bf16.msra.mxu1 %v1102_v25 }
  0x38   : > { %670 = vmatprep.subr.bf16.mxu1 %v1106_v26 }
  0x39   : > { %628 = vmatpush1.bf16.msra.mxu0 %v1075_v18 }
  0x3a   : > { %629 = vmatprep.subr.bf16.mxu0 %v1076_v20 }
  0x3b   : > { %671 = vmatpush1.bf16.msra.mxu1 %v1108_v29 }
  0x3c   : > { %672 = vmatprep.subr.bf16.mxu1 %v1112_v30 }
  0x3d   : > { %630 = vmatpush1.bf16.msra.mxu0 %v1078_v23 }
  0x3e   : > { %631 = vmatprep.subr.bf16.mxu0 %v1079_v24 }
  0x3f   : > { %673 = vmatpush1.bf16.msra.mxu1 %v1114_v33 }
  0x40   : > { %674 = vmatprep.subr.bf16.mxu1 %v1118_v34 }
  0x41   : > { %632 = vmatpush1.bf16.msra.mxu0 %v1081_v27 }
  0x42   : > { %633 = vmatprep.subr.bf16.mxu0 %v1085_v28 }
  0x43   : > { %675 = vmatpush1.bf16.msra.mxu1 %v1120_v38 }
  0x44   : > { %676 = vmatprep.subr.bf16.mxu1 %v1124_v39 }
  0x45   : > { %634 = vmatpush1.bf16.msra.mxu0 %v1087_v31 }
  0x46   : > { %635 = vmatprep.subr.bf16.mxu0 %v1091_v32 }
  0x47   : > { %677 = vmatpush1.bf16.msra.mxu1 %v1126_v42 }
  0x49   : > { %636 = vmatpush2.bf16.msra.mxu0 %v1093_v35 }
  0x4a   : > { %637 = vmatprep.subr.bf16.mxu0 %v1097_v36  ;;  %695 = vmatmul.mubr.bf16.vlgmr.msra.gmra.mxu1 %v1130_v45 }
  0x4d   : > { %638 = vmatpush2.bf16.msra.mxu0 %v1099_v40 }
  0x4e   : > { %639 = vmatprep.subr.bf16.mxu0 %v1103_v41 }
  0x51   : > { %640 = vmatpush2.bf16.msra.mxu0 %v1105_v43 }
  0x52   : > { %641 = vmatprep.subr.bf16.mxu0 %v1109_v44 }
  0x55   : > { %642 = vmatpush2.bf16.msra.mxu0 %v1111_v46 }
  0x56   : > { %643 = vmatprep.subr.bf16.mxu0 %v1115_v47 }
  0x59   : > { %644 = vmatpush2.bf16.msra.mxu0 %v1117_v48 }
  0x5a   : > { %645 = vmatprep.subr.bf16.mxu0 %v1121_v49 }
  0x5d   : > { %646 = vmatpush2.bf16.msra.mxu0 %v1123_v50 }
  0x5e   : > { %647 = vmatprep.subr.bf16.mxu0 %v1127_v51 }
  0x61   : > { %648 = vmatpush2.bf16.msra.mxu0 %v1129_v52 }
  0x62   : > { %649 = vmatprep.subr.bf16.mxu0 %v1131_v53 }
  0x65   : > { %650 = vmatpush2.bf16.msra.mxu0 %v1133_v54 }
  0x68   : > { %652 = vmatmul.mubr.bf16.vlgmr.msra.gmra.mxu0 %v1134_v55 }
 0x10a   : > { %v696_v56 = vpop.f32.mrf.mxu1 }
 0x10c   : > { %v698_v57 = vpop.f32.mrf.mxu1 }
 0x10e   : > { %v700_v60 = vpop.f32.mrf.mxu1 }
 0x110   : > { %v702_v1 = vpop.f32.mrf.mxu1 }
 0x128   : > { %v653_v58 = vpop.f32.mrf.mxu0 }
 0x129   : > { %v697_v59 = vadd.f32 %v696_v56, %v653_v58 }
 0x12a   : > { %v655_v61 = vpop.f32.mrf.mxu0 }
 0x12b   : > { %v699_v62 = vadd.f32 %v698_v57, %v655_v61  ;;  %708 = sbr.rel (%p989_p12) target bundleno = 306 (0x132), region = 62 }
 0x12c   : > { %v657_v63 = vpop.f32.mrf.mxu0 }
 0x12d   : > { %v701_v0 = vadd.f32 %v700_v60, %v657_v63 }
 0x12e   : > { %v659_v2 = vpop.f32.mrf.mxu0 }
 0x12f   : > { %v703_v3 = vadd.f32 %v702_v1, %v659_v2 }
 0x130   : > { %709 = vst [vmem:[#allocation2 + $0x10] sm:$0xff] %v697_v59  ;;  %710 = vst [vmem:[#allocation2] sm:$0xff] %v699_v62 }
 0x131   : > { %711 = vst [vmem:[#allocation2 + $0x18] sm:$0xff] %v701_v0  ;;  %712 = vst [vmem:[#allocation2 + $0x8] sm:$0xff] %v703_v3 }
 0x132 PF: > { %p990_p13 = scmp.le.s32.totalorder %s1175_s14, 0 }
 0x134   : > { %716 = sbr.rel (%p990_p13) target bundleno = 318 (0x13e), region = 66 }
 0x139   : > { %v717_v4 = vld [vmem:[#allocation2 + $0x10] sm:$0xff]  ;;  %v718_v5 = vld [vmem:[#allocation2] sm:$0xff]  ;;  %v719_v6 = vld [vmem:[#allocation2 + $0x18] sm:$0xff] }
 0x13a   : > { %v721_v7 = vadd.f32 %v717_v4, %v697_v59  ;;  %v722_v8 = vadd.f32 %v718_v5, %v699_v62  ;;  %v723_v9 = vadd.f32 %v719_v6, %v701_v0  ;;  %v720_v10 = vld [vmem:[#allocation2 + $0x8] sm:$0xff] }
 0x13b   : > { %v724_v11 = vadd.f32 %v720_v10, %v703_v3 }
 0x13c   : > { %725 = vst [vmem:[#allocation2 + $0x10] sm:$0xff] %v721_v7  ;;  %726 = vst [vmem:[#allocation2] sm:$0xff] %v722_v8 }
 0x13d   : > { %727 = vst [vmem:[#allocation2 + $0x18] sm:$0xff] %v723_v9  ;;  %728 = vst [vmem:[#allocation2 + $0x8] sm:$0xff] %v724_v11 }
 0x13e PF: > { %p991_p0 = scmp.ne.s32.totalorder %s1175_s14, 5 }
 0x140   : > { %732 = sbr.rel (%p991_p0) target bundleno = 340 (0x154), region = 70 }
 0x145   : > { %v739_v12 = vlaneseq  ;;  %v737_v14 = vld [vmem:[%s1376_s2] ss:$2 sm:$0x3]  ;;  %v992_v15 = vld [vmem:[%s1376_s2 + $0x1] ss:$2 sm:$0x3] }
 0x146   : > { %v733_v16 = vld [vmem:[#allocation2 + $0x10] sm:$0xff]  ;;  %v734_v19 = vld [vmem:[#allocation2] sm:$0xff]  ;;  %v735_v20 = vld [vmem:[#allocation2 + $0x18] sm:$0xff] }
 0x147   : > { %v740_v13 = vshrl.u32 %v739_v12, 7  ;;  %v736_v21 = vld [vmem:[#allocation2 + $0x8] sm:$0xff] }
 0x149   : > { %v741_v17 = vsub.s32 0, %v740_v13  ;;  %v745_v18 = vsub.s32 1, %v740_v13 }
 0x14b   : > { %v742_v22 = vrot.slane %v737_v14, %v741_v17  ;;  %v746_v23 = vrot.slane %v737_v14, %v745_v18  ;;  %v759_v24 = vrot.slane %v992_v15, %v741_v17  ;;  %v763_v25 = vrot.slane %v992_v15, %v745_v18 }
 0x14d   : > { %v749_v26 = vmul.f32 %v742_v22, %v733_v16  ;;  %v750_v27 = vmul.f32 %v746_v23, %v734_v19  ;;  %v751_v28 = vmul.f32 %v742_v22, %v735_v20  ;;  %v752_v29 = vmul.f32 %v746_v23, %v736_v21 }
 0x14f   : > { %v766_v30 = vadd.f32 %v759_v24, %v749_v26  ;;  %v767_v31 = vadd.f32 %v763_v25, %v750_v27  ;;  %v768_v32 = vadd.f32 %v759_v24, %v751_v28  ;;  %v769_v33 = vadd.f32 %v763_v25, %v752_v29 }
 0x151   : > { %v999_v34 = vpack.c.bf16 %v767_v31, %v766_v30  ;;  %v1000_v35 = vpack.c.bf16 %v769_v33, %v768_v32 }
 0x153   : > { %782 = vst [vmem:[%s1282_s27] sm:$0xff] %v999_v34  ;;  %783 = vst [vmem:[%s1282_s27 + $0x8] sm:$0xff] %v1000_v35 }
 0x154 PF: > { %s13_s18 = sadd.s32 1, %s1191_s18   ;;  %s1378_s12 = smov %s1171_s13 }
 0x155   : > { %p10_p1 = scmp.ge.s32.totalorder %s13_s18, 14   ;;  %s1379_s13 = smov %s1265_s25 }
 0x156   : > { %s1380_s14 = smov %s1183_s16  ;;  %s1381_s15 = smov %s1187_s17 }
 0x157   : > { %s1382_s16 = smov %s1385_s19  ;;  %s1383_s17 = smov %s1389_s20 }
 0x158   :  { %12 = sbr.rel (!%p10_p1) target bundleno = 4 (0x4), region = 118 }

// kernel: maps_in_forward.27
= control target key start
LH: loop header
LB: loop body
LE: loop exit
PB: predicated region body
PF: predicated region fallthrough
CT: control target
= control target key end

     0   :  { %s1253_s12 = smov 0   ;;  %s1255_s13 = smov 0   ;;  %s1497_s0 = inlined_call_operand.vmem [shape: bf16[32,512], index: 0, kind: input, shape index: {}]   ;;  %s1498_s1 = inlined_call_operand.vmem [shape: bf16[512,256], index: 1, kind: input, shape index: {}]   ;;  %s1499_s2 = inlined_call_operand.vmem [shape: f32[2,256], index: 2, kind: input, shape index: {}]   ;;  %s1500_s3 = inlined_call_operand.vmem [shape: bf16[32,256], index: 3, kind: output, shape index: {}]  }
   0x1   :  { %s1257_s14 = smov 0  }
   0x2 LB: > { %s32_s15 = sadd.s32 1, %s1227_s13  ;;  %p999_p0 = scmp.ge.s32.totalorder %s1231_s14, 1  ;;  %s1231_s14 = sphi %s1257_s14, %s13_s14   ;;  %s1227_s13 = sphi %s1255_s13, %s1502_s13   ;;  %s1223_s12 = sphi %s1253_s12, %s1501_s12  }
   0x3   : > { %p34_p1 = scmp.ge.s32.totalorder %s32_s15, 2  ;;  %p197_p2 = scmp.lt.s32.totalorder %s1231_s14, 3 }
   0x5   : > { %s1504_s15 = smov (%p34_p1, %s32_s15), 0  ;;  %p198_p3 = pnand %p999_p0, %p197_p2 }
   0x6   : > { %s1000_s30 = sshll.u32 (!%p198_p3), %s1223_s12, 1 }
   0x7   : > { %201 = sbr.rel (%p198_p3) target bundleno = 288 (0x120), region = 32  ;;  %p248_p4 = scmp.lt.s32.totalorder (!%p198_p3), %s1000_s30, 3 }
   0xc   : > { %v1107_v0 = vld [vmem:[%s1498_s1 + $0x74] ss:$8 sps:$4 sm:$0xff]   ;;  %v1111_v2 = vld [vmem:[%s1498_s1 + $0x70] ss:$8 sps:$4 sm:$0xff]   ;;  %v1113_v4 = vld [vmem:[%s1498_s1 + $0x64] ss:$8 sps:$4 sm:$0xff]  }
   0xd   : > { %v1109_v1 = vld [vmem:[%s1498_s1 + $0x174] ss:$8 sps:$4 sm:$0xff]   ;;  %696 = vmatprep.subr.bf16.mxu0 %v1107_v0  ;;  %v1112_v3 = vld [vmem:[%s1498_s1 + $0x170] ss:$8 sps:$4 sm:$0xff]   ;;  %v1115_v5 = vld [vmem:[%s1498_s1 + $0x164] ss:$8 sps:$4 sm:$0xff]  }
   0xe   : > { %739 = vmatprep.subr.bf16.mxu1 %v1109_v1  ;;  %697 = vmatpush1.bf16.msra.mxu0 %v1111_v2  ;;  %v1117_v6 = vld [vmem:[%s1498_s1 + $0x60] ss:$8 sps:$4 sm:$0xff]   ;;  %v1119_v8 = vld [vmem:[%s1498_s1 + $0x54] ss:$8 sps:$4 sm:$0xff]   ;;  %v1123_v10 = vld [vmem:[%s1498_s1 + $0x50] ss:$8 sps:$4 sm:$0xff]  }
   0xf   : > { %740 = vmatpush1.bf16.msra.mxu1 %v1112_v3  ;;  %698 = vmatprep.subr.bf16.mxu0 %v1113_v4  ;;  %v1118_v7 = vld [vmem:[%s1498_s1 + $0x160] ss:$8 sps:$4 sm:$0xff]   ;;  %v1121_v9 = vld [vmem:[%s1498_s1 + $0x154] ss:$8 sps:$4 sm:$0xff]   ;;  %v1124_v11 = vld [vmem:[%s1498_s1 + $0x150] ss:$8 sps:$4 sm:$0xff]   ;;  %v815_v4 = vlaneseq }
  0x10   : > { %741 = vmatprep.subr.bf16.mxu1 %v1115_v5  ;;  %v1125_v12 = vld [vmem:[%s1498_s1 + $0x44] ss:$8 sps:$4 sm:$0xff]   ;;  %v1129_v14 = vld [vmem:[%s1498_s1 + $0x40] ss:$8 sps:$4 sm:$0xff]   ;;  %v1131_v16 = vld [vmem:[%s1498_s1 + $0x34] ss:$8 sps:$4 sm:$0xff]  }
  0x11   : > { %v1127_v13 = vld [vmem:[%s1498_s1 + $0x144] ss:$8 sps:$4 sm:$0xff]   ;;  %v1130_v15 = vld [vmem:[%s1498_s1 + $0x140] ss:$8 sps:$4 sm:$0xff]   ;;  %v1133_v17 = vld [vmem:[%s1498_s1 + $0x134] ss:$8 sps:$4 sm:$0xff]  }
  0x12   : > { %699 = vmatpush1.bf16.msra.mxu0 %v1117_v6  ;;  %v1135_v18 = vld [vmem:[%s1498_s1 + $0x30] ss:$8 sps:$4 sm:$0xff]   ;;  %v1137_v20 = vld [vmem:[%s1498_s1 + $0x24] ss:$8 sps:$4 sm:$0xff]   ;;  %v1141_v22 = vld [vmem:[%s1498_s1 + $0x20] ss:$8 sps:$4 sm:$0xff]  }
  0x13   : > { %742 = vmatpush1.bf16.msra.mxu1 %v1118_v7  ;;  %700 = vmatprep.subr.bf16.mxu0 %v1119_v8  ;;  %v1136_v19 = vld [vmem:[%s1498_s1 + $0x130] ss:$8 sps:$4 sm:$0xff]   ;;  %v1139_v21 = vld [vmem:[%s1498_s1 + $0x124] ss:$8 sps:$4 sm:$0xff]   ;;  %v1142_v23 = vld [vmem:[%s1498_s1 + $0x120] ss:$8 sps:$4 sm:$0xff]  }
  0x14   : > { %743 = vmatprep.subr.bf16.mxu1 %v1121_v9  ;;  %v1143_v24 = vld [vmem:[%s1498_s1 + $0x14] ss:$8 sps:$4 sm:$0xff]   ;;  %v1147_v26 = vld [vmem:[%s1498_s1 + $0x10] ss:$8 sps:$4 sm:$0xff]   ;;  %v1149_v28 = vld [vmem:[%s1498_s1 + $0x4] ss:$8 sps:$4 sm:$0xff]  }
  0x15   : > { %v1145_v25 = vld [vmem:[%s1498_s1 + $0x114] ss:$8 sps:$4 sm:$0xff]   ;;  %v1148_v27 = vld [vmem:[%s1498_s1 + $0x110] ss:$8 sps:$4 sm:$0xff]   ;;  %v1151_v29 = vld [vmem:[%s1498_s1 + $0x104] ss:$8 sps:$4 sm:$0xff]  }
  0x16   : > { %701 = vmatpush1.bf16.msra.mxu0 %v1123_v10  ;;  %v1153_v30 = vld [vmem:[%s1498_s1] ss:$8 sps:$4 sm:$0xff]   ;;  %v1155_v32 = vld [vmem:[%s1498_s1 + $0xf4] ss:$8 sps:$4 sm:$0xff]   ;;  %v1159_v34 = vld [vmem:[%s1498_s1 + $0xf0] ss:$8 sps:$4 sm:$0xff]  }
  0x17   : > { %744 = vmatpush1.bf16.msra.mxu1 %v1124_v11  ;;  %702 = vmatprep.subr.bf16.mxu0 %v1125_v12  ;;  %v1154_v31 = vld [vmem:[%s1498_s1 + $0x100] ss:$8 sps:$4 sm:$0xff]   ;;  %v1157_v33 = vld [vmem:[%s1498_s1 + $0x1f4] ss:$8 sps:$4 sm:$0xff]   ;;  %v1160_v35 = vld [vmem:[%s1498_s1 + $0x1f0] ss:$8 sps:$4 sm:$0xff]  }
  0x18   : > { %745 = vmatprep.subr.bf16.mxu1 %v1127_v13  ;;  %v1161_v36 = vld [vmem:[%s1498_s1 + $0xe4] ss:$8 sps:$4 sm:$0xff]   ;;  %s1506_s30 = smov (!%p248_p4, %s1000_s30), 3  ;;  %v1165_v38 = vld [vmem:[%s1498_s1 + $0xe0] ss:$8 sps:$4 sm:$0xff]   ;;  %v816_v5 = vshrl.u32 %v815_v4, 7 }
  0x19   : > { %v1163_v37 = vld [vmem:[%s1498_s1 + $0x1e4] ss:$8 sps:$4 sm:$0xff]   ;;  %v1166_v39 = vld [vmem:[%s1498_s1 + $0x1e0] ss:$8 sps:$4 sm:$0xff]   ;;  %v1167_v40 = vld [vmem:[%s1498_s1 + $0xd4] ss:$8 sps:$4 sm:$0xff]  }
  0x1a   : > { %703 = vmatpush1.bf16.msra.mxu0 %v1129_v14  ;;  %v1169_v41 = vld [vmem:[%s1498_s1 + $0x1d4] ss:$8 sps:$4 sm:$0xff]   ;;  %s1079_s5 = sshll.u32 %s1506_s30, 4  ;;  %v1171_v42 = vld [vmem:[%s1498_s1 + $0xd0] ss:$8 sps:$4 sm:$0xff]   ;;  %v817_v6 = vsub.s32 0, %v816_v5 }
  0x1b   : > { %746 = vmatpush1.bf16.msra.mxu1 %v1130_v15  ;;  %704 = vmatprep.subr.bf16.mxu0 %v1131_v16  ;;  %v1172_v43 = vld [vmem:[%s1498_s1 + $0x1d0] ss:$8 sps:$4 sm:$0xff]   ;;  %v1173_v44 = vld [vmem:[%s1498_s1 + $0xc4] ss:$8 sps:$4 sm:$0xff]   ;;  %s1415_s17 = scalar_lea.vmem %s1497_s0, %s1079_s5  ;;  %v1177_v46 = vld [vmem:[%s1498_s1 + $0xc0] ss:$8 sps:$4 sm:$0xff]  }
  0x1c   : > { %747 = vmatprep.subr.bf16.mxu1 %v1133_v17  ;;  %v1175_v45 = vld [vmem:[%s1498_s1 + $0x1c4] ss:$8 sps:$4 sm:$0xff]   ;;  %v1178_v48 = vld [vmem:[%s1498_s1 + $0x1c0] ss:$8 sps:$4 sm:$0xff]   ;;  %v1179_v49 = vld [vmem:[%s1498_s1 + $0xb4] ss:$8 sps:$4 sm:$0xff]  }
  0x1d   : > { %v1205_v47 = vld [vmem:[%s1415_s17 + $0x4] ss:$16 sps:$4 sm:$0xff]   ;;  %v1208_v51 = vld [vmem:[%s1415_s17 + $0xc] ss:$16 sps:$4 sm:$0xff]   ;;  %v1183_v52 = vld [vmem:[%s1498_s1 + $0xb0] ss:$8 sps:$4 sm:$0xff]  }
  0x1e   : > { %705 = vmatpush1.bf16.msra.mxu0 %v1135_v18  ;;  %v1181_v50 = vld [vmem:[%s1498_s1 + $0x1b4] ss:$8 sps:$4 sm:$0xff]   ;;  %728 = vmatprep.mubr.bf16.mxu0 %v1205_v47  ;;  %v1184_v53 = vld [vmem:[%s1498_s1 + $0x1b0] ss:$8 sps:$4 sm:$0xff]   ;;  %v1185_v54 = vld [vmem:[%s1498_s1 + $0xa4] ss:$8 sps:$4 sm:$0xff]  }
  0x1f   : > { %748 = vmatpush1.bf16.msra.mxu1 %v1136_v19  ;;  %706 = vmatprep.subr.bf16.mxu0 %v1137_v20  ;;  %v1187_v55 = vld [vmem:[%s1498_s1 + $0x1a4] ss:$8 sps:$4 sm:$0xff]   ;;  %v1189_v56 = vld [vmem:[%s1498_s1 + $0xa0] ss:$8 sps:$4 sm:$0xff]   ;;  %v1191_v58 = vld [vmem:[%s1498_s1 + $0x94] ss:$8 sps:$4 sm:$0xff]  }
  0x20   : > { %749 = vmatprep.subr.bf16.mxu1 %v1139_v21  ;;  %771 = vmatprep.mubr.bf16.mxu1 %v1208_v51  ;;  %v1190_v57 = vld [vmem:[%s1498_s1 + $0x1a0] ss:$8 sps:$4 sm:$0xff]   ;;  %v1193_v59 = vld [vmem:[%s1498_s1 + $0x194] ss:$8 sps:$4 sm:$0xff]   ;;  %v1195_v60 = vld [vmem:[%s1498_s1 + $0x90] ss:$8 sps:$4 sm:$0xff]  }
  0x21   : > { %v1196_v61 = vld [vmem:[%s1498_s1 + $0x190] ss:$8 sps:$4 sm:$0xff]   ;;  %v1197_v62 = vld [vmem:[%s1498_s1 + $0x84] ss:$8 sps:$4 sm:$0xff]   ;;  %v1201_v0 = vld [vmem:[%s1498_s1 + $0x80] ss:$8 sps:$4 sm:$0xff]  }
  0x22   : > { %707 = vmatpush1.bf16.msra.mxu0 %v1141_v22  ;;  %v1199_v63 = vld [vmem:[%s1498_s1 + $0x184] ss:$8 sps:$4 sm:$0xff]   ;;  %v1202_v1 = vld [vmem:[%s1498_s1 + $0x180] ss:$8 sps:$4 sm:$0xff]   ;;  %v821_v8 = vsub.s32 1, %v816_v5 }
  0x23   : > { %750 = vmatpush1.bf16.msra.mxu1 %v1142_v23  ;;  %708 = vmatprep.subr.bf16.mxu0 %v1143_v24  ;;  %v1203_v2 = vld [vmem:[%s1415_s17] ss:$16 sps:$4 sm:$0xff]   ;;  %v1206_v3 = vld [vmem:[%s1415_s17 + $0x8] ss:$16 sps:$4 sm:$0xff]   ;;  %s1080_s17 = sshll.u32 %s1506_s30, 3 }
  0x24   : > { %751 = vmatprep.subr.bf16.mxu1 %v1145_v25  ;;  %v813_v7 = vld [vmem:[%s1499_s2] ss:$2 sm:$0x3]  ;;  %v1074_v9 = vld [vmem:[%s1499_s2 + $0x1] ss:$2 sm:$0x3]  ;;  %s285_s18 = scalar_lea.vmem %s1500_s3, %s1080_s17 }
  0x25   : > { %v818_v10 = vrot.slane %v813_v7, %v817_v6  ;;  %v835_v14 = vrot.slane %v1074_v9, %v817_v6  ;;  %v822_v15 = vrot.slane %v813_v7, %v821_v8  ;;  %v839_v20 = vrot.slane %v1074_v9, %v821_v8 }
  0x26   : > { %709 = vmatpush1.bf16.msra.mxu0 %v1147_v26 }
  0x27   : > { %752 = vmatpush1.bf16.msra.mxu1 %v1148_v27  ;;  %710 = vmatprep.subr.bf16.mxu0 %v1149_v28 }
  0x28   : > { %753 = vmatprep.subr.bf16.mxu1 %v1151_v29 }
  0x2a   : > { %711 = vmatpush1.bf16.msra.mxu0 %v1153_v30 }
  0x2b   : > { %754 = vmatpush1.bf16.msra.mxu1 %v1154_v31  ;;  %712 = vmatprep.subr.bf16.mxu0 %v1155_v32 }
  0x2c   : > { %755 = vmatprep.subr.bf16.mxu1 %v1157_v33 }
  0x2e   : > { %713 = vmatpush2.bf16.msra.mxu0 %v1159_v34 }
  0x2f   : > { %756 = vmatpush2.bf16.msra.mxu1 %v1160_v35  ;;  %714 = vmatprep.subr.bf16.mxu0 %v1161_v36 }
  0x30   : > { %757 = vmatprep.subr.bf16.mxu1 %v1163_v37 }
  0x32   : > { %715 = vmatpush2.bf16.msra.mxu0 %v1165_v38 }
  0x33   : > { %758 = vmatpush2.bf16.msra.mxu1 %v1166_v39  ;;  %716 = vmatprep.subr.bf16.mxu0 %v1167_v40 }
  0x34   : > { %759 = vmatprep.subr.bf16.mxu1 %v1169_v41 }
  0x36   : > { %717 = vmatpush2.bf16.msra.mxu0 %v1171_v42 }
  0x37   : > { %760 = vmatpush2.bf16.msra.mxu1 %v1172_v43  ;;  %718 = vmatprep.subr.bf16.mxu0 %v1173_v44 }
  0x38   : > { %761 = vmatprep.subr.bf16.mxu1 %v1175_v45 }
  0x3a   : > { %719 = vmatpush2.bf16.msra.mxu0 %v1177_v46 }
  0x3b   : > { %762 = vmatpush2.bf16.msra.mxu1 %v1178_v48  ;;  %720 = vmatprep.subr.bf16.mxu0 %v1179_v49 }
  0x3c   : > { %763 = vmatprep.subr.bf16.mxu1 %v1181_v50 }
  0x3e   : > { %721 = vmatpush2.bf16.msra.mxu0 %v1183_v52 }
  0x3f   : > { %764 = vmatpush2.bf16.msra.mxu1 %v1184_v53  ;;  %722 = vmatprep.subr.bf16.mxu0 %v1185_v54 }
  0x40   : > { %765 = vmatprep.subr.bf16.mxu1 %v1187_v55 }
  0x42   : > { %723 = vmatpush2.bf16.msra.mxu0 %v1189_v56 }
  0x43   : > { %766 = vmatpush2.bf16.msra.mxu1 %v1190_v57  ;;  %724 = vmatprep.subr.bf16.mxu0 %v1191_v58 }
  0x44   : > { %767 = vmatprep.subr.bf16.mxu1 %v1193_v59 }
  0x46   : > { %725 = vmatpush2.bf16.msra.mxu0 %v1195_v60 }
  0x47   : > { %768 = vmatpush2.bf16.msra.mxu1 %v1196_v61  ;;  %726 = vmatprep.subr.bf16.mxu0 %v1197_v62 }
  0x48   : > { %769 = vmatprep.subr.bf16.mxu1 %v1199_v63 }
  0x4a   : > { %727 = vmatpush2.bf16.msra.mxu0 %v1201_v0 }
  0x4b   : > { %770 = vmatpush2.bf16.msra.mxu1 %v1202_v1 }
  0x4d   : > { %729 = vmatmul.mubr.bf16.vlgmr.msra.gmra.mxu0 %v1203_v2 }
  0x4e   : > { %772 = vmatmul.mubr.bf16.vlgmr.msra.gmra.mxu1 %v1206_v3 }
 0x10d   : > { %v730_v11 = vpop.f32.mrf.mxu0 }
 0x10e   : > { %v773_v12 = vpop.f32.mrf.mxu1 }
 0x10f   : > { %v774_v13 = vadd.f32 %v773_v12, %v730_v11  ;;  %v732_v16 = vpop.f32.mrf.mxu0 }
 0x110   : > { %v775_v17 = vpop.f32.mrf.mxu1 }
 0x111   : > { %v825_v18 = vmul.f32 %v818_v10, %v774_v13  ;;  %v776_v19 = vadd.f32 %v775_v17, %v732_v16  ;;  %v734_v21 = vpop.f32.mrf.mxu0 }
 0x112   : > { %v777_v22 = vpop.f32.mrf.mxu1 }
 0x113   : > { %v842_v23 = vadd.f32 %v835_v14, %v825_v18  ;;  %v826_v24 = vmul.f32 %v822_v15, %v776_v19  ;;  %v778_v25 = vadd.f32 %v777_v22, %v734_v21  ;;  %v736_v26 = vpop.f32.mrf.mxu0 }
 0x114   : > { %v779_v27 = vpop.f32.mrf.mxu1 }
 0x115   : > { %v843_v28 = vadd.f32 %v839_v20, %v826_v24  ;;  %v827_v29 = vmul.f32 %v818_v10, %v778_v25  ;;  %v780_v30 = vadd.f32 %v779_v27, %v736_v26  ;;  %v846_v31 = vmax.f32 %v842_v23, 0.0 }
 0x117   : > { %v847_v32 = vmax.f32 %v843_v28, 0.0  ;;  %v844_v33 = vadd.f32 %v835_v14, %v827_v29  ;;  %v828_v34 = vmul.f32 %v822_v15, %v780_v30 }
 0x119   : > { %v1081_v35 = vpack.c.bf16 %v847_v32, %v846_v31  ;;  %v845_v36 = vadd.f32 %v839_v20, %v828_v34  ;;  %v848_v37 = vmax.f32 %v844_v33, 0.0 }
 0x11b   : > { %862 = vst [vmem:[%s285_s18] sm:$0xff] %v1081_v35  ;;  %v849_v38 = vmax.f32 %v845_v36, 0.0 }
 0x11d   : > { %v1082_v39 = vpack.c.bf16 %v849_v38, %v848_v37 }
 0x11f   : > { %863 = vst [vmem:[%s285_s18 + $0x8] sm:$0xff] %v1082_v39 }
 0x120 PF: > { %s13_s14 = sadd.s32 1, %s1231_s14   ;;  %s1501_s12 = smov %s1227_s13 }
 0x121   : > { %p10_p5 = scmp.ge.s32.totalorder %s13_s14, 4   ;;  %s1502_s13 = smov %s1504_s15 }
 0x123   :  { %12 = sbr.rel (!%p10_p5) target bundleno = 2 (0x2), region = 81 }

// kernel: maps_in_forward.28
= control target key start
LH: loop header
LB: loop body
LE: loop exit
PB: predicated region body
PF: predicated region fallthrough
CT: control target
= control target key end

     0   :  { %s1330_s12 = smov 0   ;;  %s1332_s13 = smov 0   ;;  %s1495_s0 = inlined_call_operand.vmem [shape: bf16[128,2304], index: 0, kind: input, shape index: {}]   ;;  %s1496_s1 = inlined_call_operand.vmem [shape: bf16[2304,128], index: 1, kind: input, shape index: {}]   ;;  %s1497_s2 = inlined_call_operand.vmem [shape: f32[2,128], index: 2, kind: input, shape index: {}]   ;;  %s1498_s3 = inlined_call_operand.vmem [shape: bf16[128,128], index: 3, kind: output, shape index: {}]  }
   0x1   :  { %s1334_s14 = smov 0   ;;  %s1336_s15 = smov 0  }
   0x2   :  { %s1338_s16 = smov 0   ;;  %s1340_s17 = smov 0  }
   0x3   :  { %s1342_s18 = smov 0  }
   0x4 LB: > { %s25_s19 = sadd.s32 1, %s1300_s16  ;;  %s32_s20 = sadd.s32 1, %s1304_s17  ;;  %s1308_s18 = sphi %s1342_s18, %s13_s18   ;;  %s1304_s17 = sphi %s1340_s17, %s1504_s17   ;;  %s1300_s16 = sphi %s1338_s16, %s1503_s16   ;;  %s1296_s15 = sphi %s1336_s15, %s1502_s15   ;;  %s1292_s14 = sphi %s1334_s14, %s1501_s14   ;;  %s1288_s13 = sphi %s1332_s13, %s1500_s13   ;;  %s1284_s12 = sphi %s1330_s12, %s1499_s12  }
   0x5   : > { %p26_p0 = scmp.ge.s32.totalorder %s25_s19, 6  ;;  %p48_p1 = scmp.ne.s32.totalorder %s1288_s13, %s1284_s12 }
   0x6   : > { %p49_p2 = scmp.eq.s32.totalorder %s1308_s18, 0  ;;  %s41_s24 = sadd.s32 1, %s1288_s13 }
   0x7   : > { %s1506_s19 = smov (%p26_p0, %s25_s19), 0  ;;  %s1508_s20 = smov (!%p26_p0, %s32_s20), %s1304_s17 }
   0x8   : > { %p50_p3 = por %p49_p2, %p48_p1  ;;  %p34_p4 = scmp.ge.s32.totalorder %s1508_s20, 2 }
   0x9   : > { %s37_s21 = ssub.s32 %s1300_s16, %s1506_s19  ;;  %p973_p6 = scmp.ge.s32.totalorder %s1308_s18, 12 }
   0xa   : > { %s1510_s20 = smov (%p34_p4, %s1508_s20), 0 }
   0xb   : > { %s36_s22 = ssub.s32 %s1304_s17, %s1510_s20  ;;  %163 = sbr.rel (%p973_p6) target bundleno = 34 (0x22), region = 20 }
   0xc   : > { %s38_s23 = sor.u32 %s37_s21, %s36_s22 }
   0xd   : > { %p39_p5 = scmp.eq.s32.totalorder %s38_s23, 0 }
   0xf   : > { %s1381_s25 = scalar_select %p39_p5, %s1288_s13, %s41_s24  }
  0x10   : > { %166 = sbr.rel (!%p50_p3) target bundleno = 34 (0x22), region = 24  ;;  %s168_s26 = sand.u32 (%p50_p3), 1, %s1288_s13  }
  0x11   : > { %s172_s27 = smul.u32 (%p50_p3), 3, %s1300_s16 }
  0x12   : > { %s1155_s28 = smul.u32 (%p50_p3), 96, %s168_s26 }
  0x13   : > { %s1156_s29 = smul.u32 (%p50_p3), 144, %s1304_s17 }
  0x14   : > { %s170_s8 = scalar_lea.vmem (%p50_p3), [#allocation3], %s1155_s28 }
  0x15   : > { %s174_s30 = sadd.s32 %s1156_s29, %s172_s27 }
  0x16   : > { %s976_s4 = sshll.u32 %s174_s30, 2 }
  0x17   : > { %s1390_s7 = scalar_lea.vmem %s1495_s0, %s976_s4 }
  0x18   : > { %v191_v0 = vld [vmem:[%s1390_s7] sm:$0xff]  ;;  %v193_v1 = vld [vmem:[%s1390_s7 + $0x48] sm:$0xff]  ;;  %v195_v2 = vld [vmem:[%s1390_s7 + $0x90] sm:$0xff] }
  0x19   : > { %192 = vst [vmem:[%s170_s8] sm:$0xff] %v191_v0  ;;  %194 = vst [vmem:[%s170_s8 + $0xc] sm:$0xff] %v193_v1  ;;  %v197_v3 = vld [vmem:[%s1390_s7 + $0xd8] sm:$0xff]  ;;  %v199_v4 = vld [vmem:[%s1390_s7 + $0x120] sm:$0xff] }
  0x1a   : > { %196 = vst [vmem:[%s170_s8 + $0x18] sm:$0xff] %v195_v2  ;;  %v201_v5 = vld [vmem:[%s1390_s7 + $0x168] sm:$0xff]  ;;  %198 = vst [vmem:[%s170_s8 + $0x24] sm:$0xff] %v197_v3  ;;  %v203_v6 = vld [vmem:[%s1390_s7 + $0x1b0] sm:$0xff] }
  0x1b   : > { %200 = vst [vmem:[%s170_s8 + $0x30] sm:$0xff] %v199_v4  ;;  %202 = vst [vmem:[%s170_s8 + $0x3c] sm:$0xff] %v201_v5  ;;  %v205_v7 = vld [vmem:[%s1390_s7 + $0x1f8] sm:$0xff]  ;;  %v977_v8 = vld [vmem:[%s1390_s7 + $0x8] sm:$0xf] }
  0x1c   : > { %204 = vst [vmem:[%s170_s8 + $0x48] sm:$0xff] %v203_v6  ;;  %206 = vst [vmem:[%s170_s8 + $0x54] sm:$0xff] %v205_v7  ;;  %v979_v9 = vld [vmem:[%s1390_s7 + $0x50] sm:$0xf]  ;;  %v981_v10 = vld [vmem:[%s1390_s7 + $0x98] sm:$0xf] }
  0x1d   : > { %978 = vst [vmem:[%s170_s8 + $0x8] sm:$0xf] %v977_v8  ;;  %v983_v11 = vld [vmem:[%s1390_s7 + $0xe0] sm:$0xf]  ;;  %980 = vst [vmem:[%s170_s8 + $0x14] sm:$0xf] %v979_v9 }
  0x1e   : > { %982 = vst [vmem:[%s170_s8 + $0x20] sm:$0xf] %v981_v10  ;;  %984 = vst [vmem:[%s170_s8 + $0x2c] sm:$0xf] %v983_v11  ;;  %v985_v12 = vld [vmem:[%s1390_s7 + $0x128] sm:$0xf] }
  0x1f   : > { %v987_v13 = vld [vmem:[%s1390_s7 + $0x170] sm:$0xf]  ;;  %v989_v14 = vld [vmem:[%s1390_s7 + $0x1b8] sm:$0xf]  ;;  %986 = vst [vmem:[%s170_s8 + $0x38] sm:$0xf] %v985_v12 }
  0x20   : > { %988 = vst [vmem:[%s170_s8 + $0x44] sm:$0xf] %v987_v13  ;;  %990 = vst [vmem:[%s170_s8 + $0x50] sm:$0xf] %v989_v14  ;;  %v991_v15 = vld [vmem:[%s1390_s7 + $0x200] sm:$0xf] }
  0x21   : > { %992 = vst [vmem:[%s170_s8 + $0x5c] sm:$0xf] %v991_v15 }
  0x22 PF: > { %p993_p7 = scmp.ge.s32.totalorder %s1308_s18, 1  ;;  %p247_p8 = scmp.lt.s32.totalorder %s1308_s18, 13 }
  0x24   : > { %p248_p9 = pnand %p993_p7, %p247_p8 }
  0x25   : > { %s294_s9 = smul.u32 (!%p248_p9), 48, %s1292_s14  ;;  %s995_s10 = sshll.u32 (!%p248_p9), %s1296_s15, 3 }
  0x26   : > { %251 = sbr.rel (%p248_p9) target bundleno = 344 (0x158), region = 54  ;;  %p308_p10 = scmp.lt.s32.totalorder (!%p248_p9), %s995_s10, 15 }
  0x27   : > { %s254_s11 = sand.u32 (!%p248_p9), 1, %s1284_s12   ;;  %p295_p11 = scmp.lt.s32.totalorder (!%p248_p9), %s294_s9, 287 }
  0x28   : > { %s1157_s21 = smul.u32 (!%p248_p9), 96, %s254_s11  ;;  %p1033_p12 = scmp.ne.s32.totalorder (!%p248_p9), %s1292_s14, 0 }
  0x2a   : > { %s1418_s28 = scalar_lea.vmem (!%p248_p9), [#allocation3], %s1157_s21 }
  0x2b   : > { %s1512_s10 = smov (!%p308_p10, %s995_s10), 15  ;;  %s1514_s9 = smov (!%p295_p11, %s294_s9), 287  ;;  %v1240_v16 = vld [vmem:[%s1418_s28 + $0x4] ss:$12 sps:$4 sm:$0xff]   ;;  %v1241_v39 = vld [vmem:[%s1418_s28 + $0x8] ss:$12 sps:$4 sm:$0xff]  }
  0x2c   : > { %s996_s22 = sshll.u32 %s1512_s10, 2  ;;  %s994_s23 = sshll.u32 %s1514_s9, 2  ;;  %621 = vmatprep.mubr.bf16.mxu0 %v1240_v16  ;;  %1147 = vmatprep.mubr.bf16.mxu1 %v1241_v39  ;;  %v1238_v42 = vld [vmem:[%s1418_s28] ss:$12 sps:$4 sm:$0xff]   ;;  %v1243_v43 = vld [vmem:[%s1418_s28 + $0x1c] ss:$12 sps:$4 sm:$0xff]  }
  0x2d   : > { %s1416_s27 = scalar_lea.vmem %s1498_s3, %s996_s22  ;;  %s1423_s15 = scalar_lea.vmem %s1496_s1, %s994_s23  ;;  %v1242_v44 = vld [vmem:[%s1418_s28 + $0x20] ss:$12 sps:$4 sm:$0xff]   ;;  %v1249_v45 = vld [vmem:[%s1418_s28 + $0x38] ss:$12 sps:$4 sm:$0xff]   ;;  %v1250_v48 = vld [vmem:[%s1418_s28 + $0x50] ss:$12 sps:$4 sm:$0xff]  }
  0x2e   : > { %v1214_v17 = vld [vmem:[%s1423_s15 + $0x78] sm:$0xff]   ;;  %v1217_v20 = vld [vmem:[%s1423_s15 + $0x70] sm:$0xff]   ;;  %v1220_v23 = vld [vmem:[%s1423_s15 + $0x68] sm:$0xff]  }
  0x2f   : > { %v1215_v18 = vld [vmem:[%s1423_s15 + $0x38] sm:$0xff]   ;;  %1079 = vmatprep.subr.bf16.mxu0 %v1214_v17  ;;  %v1218_v21 = vld [vmem:[%s1423_s15 + $0x30] sm:$0xff]   ;;  %v1221_v24 = vld [vmem:[%s1423_s15 + $0x28] sm:$0xff]  }
  0x30   : > { %v1216_v19 = vld [vmem:[%s1423_s15 + $0xb8] sm:$0xff]   ;;  %1080 = vmatpush3.bf16.msra.mxu0 %v1215_v18  ;;  %v1219_v22 = vld [vmem:[%s1423_s15 + $0xb0] sm:$0xff]   ;;  %v1222_v25 = vld [vmem:[%s1423_s15 + $0xa8] sm:$0xff]  }
  0x31   : > { %1131 = vmatprep.subr.bf16.mxu1 %v1216_v19  ;;  %1081 = vmatprep.subr.bf16.mxu0 %v1217_v20  ;;  %v1223_v26 = vld [vmem:[%s1423_s15 + $0x60] sm:$0xff]   ;;  %v1226_v29 = vld [vmem:[%s1423_s15 + $0x58] sm:$0xff]   ;;  %v1229_v32 = vld [vmem:[%s1423_s15 + $0x50] sm:$0xff]  }
  0x32   : > { %1132 = vmatpush3.bf16.msra.mxu1 %v1216_v19  ;;  %v1224_v27 = vld [vmem:[%s1423_s15 + $0x20] sm:$0xff]   ;;  %v1228_v30 = vld [vmem:[%s1423_s15 + $0x98] sm:$0xff]   ;;  %v1231_v33 = vld [vmem:[%s1423_s15 + $0x90] sm:$0xff]  }
  0x33   : > { %1133 = vmatprep.subr.bf16.mxu1 %v1219_v22  ;;  %v1225_v28 = vld [vmem:[%s1423_s15 + $0xa0] sm:$0xff]   ;;  %v1227_v31 = vld [vmem:[%s1423_s15 + $0x18] sm:$0xff]   ;;  %v1230_v34 = vld [vmem:[%s1423_s15 + $0x10] sm:$0xff]  }
  0x34   : > { %1082 = vmatpush3.bf16.msra.mxu0 %v1218_v21  ;;  %v1232_v35 = vld [vmem:[%s1423_s15 + $0x48] sm:$0xff]   ;;  %v1235_v38 = vld [vmem:[%s1423_s15 + $0x40] sm:$0xff]   ;;  %v1248_v49 = vld [vmem:[%s1418_s28 + $0x30] ss:$12 sps:$4 sm:$0xff]  }
  0x35   : > { %1083 = vmatprep.subr.bf16.mxu0 %v1220_v23  ;;  %v1233_v36 = vld [vmem:[%s1423_s15 + $0x8] sm:$0xff]   ;;  %v1237_v40 = vld [vmem:[%s1423_s15 + $0x80] sm:$0xff]  }
  0x36   : > { %1134 = vmatpush3.bf16.msra.mxu1 %v1219_v22  ;;  %v1234_v37 = vld [vmem:[%s1423_s15 + $0x88] sm:$0xff]   ;;  %v1236_v41 = vld [vmem:[%s1423_s15] sm:$0xff]  }
  0x37   : > { %1135 = vmatprep.subr.bf16.mxu1 %v1222_v25  ;;  %v1245_v46 = vld [vmem:[%s1418_s28 + $0x18] ss:$12 sps:$4 sm:$0xff]   ;;  %v1246_v47 = vld [vmem:[%s1418_s28 + $0x34] ss:$12 sps:$4 sm:$0xff]  }
  0x38   : > { %1084 = vmatpush3.bf16.msra.mxu0 %v1221_v24  ;;  %v1251_v50 = vld [vmem:[%s1418_s28 + $0x4c] ss:$12 sps:$4 sm:$0xff]   ;;  %v1253_v51 = vld [vmem:[%s1418_s28 + $0x48] ss:$12 sps:$4 sm:$0xff]  }
  0x39   : > { %1085 = vmatprep.subr.bf16.mxu0 %v1223_v26 }
  0x3a   : > { %1136 = vmatpush3.bf16.msra.mxu1 %v1222_v25 }
  0x3b   : > { %1137 = vmatprep.subr.bf16.mxu1 %v1225_v28 }
  0x3c   : > { %1086 = vmatpush3.bf16.msra.mxu0 %v1224_v27 }
  0x3d   : > { %1087 = vmatprep.subr.bf16.mxu0 %v1226_v29 }
  0x3e   : > { %1138 = vmatpush3.bf16.msra.mxu1 %v1225_v28 }
  0x3f   : > { %1139 = vmatprep.subr.bf16.mxu1 %v1228_v30 }
  0x40   : > { %1088 = vmatpush3.bf16.msra.mxu0 %v1227_v31 }
  0x41   : > { %1089 = vmatprep.subr.bf16.mxu0 %v1229_v32 }
  0x42   : > { %1140 = vmatpush3.bf16.msra.mxu1 %v1228_v30 }
  0x43   : > { %1141 = vmatprep.subr.bf16.mxu1 %v1231_v33 }
  0x44   : > { %1090 = vmatpush3.bf16.msra.mxu0 %v1230_v34 }
  0x45   : > { %1091 = vmatprep.subr.bf16.mxu0 %v1232_v35 }
  0x46   : > { %1142 = vmatpush3.bf16.msra.mxu1 %v1231_v33 }
  0x47   : > { %1143 = vmatprep.subr.bf16.mxu1 %v1234_v37 }
  0x48   : > { %1092 = vmatpush3.bf16.msra.mxu0 %v1233_v36 }
  0x49   : > { %1093 = vmatprep.subr.bf16.mxu0 %v1235_v38 }
  0x4a   : > { %1144 = vmatpush3.bf16.msra.mxu1 %v1234_v37 }
  0x4b   : > { %1145 = vmatprep.subr.bf16.mxu1 %v1237_v40 }
  0x4c   : > { %1094 = vmatpush3.bf16.msra.mxu0 %v1236_v41 }
  0x4e   : > { %1146 = vmatpush3.bf16.msra.mxu1 %v1237_v40 }
  0x4f   : > { %622 = vmatmul.mubr.bf16.vlgmr.msra.gmra.mxu0 %v1238_v42 }
  0x50   : > { %629 = vmatprep.mubr.bf16.mxu0 %v1243_v43 }
  0x51   : > { %1148 = vmatmul.mubr.bf16.vlgmr.msra.gmra.mxu1 %v1242_v44 }
  0x52   : > { %1151 = vmatprep.mubr.bf16.mxu1 %v1249_v45 }
  0x57   : > { %630 = vmatmul.mubr.bf16.gmra.mxu0 %v1245_v46 }
  0x58   : > { %637 = vmatprep.mubr.bf16.mxu0 %v1246_v47 }
  0x59   : > { %1152 = vmatmul.mubr.bf16.gmra.mxu1 %v1250_v48 }
  0x5f   : > { %638 = vmatmul.mubr.bf16.gmra.mxu0 %v1248_v49 }
  0x60   : > { %645 = vmatprep.mubr.bf16.mxu0 %v1251_v50 }
  0x67   : > { %646 = vmatmul.mubr.bf16.gmra.mxu0 %v1253_v51 }
 0x10f   : > { %v1095_v52 = vpop.f32.mrf.mxu0 }
 0x111   : > { %v1096_v53 = vpop.f32.mrf.mxu0  ;;  %v1149_v54 = vpop.f32.mrf.mxu1 }
 0x112   : > { %v1097_v55 = vadd.f32 %v1096_v53, %v1095_v52 }
 0x113   : > { %v1098_v56 = vpop.f32.mrf.mxu0  ;;  %v688_v57 = vpop.f32.mrf.mxu1 }
 0x114   : > { %v689_v58 = vadd.f32 %v1097_v55, %v688_v57 }
 0x115   : > { %v1099_v59 = vpop.f32.mrf.mxu0  ;;  %v1150_v60 = vpop.f32.mrf.mxu1 }
 0x116   : > { %v1100_v61 = vadd.f32 %v1099_v59, %v1098_v56 }
 0x117   : > { %v1101_v62 = vpop.f32.mrf.mxu0  ;;  %v691_v63 = vpop.f32.mrf.mxu1 }
 0x118   : > { %v692_v0 = vadd.f32 %v1100_v61, %v691_v63 }
 0x119   : > { %v1102_v1 = vpop.f32.mrf.mxu0  ;;  %v1153_v2 = vpop.f32.mrf.mxu1 }
 0x11a   : > { %v1103_v3 = vadd.f32 %v1102_v1, %v1101_v62 }
 0x11b   : > { %v1104_v4 = vpop.f32.mrf.mxu0  ;;  %v704_v7 = vpop.f32.mrf.mxu1 }
 0x11c   : > { %v697_v5 = vadd.f32 %v1149_v54, %v1103_v3 }
 0x11d   : > { %v1105_v6 = vpop.f32.mrf.mxu0  ;;  %v1154_v12 = vpop.f32.mrf.mxu1 }
 0x11e   : > { %v1106_v8 = vadd.f32 %v1105_v6, %v1104_v4 }
 0x11f   : > { %v1107_v9 = vpop.f32.mrf.mxu0  ;;  %v707_v17 = vpop.f32.mrf.mxu1 }
 0x120   : > { %v700_v10 = vadd.f32 %v1150_v60, %v1106_v8 }
 0x121   : > { %v1108_v11 = vpop.f32.mrf.mxu0 }
 0x122   : > { %v1109_v13 = vadd.f32 %v1108_v11, %v1107_v9 }
 0x123   : > { %v1110_v14 = vpop.f32.mrf.mxu0 }
 0x124   : > { %v705_v15 = vadd.f32 %v1109_v13, %v704_v7 }
 0x125   : > { %v1111_v16 = vpop.f32.mrf.mxu0 }
 0x126   : > { %v1112_v18 = vadd.f32 %v1111_v16, %v1110_v14 }
 0x127   : > { %v1113_v19 = vpop.f32.mrf.mxu0 }
 0x128   : > { %v708_v20 = vadd.f32 %v1112_v18, %v707_v17 }
 0x129   : > { %v1114_v21 = vpop.f32.mrf.mxu0 }
 0x12a   : > { %v1115_v22 = vadd.f32 %v1114_v21, %v1113_v19 }
 0x12b   : > { %v1116_v23 = vpop.f32.mrf.mxu0 }
 0x12c   : > { %v713_v24 = vadd.f32 %v1153_v2, %v1115_v22  ;;  %722 = sbr.rel (%p1033_p12) target bundleno = 309 (0x135), region = 62 }
 0x12d   : > { %v1117_v25 = vpop.f32.mrf.mxu0 }
 0x12e   : > { %v1118_v26 = vadd.f32 %v1117_v25, %v1116_v23 }
 0x130   : > { %v716_v27 = vadd.f32 %v1154_v12, %v1118_v26 }
 0x131   : > { %723 = vst [vmem:[#allocation2 + $0x30] sm:$0xff] %v689_v58  ;;  %724 = vst [vmem:[#allocation2] sm:$0xff] %v692_v0 }
 0x132   : > { %725 = vst [vmem:[#allocation2 + $0x18] sm:$0xff] %v697_v5  ;;  %726 = vst [vmem:[#allocation2 + $0x10] sm:$0xff] %v700_v10 }
 0x133   : > { %727 = vst [vmem:[#allocation2 + $0x8] sm:$0xff] %v705_v15  ;;  %728 = vst [vmem:[#allocation2 + $0x20] sm:$0xff] %v708_v20 }
 0x134   : > { %729 = vst [vmem:[#allocation2 + $0x28] sm:$0xff] %v713_v24  ;;  %730 = vst [vmem:[#allocation2 + $0x38] sm:$0xff] %v716_v27 }
 0x135 PF: > { %p1034_p13 = scmp.le.s32.totalorder %s1292_s14, 0 }
 0x137   : > { %734 = sbr.rel (%p1034_p13) target bundleno = 323 (0x143), region = 66 }
 0x13c   : > { %v735_v28 = vld [vmem:[#allocation2 + $0x30] sm:$0xff]  ;;  %v736_v29 = vld [vmem:[#allocation2] sm:$0xff]  ;;  %v737_v30 = vld [vmem:[#allocation2 + $0x18] sm:$0xff] }
 0x13d   : > { %v743_v31 = vadd.f32 %v735_v28, %v689_v58  ;;  %v744_v32 = vadd.f32 %v736_v29, %v692_v0  ;;  %v745_v33 = vadd.f32 %v737_v30, %v697_v5  ;;  %v738_v34 = vld [vmem:[#allocation2 + $0x10] sm:$0xff]  ;;  %v739_v35 = vld [vmem:[#allocation2 + $0x8] sm:$0xff]  ;;  %v740_v36 = vld [vmem:[#allocation2 + $0x20] sm:$0xff] }
 0x13e   : > { %v746_v37 = vadd.f32 %v738_v34, %v700_v10  ;;  %v747_v38 = vadd.f32 %v739_v35, %v705_v15  ;;  %v748_v39 = vadd.f32 %v740_v36, %v708_v20  ;;  %v741_v40 = vld [vmem:[#allocation2 + $0x28] sm:$0xff]  ;;  %v742_v41 = vld [vmem:[#allocation2 + $0x38] sm:$0xff] }
 0x13f   : > { %751 = vst [vmem:[#allocation2 + $0x30] sm:$0xff] %v743_v31  ;;  %752 = vst [vmem:[#allocation2] sm:$0xff] %v744_v32  ;;  %v749_v42 = vadd.f32 %v741_v40, %v713_v24  ;;  %v750_v43 = vadd.f32 %v742_v41, %v716_v27 }
 0x140   : > { %753 = vst [vmem:[#allocation2 + $0x18] sm:$0xff] %v745_v33  ;;  %754 = vst [vmem:[#allocation2 + $0x10] sm:$0xff] %v746_v37 }
 0x141   : > { %755 = vst [vmem:[#allocation2 + $0x8] sm:$0xff] %v747_v38  ;;  %756 = vst [vmem:[#allocation2 + $0x20] sm:$0xff] %v748_v39 }
 0x142   : > { %757 = vst [vmem:[#allocation2 + $0x28] sm:$0xff] %v749_v42  ;;  %758 = vst [vmem:[#allocation2 + $0x38] sm:$0xff] %v750_v43 }
 0x143 PF: > { %p1035_p0 = scmp.ne.s32.totalorder %s1292_s14, 5 }
 0x145   : > { %762 = sbr.rel (%p1035_p0) target bundleno = 344 (0x158), region = 70 }
 0x14a   : > { %v763_v44 = vld [vmem:[#allocation2 + $0x30] sm:$0xff]  ;;  %v764_v45 = vld [vmem:[#allocation2] sm:$0xff]  ;;  %v765_v50 = vld [vmem:[#allocation2 + $0x18] sm:$0xff] }
 0x14b   : > { %v1036_v46 = vld [vmem:[%s1497_s2] ss:$0 sm:$0xff]  ;;  %v1037_v49 = vld [vmem:[%s1497_s2 + $0x1] ss:$0 sm:$0xff]  ;;  %v766_v51 = vld [vmem:[#allocation2 + $0x10] sm:$0xff] }
 0x14c   : > { %v776_v47 = vmul.f32 %v1036_v46, %v763_v44  ;;  %v777_v48 = vmul.f32 %v1036_v46, %v764_v45  ;;  %v778_v52 = vmul.f32 %v1036_v46, %v765_v50  ;;  %v779_v53 = vmul.f32 %v1036_v46, %v766_v51  ;;  %v767_v54 = vld [vmem:[#allocation2 + $0x8] sm:$0xff]  ;;  %v768_v55 = vld [vmem:[#allocation2 + $0x20] sm:$0xff]  ;;  %v770_v61 = vld [vmem:[#allocation2 + $0x38] sm:$0xff] }
 0x14d   : > { %v769_v56 = vld [vmem:[#allocation2 + $0x28] sm:$0xff]  ;;  %v780_v59 = vmul.f32 %v1036_v46, %v767_v54  ;;  %v781_v60 = vmul.f32 %v1036_v46, %v768_v55  ;;  %v783_v1 = vmul.f32 %v1036_v46, %v770_v61 }
 0x14e   : > { %v789_v57 = vadd.f32 %v1037_v49, %v776_v47  ;;  %v790_v58 = vadd.f32 %v1037_v49, %v777_v48  ;;  %v791_v62 = vadd.f32 %v1037_v49, %v778_v52  ;;  %v792_v63 = vadd.f32 %v1037_v49, %v779_v53 }
 0x14f   : > { %v782_v0 = vmul.f32 %v1036_v46, %v769_v56  ;;  %v793_v4 = vadd.f32 %v1037_v49, %v780_v59  ;;  %v794_v5 = vadd.f32 %v1037_v49, %v781_v60  ;;  %v796_v9 = vadd.f32 %v1037_v49, %v783_v1 }
 0x150   : > { %v797_v2 = vmax.f32 %v789_v57, 0.0  ;;  %v798_v3 = vmax.f32 %v790_v58, 0.0  ;;  %v799_v6 = vmax.f32 %v791_v62, 0.0  ;;  %v800_v7 = vmax.f32 %v792_v63, 0.0 }
 0x151   : > { %v795_v8 = vadd.f32 %v1037_v49, %v782_v0  ;;  %v801_v11 = vmax.f32 %v793_v4, 0.0  ;;  %v802_v12 = vmax.f32 %v794_v5, 0.0  ;;  %v804_v15 = vmax.f32 %v796_v9, 0.0 }
 0x152   : > { %v1059_v10 = vpack.c.bf16 %v798_v3, %v797_v2  ;;  %v1064_v13 = vpack.c.bf16 %v800_v7, %v799_v6 }
 0x153   : > { %v803_v14 = vmax.f32 %v795_v8, 0.0  ;;  %v1069_v16 = vpack.c.bf16 %v802_v12, %v801_v11 }
 0x154   : > { %1060 = vst [vmem:[%s1416_s27] sm:$0xff] %v1059_v10   ;;  %1076 = vst [vmem:[%s1416_s27 + $0x8] sm:$0xff] %v1064_v13  }
 0x155   : > { %v1074_v17 = vpack.c.bf16 %v804_v15, %v803_v14  ;;  %1077 = vst [vmem:[%s1416_s27 + $0x10] sm:$0xff] %v1069_v16  }
 0x157   : > { %1078 = vst [vmem:[%s1416_s27 + $0x18] sm:$0xff] %v1074_v17  }
 0x158 PF: > { %s13_s18 = sadd.s32 1, %s1308_s18   ;;  %s1499_s12 = smov %s1288_s13 }
 0x159   : > { %p10_p1 = scmp.ge.s32.totalorder %s13_s18, 14   ;;  %s1500_s13 = smov %s1381_s25 }
 0x15a   : > { %s1501_s14 = smov %s1300_s16  ;;  %s1502_s15 = smov %s1304_s17 }
 0x15b   : > { %s1503_s16 = smov %s1506_s19  ;;  %s1504_s17 = smov %s1510_s20 }
 0x15c   :  { %12 = sbr.rel (!%p10_p1) target bundleno = 4 (0x4), region = 117 }

// kernel: maps_in_forward.29
= control target key start
LH: loop header
LB: loop body
LE: loop exit
PB: predicated region body
PF: predicated region fallthrough
CT: control target
= control target key end

     0   :  { %s986_s12 = smov 0   ;;  %s988_s13 = smov 0   ;;  %s1087_s0 = inlined_call_operand.vmem [shape: bf16[128,256], index: 0, kind: input, shape index: {}]   ;;  %s1088_s1 = inlined_call_operand.vmem [shape: bf16[256,128], index: 1, kind: input, shape index: {}]   ;;  %s1089_s2 = inlined_call_operand.vmem [shape: f32[2,128], index: 2, kind: input, shape index: {}]   ;;  %s1090_s3 = inlined_call_operand.vmem [shape: bf16[128,128], index: 3, kind: output, shape index: {}]  }
   0x1   :  { %s990_s14 = smov 0  }
   0x2 LB: > { %s32_s15 = sadd.s32 1, %s960_s13  ;;  %p760_p0 = scmp.ge.s32.totalorder %s964_s14, 1  ;;  %s964_s14 = sphi %s990_s14, %s13_s14   ;;  %s960_s13 = sphi %s988_s13, %s1092_s13   ;;  %s956_s12 = sphi %s986_s12, %s1091_s12  }
   0x3   : > { %p34_p1 = scmp.ge.s32.totalorder %s32_s15, 2  ;;  %p192_p2 = scmp.lt.s32.totalorder %s964_s14, 3 }
   0x5   : > { %s1094_s15 = smov (%p34_p1, %s32_s15), 0  ;;  %p193_p3 = pnand %p760_p0, %p192_p2 }
   0x6   : > { %s761_s18 = sshll.u32 (!%p193_p3), %s956_s12, 3 }
   0x7   : > { %196 = sbr.rel (%p193_p3) target bundleno = 263 (0x107), region = 32  ;;  %p238_p4 = scmp.lt.s32.totalorder (!%p193_p3), %s761_s18, 15 }
   0xc   : > { %v914_v0 = vld [vmem:[%s1088_s1 + $0x78] sm:$0xff]   ;;  %v916_v2 = vld [vmem:[%s1088_s1 + $0x70] sm:$0xff]   ;;  %v918_v4 = vld [vmem:[%s1088_s1 + $0x68] sm:$0xff]   ;;  %s1096_s18 = smov (!%p238_p4, %s761_s18), 15 }
   0xd   : > { %v915_v1 = vld [vmem:[%s1088_s1 + $0x38] sm:$0xff]   ;;  %834 = vmatprep.subr.bf16.mxu0 %v914_v0  ;;  %874 = vmatprep.subr.bf16.mxu1 %v914_v0  ;;  %v917_v3 = vld [vmem:[%s1088_s1 + $0x30] sm:$0xff]   ;;  %v919_v5 = vld [vmem:[%s1088_s1 + $0x28] sm:$0xff]   ;;  %s802_s6 = sshll.u32 %s1096_s18, 3  ;;  %s765_s7 = sshll.u32 %s1096_s18, 2 }
   0xe   : > { %835 = vmatpush3.bf16.msra.mxu0 %v915_v1  ;;  %882 = vmatpush3.bf16.msra.mxu1 %v915_v1  ;;  %v920_v6 = vld [vmem:[%s1088_s1 + $0x60] sm:$0xff]   ;;  %v922_v8 = vld [vmem:[%s1088_s1 + $0x58] sm:$0xff]   ;;  %s1037_s11 = scalar_lea.vmem %s1087_s0, %s802_s6  ;;  %v924_v10 = vld [vmem:[%s1088_s1 + $0x50] sm:$0xff]   ;;  %s268_s10 = scalar_lea.vmem %s1090_s3, %s765_s7 }
   0xf   : > { %836 = vmatprep.subr.bf16.mxu0 %v916_v2  ;;  %875 = vmatprep.subr.bf16.mxu1 %v916_v2  ;;  %v921_v7 = vld [vmem:[%s1088_s1 + $0x20] sm:$0xff]   ;;  %v923_v9 = vld [vmem:[%s1088_s1 + $0x18] sm:$0xff]   ;;  %v925_v13 = vld [vmem:[%s1088_s1 + $0x10] sm:$0xff]  }
  0x10   : > { %v932_v11 = vld [vmem:[%s1037_s11 + $0x4] ss:$8 sps:$4 sm:$0xff]   ;;  %v930_v18 = vld [vmem:[%s1037_s11] ss:$8 sps:$4 sm:$0xff]   ;;  %v936_v20 = vld [vmem:[%s1037_s11 + $0x14] ss:$8 sps:$4 sm:$0xff]  }
  0x11   : > { %v935_v12 = vld [vmem:[%s1037_s11 + $0x24] ss:$8 sps:$4 sm:$0xff]   ;;  %479 = vmatprep.mubr.bf16.mxu0 %v932_v11  ;;  %v933_v19 = vld [vmem:[%s1037_s11 + $0x20] ss:$8 sps:$4 sm:$0xff]   ;;  %v938_v21 = vld [vmem:[%s1037_s11 + $0x34] ss:$8 sps:$4 sm:$0xff]  }
  0x12   : > { %837 = vmatpush3.bf16.msra.mxu0 %v917_v3  ;;  %883 = vmatpush3.bf16.msra.mxu1 %v917_v3  ;;  %v926_v14 = vld [vmem:[%s1088_s1 + $0x48] sm:$0xff]   ;;  %v928_v16 = vld [vmem:[%s1088_s1 + $0x40] sm:$0xff]   ;;  %v940_v22 = vld [vmem:[%s1037_s11 + $0x10] ss:$8 sps:$4 sm:$0xff]  }
  0x13   : > { %838 = vmatprep.subr.bf16.mxu0 %v918_v4  ;;  %876 = vmatprep.subr.bf16.mxu1 %v918_v4  ;;  %v927_v15 = vld [vmem:[%s1088_s1 + $0x8] sm:$0xff]   ;;  %v929_v17 = vld [vmem:[%s1088_s1] sm:$0xff]   ;;  %v941_v23 = vld [vmem:[%s1037_s11 + $0x30] ss:$8 sps:$4 sm:$0xff]  }
  0x14   : > { %495 = vmatprep.mubr.bf16.mxu1 %v935_v12  ;;  %v790_v27 = vld [vmem:[%s1089_s2] ss:$0 sm:$0xff]  ;;  %v791_v35 = vld [vmem:[%s1089_s2 + $0x1] ss:$0 sm:$0xff] }
  0x16   : > { %839 = vmatpush3.bf16.msra.mxu0 %v919_v5  ;;  %884 = vmatpush3.bf16.msra.mxu1 %v919_v5 }
  0x17   : > { %840 = vmatprep.subr.bf16.mxu0 %v920_v6  ;;  %877 = vmatprep.subr.bf16.mxu1 %v920_v6 }
  0x1a   : > { %841 = vmatpush3.bf16.msra.mxu0 %v921_v7  ;;  %885 = vmatpush3.bf16.msra.mxu1 %v921_v7 }
  0x1b   : > { %842 = vmatprep.subr.bf16.mxu0 %v922_v8  ;;  %878 = vmatprep.subr.bf16.mxu1 %v922_v8 }
  0x1e   : > { %843 = vmatpush3.bf16.msra.mxu0 %v923_v9  ;;  %886 = vmatpush3.bf16.msra.mxu1 %v923_v9 }
  0x1f   : > { %844 = vmatprep.subr.bf16.mxu0 %v924_v10  ;;  %879 = vmatprep.subr.bf16.mxu1 %v924_v10 }
  0x22   : > { %845 = vmatpush3.bf16.msra.mxu0 %v925_v13  ;;  %887 = vmatpush3.bf16.msra.mxu1 %v925_v13 }
  0x23   : > { %846 = vmatprep.subr.bf16.mxu0 %v926_v14  ;;  %880 = vmatprep.subr.bf16.mxu1 %v926_v14 }
  0x26   : > { %847 = vmatpush3.bf16.msra.mxu0 %v927_v15  ;;  %888 = vmatpush3.bf16.msra.mxu1 %v927_v15 }
  0x27   : > { %848 = vmatprep.subr.bf16.mxu0 %v928_v16  ;;  %881 = vmatprep.subr.bf16.mxu1 %v928_v16 }
  0x2a   : > { %849 = vmatpush3.bf16.msra.mxu0 %v929_v17  ;;  %889 = vmatpush3.bf16.msra.mxu1 %v929_v17 }
  0x2d   : > { %480 = vmatmul.mubr.bf16.vlgmr.msra.gmra.mxu0 %v930_v18  ;;  %496 = vmatmul.mubr.bf16.vlgmr.msra.gmra.mxu1 %v933_v19 }
  0x2e   : > { %487 = vmatprep.mubr.bf16.mxu0 %v936_v20  ;;  %503 = vmatprep.mubr.bf16.mxu1 %v938_v21 }
  0x35   : > { %488 = vmatmul.mubr.bf16.gmra.mxu0 %v940_v22  ;;  %504 = vmatmul.mubr.bf16.gmra.mxu1 %v941_v23 }
  0xed   : > { %v850_v24 = vpop.f32.mrf.mxu0  ;;  %v862_v25 = vpop.f32.mrf.mxu1 }
  0xef   : > { %v851_v26 = vpop.f32.mrf.mxu0  ;;  %v863_v28 = vpop.f32.mrf.mxu1 }
  0xf0   : > { %v852_v29 = vadd.f32 %v851_v26, %v850_v24  ;;  %v864_v30 = vadd.f32 %v863_v28, %v862_v25 }
  0xf1   : > { %v853_v31 = vpop.f32.mrf.mxu0  ;;  %v865_v32 = vpop.f32.mrf.mxu1 }
  0xf2   : > { %v568_v33 = vmul.f32 %v852_v29, %v790_v27  ;;  %v572_v34 = vmul.f32 %v864_v30, %v790_v27 }
  0xf3   : > { %v854_v36 = vpop.f32.mrf.mxu0  ;;  %v866_v37 = vpop.f32.mrf.mxu1 }
  0xf4   : > { %v855_v38 = vadd.f32 %v854_v36, %v853_v31  ;;  %v867_v39 = vadd.f32 %v866_v37, %v865_v32  ;;  %v581_v42 = vadd.f32 %v791_v35, %v568_v33  ;;  %v585_v43 = vadd.f32 %v791_v35, %v572_v34 }
  0xf5   : > { %v856_v40 = vpop.f32.mrf.mxu0  ;;  %v868_v41 = vpop.f32.mrf.mxu1 }
  0xf6   : > { %v569_v44 = vmul.f32 %v855_v38, %v790_v27  ;;  %v573_v45 = vmul.f32 %v867_v39, %v790_v27  ;;  %v589_v54 = vmax.f32 %v581_v42, 0.0  ;;  %v593_v55 = vmax.f32 %v585_v43, 0.0 }
  0xf7   : > { %v857_v46 = vpop.f32.mrf.mxu0  ;;  %v869_v47 = vpop.f32.mrf.mxu1 }
  0xf8   : > { %v582_v48 = vadd.f32 %v791_v35, %v569_v44  ;;  %v586_v49 = vadd.f32 %v791_v35, %v573_v45  ;;  %v858_v50 = vadd.f32 %v857_v46, %v856_v40  ;;  %v870_v51 = vadd.f32 %v869_v47, %v868_v41 }
  0xf9   : > { %v859_v52 = vpop.f32.mrf.mxu0  ;;  %v871_v53 = vpop.f32.mrf.mxu1 }
  0xfa   : > { %v590_v56 = vmax.f32 %v582_v48, 0.0  ;;  %v594_v57 = vmax.f32 %v586_v49, 0.0  ;;  %v570_v58 = vmul.f32 %v858_v50, %v790_v27  ;;  %v574_v59 = vmul.f32 %v870_v51, %v790_v27 }
  0xfb   : > { %v860_v60 = vpop.f32.mrf.mxu0  ;;  %v872_v61 = vpop.f32.mrf.mxu1 }
  0xfc   : > { %v814_v62 = vpack.c.bf16 %v590_v56, %v589_v54  ;;  %v824_v63 = vpack.c.bf16 %v594_v57, %v593_v55  ;;  %v861_v0 = vadd.f32 %v860_v60, %v859_v52  ;;  %v873_v1 = vadd.f32 %v872_v61, %v871_v53 }
  0xfd   : > { %v583_v2 = vadd.f32 %v791_v35, %v570_v58  ;;  %v587_v3 = vadd.f32 %v791_v35, %v574_v59 }
  0xfe   : > { %815 = vst [vmem:[%s268_s10] sm:$0xff] %v814_v62   ;;  %832 = vst [vmem:[%s268_s10 + $0x10] sm:$0xff] %v824_v63   ;;  %v571_v4 = vmul.f32 %v861_v0, %v790_v27  ;;  %v575_v5 = vmul.f32 %v873_v1, %v790_v27 }
  0xff   : > { %v591_v8 = vmax.f32 %v583_v2, 0.0  ;;  %v595_v9 = vmax.f32 %v587_v3, 0.0 }
 0x100   : > { %v584_v6 = vadd.f32 %v791_v35, %v571_v4  ;;  %v588_v7 = vadd.f32 %v791_v35, %v575_v5 }
 0x102   : > { %v592_v10 = vmax.f32 %v584_v6, 0.0  ;;  %v596_v11 = vmax.f32 %v588_v7, 0.0 }
 0x104   : > { %v819_v12 = vpack.c.bf16 %v592_v10, %v591_v8  ;;  %v829_v13 = vpack.c.bf16 %v596_v11, %v595_v9 }
 0x106   : > { %831 = vst [vmem:[%s268_s10 + $0x8] sm:$0xff] %v819_v12   ;;  %833 = vst [vmem:[%s268_s10 + $0x18] sm:$0xff] %v829_v13  }
 0x107 PF: > { %s13_s14 = sadd.s32 1, %s964_s14   ;;  %s1091_s12 = smov %s960_s13 }
 0x108   : > { %p10_p5 = scmp.ge.s32.totalorder %s13_s14, 4   ;;  %s1092_s13 = smov %s1094_s15 }
 0x10a   :  { %12 = sbr.rel (!%p10_p5) target bundleno = 2 (0x2), region = 80 }

// kernel: maps_in_forward.30
= control target key start
LH: loop header
LB: loop body
LE: loop exit
PB: predicated region body
PF: predicated region fallthrough
CT: control target
= control target key end

     0   :  { %s2546_s12 = smov 0   ;;  %s2548_s13 = smov 0   ;;  %s3096_s0 = inlined_call_operand.vmem [shape: bf16[512,1152], index: 0, kind: input, shape index: {}]   ;;  %s3097_s1 = inlined_call_operand.vmem [shape: bf16[1152,128], index: 1, kind: input, shape index: {}]   ;;  %s3098_s2 = inlined_call_operand.vmem [shape: f32[2,128], index: 2, kind: input, shape index: {}]   ;;  %s3099_s3 = inlined_call_operand.vmem [shape: bf16[512,128], index: 3, kind: output, shape index: {}]  }
   0x1   :  { %s2550_s14 = smov 0   ;;  %s2552_s15 = smov 0  }
   0x2   :  { %s2554_s16 = smov 0   ;;  %s2556_s17 = smov 0  }
   0x3   :  { %s2558_s18 = smov 0  }
   0x4 LB: > { %s25_s19 = sadd.s32 1, %s2516_s16  ;;  %s32_s20 = sadd.s32 1, %s2520_s17  ;;  %s2524_s18 = sphi %s2558_s18, %s13_s18   ;;  %s2520_s17 = sphi %s2556_s17, %s3105_s17   ;;  %s2516_s16 = sphi %s2554_s16, %s3104_s16   ;;  %s2512_s15 = sphi %s2552_s15, %s3103_s15   ;;  %s2508_s14 = sphi %s2550_s14, %s3102_s14   ;;  %s2504_s13 = sphi %s2548_s13, %s3101_s13   ;;  %s2500_s12 = sphi %s2546_s12, %s3100_s12  }
   0x5   : > { %p26_p0 = scmp.ge.s32.totalorder %s25_s19, 3  ;;  %p48_p1 = scmp.ne.s32.totalorder %s2504_s13, %s2500_s12 }
   0x6   : > { %p49_p2 = scmp.eq.s32.totalorder %s2524_s18, 0  ;;  %s41_s24 = sadd.s32 1, %s2504_s13 }
   0x7   : > { %s3107_s19 = smov (%p26_p0, %s25_s19), 0  ;;  %s3109_s20 = smov (!%p26_p0, %s32_s20), %s2520_s17 }
   0x8   : > { %p50_p3 = por %p49_p2, %p48_p1  ;;  %p34_p4 = scmp.ge.s32.totalorder %s3109_s20, 2 }
   0x9   : > { %s37_s21 = ssub.s32 %s2516_s16, %s3107_s19  ;;  %p1813_p6 = scmp.ge.s32.totalorder %s2524_s18, 6 }
   0xa   : > { %s3111_s20 = smov (%p34_p4, %s3109_s20), 0 }
   0xb   : > { %s36_s22 = ssub.s32 %s2520_s17, %s3111_s20  ;;  %163 = sbr.rel (%p1813_p6) target bundleno = 62 (0x3e), region = 20 }
   0xc   : > { %s38_s23 = sor.u32 %s37_s21, %s36_s22 }
   0xd   : > { %p39_p5 = scmp.eq.s32.totalorder %s38_s23, 0 }
   0xf   : > { %s2597_s25 = scalar_select %p39_p5, %s2504_s13, %s41_s24  }
  0x10   : > { %166 = sbr.rel (!%p50_p3) target bundleno = 62 (0x3e), region = 24  ;;  %s168_s26 = sand.u32 (%p50_p3), 1, %s2504_s13  }
  0x11   : > { %s172_s27 = smul.u32 (%p50_p3), 3, %s2516_s16 }
  0x12   : > { %s2323_s28 = smul.u32 (%p50_p3), 384, %s168_s26 }
  0x13   : > { %s2324_s29 = smul.u32 (%p50_p3), 288, %s2520_s17 }
  0x14   : > { %s2611_s8 = scalar_lea.vmem (%p50_p3), [#allocation3], %s2323_s28 }
  0x15   : > { %s174_s30 = sadd.s32 %s2324_s29, %s172_s27 }
  0x16   : > { %s1816_s4 = sshll.u32 %s174_s30, 2 }
  0x17   : > { %s2606_s7 = scalar_lea.vmem %s3096_s0, %s1816_s4 }
  0x18   : > { %v191_v0 = vld [vmem:[%s2606_s7] sm:$0xff]  ;;  %v195_v2 = vld [vmem:[%s2606_s7 + $0x48] sm:$0xff]  ;;  %v199_v4 = vld [vmem:[%s2606_s7 + $0x90] sm:$0xff] }
  0x19   : > { %v193_v1 = vld [vmem:[%s2606_s7 + $0x24] sm:$0xff]  ;;  %192 = vst [vmem:[%s2611_s8] sm:$0xff] %v191_v0  ;;  %196 = vst [vmem:[%s2611_s8 + $0x18] sm:$0xff] %v195_v2  ;;  %v197_v3 = vld [vmem:[%s2606_s7 + $0x6c] sm:$0xff] }
  0x1a   : > { %194 = vst [vmem:[%s2611_s8 + $0xc] sm:$0xff] %v193_v1  ;;  %v201_v5 = vld [vmem:[%s2606_s7 + $0xb4] sm:$0xff]  ;;  %198 = vst [vmem:[%s2611_s8 + $0x24] sm:$0xff] %v197_v3  ;;  %v205_v7 = vld [vmem:[%s2606_s7 + $0xfc] sm:$0xff] }
  0x1b   : > { %200 = vst [vmem:[%s2611_s8 + $0x30] sm:$0xff] %v199_v4  ;;  %202 = vst [vmem:[%s2611_s8 + $0x3c] sm:$0xff] %v201_v5  ;;  %v203_v6 = vld [vmem:[%s2606_s7 + $0xd8] sm:$0xff]  ;;  %v207_v8 = vld [vmem:[%s2606_s7 + $0x120] sm:$0xff] }
  0x1c   : > { %204 = vst [vmem:[%s2611_s8 + $0x48] sm:$0xff] %v203_v6  ;;  %206 = vst [vmem:[%s2611_s8 + $0x54] sm:$0xff] %v205_v7  ;;  %v209_v9 = vld [vmem:[%s2606_s7 + $0x144] sm:$0xff]  ;;  %v213_v11 = vld [vmem:[%s2606_s7 + $0x18c] sm:$0xff] }
  0x1d   : > { %208 = vst [vmem:[%s2611_s8 + $0x60] sm:$0xff] %v207_v8  ;;  %v211_v10 = vld [vmem:[%s2606_s7 + $0x168] sm:$0xff]  ;;  %210 = vst [vmem:[%s2611_s8 + $0x6c] sm:$0xff] %v209_v9  ;;  %v215_v12 = vld [vmem:[%s2606_s7 + $0x1b0] sm:$0xff] }
  0x1e   : > { %212 = vst [vmem:[%s2611_s8 + $0x78] sm:$0xff] %v211_v10  ;;  %214 = vst [vmem:[%s2611_s8 + $0x84] sm:$0xff] %v213_v11  ;;  %v217_v13 = vld [vmem:[%s2606_s7 + $0x1d4] sm:$0xff]  ;;  %v221_v15 = vld [vmem:[%s2606_s7 + $0x21c] sm:$0xff] }
  0x1f   : > { %v219_v14 = vld [vmem:[%s2606_s7 + $0x1f8] sm:$0xff]  ;;  %216 = vst [vmem:[%s2611_s8 + $0x90] sm:$0xff] %v215_v12  ;;  %218 = vst [vmem:[%s2611_s8 + $0x9c] sm:$0xff] %v217_v13  ;;  %v223_v16 = vld [vmem:[%s2606_s7 + $0x240] sm:$0xff] }
  0x20   : > { %220 = vst [vmem:[%s2611_s8 + $0xa8] sm:$0xff] %v219_v14  ;;  %v225_v17 = vld [vmem:[%s2606_s7 + $0x264] sm:$0xff]  ;;  %222 = vst [vmem:[%s2611_s8 + $0xb4] sm:$0xff] %v221_v15  ;;  %v229_v19 = vld [vmem:[%s2606_s7 + $0x2ac] sm:$0xff] }
  0x21   : > { %224 = vst [vmem:[%s2611_s8 + $0xc0] sm:$0xff] %v223_v16  ;;  %226 = vst [vmem:[%s2611_s8 + $0xcc] sm:$0xff] %v225_v17  ;;  %v227_v18 = vld [vmem:[%s2606_s7 + $0x288] sm:$0xff]  ;;  %v231_v20 = vld [vmem:[%s2606_s7 + $0x2d0] sm:$0xff] }
  0x22   : > { %228 = vst [vmem:[%s2611_s8 + $0xd8] sm:$0xff] %v227_v18  ;;  %230 = vst [vmem:[%s2611_s8 + $0xe4] sm:$0xff] %v229_v19  ;;  %v233_v21 = vld [vmem:[%s2606_s7 + $0x2f4] sm:$0xff]  ;;  %v237_v23 = vld [vmem:[%s2606_s7 + $0x33c] sm:$0xff] }
  0x23   : > { %232 = vst [vmem:[%s2611_s8 + $0xf0] sm:$0xff] %v231_v20  ;;  %v235_v22 = vld [vmem:[%s2606_s7 + $0x318] sm:$0xff]  ;;  %234 = vst [vmem:[%s2611_s8 + $0xfc] sm:$0xff] %v233_v21  ;;  %v239_v24 = vld [vmem:[%s2606_s7 + $0x360] sm:$0xff] }
  0x24   : > { %236 = vst [vmem:[%s2611_s8 + $0x108] sm:$0xff] %v235_v22  ;;  %238 = vst [vmem:[%s2611_s8 + $0x114] sm:$0xff] %v237_v23  ;;  %v241_v25 = vld [vmem:[%s2606_s7 + $0x384] sm:$0xff]  ;;  %v245_v27 = vld [vmem:[%s2606_s7 + $0x3cc] sm:$0xff] }
  0x25   : > { %v243_v26 = vld [vmem:[%s2606_s7 + $0x3a8] sm:$0xff]  ;;  %240 = vst [vmem:[%s2611_s8 + $0x120] sm:$0xff] %v239_v24  ;;  %242 = vst [vmem:[%s2611_s8 + $0x12c] sm:$0xff] %v241_v25  ;;  %v247_v28 = vld [vmem:[%s2606_s7 + $0x3f0] sm:$0xff] }
  0x26   : > { %244 = vst [vmem:[%s2611_s8 + $0x138] sm:$0xff] %v243_v26  ;;  %v249_v29 = vld [vmem:[%s2606_s7 + $0x414] sm:$0xff]  ;;  %246 = vst [vmem:[%s2611_s8 + $0x144] sm:$0xff] %v245_v27  ;;  %v253_v31 = vld [vmem:[%s2606_s7 + $0x45c] sm:$0xff] }
  0x27   : > { %248 = vst [vmem:[%s2611_s8 + $0x150] sm:$0xff] %v247_v28  ;;  %250 = vst [vmem:[%s2611_s8 + $0x15c] sm:$0xff] %v249_v29  ;;  %v251_v30 = vld [vmem:[%s2606_s7 + $0x438] sm:$0xff]  ;;  %v1817_v32 = vld [vmem:[%s2606_s7 + $0x8] sm:$0xf] }
  0x28   : > { %252 = vst [vmem:[%s2611_s8 + $0x168] sm:$0xff] %v251_v30  ;;  %254 = vst [vmem:[%s2611_s8 + $0x174] sm:$0xff] %v253_v31  ;;  %v1819_v33 = vld [vmem:[%s2606_s7 + $0x2c] sm:$0xf]  ;;  %v1821_v34 = vld [vmem:[%s2606_s7 + $0x50] sm:$0xf] }
  0x29   : > { %1818 = vst [vmem:[%s2611_s8 + $0x8] sm:$0xf] %v1817_v32  ;;  %v1823_v35 = vld [vmem:[%s2606_s7 + $0x74] sm:$0xf]  ;;  %1820 = vst [vmem:[%s2611_s8 + $0x14] sm:$0xf] %v1819_v33 }
  0x2a   : > { %1822 = vst [vmem:[%s2611_s8 + $0x20] sm:$0xf] %v1821_v34  ;;  %1824 = vst [vmem:[%s2611_s8 + $0x2c] sm:$0xf] %v1823_v35  ;;  %v1825_v36 = vld [vmem:[%s2606_s7 + $0x98] sm:$0xf] }
  0x2b   : > { %v1827_v37 = vld [vmem:[%s2606_s7 + $0xbc] sm:$0xf]  ;;  %v1829_v38 = vld [vmem:[%s2606_s7 + $0xe0] sm:$0xf]  ;;  %1826 = vst [vmem:[%s2611_s8 + $0x38] sm:$0xf] %v1825_v36 }
  0x2c   : > { %1828 = vst [vmem:[%s2611_s8 + $0x44] sm:$0xf] %v1827_v37  ;;  %1830 = vst [vmem:[%s2611_s8 + $0x50] sm:$0xf] %v1829_v38  ;;  %v1831_v39 = vld [vmem:[%s2606_s7 + $0x104] sm:$0xf] }
  0x2d   : > { %v1833_v40 = vld [vmem:[%s2606_s7 + $0x128] sm:$0xf]  ;;  %v1835_v41 = vld [vmem:[%s2606_s7 + $0x14c] sm:$0xf]  ;;  %1832 = vst [vmem:[%s2611_s8 + $0x5c] sm:$0xf] %v1831_v39 }
  0x2e   : > { %1834 = vst [vmem:[%s2611_s8 + $0x68] sm:$0xf] %v1833_v40  ;;  %1836 = vst [vmem:[%s2611_s8 + $0x74] sm:$0xf] %v1835_v41  ;;  %v1837_v42 = vld [vmem:[%s2606_s7 + $0x170] sm:$0xf] }
  0x2f   : > { %v1839_v43 = vld [vmem:[%s2606_s7 + $0x194] sm:$0xf]  ;;  %v1841_v44 = vld [vmem:[%s2606_s7 + $0x1b8] sm:$0xf]  ;;  %1838 = vst [vmem:[%s2611_s8 + $0x80] sm:$0xf] %v1837_v42 }
  0x30   : > { %1840 = vst [vmem:[%s2611_s8 + $0x8c] sm:$0xf] %v1839_v43  ;;  %1842 = vst [vmem:[%s2611_s8 + $0x98] sm:$0xf] %v1841_v44  ;;  %v1843_v45 = vld [vmem:[%s2606_s7 + $0x1dc] sm:$0xf] }
  0x31   : > { %v1845_v46 = vld [vmem:[%s2606_s7 + $0x200] sm:$0xf]  ;;  %v1847_v47 = vld [vmem:[%s2606_s7 + $0x224] sm:$0xf]  ;;  %1844 = vst [vmem:[%s2611_s8 + $0xa4] sm:$0xf] %v1843_v45 }
  0x32   : > { %1846 = vst [vmem:[%s2611_s8 + $0xb0] sm:$0xf] %v1845_v46  ;;  %1848 = vst [vmem:[%s2611_s8 + $0xbc] sm:$0xf] %v1847_v47  ;;  %v1849_v48 = vld [vmem:[%s2606_s7 + $0x248] sm:$0xf] }
  0x33   : > { %v1851_v49 = vld [vmem:[%s2606_s7 + $0x26c] sm:$0xf]  ;;  %v1853_v50 = vld [vmem:[%s2606_s7 + $0x290] sm:$0xf]  ;;  %1850 = vst [vmem:[%s2611_s8 + $0xc8] sm:$0xf] %v1849_v48 }
  0x34   : > { %1852 = vst [vmem:[%s2611_s8 + $0xd4] sm:$0xf] %v1851_v49  ;;  %1854 = vst [vmem:[%s2611_s8 + $0xe0] sm:$0xf] %v1853_v50  ;;  %v1855_v51 = vld [vmem:[%s2606_s7 + $0x2b4] sm:$0xf] }
  0x35   : > { %v1857_v52 = vld [vmem:[%s2606_s7 + $0x2d8] sm:$0xf]  ;;  %v1859_v53 = vld [vmem:[%s2606_s7 + $0x2fc] sm:$0xf]  ;;  %1856 = vst [vmem:[%s2611_s8 + $0xec] sm:$0xf] %v1855_v51 }
  0x36   : > { %1858 = vst [vmem:[%s2611_s8 + $0xf8] sm:$0xf] %v1857_v52  ;;  %1860 = vst [vmem:[%s2611_s8 + $0x104] sm:$0xf] %v1859_v53  ;;  %v1861_v54 = vld [vmem:[%s2606_s7 + $0x320] sm:$0xf] }
  0x37   : > { %v1863_v55 = vld [vmem:[%s2606_s7 + $0x344] sm:$0xf]  ;;  %v1865_v56 = vld [vmem:[%s2606_s7 + $0x368] sm:$0xf]  ;;  %1862 = vst [vmem:[%s2611_s8 + $0x110] sm:$0xf] %v1861_v54 }
  0x38   : > { %1864 = vst [vmem:[%s2611_s8 + $0x11c] sm:$0xf] %v1863_v55  ;;  %1866 = vst [vmem:[%s2611_s8 + $0x128] sm:$0xf] %v1865_v56  ;;  %v1867_v57 = vld [vmem:[%s2606_s7 + $0x38c] sm:$0xf] }
  0x39   : > { %v1869_v58 = vld [vmem:[%s2606_s7 + $0x3b0] sm:$0xf]  ;;  %v1871_v59 = vld [vmem:[%s2606_s7 + $0x3d4] sm:$0xf]  ;;  %1868 = vst [vmem:[%s2611_s8 + $0x134] sm:$0xf] %v1867_v57 }
  0x3a   : > { %1870 = vst [vmem:[%s2611_s8 + $0x140] sm:$0xf] %v1869_v58  ;;  %1872 = vst [vmem:[%s2611_s8 + $0x14c] sm:$0xf] %v1871_v59  ;;  %v1873_v60 = vld [vmem:[%s2606_s7 + $0x3f8] sm:$0xf] }
  0x3b   : > { %v1875_v61 = vld [vmem:[%s2606_s7 + $0x41c] sm:$0xf]  ;;  %v1877_v62 = vld [vmem:[%s2606_s7 + $0x440] sm:$0xf]  ;;  %1874 = vst [vmem:[%s2611_s8 + $0x158] sm:$0xf] %v1873_v60 }
  0x3c   : > { %1876 = vst [vmem:[%s2611_s8 + $0x164] sm:$0xf] %v1875_v61  ;;  %1878 = vst [vmem:[%s2611_s8 + $0x170] sm:$0xf] %v1877_v62  ;;  %v1879_v63 = vld [vmem:[%s2606_s7 + $0x464] sm:$0xf] }
  0x3d   : > { %1880 = vst [vmem:[%s2611_s8 + $0x17c] sm:$0xf] %v1879_v63 }
  0x3e PF: > { %p1881_p7 = scmp.ge.s32.totalorder %s2524_s18, 1  ;;  %p343_p8 = scmp.lt.s32.totalorder %s2524_s18, 7 }
  0x40   : > { %p344_p9 = pnand %p1881_p7, %p343_p8 }
  0x41   : > { %s390_s9 = smul.u32 (!%p344_p9), 48, %s2508_s14  ;;  %s1883_s10 = sshll.u32 (!%p344_p9), %s2512_s15, 5 }
  0x42   : > { %347 = sbr.rel (%p344_p9) target bundleno = 481 (0x1e1), region = 54  ;;  %p404_p10 = scmp.lt.s32.totalorder (!%p344_p9), %s1883_s10, 63 }
  0x43   : > { %s350_s11 = sand.u32 (!%p344_p9), 1, %s2500_s12   ;;  %p391_p11 = scmp.lt.s32.totalorder (!%p344_p9), %s390_s9, 143 }
  0x44   : > { %s2325_s21 = smul.u32 (!%p344_p9), 384, %s350_s11  ;;  %p1957_p12 = scmp.ne.s32.totalorder (!%p344_p9), %s2508_s14, 0 }
  0x46   : > { %s2748_s28 = scalar_lea.vmem (!%p344_p9), [#allocation3], %s2325_s21 }
  0x47   : > { %s3113_s10 = smov (!%p404_p10, %s1883_s10), 63  ;;  %s3115_s9 = smov (!%p391_p11, %s390_s9), 143  ;;  %v2400_v0 = vld [vmem:[%s2748_s28 + $0x4] ss:$12 sps:$4 sm:$0xff]   ;;  %v2398_v19 = vld [vmem:[%s2748_s28] ss:$12 sps:$4 sm:$0xff]  }
  0x48   : > { %s1884_s22 = sshll.u32 %s3113_s10, 2  ;;  %s1882_s23 = sshll.u32 %s3115_s9, 2  ;;  %957 = vmatprep.mubr.bf16.mxu0 %v2400_v0  ;;  %v2403_v12 = vld [vmem:[%s2748_s28 + $0x124] ss:$12 sps:$4 sm:$0xff]   ;;  %v2401_v20 = vld [vmem:[%s2748_s28 + $0x120] ss:$12 sps:$4 sm:$0xff]  }
  0x49   : > { %s2746_s27 = scalar_lea.vmem %s3099_s3, %s1884_s22  ;;  %s2753_s15 = scalar_lea.vmem %s3097_s1, %s1882_s23  ;;  %1053 = vmatprep.mubr.bf16.mxu1 %v2403_v12  ;;  %v2406_v22 = vld [vmem:[%s2748_s28 + $0x1c] ss:$12 sps:$4 sm:$0xff]   ;;  %v2410_v24 = vld [vmem:[%s2748_s28 + $0x18] ss:$12 sps:$4 sm:$0xff]   ;;  %v2414_v28 = vld [vmem:[%s2748_s28 + $0x34] ss:$12 sps:$4 sm:$0xff]  }
  0x4a   : > { %v2382_v1 = vld [vmem:[%s2753_s15 + $0x78] sm:$0xff]   ;;  %v2384_v3 = vld [vmem:[%s2753_s15 + $0x70] sm:$0xff]   ;;  %v2386_v5 = vld [vmem:[%s2753_s15 + $0x68] sm:$0xff]  }
  0x4b   : > { %v2383_v2 = vld [vmem:[%s2753_s15 + $0x38] sm:$0xff]   ;;  %2123 = vmatprep.subr.bf16.mxu0 %v2382_v1  ;;  %2307 = vmatprep.subr.bf16.mxu1 %v2382_v1  ;;  %v2385_v4 = vld [vmem:[%s2753_s15 + $0x30] sm:$0xff]   ;;  %v2387_v6 = vld [vmem:[%s2753_s15 + $0x28] sm:$0xff]  }
  0x4c   : > { %2124 = vmatpush3.bf16.msra.mxu0 %v2383_v2  ;;  %2315 = vmatpush3.bf16.msra.mxu1 %v2383_v2  ;;  %v2388_v7 = vld [vmem:[%s2753_s15 + $0x60] sm:$0xff]   ;;  %v2390_v9 = vld [vmem:[%s2753_s15 + $0x58] sm:$0xff]   ;;  %v2392_v11 = vld [vmem:[%s2753_s15 + $0x50] sm:$0xff]  }
  0x4d   : > { %2125 = vmatprep.subr.bf16.mxu0 %v2384_v3  ;;  %2308 = vmatprep.subr.bf16.mxu1 %v2384_v3  ;;  %v2389_v8 = vld [vmem:[%s2753_s15 + $0x20] sm:$0xff]   ;;  %v2391_v10 = vld [vmem:[%s2753_s15 + $0x18] sm:$0xff]   ;;  %v2393_v13 = vld [vmem:[%s2753_s15 + $0x10] sm:$0xff]  }
  0x4e   : > { %v2394_v14 = vld [vmem:[%s2753_s15 + $0x48] sm:$0xff]   ;;  %v2396_v16 = vld [vmem:[%s2753_s15 + $0x40] sm:$0xff]   ;;  %v2404_v18 = vld [vmem:[%s2753_s15 + $0xb8] sm:$0xff]  }
  0x4f   : > { %v2395_v15 = vld [vmem:[%s2753_s15 + $0x8] sm:$0xff]   ;;  %v2397_v17 = vld [vmem:[%s2753_s15] sm:$0xff]   ;;  %v2405_v21 = vld [vmem:[%s2753_s15 + $0xb0] sm:$0xff]  }
  0x50   : > { %2126 = vmatpush3.bf16.msra.mxu0 %v2385_v4  ;;  %2316 = vmatpush3.bf16.msra.mxu1 %v2385_v4  ;;  %v2408_v23 = vld [vmem:[%s2748_s28 + $0x13c] ss:$12 sps:$4 sm:$0xff]   ;;  %v2411_v26 = vld [vmem:[%s2748_s28 + $0x138] ss:$12 sps:$4 sm:$0xff]   ;;  %v2416_v29 = vld [vmem:[%s2748_s28 + $0x154] ss:$12 sps:$4 sm:$0xff]  }
  0x51   : > { %2127 = vmatprep.subr.bf16.mxu0 %v2386_v5  ;;  %2309 = vmatprep.subr.bf16.mxu1 %v2386_v5  ;;  %v2412_v25 = vld [vmem:[%s2753_s15 + $0xa8] sm:$0xff]   ;;  %v2413_v27 = vld [vmem:[%s2753_s15 + $0xa0] sm:$0xff]   ;;  %v2418_v30 = vld [vmem:[%s2748_s28 + $0x30] ss:$12 sps:$4 sm:$0xff]  }
  0x52   : > { %v2420_v31 = vld [vmem:[%s2753_s15 + $0x98] sm:$0xff]   ;;  %v2421_v33 = vld [vmem:[%s2753_s15 + $0x90] sm:$0xff]   ;;  %v2428_v36 = vld [vmem:[%s2753_s15 + $0x88] sm:$0xff]  }
  0x53   : > { %v2419_v32 = vld [vmem:[%s2748_s28 + $0x150] ss:$12 sps:$4 sm:$0xff]   ;;  %v2422_v34 = vld [vmem:[%s2748_s28 + $0x4c] ss:$12 sps:$4 sm:$0xff]   ;;  %v2426_v37 = vld [vmem:[%s2748_s28 + $0x48] ss:$12 sps:$4 sm:$0xff]  }
  0x54   : > { %2128 = vmatpush3.bf16.msra.mxu0 %v2387_v6  ;;  %2317 = vmatpush3.bf16.msra.mxu1 %v2387_v6  ;;  %v2424_v35 = vld [vmem:[%s2748_s28 + $0x16c] ss:$12 sps:$4 sm:$0xff]   ;;  %v2427_v38 = vld [vmem:[%s2748_s28 + $0x168] ss:$12 sps:$4 sm:$0xff]   ;;  %v2429_v39 = vld [vmem:[%s2753_s15 + $0x80] sm:$0xff]  }
  0x55   : > { %2129 = vmatprep.subr.bf16.mxu0 %v2388_v7  ;;  %2310 = vmatprep.subr.bf16.mxu1 %v2388_v7  ;;  %v2430_v40 = vld [vmem:[%s2748_s28 + $0x64] ss:$12 sps:$4 sm:$0xff]   ;;  %v2432_v41 = vld [vmem:[%s2748_s28 + $0x8] ss:$12 sps:$4 sm:$0xff]   ;;  %v2433_v42 = vld [vmem:[%s2748_s28 + $0x60] ss:$12 sps:$4 sm:$0xff]  }
  0x56   : > { %v2434_v43 = vld [vmem:[%s2748_s28 + $0x20] ss:$12 sps:$4 sm:$0xff]   ;;  %v2435_v44 = vld [vmem:[%s2748_s28 + $0x7c] ss:$12 sps:$4 sm:$0xff]   ;;  %v2437_v45 = vld [vmem:[%s2748_s28 + $0x38] ss:$12 sps:$4 sm:$0xff]  }
  0x57   : > { %v2438_v46 = vld [vmem:[%s2748_s28 + $0x78] ss:$12 sps:$4 sm:$0xff]   ;;  %v2439_v47 = vld [vmem:[%s2748_s28 + $0x50] ss:$12 sps:$4 sm:$0xff]   ;;  %v2440_v48 = vld [vmem:[%s2748_s28 + $0x94] ss:$12 sps:$4 sm:$0xff]  }
  0x58   : > { %2130 = vmatpush3.bf16.msra.mxu0 %v2389_v8  ;;  %2318 = vmatpush3.bf16.msra.mxu1 %v2389_v8  ;;  %v2442_v49 = vld [vmem:[%s2748_s28 + $0x68] ss:$12 sps:$4 sm:$0xff]   ;;  %v2443_v50 = vld [vmem:[%s2748_s28 + $0x90] ss:$12 sps:$4 sm:$0xff]   ;;  %v2444_v51 = vld [vmem:[%s2748_s28 + $0x80] ss:$12 sps:$4 sm:$0xff]  }
  0x59   : > { %2131 = vmatprep.subr.bf16.mxu0 %v2390_v9  ;;  %2311 = vmatprep.subr.bf16.mxu1 %v2390_v9  ;;  %v2445_v52 = vld [vmem:[%s2748_s28 + $0xac] ss:$12 sps:$4 sm:$0xff]   ;;  %v2448_v54 = vld [vmem:[%s2748_s28 + $0xa8] ss:$12 sps:$4 sm:$0xff]   ;;  %v2449_v55 = vld [vmem:[%s2748_s28 + $0xb0] ss:$12 sps:$4 sm:$0xff]  }
  0x5a   : > { %v2447_v53 = vld [vmem:[%s2748_s28 + $0x98] ss:$12 sps:$4 sm:$0xff]   ;;  %v2452_v57 = vld [vmem:[%s2748_s28 + $0xc8] ss:$12 sps:$4 sm:$0xff]   ;;  %v2453_v58 = vld [vmem:[%s2748_s28 + $0xc0] ss:$12 sps:$4 sm:$0xff]  }
  0x5b   : > { %v2450_v56 = vld [vmem:[%s2748_s28 + $0xc4] ss:$12 sps:$4 sm:$0xff]   ;;  %v2454_v59 = vld [vmem:[%s2748_s28 + $0xe0] ss:$12 sps:$4 sm:$0xff]   ;;  %v2455_v60 = vld [vmem:[%s2748_s28 + $0xdc] ss:$12 sps:$4 sm:$0xff]  }
  0x5c   : > { %2132 = vmatpush3.bf16.msra.mxu0 %v2391_v10  ;;  %2319 = vmatpush3.bf16.msra.mxu1 %v2391_v10  ;;  %v2457_v61 = vld [vmem:[%s2748_s28 + $0xf8] ss:$12 sps:$4 sm:$0xff]   ;;  %v2459_v63 = vld [vmem:[%s2748_s28 + $0x110] ss:$12 sps:$4 sm:$0xff]   ;;  %v2460_v0 = vld [vmem:[%s2748_s28 + $0xf4] ss:$12 sps:$4 sm:$0xff]  }
  0x5d   : > { %2133 = vmatprep.subr.bf16.mxu0 %v2392_v11  ;;  %2312 = vmatprep.subr.bf16.mxu1 %v2392_v11  ;;  %v2458_v62 = vld [vmem:[%s2748_s28 + $0xd8] ss:$12 sps:$4 sm:$0xff]   ;;  %v2462_v1 = vld [vmem:[%s2748_s28 + $0x128] ss:$12 sps:$4 sm:$0xff]   ;;  %v2463_v2 = vld [vmem:[%s2748_s28 + $0xf0] ss:$12 sps:$4 sm:$0xff]  }
  0x5e   : > { %v2464_v3 = vld [vmem:[%s2748_s28 + $0x140] ss:$12 sps:$4 sm:$0xff]   ;;  %v2467_v5 = vld [vmem:[%s2748_s28 + $0x158] ss:$12 sps:$4 sm:$0xff]   ;;  %v2468_v6 = vld [vmem:[%s2748_s28 + $0x108] ss:$12 sps:$4 sm:$0xff]  }
  0x5f   : > { %v2465_v4 = vld [vmem:[%s2748_s28 + $0x10c] ss:$12 sps:$4 sm:$0xff]   ;;  %v2469_v7 = vld [vmem:[%s2748_s28 + $0x170] ss:$12 sps:$4 sm:$0xff]  }
  0x60   : > { %2134 = vmatpush3.bf16.msra.mxu0 %v2393_v13  ;;  %2320 = vmatpush3.bf16.msra.mxu1 %v2393_v13 }
  0x61   : > { %2135 = vmatprep.subr.bf16.mxu0 %v2394_v14  ;;  %2313 = vmatprep.subr.bf16.mxu1 %v2394_v14 }
  0x64   : > { %2136 = vmatpush3.bf16.msra.mxu0 %v2395_v15  ;;  %2321 = vmatpush3.bf16.msra.mxu1 %v2395_v15 }
  0x65   : > { %2137 = vmatprep.subr.bf16.mxu0 %v2396_v16  ;;  %2314 = vmatprep.subr.bf16.mxu1 %v2396_v16 }
  0x68   : > { %2138 = vmatpush3.bf16.msra.mxu0 %v2397_v17  ;;  %2322 = vmatpush3.bf16.msra.mxu1 %v2397_v17 }
  0x69   : > { %2259 = vmatprep.subr.bf16.mxu1 %v2404_v18 }
  0x6b   : > { %958 = vmatmul.mubr.bf16.vlgmr.msra.gmra.mxu0 %v2398_v19  ;;  %1054 = vmatmul.mubr.bf16.vlgmr.msra.gmra.mxu1 %v2401_v20 }
  0x6c   : > { %2260 = vmatpush3.bf16.msra.mxu1 %v2404_v18  ;;  %965 = vmatprep.mubr.bf16.mxu0 %v2406_v22 }
  0x6d   : > { %2261 = vmatprep.subr.bf16.mxu1 %v2405_v21  ;;  %1061 = vmatprep.mubr.bf16.mxu1 %v2408_v23 }
  0x70   : > { %2262 = vmatpush3.bf16.msra.mxu1 %v2405_v21 }
  0x71   : > { %2263 = vmatprep.subr.bf16.mxu1 %v2412_v25 }
  0x73   : > { %966 = vmatmul.mubr.bf16.gmra.mxu0 %v2410_v24  ;;  %1062 = vmatmul.mubr.bf16.gmra.mxu1 %v2411_v26 }
  0x74   : > { %2264 = vmatpush3.bf16.msra.mxu1 %v2412_v25  ;;  %973 = vmatprep.mubr.bf16.mxu0 %v2414_v28 }
  0x75   : > { %2265 = vmatprep.subr.bf16.mxu1 %v2413_v27  ;;  %1069 = vmatprep.mubr.bf16.mxu1 %v2416_v29 }
  0x78   : > { %2266 = vmatpush3.bf16.msra.mxu1 %v2413_v27 }
  0x79   : > { %2267 = vmatprep.subr.bf16.mxu1 %v2420_v31 }
  0x7b   : > { %974 = vmatmul.mubr.bf16.gmra.mxu0 %v2418_v30  ;;  %1070 = vmatmul.mubr.bf16.gmra.mxu1 %v2419_v32 }
  0x7c   : > { %2268 = vmatpush3.bf16.msra.mxu1 %v2420_v31  ;;  %981 = vmatprep.mubr.bf16.mxu0 %v2422_v34 }
  0x7d   : > { %2269 = vmatprep.subr.bf16.mxu1 %v2421_v33  ;;  %1077 = vmatprep.mubr.bf16.mxu1 %v2424_v35 }
  0x80   : > { %2270 = vmatpush3.bf16.msra.mxu1 %v2421_v33 }
  0x81   : > { %2271 = vmatprep.subr.bf16.mxu1 %v2428_v36 }
  0x83   : > { %982 = vmatmul.mubr.bf16.gmra.mxu0 %v2426_v37  ;;  %1078 = vmatmul.mubr.bf16.gmra.mxu1 %v2427_v38 }
  0x84   : > { %2272 = vmatpush3.bf16.msra.mxu1 %v2428_v36  ;;  %989 = vmatprep.mubr.bf16.mxu0 %v2430_v40 }
  0x85   : > { %2273 = vmatprep.subr.bf16.mxu1 %v2429_v39  ;;  %2275 = vmatprep.mubr.bf16.mxu1 %v2432_v41 }
  0x88   : > { %2274 = vmatpush3.bf16.msra.mxu1 %v2429_v39 }
  0x8b   : > { %990 = vmatmul.mubr.bf16.gmra.mxu0 %v2433_v42  ;;  %2276 = vmatmul.mubr.bf16.vlgmr.msra.gmra.mxu1 %v2434_v43 }
  0x8c   : > { %997 = vmatprep.mubr.bf16.mxu0 %v2435_v44  ;;  %2279 = vmatprep.mubr.bf16.mxu1 %v2437_v45 }
  0x93   : > { %998 = vmatmul.mubr.bf16.gmra.mxu0 %v2438_v46  ;;  %2280 = vmatmul.mubr.bf16.gmra.mxu1 %v2439_v47 }
  0x94   : > { %1005 = vmatprep.mubr.bf16.mxu0 %v2440_v48  ;;  %2283 = vmatprep.mubr.bf16.mxu1 %v2442_v49 }
  0x9b   : > { %1006 = vmatmul.mubr.bf16.gmra.mxu0 %v2443_v50  ;;  %2284 = vmatmul.mubr.bf16.gmra.mxu1 %v2444_v51 }
  0x9c   : > { %1013 = vmatprep.mubr.bf16.mxu0 %v2445_v52  ;;  %2287 = vmatprep.mubr.bf16.mxu1 %v2447_v53 }
  0xa3   : > { %1014 = vmatmul.mubr.bf16.gmra.mxu0 %v2448_v54  ;;  %2288 = vmatmul.mubr.bf16.gmra.mxu1 %v2449_v55 }
  0xa4   : > { %1021 = vmatprep.mubr.bf16.mxu0 %v2450_v56  ;;  %2291 = vmatprep.mubr.bf16.mxu1 %v2452_v57 }
  0xab   : > { %1022 = vmatmul.mubr.bf16.gmra.mxu0 %v2453_v58  ;;  %2292 = vmatmul.mubr.bf16.gmra.mxu1 %v2454_v59 }
  0xac   : > { %1029 = vmatprep.mubr.bf16.mxu0 %v2455_v60  ;;  %2295 = vmatprep.mubr.bf16.mxu1 %v2457_v61 }
  0xb3   : > { %1030 = vmatmul.mubr.bf16.gmra.mxu0 %v2458_v62  ;;  %2296 = vmatmul.mubr.bf16.gmra.mxu1 %v2459_v63 }
  0xb4   : > { %1037 = vmatprep.mubr.bf16.mxu0 %v2460_v0  ;;  %2299 = vmatprep.mubr.bf16.mxu1 %v2462_v1 }
  0xbb   : > { %1038 = vmatmul.mubr.bf16.gmra.mxu0 %v2463_v2  ;;  %2300 = vmatmul.mubr.bf16.gmra.mxu1 %v2464_v3 }
  0xbc   : > { %1045 = vmatprep.mubr.bf16.mxu0 %v2465_v4  ;;  %2303 = vmatprep.mubr.bf16.mxu1 %v2467_v5 }
  0xc3   : > { %1046 = vmatmul.mubr.bf16.gmra.mxu0 %v2468_v6  ;;  %2304 = vmatmul.mubr.bf16.gmra.mxu1 %v2469_v7 }
 0x12b   : > { %v2139_v8 = vpop.f32.mrf.mxu0  ;;  %v2211_v9 = vpop.f32.mrf.mxu1 }
 0x12d   : > { %v2140_v10 = vpop.f32.mrf.mxu0  ;;  %v2212_v11 = vpop.f32.mrf.mxu1 }
 0x12e   : > { %v2141_v12 = vadd.f32 %v2140_v10, %v2139_v8  ;;  %v2827_v13 = vadd.f32 %v2212_v11, %v2211_v9 }
 0x12f   : > { %v2142_v14 = vpop.f32.mrf.mxu0  ;;  %v2214_v15 = vpop.f32.mrf.mxu1 }
 0x131   : > { %v2143_v16 = vpop.f32.mrf.mxu0  ;;  %v2215_v17 = vpop.f32.mrf.mxu1 }
 0x132   : > { %v2144_v18 = vadd.f32 %v2143_v16, %v2142_v14  ;;  %v2829_v19 = vadd.f32 %v2215_v17, %v2214_v15 }
 0x133   : > { %v2145_v20 = vpop.f32.mrf.mxu0  ;;  %v2217_v21 = vpop.f32.mrf.mxu1 }
 0x135   : > { %v2146_v22 = vpop.f32.mrf.mxu0  ;;  %v2218_v23 = vpop.f32.mrf.mxu1 }
 0x136   : > { %v2147_v24 = vadd.f32 %v2146_v22, %v2145_v20  ;;  %v2831_v25 = vadd.f32 %v2218_v23, %v2217_v21 }
 0x137   : > { %v2148_v26 = vpop.f32.mrf.mxu0  ;;  %v2220_v27 = vpop.f32.mrf.mxu1 }
 0x139   : > { %v2149_v28 = vpop.f32.mrf.mxu0  ;;  %v2221_v29 = vpop.f32.mrf.mxu1 }
 0x13a   : > { %v2150_v30 = vadd.f32 %v2149_v28, %v2148_v26  ;;  %v2833_v31 = vadd.f32 %v2221_v29, %v2220_v27 }
 0x13b   : > { %v2151_v32 = vpop.f32.mrf.mxu0  ;;  %v2223_v33 = vpop.f32.mrf.mxu1 }
 0x13d   : > { %v2152_v34 = vpop.f32.mrf.mxu0  ;;  %v2224_v35 = vpop.f32.mrf.mxu1 }
 0x13e   : > { %v2153_v36 = vadd.f32 %v2152_v34, %v2151_v32  ;;  %v2835_v37 = vadd.f32 %v2224_v35, %v2223_v33 }
 0x13f   : > { %v2154_v38 = vpop.f32.mrf.mxu0  ;;  %v2226_v39 = vpop.f32.mrf.mxu1 }
 0x141   : > { %v2155_v40 = vpop.f32.mrf.mxu0  ;;  %v2227_v41 = vpop.f32.mrf.mxu1 }
 0x142   : > { %v2156_v42 = vadd.f32 %v2155_v40, %v2154_v38  ;;  %v2837_v43 = vadd.f32 %v2227_v41, %v2226_v39 }
 0x143   : > { %v2157_v44 = vpop.f32.mrf.mxu0  ;;  %v2229_v45 = vpop.f32.mrf.mxu1 }
 0x145   : > { %v2158_v46 = vpop.f32.mrf.mxu0  ;;  %v2230_v47 = vpop.f32.mrf.mxu1 }
 0x146   : > { %v2159_v48 = vadd.f32 %v2158_v46, %v2157_v44  ;;  %v2839_v49 = vadd.f32 %v2230_v47, %v2229_v45 }
 0x147   : > { %v2160_v50 = vpop.f32.mrf.mxu0  ;;  %v2841_v51 = vpop.f32.mrf.mxu1 }
 0x149   : > { %v2161_v52 = vpop.f32.mrf.mxu0  ;;  %v2843_v53 = vpop.f32.mrf.mxu1 }
 0x14a   : > { %v2162_v54 = vadd.f32 %v2161_v52, %v2160_v50 }
 0x14b   : > { %v2163_v55 = vpop.f32.mrf.mxu0  ;;  %v2277_v56 = vpop.f32.mrf.mxu1 }
 0x14c   : > { %v2845_v57 = vadd.f32 %v2277_v56, %v2147_v24 }
 0x14d   : > { %v2164_v58 = vpop.f32.mrf.mxu0  ;;  %v1120_v59 = vpop.f32.mrf.mxu1 }
 0x14e   : > { %v2847_v60 = vadd.f32 %v2141_v12, %v1120_v59  ;;  %v2165_v20 = vadd.f32 %v2164_v58, %v2163_v55 }
 0x14f   : > { %v2166_v61 = vpop.f32.mrf.mxu0  ;;  %v2278_v62 = vpop.f32.mrf.mxu1 }
 0x150   : > { %v2849_v63 = vadd.f32 %v2278_v62, %v2150_v30 }
 0x151   : > { %v2167_v0 = vpop.f32.mrf.mxu0  ;;  %v1123_v1 = vpop.f32.mrf.mxu1 }
 0x152   : > { %v2851_v2 = vadd.f32 %v2144_v18, %v1123_v1  ;;  %v2168_v29 = vadd.f32 %v2167_v0, %v2166_v61 }
 0x153   : > { %v2169_v3 = vpop.f32.mrf.mxu0  ;;  %v2281_v4 = vpop.f32.mrf.mxu1 }
 0x154   : > { %v2853_v5 = vadd.f32 %v2281_v4, %v2159_v48 }
 0x155   : > { %v2170_v6 = vpop.f32.mrf.mxu0  ;;  %v1136_v7 = vpop.f32.mrf.mxu1 }
 0x156   : > { %v2855_v8 = vadd.f32 %v2153_v36, %v1136_v7  ;;  %v2171_v15 = vadd.f32 %v2170_v6, %v2169_v3 }
 0x157   : > { %v2172_v9 = vpop.f32.mrf.mxu0  ;;  %v2282_v10 = vpop.f32.mrf.mxu1 }
 0x158   : > { %v2857_v11 = vadd.f32 %v2282_v10, %v2162_v54 }
 0x159   : > { %v2173_v12 = vpop.f32.mrf.mxu0  ;;  %v1139_v14 = vpop.f32.mrf.mxu1 }
 0x15a   : > { %v2859_v16 = vadd.f32 %v2156_v42, %v1139_v14  ;;  %v2174_v24 = vadd.f32 %v2173_v12, %v2172_v9 }
 0x15b   : > { %v2175_v17 = vpop.f32.mrf.mxu0  ;;  %v2285_v18 = vpop.f32.mrf.mxu1 }
 0x15c   : > { %v2861_v21 = vadd.f32 %v2285_v18, %v2171_v15 }
 0x15d   : > { %v2176_v22 = vpop.f32.mrf.mxu0  ;;  %v1152_v23 = vpop.f32.mrf.mxu1 }
 0x15e   : > { %v2863_v26 = vadd.f32 %v2165_v20, %v1152_v23  ;;  %v2177_v38 = vadd.f32 %v2176_v22, %v2175_v17 }
 0x15f   : > { %v2178_v27 = vpop.f32.mrf.mxu0  ;;  %v2286_v28 = vpop.f32.mrf.mxu1 }
 0x160   : > { %v2865_v30 = vadd.f32 %v2286_v28, %v2174_v24 }
 0x161   : > { %v2179_v32 = vpop.f32.mrf.mxu0  ;;  %v1155_v33 = vpop.f32.mrf.mxu1 }
 0x162   : > { %v2867_v34 = vadd.f32 %v2168_v29, %v1155_v33  ;;  %v2180_v46 = vadd.f32 %v2179_v32, %v2178_v27 }
 0x163   : > { %v2181_v35 = vpop.f32.mrf.mxu0  ;;  %v2289_v36 = vpop.f32.mrf.mxu1 }
 0x165   : > { %v2182_v39 = vpop.f32.mrf.mxu0  ;;  %v1168_v40 = vpop.f32.mrf.mxu1 }
 0x166   : > { %v2183_v41 = vadd.f32 %v2182_v39, %v2181_v35  ;;  %v2869_v42 = vadd.f32 %v2177_v38, %v1168_v40 }
 0x167   : > { %v2184_v44 = vpop.f32.mrf.mxu0  ;;  %v2290_v45 = vpop.f32.mrf.mxu1 }
 0x168   : > { %v2871_v47 = vadd.f32 %v2289_v36, %v2183_v41 }
 0x169   : > { %v2185_v48 = vpop.f32.mrf.mxu0  ;;  %v1171_v50 = vpop.f32.mrf.mxu1 }
 0x16a   : > { %v2186_v52 = vadd.f32 %v2185_v48, %v2184_v44  ;;  %v2873_v54 = vadd.f32 %v2180_v46, %v1171_v50 }
 0x16b   : > { %v2187_v55 = vpop.f32.mrf.mxu0  ;;  %v2293_v56 = vpop.f32.mrf.mxu1 }
 0x16c   : > { %v2875_v58 = vadd.f32 %v2290_v45, %v2186_v52 }
 0x16d   : > { %v2188_v59 = vpop.f32.mrf.mxu0  ;;  %v1184_v61 = vpop.f32.mrf.mxu1 }
 0x16e   : > { %v2189_v62 = vadd.f32 %v2188_v59, %v2187_v55 }
 0x16f   : > { %v2190_v0 = vpop.f32.mrf.mxu0  ;;  %v2294_v1 = vpop.f32.mrf.mxu1 }
 0x170   : > { %v2877_v3 = vadd.f32 %v2189_v62, %v1184_v61  ;;  %v2234_v62 = vadd.f32 %v2843_v53, %v2841_v51 }
 0x171   : > { %v2191_v4 = vpop.f32.mrf.mxu0  ;;  %v1187_v6 = vpop.f32.mrf.mxu1 }
 0x172   : > { %v2192_v7 = vadd.f32 %v2191_v4, %v2190_v0 }
 0x173   : > { %v2193_v9 = vpop.f32.mrf.mxu0  ;;  %v2297_v10 = vpop.f32.mrf.mxu1 }
 0x174   : > { %v2879_v12 = vadd.f32 %v2192_v7, %v1187_v6 }
 0x175   : > { %v2194_v14 = vpop.f32.mrf.mxu0  ;;  %v1200_v15 = vpop.f32.mrf.mxu1 }
 0x176   : > { %v2195_v17 = vadd.f32 %v2194_v14, %v2193_v9 }
 0x177   : > { %v2196_v18 = vpop.f32.mrf.mxu0  ;;  %v2298_v20 = vpop.f32.mrf.mxu1 }
 0x178   : > { %v2881_v22 = vadd.f32 %v2293_v56, %v2195_v17 }
 0x179   : > { %v2197_v23 = vpop.f32.mrf.mxu0  ;;  %v1203_v24 = vpop.f32.mrf.mxu1 }
 0x17a   : > { %v2198_v27 = vadd.f32 %v2197_v23, %v2196_v18 }
 0x17b   : > { %v2199_v28 = vpop.f32.mrf.mxu0  ;;  %v2301_v29 = vpop.f32.mrf.mxu1 }
 0x17c   : > { %v2883_v32 = vadd.f32 %v2294_v1, %v2198_v27  ;;  %v2886_v33 = vadd.f32 %v2301_v29, %v2831_v25 }
 0x17d   : > { %v2200_v35 = vpop.f32.mrf.mxu0  ;;  %v1216_v36 = vpop.f32.mrf.mxu1 }
 0x17e   : > { %v2201_v38 = vadd.f32 %v2200_v35, %v2199_v28  ;;  %v2889_v39 = vadd.f32 %v2827_v13, %v1216_v36 }
 0x17f   : > { %v2202_v40 = vpop.f32.mrf.mxu0  ;;  %v2302_v41 = vpop.f32.mrf.mxu1 }
 0x180   : > { %v2891_v44 = vadd.f32 %v2201_v38, %v1200_v15  ;;  %v2894_v45 = vadd.f32 %v2302_v41, %v2833_v31 }
 0x181   : > { %v2203_v46 = vpop.f32.mrf.mxu0  ;;  %v1219_v48 = vpop.f32.mrf.mxu1 }
 0x182   : > { %v2204_v50 = vadd.f32 %v2203_v46, %v2202_v40  ;;  %v2897_v52 = vadd.f32 %v2829_v19, %v1219_v48 }
 0x183   : > { %v2205_v25 = vpop.f32.mrf.mxu0  ;;  %v2305_v55 = vpop.f32.mrf.mxu1 }
 0x184   : > { %v2899_v56 = vadd.f32 %v2204_v50, %v1203_v24  ;;  %v2902_v13 = vadd.f32 %v2305_v55, %v2839_v49 }
 0x185   : > { %v2206_v59 = vpop.f32.mrf.mxu0  ;;  %v1232_v61 = vpop.f32.mrf.mxu1 }
 0x186   : > { %v2207_v31 = vadd.f32 %v2206_v59, %v2205_v25  ;;  %v2907_v0 = vadd.f32 %v2835_v37, %v1232_v61 }
 0x187   : > { %v2208_v1 = vpop.f32.mrf.mxu0  ;;  %v2306_v4 = vpop.f32.mrf.mxu1 }
 0x188   : > { %v2909_v19 = vadd.f32 %v2297_v10, %v2207_v31  ;;  %v2911_v6 = vadd.f32 %v2306_v4, %v2234_v62  ;;  %1250 = sbr.rel (%p1957_p12) target bundleno = 413 (0x19d), region = 62 }
 0x189   : > { %v2209_v7 = vpop.f32.mrf.mxu0  ;;  %v1235_v9 = vpop.f32.mrf.mxu1 }
 0x18a   : > { %v2210_v14 = vadd.f32 %v2209_v7, %v2208_v1  ;;  %v2914_v49 = vadd.f32 %v2837_v43, %v1235_v9 }
 0x18c   : > { %v2916_v15 = vadd.f32 %v2298_v20, %v2210_v14 }
 0x18d   : > { %1251 = vst [vmem:[#allocation2 + $0xb0] sm:$0xff] %v2847_v60  ;;  %1252 = vst [vmem:[#allocation2] sm:$0xff] %v2851_v2 }
 0x18e   : > { %1253 = vst [vmem:[#allocation2 + $0xd8] sm:$0xff] %v2845_v57  ;;  %1254 = vst [vmem:[#allocation2 + $0x18] sm:$0xff] %v2849_v63 }
 0x18f   : > { %1255 = vst [vmem:[#allocation2 + $0x50] sm:$0xff] %v2855_v8  ;;  %1256 = vst [vmem:[#allocation2 + $0x68] sm:$0xff] %v2859_v16 }
 0x190   : > { %1257 = vst [vmem:[#allocation2 + $0x30] sm:$0xff] %v2853_v5  ;;  %1258 = vst [vmem:[#allocation2 + $0x48] sm:$0xff] %v2857_v11 }
 0x191   : > { %1259 = vst [vmem:[#allocation2 + $0x80] sm:$0xff] %v2863_v26  ;;  %1260 = vst [vmem:[#allocation2 + $0x88] sm:$0xff] %v2867_v34 }
 0x192   : > { %1261 = vst [vmem:[#allocation2 + $0xe8] sm:$0xff] %v2861_v21  ;;  %1262 = vst [vmem:[#allocation2 + $0xb8] sm:$0xff] %v2865_v30 }
 0x193   : > { %1263 = vst [vmem:[#allocation2 + $0x60] sm:$0xff] %v2869_v42  ;;  %1264 = vst [vmem:[#allocation2 + $0xf0] sm:$0xff] %v2873_v54 }
 0x194   : > { %1265 = vst [vmem:[#allocation2 + $0x8] sm:$0xff] %v2871_v47  ;;  %1266 = vst [vmem:[#allocation2 + $0x78] sm:$0xff] %v2875_v58 }
 0x195   : > { %1267 = vst [vmem:[#allocation2 + $0x38] sm:$0xff] %v2877_v3  ;;  %1268 = vst [vmem:[#allocation2 + $0x58] sm:$0xff] %v2879_v12 }
 0x196   : > { %1269 = vst [vmem:[#allocation2 + $0x40] sm:$0xff] %v2881_v22  ;;  %1270 = vst [vmem:[#allocation2 + $0xc8] sm:$0xff] %v2883_v32 }
 0x197   : > { %1271 = vst [vmem:[#allocation2 + $0xe0] sm:$0xff] %v2891_v44  ;;  %1272 = vst [vmem:[#allocation2 + $0x90] sm:$0xff] %v2899_v56 }
 0x198   : > { %1273 = vst [vmem:[#allocation2 + $0x70] sm:$0xff] %v2909_v19  ;;  %1274 = vst [vmem:[#allocation2 + $0xc0] sm:$0xff] %v2916_v15 }
 0x199   : > { %1275 = vst [vmem:[#allocation2 + $0xa8] sm:$0xff] %v2889_v39  ;;  %1276 = vst [vmem:[#allocation2 + $0xd0] sm:$0xff] %v2897_v52 }
 0x19a   : > { %1277 = vst [vmem:[#allocation2 + $0x10] sm:$0xff] %v2886_v33  ;;  %1278 = vst [vmem:[#allocation2 + $0x28] sm:$0xff] %v2894_v45 }
 0x19b   : > { %1279 = vst [vmem:[#allocation2 + $0xa0] sm:$0xff] %v2907_v0  ;;  %1280 = vst [vmem:[#allocation2 + $0xf8] sm:$0xff] %v2914_v49 }
 0x19c   : > { %1281 = vst [vmem:[#allocation2 + $0x20] sm:$0xff] %v2902_v13  ;;  %1282 = vst [vmem:[#allocation2 + $0x98] sm:$0xff] %v2911_v6 }
 0x19d PF: > { %p1958_p13 = scmp.le.s32.totalorder %s2508_s14, 0 }
 0x19f   : > { %1286 = sbr.rel (%p1958_p13) target bundleno = 439 (0x1b7), region = 66 }
 0x1a4   : > { %v1287_v37 = vld [vmem:[#allocation2 + $0xb0] sm:$0xff]  ;;  %v1288_v43 = vld [vmem:[#allocation2] sm:$0xff]  ;;  %v1289_v51 = vld [vmem:[#allocation2 + $0xd8] sm:$0xff] }
 0x1a5   : > { %v1319_v53 = vadd.f32 %v1287_v37, %v2847_v60  ;;  %v1320_v10 = vadd.f32 %v1288_v43, %v2851_v2  ;;  %v1321_v17 = vadd.f32 %v1289_v51, %v2845_v57  ;;  %v1290_v18 = vld [vmem:[#allocation2 + $0x18] sm:$0xff]  ;;  %v1291_v20 = vld [vmem:[#allocation2 + $0x50] sm:$0xff]  ;;  %v1292_v23 = vld [vmem:[#allocation2 + $0x68] sm:$0xff] }
 0x1a6   : > { %v1322_v24 = vadd.f32 %v1290_v18, %v2849_v63  ;;  %v1323_v27 = vadd.f32 %v1291_v20, %v2855_v8  ;;  %v1324_v28 = vadd.f32 %v1292_v23, %v2859_v16  ;;  %v1293_v29 = vld [vmem:[#allocation2 + $0x30] sm:$0xff]  ;;  %v1294_v35 = vld [vmem:[#allocation2 + $0x48] sm:$0xff]  ;;  %v1295_v36 = vld [vmem:[#allocation2 + $0x80] sm:$0xff] }
 0x1a7   : > { %1351 = vst [vmem:[#allocation2 + $0xb0] sm:$0xff] %v1319_v53  ;;  %1352 = vst [vmem:[#allocation2] sm:$0xff] %v1320_v10  ;;  %v1325_v60 = vadd.f32 %v1293_v29, %v2853_v5  ;;  %v1326_v2 = vadd.f32 %v1294_v35, %v2857_v11  ;;  %v1327_v57 = vadd.f32 %v1295_v36, %v2863_v26  ;;  %v1296_v38 = vld [vmem:[#allocation2 + $0x88] sm:$0xff]  ;;  %v1298_v41 = vld [vmem:[#allocation2 + $0xb8] sm:$0xff] }
 0x1a8   : > { %1353 = vst [vmem:[#allocation2 + $0xd8] sm:$0xff] %v1321_v17  ;;  %v1297_v40 = vld [vmem:[#allocation2 + $0xe8] sm:$0xff]  ;;  %1354 = vst [vmem:[#allocation2 + $0x18] sm:$0xff] %v1322_v24  ;;  %v1328_v63 = vadd.f32 %v1296_v38, %v2867_v34  ;;  %v1330_v16 = vadd.f32 %v1298_v41, %v2865_v30  ;;  %v1299_v46 = vld [vmem:[#allocation2 + $0x60] sm:$0xff] }
 0x1a9   : > { %1355 = vst [vmem:[#allocation2 + $0x50] sm:$0xff] %v1323_v27  ;;  %1356 = vst [vmem:[#allocation2 + $0x68] sm:$0xff] %v1324_v28  ;;  %v1329_v8 = vadd.f32 %v1297_v40, %v2861_v21  ;;  %v1300_v48 = vld [vmem:[#allocation2 + $0xf0] sm:$0xff]  ;;  %v1301_v50 = vld [vmem:[#allocation2 + $0x8] sm:$0xff]  ;;  %v1331_v5 = vadd.f32 %v1299_v46, %v2869_v42 }
 0x1aa   : > { %1357 = vst [vmem:[#allocation2 + $0x30] sm:$0xff] %v1325_v60  ;;  %1358 = vst [vmem:[#allocation2 + $0x48] sm:$0xff] %v1326_v2  ;;  %v1332_v11 = vadd.f32 %v1300_v48, %v2873_v54  ;;  %v1333_v26 = vadd.f32 %v1301_v50, %v2871_v47  ;;  %v1302_v25 = vld [vmem:[#allocation2 + $0x78] sm:$0xff]  ;;  %v1305_v61 = vld [vmem:[#allocation2 + $0x40] sm:$0xff] }
 0x1ab   : > { %1359 = vst [vmem:[#allocation2 + $0x80] sm:$0xff] %v1327_v57  ;;  %v1303_v55 = vld [vmem:[#allocation2 + $0x38] sm:$0xff]  ;;  %1360 = vst [vmem:[#allocation2 + $0x88] sm:$0xff] %v1328_v63  ;;  %v1334_v21 = vadd.f32 %v1302_v25, %v2875_v58  ;;  %v1306_v62 = vld [vmem:[#allocation2 + $0xc8] sm:$0xff]  ;;  %v1337_v42 = vadd.f32 %v1305_v61, %v2881_v22 }
 0x1ac   : > { %v1304_v59 = vld [vmem:[#allocation2 + $0x58] sm:$0xff]  ;;  %1361 = vst [vmem:[#allocation2 + $0xe8] sm:$0xff] %v1329_v8  ;;  %1362 = vst [vmem:[#allocation2 + $0xb8] sm:$0xff] %v1330_v16  ;;  %v1335_v30 = vadd.f32 %v1303_v55, %v2877_v3  ;;  %v1307_v31 = vld [vmem:[#allocation2 + $0xe0] sm:$0xff]  ;;  %v1338_v47 = vadd.f32 %v1306_v62, %v2883_v32 }
 0x1ad   : > { %v1336_v34 = vadd.f32 %v1304_v59, %v2879_v12  ;;  %1363 = vst [vmem:[#allocation2 + $0x60] sm:$0xff] %v1331_v5  ;;  %1364 = vst [vmem:[#allocation2 + $0xf0] sm:$0xff] %v1332_v11  ;;  %v1339_v54 = vadd.f32 %v1307_v31, %v2891_v44  ;;  %v1308_v1 = vld [vmem:[#allocation2 + $0x90] sm:$0xff]  ;;  %v1310_v7 = vld [vmem:[#allocation2 + $0xc0] sm:$0xff] }
 0x1ae   : > { %1365 = vst [vmem:[#allocation2 + $0x8] sm:$0xff] %v1333_v26  ;;  %v1309_v4 = vld [vmem:[#allocation2 + $0x70] sm:$0xff]  ;;  %1366 = vst [vmem:[#allocation2 + $0x78] sm:$0xff] %v1334_v21  ;;  %v1340_v58 = vadd.f32 %v1308_v1, %v2899_v56  ;;  %v1342_v12 = vadd.f32 %v1310_v7, %v2916_v15  ;;  %v1311_v9 = vld [vmem:[#allocation2 + $0xa8] sm:$0xff] }
 0x1af   : > { %1367 = vst [vmem:[#allocation2 + $0x38] sm:$0xff] %v1335_v30  ;;  %1368 = vst [vmem:[#allocation2 + $0x58] sm:$0xff] %v1336_v34  ;;  %v1341_v3 = vadd.f32 %v1309_v4, %v2909_v19  ;;  %v1312_v14 = vld [vmem:[#allocation2 + $0xd0] sm:$0xff]  ;;  %v1343_v22 = vadd.f32 %v1311_v9, %v2889_v39  ;;  %v1314_v43 = vld [vmem:[#allocation2 + $0x28] sm:$0xff] }
 0x1b0   : > { %v1313_v37 = vld [vmem:[#allocation2 + $0x10] sm:$0xff]  ;;  %1369 = vst [vmem:[#allocation2 + $0x40] sm:$0xff] %v1337_v42  ;;  %1370 = vst [vmem:[#allocation2 + $0xc8] sm:$0xff] %v1338_v47  ;;  %v1344_v32 = vadd.f32 %v1312_v14, %v2897_v52  ;;  %v1315_v51 = vld [vmem:[#allocation2 + $0xa0] sm:$0xff]  ;;  %v1346_v56 = vadd.f32 %v1314_v43, %v2894_v45 }
 0x1b1   : > { %1371 = vst [vmem:[#allocation2 + $0xe0] sm:$0xff] %v1339_v54  ;;  %v1345_v44 = vadd.f32 %v1313_v37, %v2886_v33  ;;  %v1316_v53 = vld [vmem:[#allocation2 + $0xf8] sm:$0xff]  ;;  %1372 = vst [vmem:[#allocation2 + $0x90] sm:$0xff] %v1340_v58  ;;  %v1347_v19 = vadd.f32 %v1315_v51, %v2907_v0  ;;  %v1317_v10 = vld [vmem:[#allocation2 + $0x20] sm:$0xff] }
 0x1b2   : > { %1373 = vst [vmem:[#allocation2 + $0x70] sm:$0xff] %v1341_v3  ;;  %1374 = vst [vmem:[#allocation2 + $0xc0] sm:$0xff] %v1342_v12  ;;  %v1348_v15 = vadd.f32 %v1316_v53, %v2914_v49  ;;  %v1318_v17 = vld [vmem:[#allocation2 + $0x98] sm:$0xff]  ;;  %v1349_v39 = vadd.f32 %v1317_v10, %v2902_v13 }
 0x1b3   : > { %1375 = vst [vmem:[#allocation2 + $0xa8] sm:$0xff] %v1343_v22  ;;  %1376 = vst [vmem:[#allocation2 + $0xd0] sm:$0xff] %v1344_v32  ;;  %v1350_v33 = vadd.f32 %v1318_v17, %v2911_v6 }
 0x1b4   : > { %1377 = vst [vmem:[#allocation2 + $0x10] sm:$0xff] %v1345_v44  ;;  %1378 = vst [vmem:[#allocation2 + $0x28] sm:$0xff] %v1346_v56 }
 0x1b5   : > { %1379 = vst [vmem:[#allocation2 + $0xa0] sm:$0xff] %v1347_v19  ;;  %1380 = vst [vmem:[#allocation2 + $0xf8] sm:$0xff] %v1348_v15 }
 0x1b6   : > { %1381 = vst [vmem:[#allocation2 + $0x20] sm:$0xff] %v1349_v39  ;;  %1382 = vst [vmem:[#allocation2 + $0x98] sm:$0xff] %v1350_v33 }
 0x1b7 PF: > { %p1959_p0 = scmp.ne.s32.totalorder %s2508_s14, 2 }
 0x1b9   : > { %1386 = sbr.rel (%p1959_p0) target bundleno = 481 (0x1e1), region = 70 }
 0x1be   : > { %v1387_v45 = vld [vmem:[#allocation2 + $0xb0] sm:$0xff]  ;;  %v1388_v52 = vld [vmem:[#allocation2] sm:$0xff]  ;;  %v1389_v18 = vld [vmem:[#allocation2 + $0xd8] sm:$0xff] }
 0x1bf   : > { %v2988_v0 = vld [vmem:[%s3098_s2] ss:$0 sm:$0xff]  ;;  %v2995_v49 = vld [vmem:[%s3098_s2 + $0x1] ss:$0 sm:$0xff]  ;;  %v1390_v20 = vld [vmem:[#allocation2 + $0x18] sm:$0xff] }
 0x1c0   : > { %v1424_v13 = vmul.f32 %v2988_v0, %v1387_v45  ;;  %v1425_v6 = vmul.f32 %v2988_v0, %v1388_v52  ;;  %v1426_v23 = vmul.f32 %v2988_v0, %v1389_v18  ;;  %v1427_v24 = vmul.f32 %v2988_v0, %v1390_v20  ;;  %v1391_v27 = vld [vmem:[#allocation2 + $0x50] sm:$0xff]  ;;  %v1392_v28 = vld [vmem:[#allocation2 + $0x68] sm:$0xff]  ;;  %v1395_v8 = vld [vmem:[#allocation2 + $0x80] sm:$0xff] }
 0x1c1   : > { %v1393_v29 = vld [vmem:[#allocation2 + $0x30] sm:$0xff]  ;;  %v1428_v60 = vmul.f32 %v2988_v0, %v1391_v27  ;;  %v1429_v2 = vmul.f32 %v2988_v0, %v1392_v28  ;;  %v1394_v57 = vld [vmem:[#allocation2 + $0x48] sm:$0xff]  ;;  %v1398_v21 = vld [vmem:[#allocation2 + $0xb8] sm:$0xff]  ;;  %v1432_v62 = vmul.f32 %v2988_v0, %v1395_v8 }
 0x1c2   : > { %v1461_v35 = vadd.f32 %v2995_v49, %v1424_v13  ;;  %v1462_v36 = vadd.f32 %v2995_v49, %v1425_v6  ;;  %v1463_v38 = vadd.f32 %v2995_v49, %v1426_v23  ;;  %v1464_v40 = vadd.f32 %v2995_v49, %v1427_v24  ;;  %v1396_v5 = vld [vmem:[#allocation2 + $0x88] sm:$0xff]  ;;  %v1399_v31 = vld [vmem:[#allocation2 + $0x60] sm:$0xff]  ;;  %v1400_v42 = vld [vmem:[#allocation2 + $0xf0] sm:$0xff] }
 0x1c3   : > { %v1430_v41 = vmul.f32 %v2988_v0, %v1393_v29  ;;  %v1431_v63 = vmul.f32 %v2988_v0, %v1394_v57  ;;  %v1465_v48 = vadd.f32 %v2995_v49, %v1428_v60  ;;  %v1466_v50 = vadd.f32 %v2995_v49, %v1429_v2  ;;  %v1397_v59 = vld [vmem:[#allocation2 + $0xe8] sm:$0xff]  ;;  %v1402_v14 = vld [vmem:[#allocation2 + $0x78] sm:$0xff]  ;;  %v1405_v18 = vld [vmem:[#allocation2 + $0x40] sm:$0xff] }
 0x1c4   : > { %v1493_v16 = vmax.f32 %v1461_v35, 0.0  ;;  %v1494_v46 = vmax.f32 %v1462_v36, 0.0  ;;  %v1495_v11 = vmax.f32 %v1463_v38, 0.0  ;;  %v1496_v26 = vmax.f32 %v1464_v40, 0.0  ;;  %v1401_v7 = vld [vmem:[#allocation2 + $0x8] sm:$0xff]  ;;  %v1403_v43 = vld [vmem:[#allocation2 + $0x38] sm:$0xff] }
 0x1c5   : > { %v1467_v25 = vadd.f32 %v2995_v49, %v1430_v41  ;;  %v1468_v55 = vadd.f32 %v2995_v49, %v1431_v63  ;;  %v1497_v34 = vmax.f32 %v1465_v48, 0.0  ;;  %v1498_v61 = vmax.f32 %v1466_v50, 0.0  ;;  %v1404_v33 = vld [vmem:[#allocation2 + $0x58] sm:$0xff]  ;;  %v1406_v20 = vld [vmem:[#allocation2 + $0xc8] sm:$0xff]  ;;  %v1407_v29 = vld [vmem:[#allocation2 + $0xe0] sm:$0xff] }
 0x1c6   : > { %v2031_v30 = vpack.c.bf16 %v1494_v46, %v1493_v16  ;;  %v2036_v47 = vpack.c.bf16 %v1496_v26, %v1495_v11  ;;  %v1433_v4 = vmul.f32 %v2988_v0, %v1396_v5  ;;  %v1469_v3 = vadd.f32 %v2995_v49, %v1432_v62  ;;  %v1408_v35 = vld [vmem:[#allocation2 + $0x90] sm:$0xff]  ;;  %v1410_v16 = vld [vmem:[#allocation2 + $0xc0] sm:$0xff]  ;;  %v1411_v11 = vld [vmem:[#allocation2 + $0xa8] sm:$0xff] }
 0x1c7   : > { %v1499_v54 = vmax.f32 %v1467_v25, 0.0  ;;  %v1500_v1 = vmax.f32 %v1468_v55, 0.0  ;;  %v2041_v58 = vpack.c.bf16 %v1498_v61, %v1497_v34  ;;  %v1434_v12 = vmul.f32 %v2988_v0, %v1397_v59  ;;  %v1409_v38 = vld [vmem:[#allocation2 + $0x70] sm:$0xff] }
 0x1c8   : > { %2032 = vst [vmem:[%s2746_s27] sm:$0xff] %v2031_v30   ;;  %v1435_v9 = vmul.f32 %v2988_v0, %v1398_v21  ;;  %2108 = vst [vmem:[%s2746_s27 + $0x8] sm:$0xff] %v2036_v47   ;;  %v1470_v22 = vadd.f32 %v2995_v49, %v1433_v4  ;;  %v1436_v32 = vmul.f32 %v2988_v0, %v1399_v31  ;;  %v1501_v51 = vmax.f32 %v1469_v3, 0.0  ;;  %v1412_v62 = vld [vmem:[#allocation2 + $0xd0] sm:$0xff]  ;;  %v1414_v4 = vld [vmem:[#allocation2 + $0x28] sm:$0xff] }
 0x1c9   : > { %v2046_v37 = vpack.c.bf16 %v1500_v1, %v1499_v54  ;;  %v1437_v44 = vmul.f32 %v2988_v0, %v1400_v42  ;;  %2109 = vst [vmem:[%s2746_s27 + $0x10] sm:$0xff] %v2041_v58   ;;  %v1471_v53 = vadd.f32 %v2995_v49, %v1434_v12  ;;  %v1438_v19 = vmul.f32 %v2988_v0, %v1401_v7  ;;  %v1413_v1 = vld [vmem:[#allocation2 + $0x10] sm:$0xff] }
 0x1ca   : > { %v1472_v56 = vadd.f32 %v2995_v49, %v1435_v9  ;;  %v1502_v15 = vmax.f32 %v1470_v22, 0.0  ;;  %v1473_v10 = vadd.f32 %v2995_v49, %v1436_v32  ;;  %v1439_v39 = vmul.f32 %v2988_v0, %v1402_v14  ;;  %v1415_v9 = vld [vmem:[#allocation2 + $0xa0] sm:$0xff]  ;;  %v1416_v14 = vld [vmem:[#allocation2 + $0xf8] sm:$0xff] }
 0x1cb   : > { %2110 = vst [vmem:[%s2746_s27 + $0x18] sm:$0xff] %v2046_v37   ;;  %v1474_v17 = vadd.f32 %v2995_v49, %v1437_v44  ;;  %v1503_v45 = vmax.f32 %v1471_v53, 0.0  ;;  %v1475_v13 = vadd.f32 %v2995_v49, %v1438_v19  ;;  %v1440_v6 = vmul.f32 %v2988_v0, %v1403_v43  ;;  %v1417_v43 = vld [vmem:[#allocation2 + $0x20] sm:$0xff] }
 0x1cc   : > { %v1504_v52 = vmax.f32 %v1472_v56, 0.0  ;;  %v2051_v23 = vpack.c.bf16 %v1502_v15, %v1501_v51  ;;  %v1505_v24 = vmax.f32 %v1473_v10, 0.0  ;;  %v1476_v28 = vadd.f32 %v2995_v49, %v1439_v39  ;;  %v1418_v15 = vld [vmem:[#allocation2 + $0x98] sm:$0xff] }
 0x1cd   : > { %v1506_v27 = vmax.f32 %v1474_v17, 0.0  ;;  %v1507_v60 = vmax.f32 %v1475_v13, 0.0  ;;  %v1441_v2 = vmul.f32 %v2988_v0, %v1404_v33  ;;  %v1477_v57 = vadd.f32 %v2995_v49, %v1440_v6 }
 0x1ce   : > { %v2056_v36 = vpack.c.bf16 %v1504_v52, %v1503_v45  ;;  %2111 = vst [vmem:[%s2746_s27 + $0x20] sm:$0xff] %v2051_v23   ;;  %v1508_v41 = vmax.f32 %v1476_v28, 0.0  ;;  %v1442_v63 = vmul.f32 %v2988_v0, %v1405_v18  ;;  %v1443_v8 = vmul.f32 %v2988_v0, %v1406_v20 }
 0x1cf   : > { %v2061_v40 = vpack.c.bf16 %v1506_v27, %v1505_v24  ;;  %v1478_v46 = vadd.f32 %v2995_v49, %v1441_v2  ;;  %v1509_v48 = vmax.f32 %v1477_v57, 0.0  ;;  %v1444_v50 = vmul.f32 %v2988_v0, %v1407_v29 }
 0x1d0   : > { %2112 = vst [vmem:[%s2746_s27 + $0x28] sm:$0xff] %v2056_v36   ;;  %v1445_v5 = vmul.f32 %v2988_v0, %v1408_v35  ;;  %v2066_v26 = vpack.c.bf16 %v1508_v41, %v1507_v60  ;;  %v1479_v25 = vadd.f32 %v2995_v49, %v1442_v63  ;;  %v1480_v55 = vadd.f32 %v2995_v49, %v1443_v8 }
 0x1d1   : > { %2113 = vst [vmem:[%s2746_s27 + $0x30] sm:$0xff] %v2061_v40   ;;  %v1446_v59 = vmul.f32 %v2988_v0, %v1409_v38  ;;  %v1510_v21 = vmax.f32 %v1478_v46, 0.0  ;;  %v1481_v30 = vadd.f32 %v2995_v49, %v1444_v50  ;;  %v1447_v61 = vmul.f32 %v2988_v0, %v1410_v16 }
 0x1d2   : > { %v1482_v34 = vadd.f32 %v2995_v49, %v1445_v5  ;;  %2114 = vst [vmem:[%s2746_s27 + $0x38] sm:$0xff] %v2066_v26   ;;  %v1511_v31 = vmax.f32 %v1479_v25, 0.0  ;;  %v1512_v42 = vmax.f32 %v1480_v55, 0.0  ;;  %v1448_v54 = vmul.f32 %v2988_v0, %v1411_v11 }
 0x1d3   : > { %v1483_v47 = vadd.f32 %v2995_v49, %v1446_v59  ;;  %v2071_v7 = vpack.c.bf16 %v1510_v21, %v1509_v48  ;;  %v1513_v58 = vmax.f32 %v1481_v30, 0.0  ;;  %v1484_v12 = vadd.f32 %v2995_v49, %v1447_v61 }
 0x1d4   : > { %v1514_v3 = vmax.f32 %v1482_v34, 0.0  ;;  %v2076_v37 = vpack.c.bf16 %v1512_v42, %v1511_v31  ;;  %v1449_v32 = vmul.f32 %v2988_v0, %v1412_v62  ;;  %v1485_v44 = vadd.f32 %v2995_v49, %v1448_v54 }
 0x1d5   : > { %v1515_v22 = vmax.f32 %v1483_v47, 0.0  ;;  %2115 = vst [vmem:[%s2746_s27 + $0x40] sm:$0xff] %v2071_v7   ;;  %v1516_v53 = vmax.f32 %v1484_v12, 0.0  ;;  %v1450_v56 = vmul.f32 %v2988_v0, %v1413_v1  ;;  %v1451_v19 = vmul.f32 %v2988_v0, %v1414_v4 }
 0x1d6   : > { %v2081_v51 = vpack.c.bf16 %v1514_v3, %v1513_v58  ;;  %2116 = vst [vmem:[%s2746_s27 + $0x48] sm:$0xff] %v2076_v37   ;;  %v1486_v10 = vadd.f32 %v2995_v49, %v1449_v32  ;;  %v1517_v17 = vmax.f32 %v1485_v44, 0.0  ;;  %v1452_v39 = vmul.f32 %v2988_v0, %v1415_v9 }
 0x1d7   : > { %v1453_v33 = vmul.f32 %v2988_v0, %v1416_v14  ;;  %v2086_v45 = vpack.c.bf16 %v1516_v53, %v1515_v22  ;;  %v1487_v52 = vadd.f32 %v2995_v49, %v1450_v56  ;;  %v1488_v13 = vadd.f32 %v2995_v49, %v1451_v19 }
 0x1d8   : > { %2117 = vst [vmem:[%s2746_s27 + $0x50] sm:$0xff] %v2081_v51   ;;  %v1454_v6 = vmul.f32 %v2988_v0, %v1417_v43  ;;  %v1518_v18 = vmax.f32 %v1486_v10, 0.0  ;;  %v1489_v20 = vadd.f32 %v2995_v49, %v1452_v39  ;;  %v1455_v24 = vmul.f32 %v2988_v0, %v1418_v15 }
 0x1d9   : > { %v1490_v23 = vadd.f32 %v2995_v49, %v1453_v33  ;;  %2118 = vst [vmem:[%s2746_s27 + $0x58] sm:$0xff] %v2086_v45   ;;  %v1519_v27 = vmax.f32 %v1487_v52, 0.0  ;;  %v1520_v28 = vmax.f32 %v1488_v13, 0.0 }
 0x1da   : > { %v1491_v29 = vadd.f32 %v2995_v49, %v1454_v6  ;;  %v2091_v35 = vpack.c.bf16 %v1518_v18, %v1517_v17  ;;  %v1521_v36 = vmax.f32 %v1489_v20, 0.0  ;;  %v1492_v2 = vadd.f32 %v2995_v49, %v1455_v24 }
 0x1db   : > { %v1522_v60 = vmax.f32 %v1490_v23, 0.0  ;;  %v2096_v57 = vpack.c.bf16 %v1520_v28, %v1519_v27 }
 0x1dc   : > { %v1523_v38 = vmax.f32 %v1491_v29, 0.0  ;;  %2119 = vst [vmem:[%s2746_s27 + $0x60] sm:$0xff] %v2091_v35   ;;  %v1524_v41 = vmax.f32 %v1492_v2, 0.0 }
 0x1dd   : > { %v2101_v40 = vpack.c.bf16 %v1522_v60, %v1521_v36  ;;  %2120 = vst [vmem:[%s2746_s27 + $0x68] sm:$0xff] %v2096_v57  }
 0x1de   : > { %v2106_v63 = vpack.c.bf16 %v1524_v41, %v1523_v38 }
 0x1df   : > { %2121 = vst [vmem:[%s2746_s27 + $0x70] sm:$0xff] %v2101_v40  }
 0x1e0   : > { %2122 = vst [vmem:[%s2746_s27 + $0x78] sm:$0xff] %v2106_v63  }
 0x1e1 PF: > { %s13_s18 = sadd.s32 1, %s2524_s18   ;;  %s3100_s12 = smov %s2504_s13 }
 0x1e2   : > { %p10_p1 = scmp.ge.s32.totalorder %s13_s18, 8   ;;  %s3101_s13 = smov %s2597_s25 }
 0x1e3   : > { %s3102_s14 = smov %s2516_s16  ;;  %s3103_s15 = smov %s2520_s17 }
 0x1e4   : > { %s3104_s16 = smov %s3107_s19  ;;  %s3105_s17 = smov %s3111_s20 }
 0x1e5   :  { %12 = sbr.rel (!%p10_p1) target bundleno = 4 (0x4), region = 117 }

// kernel: maps_in_forward.31
= control target key start
LH: loop header
LB: loop body
LE: loop exit
PB: predicated region body
PF: predicated region fallthrough
CT: control target
= control target key end

     0   :  { %s1545_s12 = smov 0   ;;  %s1547_s13 = smov 0   ;;  %s1719_s0 = inlined_call_operand.vmem [shape: bf16[512,128], index: 0, kind: input, shape index: {}]   ;;  %s1720_s1 = inlined_call_operand.vmem [shape: bf16[128,128], index: 1, kind: input, shape index: {}]   ;;  %s1721_s2 = inlined_call_operand.vmem [shape: f32[2,128], index: 2, kind: input, shape index: {}]   ;;  %s1722_s3 = inlined_call_operand.vmem [shape: bf16[512,128], index: 3, kind: output, shape index: {}]  }
   0x1   :  { %s1549_s14 = smov 0  }
   0x2 LB: > { %s32_s15 = sadd.s32 1, %s1519_s13  ;;  %p1173_p0 = scmp.ge.s32.totalorder %s1523_s14, 1  ;;  %s1523_s14 = sphi %s1549_s14, %s13_s14   ;;  %s1519_s13 = sphi %s1547_s13, %s1724_s13   ;;  %s1515_s12 = sphi %s1545_s12, %s1723_s12  }
   0x3   : > { %p34_p1 = scmp.ge.s32.totalorder %s32_s15, 2  ;;  %p189_p2 = scmp.lt.s32.totalorder %s1523_s14, 3 }
   0x5   : > { %s1726_s15 = smov (%p34_p1, %s32_s15), 0  ;;  %p190_p3 = pnand %p1173_p0, %p189_p2 }
   0x6   : > { %s1174_s18 = sshll.u32 (!%p190_p3), %s1515_s12, 5 }
   0x7   : > { %193 = sbr.rel (%p190_p3) target bundleno = 277 (0x115), region = 32  ;;  %p232_p4 = scmp.lt.s32.totalorder (!%p190_p3), %s1174_s18, 63 }
   0xc   : > { %v1477_v0 = vld [vmem:[%s1720_s1 + $0x38] sm:$0xff]   ;;  %v1478_v1 = vld [vmem:[%s1720_s1 + $0x30] sm:$0xff]   ;;  %s1728_s18 = smov (!%p232_p4, %s1174_s18), 63  ;;  %v1479_v2 = vld [vmem:[%s1720_s1 + $0x28] sm:$0xff]  }
   0xd   : > { %1389 = vmatprep.subr.bf16.mxu0 %v1477_v0  ;;  %1437 = vmatprep.subr.bf16.mxu1 %v1477_v0  ;;  %s1175_s23 = sshll.u32 %s1728_s18, 2  ;;  %v1480_v3 = vld [vmem:[%s1720_s1 + $0x20] sm:$0xff]   ;;  %v1481_v6 = vld [vmem:[%s1720_s1 + $0x18] sm:$0xff]   ;;  %v1482_v7 = vld [vmem:[%s1720_s1 + $0x10] sm:$0xff]  }
   0xe   : > { %1390 = vmatpush3.bf16.msra.mxu0 %v1477_v0  ;;  %1445 = vmatpush3.bf16.msra.mxu1 %v1477_v0  ;;  %s1580_s26 = scalar_lea.vmem %s1719_s0, %s1175_s23  ;;  %v1483_v8 = vld [vmem:[%s1720_s1 + $0x8] sm:$0xff]   ;;  %v1484_v9 = vld [vmem:[%s1720_s1] sm:$0xff]   ;;  %s1646_s20 = scalar_lea.vmem %s1722_s3, %s1175_s23 }
   0xf   : > { %1391 = vmatprep.subr.bf16.mxu0 %v1478_v1  ;;  %1438 = vmatprep.subr.bf16.mxu1 %v1478_v1  ;;  %v1485_v4 = vld [vmem:[%s1580_s26] sm:$0xff]   ;;  %v1487_v10 = vld [vmem:[%s1580_s26 + $0x8] sm:$0xff]   ;;  %v1489_v12 = vld [vmem:[%s1580_s26 + $0x10] sm:$0xff]  }
  0x10   : > { %v1486_v5 = vld [vmem:[%s1580_s26 + $0x40] sm:$0xff]   ;;  %1405 = vmatprep.mubr.bf16.mxu0 %v1485_v4  ;;  %v1488_v11 = vld [vmem:[%s1580_s26 + $0x48] sm:$0xff]   ;;  %v1490_v13 = vld [vmem:[%s1580_s26 + $0x50] sm:$0xff]  }
  0x11   : > { %1421 = vmatprep.mubr.bf16.mxu1 %v1486_v5  ;;  %v1491_v14 = vld [vmem:[%s1580_s26 + $0x18] sm:$0xff]   ;;  %v1493_v16 = vld [vmem:[%s1580_s26 + $0x20] sm:$0xff]   ;;  %v1495_v18 = vld [vmem:[%s1580_s26 + $0x28] sm:$0xff]  }
  0x12   : > { %1392 = vmatpush3.bf16.msra.mxu0 %v1478_v1  ;;  %1446 = vmatpush3.bf16.msra.mxu1 %v1478_v1  ;;  %v1492_v15 = vld [vmem:[%s1580_s26 + $0x58] sm:$0xff]   ;;  %v1494_v17 = vld [vmem:[%s1580_s26 + $0x60] sm:$0xff]   ;;  %v1496_v19 = vld [vmem:[%s1580_s26 + $0x68] sm:$0xff]  }
  0x13   : > { %1393 = vmatprep.subr.bf16.mxu0 %v1479_v2  ;;  %1439 = vmatprep.subr.bf16.mxu1 %v1479_v2  ;;  %v1497_v20 = vld [vmem:[%s1580_s26 + $0x30] sm:$0xff]   ;;  %v1499_v22 = vld [vmem:[%s1580_s26 + $0x38] sm:$0xff]   ;;  %v1616_v24 = vld [vmem:[%s1721_s2] ss:$0 sm:$0xff] }
  0x14   : > { %v1498_v21 = vld [vmem:[%s1580_s26 + $0x70] sm:$0xff]   ;;  %v1500_v23 = vld [vmem:[%s1580_s26 + $0x78] sm:$0xff]   ;;  %v1623_v29 = vld [vmem:[%s1721_s2 + $0x1] ss:$0 sm:$0xff] }
  0x16   : > { %1394 = vmatpush3.bf16.msra.mxu0 %v1479_v2  ;;  %1447 = vmatpush3.bf16.msra.mxu1 %v1479_v2 }
  0x17   : > { %1395 = vmatprep.subr.bf16.mxu0 %v1480_v3  ;;  %1440 = vmatprep.subr.bf16.mxu1 %v1480_v3 }
  0x1a   : > { %1396 = vmatpush3.bf16.msra.mxu0 %v1480_v3  ;;  %1448 = vmatpush3.bf16.msra.mxu1 %v1480_v3 }
  0x1b   : > { %1397 = vmatprep.subr.bf16.mxu0 %v1481_v6  ;;  %1441 = vmatprep.subr.bf16.mxu1 %v1481_v6 }
  0x1e   : > { %1398 = vmatpush3.bf16.msra.mxu0 %v1481_v6  ;;  %1449 = vmatpush3.bf16.msra.mxu1 %v1481_v6 }
  0x1f   : > { %1399 = vmatprep.subr.bf16.mxu0 %v1482_v7  ;;  %1442 = vmatprep.subr.bf16.mxu1 %v1482_v7 }
  0x22   : > { %1400 = vmatpush3.bf16.msra.mxu0 %v1482_v7  ;;  %1450 = vmatpush3.bf16.msra.mxu1 %v1482_v7 }
  0x23   : > { %1401 = vmatprep.subr.bf16.mxu0 %v1483_v8  ;;  %1443 = vmatprep.subr.bf16.mxu1 %v1483_v8 }
  0x26   : > { %1402 = vmatpush3.bf16.msra.mxu0 %v1483_v8  ;;  %1451 = vmatpush3.bf16.msra.mxu1 %v1483_v8 }
  0x27   : > { %1403 = vmatprep.subr.bf16.mxu0 %v1484_v9  ;;  %1444 = vmatprep.subr.bf16.mxu1 %v1484_v9 }
  0x2a   : > { %1404 = vmatpush3.bf16.msra.mxu0 %v1484_v9  ;;  %1452 = vmatpush3.bf16.msra.mxu1 %v1484_v9 }
  0x2d   : > { %1406 = vmatmul.mubr.bf16.vlgmr.msra.gmra.mxu0 %v1487_v10  ;;  %1422 = vmatmul.mubr.bf16.vlgmr.msra.gmra.mxu1 %v1488_v11 }
  0x2e   : > { %1409 = vmatprep.mubr.bf16.mxu0 %v1489_v12  ;;  %1425 = vmatprep.mubr.bf16.mxu1 %v1490_v13 }
  0x35   : > { %1410 = vmatmul.mubr.bf16.gmra.mxu0 %v1491_v14  ;;  %1426 = vmatmul.mubr.bf16.gmra.mxu1 %v1492_v15 }
  0x36   : > { %1413 = vmatprep.mubr.bf16.mxu0 %v1493_v16  ;;  %1429 = vmatprep.mubr.bf16.mxu1 %v1494_v17 }
  0x3d   : > { %1414 = vmatmul.mubr.bf16.gmra.mxu0 %v1495_v18  ;;  %1430 = vmatmul.mubr.bf16.gmra.mxu1 %v1496_v19 }
  0x3e   : > { %1417 = vmatprep.mubr.bf16.mxu0 %v1497_v20  ;;  %1433 = vmatprep.mubr.bf16.mxu1 %v1498_v21 }
  0x45   : > { %1418 = vmatmul.mubr.bf16.gmra.mxu0 %v1499_v22  ;;  %1434 = vmatmul.mubr.bf16.gmra.mxu1 %v1500_v23 }
  0xed   : > { %v1407_v25 = vpop.f32.mrf.mxu0  ;;  %v1423_v26 = vpop.f32.mrf.mxu1 }
  0xee   : > { %v794_v27 = vmul.f32 %v1407_v25, %v1616_v24  ;;  %v810_v28 = vmul.f32 %v1423_v26, %v1616_v24 }
  0xef   : > { %v489_v30 = vpop.f32.mrf.mxu0  ;;  %v553_v31 = vpop.f32.mrf.mxu1 }
  0xf0   : > { %v792_v32 = vmul.f32 %v1616_v24, %v489_v30  ;;  %v808_v33 = vmul.f32 %v1616_v24, %v553_v31  ;;  %v831_v36 = vadd.f32 %v1623_v29, %v794_v27  ;;  %v847_v37 = vadd.f32 %v1623_v29, %v810_v28 }
  0xf1   : > { %v1408_v34 = vpop.f32.mrf.mxu0  ;;  %v1424_v35 = vpop.f32.mrf.mxu1 }
  0xf2   : > { %v795_v38 = vmul.f32 %v1408_v34, %v1616_v24  ;;  %v811_v39 = vmul.f32 %v1424_v35, %v1616_v24  ;;  %v829_v42 = vadd.f32 %v1623_v29, %v792_v32  ;;  %v845_v43 = vadd.f32 %v1623_v29, %v808_v33 }
  0xf3   : > { %v492_v40 = vpop.f32.mrf.mxu0  ;;  %v556_v41 = vpop.f32.mrf.mxu1  ;;  %v863_v50 = vmax.f32 %v831_v36, 0.0  ;;  %v879_v51 = vmax.f32 %v847_v37, 0.0 }
  0xf4   : > { %v793_v44 = vmul.f32 %v1616_v24, %v492_v40  ;;  %v809_v45 = vmul.f32 %v1616_v24, %v556_v41  ;;  %v832_v46 = vadd.f32 %v1623_v29, %v795_v38  ;;  %v848_v47 = vadd.f32 %v1623_v29, %v811_v39 }
  0xf5   : > { %v1411_v48 = vpop.f32.mrf.mxu0  ;;  %v1427_v49 = vpop.f32.mrf.mxu1  ;;  %v861_v60 = vmax.f32 %v829_v42, 0.0  ;;  %v877_v61 = vmax.f32 %v845_v43, 0.0 }
  0xf6   : > { %v830_v52 = vadd.f32 %v1623_v29, %v793_v44  ;;  %v846_v53 = vadd.f32 %v1623_v29, %v809_v45  ;;  %v864_v54 = vmax.f32 %v832_v46, 0.0  ;;  %v880_v55 = vmax.f32 %v848_v47, 0.0 }
  0xf7   : > { %v798_v56 = vmul.f32 %v1411_v48, %v1616_v24  ;;  %v814_v57 = vmul.f32 %v1427_v49, %v1616_v24  ;;  %v505_v58 = vpop.f32.mrf.mxu0  ;;  %v569_v59 = vpop.f32.mrf.mxu1 }
  0xf8   : > { %v862_v62 = vmax.f32 %v830_v52, 0.0  ;;  %v878_v63 = vmax.f32 %v846_v53, 0.0  ;;  %v1278_v0 = vpack.c.bf16 %v864_v54, %v863_v50  ;;  %v1318_v1 = vpack.c.bf16 %v880_v55, %v879_v51 }
  0xf9   : > { %v796_v2 = vmul.f32 %v1616_v24, %v505_v58  ;;  %v812_v3 = vmul.f32 %v1616_v24, %v569_v59  ;;  %v1412_v4 = vpop.f32.mrf.mxu0  ;;  %v1428_v5 = vpop.f32.mrf.mxu1  ;;  %v835_v8 = vadd.f32 %v1623_v29, %v798_v56  ;;  %v851_v9 = vadd.f32 %v1623_v29, %v814_v57 }
  0xfa   : > { %v1273_v6 = vpack.c.bf16 %v862_v62, %v861_v60  ;;  %v1313_v7 = vpack.c.bf16 %v878_v63, %v877_v61  ;;  %1350 = vst [vmem:[%s1646_s20 + $0x8] sm:$0xff] %v1278_v0   ;;  %1358 = vst [vmem:[%s1646_s20 + $0x48] sm:$0xff] %v1318_v1   ;;  %v799_v10 = vmul.f32 %v1412_v4, %v1616_v24 }
  0xfb   : > { %v815_v11 = vmul.f32 %v1428_v5, %v1616_v24  ;;  %v508_v12 = vpop.f32.mrf.mxu0  ;;  %v572_v13 = vpop.f32.mrf.mxu1  ;;  %v833_v14 = vadd.f32 %v1623_v29, %v796_v2  ;;  %v849_v15 = vadd.f32 %v1623_v29, %v812_v3  ;;  %v867_v27 = vmax.f32 %v835_v8, 0.0 }
  0xfc   : > { %1274 = vst [vmem:[%s1646_s20] sm:$0xff] %v1273_v6   ;;  %1357 = vst [vmem:[%s1646_s20 + $0x40] sm:$0xff] %v1313_v7   ;;  %v797_v16 = vmul.f32 %v1616_v24, %v508_v12  ;;  %v813_v17 = vmul.f32 %v1616_v24, %v572_v13  ;;  %v836_v18 = vadd.f32 %v1623_v29, %v799_v10  ;;  %v883_v28 = vmax.f32 %v851_v9, 0.0 }
  0xfd   : > { %v852_v19 = vadd.f32 %v1623_v29, %v815_v11  ;;  %v1415_v20 = vpop.f32.mrf.mxu0  ;;  %v1431_v21 = vpop.f32.mrf.mxu1  ;;  %v865_v34 = vmax.f32 %v833_v14, 0.0  ;;  %v881_v35 = vmax.f32 %v849_v15, 0.0 }
  0xfe   : > { %v834_v22 = vadd.f32 %v1623_v29, %v797_v16  ;;  %v850_v23 = vadd.f32 %v1623_v29, %v813_v17  ;;  %v802_v25 = vmul.f32 %v1415_v20, %v1616_v24  ;;  %v818_v26 = vmul.f32 %v1431_v21, %v1616_v24 }
  0xff   : > { %v868_v30 = vmax.f32 %v836_v18, 0.0  ;;  %v884_v31 = vmax.f32 %v852_v19, 0.0  ;;  %v521_v32 = vpop.f32.mrf.mxu0  ;;  %v585_v33 = vpop.f32.mrf.mxu1 }
 0x100   : > { %v866_v36 = vmax.f32 %v834_v22, 0.0  ;;  %v882_v37 = vmax.f32 %v850_v23, 0.0  ;;  %v800_v40 = vmul.f32 %v1616_v24, %v521_v32  ;;  %v816_v41 = vmul.f32 %v1616_v24, %v585_v33 }
 0x101   : > { %v1288_v38 = vpack.c.bf16 %v868_v30, %v867_v27  ;;  %v1328_v39 = vpack.c.bf16 %v884_v31, %v883_v28  ;;  %v1416_v42 = vpop.f32.mrf.mxu0  ;;  %v1432_v43 = vpop.f32.mrf.mxu1  ;;  %v839_v46 = vadd.f32 %v1623_v29, %v802_v25  ;;  %v855_v47 = vadd.f32 %v1623_v29, %v818_v26 }
 0x102   : > { %v1283_v44 = vpack.c.bf16 %v866_v36, %v865_v34  ;;  %v1323_v45 = vpack.c.bf16 %v882_v37, %v881_v35  ;;  %v803_v48 = vmul.f32 %v1416_v42, %v1616_v24  ;;  %v819_v49 = vmul.f32 %v1432_v43, %v1616_v24 }
 0x103   : > { %1352 = vst [vmem:[%s1646_s20 + $0x18] sm:$0xff] %v1288_v38   ;;  %1360 = vst [vmem:[%s1646_s20 + $0x58] sm:$0xff] %v1328_v39   ;;  %v524_v50 = vpop.f32.mrf.mxu0  ;;  %v588_v51 = vpop.f32.mrf.mxu1  ;;  %v837_v52 = vadd.f32 %v1623_v29, %v800_v40  ;;  %v853_v53 = vadd.f32 %v1623_v29, %v816_v41  ;;  %v871_v60 = vmax.f32 %v839_v46, 0.0  ;;  %v887_v61 = vmax.f32 %v855_v47, 0.0 }
 0x104   : > { %1351 = vst [vmem:[%s1646_s20 + $0x10] sm:$0xff] %v1283_v44   ;;  %1359 = vst [vmem:[%s1646_s20 + $0x50] sm:$0xff] %v1323_v45   ;;  %v801_v54 = vmul.f32 %v1616_v24, %v524_v50  ;;  %v817_v55 = vmul.f32 %v1616_v24, %v588_v51  ;;  %v840_v56 = vadd.f32 %v1623_v29, %v803_v48 }
 0x105   : > { %v856_v57 = vadd.f32 %v1623_v29, %v819_v49  ;;  %v1419_v58 = vpop.f32.mrf.mxu0  ;;  %v1435_v59 = vpop.f32.mrf.mxu1  ;;  %v869_v6 = vmax.f32 %v837_v52, 0.0  ;;  %v885_v7 = vmax.f32 %v853_v53, 0.0 }
 0x106   : > { %v838_v62 = vadd.f32 %v1623_v29, %v801_v54  ;;  %v854_v63 = vadd.f32 %v1623_v29, %v817_v55  ;;  %v872_v0 = vmax.f32 %v840_v56, 0.0  ;;  %v806_v2 = vmul.f32 %v1419_v58, %v1616_v24 }
 0x107   : > { %v888_v1 = vmax.f32 %v856_v57, 0.0  ;;  %v822_v3 = vmul.f32 %v1435_v59, %v1616_v24  ;;  %v537_v4 = vpop.f32.mrf.mxu0  ;;  %v601_v5 = vpop.f32.mrf.mxu1 }
 0x108   : > { %v870_v8 = vmax.f32 %v838_v62, 0.0  ;;  %v886_v9 = vmax.f32 %v854_v63, 0.0  ;;  %v1298_v10 = vpack.c.bf16 %v872_v0, %v871_v60  ;;  %v804_v12 = vmul.f32 %v1616_v24, %v537_v4 }
 0x109   : > { %v1338_v11 = vpack.c.bf16 %v888_v1, %v887_v61  ;;  %v820_v13 = vmul.f32 %v1616_v24, %v601_v5  ;;  %v1420_v14 = vpop.f32.mrf.mxu0  ;;  %v1436_v15 = vpop.f32.mrf.mxu1  ;;  %v843_v18 = vadd.f32 %v1623_v29, %v806_v2  ;;  %v859_v19 = vadd.f32 %v1623_v29, %v822_v3 }
 0x10a   : > { %v1293_v16 = vpack.c.bf16 %v870_v8, %v869_v6  ;;  %v1333_v17 = vpack.c.bf16 %v886_v9, %v885_v7  ;;  %1354 = vst [vmem:[%s1646_s20 + $0x28] sm:$0xff] %v1298_v10   ;;  %v807_v20 = vmul.f32 %v1420_v14, %v1616_v24  ;;  %v823_v21 = vmul.f32 %v1436_v15, %v1616_v24 }
 0x10b   : > { %1362 = vst [vmem:[%s1646_s20 + $0x68] sm:$0xff] %v1338_v11   ;;  %v540_v22 = vpop.f32.mrf.mxu0  ;;  %v604_v23 = vpop.f32.mrf.mxu1  ;;  %v841_v25 = vadd.f32 %v1623_v29, %v804_v12  ;;  %v857_v26 = vadd.f32 %v1623_v29, %v820_v13  ;;  %v875_v34 = vmax.f32 %v843_v18, 0.0  ;;  %v891_v35 = vmax.f32 %v859_v19, 0.0 }
 0x10c   : > { %1353 = vst [vmem:[%s1646_s20 + $0x20] sm:$0xff] %v1293_v16   ;;  %1361 = vst [vmem:[%s1646_s20 + $0x60] sm:$0xff] %v1333_v17   ;;  %v805_v27 = vmul.f32 %v1616_v24, %v540_v22  ;;  %v821_v28 = vmul.f32 %v1616_v24, %v604_v23  ;;  %v844_v30 = vadd.f32 %v1623_v29, %v807_v20 }
 0x10d   : > { %v860_v31 = vadd.f32 %v1623_v29, %v823_v21  ;;  %v873_v38 = vmax.f32 %v841_v25, 0.0  ;;  %v889_v39 = vmax.f32 %v857_v26, 0.0 }
 0x10e   : > { %v842_v32 = vadd.f32 %v1623_v29, %v805_v27  ;;  %v858_v33 = vadd.f32 %v1623_v29, %v821_v28  ;;  %v876_v36 = vmax.f32 %v844_v30, 0.0 }
 0x10f   : > { %v892_v37 = vmax.f32 %v860_v31, 0.0 }
 0x110   : > { %v874_v40 = vmax.f32 %v842_v32, 0.0  ;;  %v890_v24 = vmax.f32 %v858_v33, 0.0  ;;  %v1308_v41 = vpack.c.bf16 %v876_v36, %v875_v34 }
 0x111   : > { %v1348_v42 = vpack.c.bf16 %v892_v37, %v891_v35 }
 0x112   : > { %v1303_v43 = vpack.c.bf16 %v874_v40, %v873_v38  ;;  %v1343_v44 = vpack.c.bf16 %v890_v24, %v889_v39  ;;  %1356 = vst [vmem:[%s1646_s20 + $0x38] sm:$0xff] %v1308_v41  }
 0x113   : > { %1364 = vst [vmem:[%s1646_s20 + $0x78] sm:$0xff] %v1348_v42  }
 0x114   : > { %1355 = vst [vmem:[%s1646_s20 + $0x30] sm:$0xff] %v1303_v43   ;;  %1363 = vst [vmem:[%s1646_s20 + $0x70] sm:$0xff] %v1343_v44  }
 0x115 PF: > { %s13_s14 = sadd.s32 1, %s1523_s14   ;;  %s1723_s12 = smov %s1519_s13 }
 0x116   : > { %p10_p5 = scmp.ge.s32.totalorder %s13_s14, 4   ;;  %s1724_s13 = smov %s1726_s15 }
 0x118   :  { %12 = sbr.rel (!%p10_p5) target bundleno = 2 (0x2), region = 80 }

</bundles_post_ra>
